<compile_context>
chip_gen: v7x
topology: tpu7x:2x2x1
jax: 0.10.0
libtpu: 0.0.40
codegen_flags: <defaults>
</compile_context>

<pallas_src>
import math

import jax
import jax.numpy as jnp
from jax.experimental import pallas as pl
from jax.experimental.pallas import tpu as pltpu

LN_EPS = 1e-6  # HF Dinov2 layer_norm_eps


# ----------------------------- small utilities ------------------------------

def _round_up(x, m):
    return (x + m - 1) // m * m


def _vmem_limit_bytes():
    cap = 64 * 1024 * 1024
    try:
        cap = int(pltpu.get_tpu_info().vmem_capacity_bytes)
    except Exception:
        pass
    # ~half of physical VMEM as the scoped limit (double-buffer headroom);
    # valid on v5e/v6e (128 MiB) and v7x (64 MiB).
    return int(min(max(cap // 2, 32 * 1024 * 1024), 96 * 1024 * 1024))


_VMEM_LIMIT = _vmem_limit_bytes()


def _pad2(a, rows, cols):
    pr, pc = rows - a.shape[0], cols - a.shape[1]
    if pr or pc:
        a = jnp.pad(a, ((0, pr), (0, pc)))
    return a


def _divisor_tile(padded, cap, unit=128):
    """Largest multiple-of-`unit` divisor of `padded` that is <= cap."""
    cap = max(unit, min(cap, padded))
    best = unit
    for t in range(unit, cap + 1, unit):
        if padded % t == 0:
            best = t
    return best


# ---------------------- fused tiled matmul Pallas kernel ---------------------
# o  = epilogue((x @ w) + bias)   with epilogue in {none, gelu} x {layerscale}
#                                 x {residual add}, K-accumulated in f32 VMEM.
# o2 = LayerNorm(o)               (optional fused second output, bf16)

def _make_matmul_kernel(act, has_scale, has_residual, has_ln, ln_eps):
    def kernel(*refs):
        i = 0
        x_ref = refs[i]; i += 1
        w_ref = refs[i]; i += 1
        b_ref = refs[i]; i += 1
        s_ref = r_ref = g_ref = bb_ref = None
        if has_scale:
            s_ref = refs[i]; i += 1
        if has_residual:
            r_ref = refs[i]; i += 1
        if has_ln:
            g_ref = refs[i]; i += 1
            bb_ref = refs[i]; i += 1
        o_ref = refs[i]; i += 1
        o2_ref = None
        if has_ln:
            o2_ref = refs[i]; i += 1
        acc_ref = refs[i]

        k = pl.program_id(2)

        @pl.when(k == 0)
        def _init():
            acc_ref[...] = jnp.zeros_like(acc_ref)

        xv = x_ref[...]
        if xv.dtype != jnp.bfloat16:
            xv = xv.astype(jnp.bfloat16)
        acc_ref[...] += jnp.dot(xv, w_ref[...],
                                preferred_element_type=jnp.float32)

        @pl.when(k == pl.num_programs(2) - 1)
        def _finalize():
            y = acc_ref[...] + b_ref[...]
            if act == "gelu":
                # TODO(synk): HF Dinov2 uses exact (erf) GELU; tanh approx here.
                y = jax.nn.gelu(y, approximate=True)
            if has_scale:
                y = y * s_ref[...]
            if has_residual:
                y = y + r_ref[...]
            o_ref[...] = y.astype(o_ref.dtype)
            if has_ln:
                mu = jnp.mean(y, axis=-1, keepdims=True)
                yc = y - mu
                var = jnp.mean(yc * yc, axis=-1, keepdims=True)
                inv = jax.lax.rsqrt(var + ln_eps)
                o2_ref[...] = ((yc * inv) * g_ref[...]
                               + bb_ref[...]).astype(o2_ref.dtype)

    return kernel


def matmul_fused(x, w, b, *, act="none", scale=None, residual=None, ln=None,
                 out_dtype=jnp.float32, ln_dtype=jnp.bfloat16,
                 tm_cap=1024, tn_cap=768, tk_cap=1536):
    m, kdim = x.shape
    kdim2, n = w.shape
    assert kdim == kdim2, (x.shape, w.shape)

    # --- tile selection: no phantom K padding, single M tile when it fits ---
    tm = min(tm_cap, _round_up(m, 16))
    mp = _round_up(m, tm)
    kp = _round_up(kdim, 128)
    tk = _divisor_tile(kp, tk_cap)
    np_ = _round_up(n, 128)
    if ln is not None:
        # Fused LayerNorm reduces over the full output row -> single N tile.
        assert n == np_ and np_ <= 2048, "fused LN needs n % 128 == 0"
        tn = np_
    else:
        tn = _divisor_tile(np_, tn_cap)

    xp = _pad2(x, mp, kp)
    wp = _pad2(w.astype(jnp.bfloat16), kp, np_)
    bp = _pad2(b.astype(jnp.float32).reshape(1, -1), 1, np_)

    args = [xp, wp, bp]
    in_specs = [
        pl.BlockSpec((tm, tk), lambda i, j, k: (i, k)),
        pl.BlockSpec((tk, tn), lambda i, j, k: (k, j)),
        pl.BlockSpec((1, tn), lambda i, j, k: (0, j)),
    ]
    bytes_accessed = (mp * kp * xp.dtype.itemsize + kp * np_ * 2
                      + mp * np_ * jnp.dtype(out_dtype).itemsize + np_ * 4)
    if scale is not None:
        args.append(_pad2(scale.astype(jnp.float32).reshape(1, -1), 1, np_))
        in_specs.append(pl.BlockSpec((1, tn), lambda i, j, k: (0, j)))
        bytes_accessed += np_ * 4
    if residual is not None:
        args.append(_pad2(residual.astype(jnp.float32), mp, np_))
        in_specs.append(pl.BlockSpec((tm, tn), lambda i, j, k: (i, j)))
        bytes_accessed += mp * np_ * 4
    if ln is not None:
        g, bb = ln
        args.append(g.astype(jnp.float32).reshape(1, -1))
        args.append(bb.astype(jnp.float32).reshape(1, -1))
        in_specs.append(pl.BlockSpec((1, tn), lambda i, j, k: (0, j)))
        in_specs.append(pl.BlockSpec((1, tn), lambda i, j, k: (0, j)))
        bytes_accessed += 2 * np_ * 4 + mp * np_ * 2

    out_block = pl.BlockSpec((tm, tn), lambda i, j, k: (i, j))
    if ln is not None:
        out_shape = (jax.ShapeDtypeStruct((mp, np_), out_dtype),
                     jax.ShapeDtypeStruct((mp, np_), ln_dtype))
        out_specs = (out_block, out_block)
    else:
        out_shape = jax.ShapeDtypeStruct((mp, np_), out_dtype)
        out_specs = out_block

    grid = (mp // tm, np_ // tn, kp // tk)
    outs = pl.pallas_call(
        _make_matmul_kernel(act, scale is not None, residual is not None,
                            ln is not None, LN_EPS),
        out_shape=out_shape,
        grid_spec=pltpu.PrefetchScalarGridSpec(
            num_scalar_prefetch=0,
            grid=grid,
            in_specs=in_specs,
            out_specs=out_specs,
            scratch_shapes=[pltpu.VMEM((tm, tn), jnp.float32)]),
        compiler_params=pltpu.CompilerParams(
            dimension_semantics=("parallel", "parallel", "arbitrary"),
            vmem_limit_bytes=_VMEM_LIMIT),
        cost_estimate=pl.CostEstimate(
            flops=2 * mp * np_ * kp,
            transcendentals=mp * np_ if act == "gelu" else 0,
            bytes_accessed=int(bytes_accessed)),
    )(*args)

    if ln is not None:
        o1, o2 = outs
        if mp != m:
            o1, o2 = o1[:m], o2[:m]
        return o1, o2
    out = outs
    if (mp, np_) != (m, n):
        out = out[:m, :n]
    return out


# ------------------------------ LayerNorm kernel -----------------------------
# Only used once (layer 0 input LN); all later LNs are fused into matmuls.

def _make_ln_kernel(eps):
    def kernel(x_ref, g_ref, b_ref, o_ref):
        x = x_ref[...].astype(jnp.float32)
        mu = jnp.mean(x, axis=-1, keepdims=True)
        xc = x - mu
        var = jnp.mean(xc * xc, axis=-1, keepdims=True)
        inv = jax.lax.rsqrt(var + eps)
        o_ref[...] = ((xc * inv) * g_ref[...] + b_ref[...]).astype(o_ref.dtype)
    return kernel


def layernorm(x2d, gamma, beta, eps=LN_EPS, out_dtype=jnp.bfloat16):
    m, d = x2d.shape
    tm = min(1024, _round_up(m, 16))
    mp = _round_up(m, tm)
    xp = _pad2(x2d, mp, d)
    out = pl.pallas_call(
        _make_ln_kernel(eps),
        out_shape=jax.ShapeDtypeStruct((mp, d), out_dtype),
        grid_spec=pltpu.PrefetchScalarGridSpec(
            num_scalar_prefetch=0,
            grid=(mp // tm,),
            in_specs=[pl.BlockSpec((tm, d), lambda i: (i, 0)),
                      pl.BlockSpec((1, d), lambda i: (0, 0)),
                      pl.BlockSpec((1, d), lambda i: (0, 0))],
            out_specs=pl.BlockSpec((tm, d), lambda i: (i, 0))),
        compiler_params=pltpu.CompilerParams(
            dimension_semantics=("parallel",),
            vmem_limit_bytes=_VMEM_LIMIT),
    )(xp, gamma.reshape(1, d), beta.reshape(1, d))
    return out[:m] if mp != m else out


# ----------------------- fused attention (per batch elem) --------------------
# Takes the whole fused QKV slab (S, 3*H*Dh) for one batch element in VMEM and
# slices every head out of it (no XLA-side transposes); writes a lane-dense
# (S, H*Dh) context block that the out-projection consumes directly.

def _make_attn_kernel(num_heads, dh, s_pad, s_real, sm_scale):
    def kernel(qkv_ref, o_ref):
        d = num_heads * dh
        key_mask = None
        if s_real < s_pad:
            key_idx = jax.lax.broadcasted_iota(jnp.int32, (1, s_pad), 1)
            key_mask = key_idx < s_real
        outs = []
        for h in range(num_heads):           # static unroll over heads
            q = qkv_ref[:, h * dh:(h + 1) * dh] * sm_scale      # fold scale in
            k = qkv_ref[:, d + h * dh:d + (h + 1) * dh]
            v = qkv_ref[:, 2 * d + h * dh:2 * d + (h + 1) * dh]
            s = jax.lax.dot_general(                            # Q @ K^T (f32)
                q, k, (((1,), (1,)), ((), ())),
                preferred_element_type=jnp.float32)
            if key_mask is not None:
                s = jnp.where(key_mask, s, -1e30)               # mask pad keys
            mx = jnp.max(s, axis=-1, keepdims=True)
            e = jnp.exp(s - mx)
            den = jnp.sum(e, axis=-1, keepdims=True)
            p = (e * pl.reciprocal(den, approx=True)).astype(jnp.bfloat16)
            outs.append(jnp.dot(p, v, preferred_element_type=jnp.float32))
        o_ref[...] = jnp.concatenate(outs, axis=-1).astype(o_ref.dtype)
    return kernel


def mha_attention(qkv_bsd, num_heads, s_real):
    """qkv: (B, S_pad, 3*D) bf16 -> context (B, S_pad, D) bf16."""
    b, s_pad, d3 = qkv_bsd.shape
    d = d3 // 3
    dh = d // num_heads
    sm_scale = 1.0 / math.sqrt(dh)
    return pl.pallas_call(
        _make_attn_kernel(num_heads, dh, s_pad, s_real, sm_scale),
        out_shape=jax.ShapeDtypeStruct((b, s_pad, d), jnp.bfloat16),
        grid_spec=pltpu.PrefetchScalarGridSpec(
            num_scalar_prefetch=0,
            grid=(b,),
            in_specs=[pl.BlockSpec((None, s_pad, d3), lambda i: (i, 0, 0))],
            out_specs=pl.BlockSpec((None, s_pad, d), lambda i: (i, 0, 0))),
        compiler_params=pltpu.CompilerParams(
            dimension_semantics=("parallel",),
            vmem_limit_bytes=_VMEM_LIMIT),
        cost_estimate=pl.CostEstimate(
            flops=4 * b * num_heads * s_pad * s_pad * dh,
            transcendentals=b * num_heads * s_pad * s_pad,
            bytes_accessed=b * s_pad * (3 * d + d) * 2),
    )(qkv_bsd)


# ------------------------------- model (glue) --------------------------------

# facebook/dinov2-base: image 224, patch 14, hidden 768, 12 layers, 12 heads.
DINOV2_BASE_CONFIG = dict(image_size=224, patch_size=14, hidden_size=768,
                          num_layers=12, num_heads=12, mlp_ratio=4,
                          num_classes=500)

# Small test config (same architecture, reduced sizes) used in __main__.
CONFIG = dict(image_size=32, patch_size=8, hidden_size=256,
              num_layers=4, num_heads=4, mlp_ratio=4, num_classes=500)


def patchify(x_nchw, patch):
    """Non-overlapping patch extraction (Conv2d k=p, stride=p as a matmul)."""
    b, c, h, w = x_nchw.shape
    gh, gw = h // patch, w // patch
    x = x_nchw.reshape(b, c, gh, patch, gw, patch)
    x = jnp.transpose(x, (0, 2, 4, 1, 3, 5))          # (B, gh, gw, C, p, p)
    return x.reshape(b * gh * gw, c * patch * patch).astype(jnp.bfloat16)


def dinov2_forward(params, x_nchw, cfg=None):
    cfg = cfg or CONFIG
    d = cfg["hidden_size"]
    nh = cfg["num_heads"]
    patch = cfg["patch_size"]
    b = x_nchw.shape[0]

    # patch embedding (conv-as-matmul) + [CLS] + position embeddings
    patches = patchify(x_nchw, patch)                                # (B*P, 3pp)
    emb = matmul_fused(patches, params["patch_w"], params["patch_b"],
                       out_dtype=jnp.float32)                        # (B*P, D)
    npatch = patches.shape[0] // b
    emb = emb.reshape(b, npatch, d)
    cls = jnp.broadcast_to(params["cls_token"], (b, 1, d))
    x = jnp.concatenate([cls, emb], axis=1) + params["pos_emb"]      # (B, S, D)
    s_real = npatch + 1
    # Pad the token axis once to a multiple of 16 so every downstream block is
    # sublane/lane aligned (pad tokens are masked out of the attention keys).
    s_pad = _round_up(s_real, 16)
    if s_pad != s_real:
        x = jnp.pad(x, ((0, 0), (0, s_pad - s_real), (0, 0)))
    m = b * s_pad
    x2 = x.reshape(m, d)                              # f32 residual stream

    layers = params["layers"]
    n_layers = len(layers)
    # LN1 of layer 0 is standalone; every later LN is fused into the preceding
    # residual matmul's epilogue.
    h_ln = layernorm(x2, layers[0]["ln1_g"], layers[0]["ln1_b"])     # bf16

    for li, lp in enumerate(layers):
        # --- attention block (pre-norm) ---
        qkv = matmul_fused(h_ln, lp["qkv_w"], lp["qkv_b"],
                           out_dtype=jnp.bfloat16)                   # (M, 3D)
        ctx = mha_attention(qkv.reshape(b, s_pad, 3 * d), nh, s_real)
        # output proj + LayerScale1 + residual + LN2, fused into one kernel
        x2, h_ln = matmul_fused(
            ctx.reshape(m, d), lp["out_w"], lp["out_b"],
            scale=lp["ls1"], residual=x2,
            ln=(lp["ln2_g"], lp["ln2_b"]), out_dtype=jnp.float32)

        # --- MLP block (pre-norm) ---
        hmid = matmul_fused(h_ln, lp["fc1_w"], lp["fc1_b"], act="gelu",
                            out_dtype=jnp.bfloat16)
        if li + 1 < n_layers:
            nxt_ln = (layers[li + 1]["ln1_g"], layers[li + 1]["ln1_b"])
        else:
            nxt_ln = (params["final_ln_g"], params["final_ln_b"])
        x2, h_ln = matmul_fused(hmid, lp["fc2_w"], lp["fc2_b"],
                                scale=lp["ls2"], residual=x2,
                                ln=nxt_ln, out_dtype=jnp.float32)
        # TODO(synk): dropout / drop-path are eval-mode identity (frozen).

    # h_ln now holds final_layernorm(last_hidden_state); take the CLS row.
    cls_tok = h_ln.reshape(b, s_pad, d)[:, 0, :]
    logits = matmul_fused(cls_tok, params["cls_w"], params["cls_b"],
                          out_dtype=jnp.float32)
    return logits


# --------------------------------- parameters --------------------------------

def build_params(cfg, seed=0):
    key = jax.random.PRNGKey(seed)

    def nxt():
        nonlocal key
        key, sub = jax.random.split(key)
        return sub

    d = cfg["hidden_size"]
    dff = d * cfg["mlp_ratio"]
    patch = cfg["patch_size"]
    npatch = (cfg["image_size"] // patch) ** 2

    def w(shape, fan_in, dtype=jnp.bfloat16):
        # matmul weights stored bf16 (halves weight HBM traffic; f32 accumulate)
        return (jax.random.normal(nxt(), shape, jnp.float32)
                / math.sqrt(fan_in)).astype(dtype)

    params = {
        "patch_w": w((3 * patch * patch, d), 3 * patch * patch),
        "patch_b": jnp.zeros((d,), jnp.float32),
        "cls_token": 0.02 * jax.random.normal(nxt(), (1, 1, d), jnp.float32),
        "pos_emb": 0.02 * jax.random.normal(nxt(), (1, npatch + 1, d), jnp.float32),
        "final_ln_g": jnp.ones((d,), jnp.float32),
        "final_ln_b": jnp.zeros((d,), jnp.float32),
        "cls_w": w((d, cfg["num_classes"]), d),
        "cls_b": jnp.zeros((cfg["num_classes"],), jnp.float32),
    }
    layers = []
    for _ in range(cfg["num_layers"]):
        layers.append({
            "ln1_g": jnp.ones((d,), jnp.float32),
            "ln1_b": jnp.zeros((d,), jnp.float32),
            "qkv_w": w((d, 3 * d), d),
            "qkv_b": jnp.zeros((3 * d,), jnp.float32),
            "out_w": w((d, d), d),
            "out_b": jnp.zeros((d,), jnp.float32),
            "ls1": jnp.ones((d,), jnp.float32),          # LayerScale init (HF)
            "ln2_g": jnp.ones((d,), jnp.float32),
            "ln2_b": jnp.zeros((d,), jnp.float32),
            "fc1_w": w((d, dff), d),
            "fc1_b": jnp.zeros((dff,), jnp.float32),
            "fc2_w": w((dff, d), dff),
            "fc2_b": jnp.zeros((d,), jnp.float32),
            "ls2": jnp.ones((d,), jnp.float32),
        })
    params["layers"] = layers
    return params


if __name__ == "__main__":
    params = build_params(CONFIG, seed=0)
    x = jax.random.normal(jax.random.PRNGKey(0),
                          (2, 3, CONFIG["image_size"], CONFIG["image_size"]),
                          jnp.float32)
    fwd = jax.jit(dinov2_forward)
    logits = jax.block_until_ready(fwd(params, x))
    assert logits.shape == (2, CONFIG["num_classes"]), logits.shape
    assert bool(jnp.all(jnp.isfinite(logits)))
    print("KERNEL_OK")
</pallas_src>

<mosaic_0001>
module attributes {stable_mosaic.version = 11 : i64} {
  func.func @kernel(%arg0: i32, %arg1: i32, %arg2: i32, %arg3: memref<32x256xbf16, #tpu.memory_space<vmem>>, %arg4: memref<256x256xbf16, #tpu.memory_space<vmem>>, %arg5: memref<1x256xf32, #tpu.memory_space<vmem>>, %arg6: memref<32x256xf32, #tpu.memory_space<vmem>>, %arg7: memref<32x256xf32, #tpu.memory_space<vmem>>) attributes {dimension_semantics = [#tpu.dimension_semantics<parallel>, #tpu.dimension_semantics<parallel>, #tpu.dimension_semantics<arbitrary>], iteration_bounds = array<i64: 1, 1, 1>, scalar_prefetch = 0 : i64, scratch_operands = 1 : i64, tpu.core_type = #tpu.core_type<tc>, window_params = [{transform_indices = @transform_0, window_bounds = array<i64: 32, 256>}, {transform_indices = @transform_1, window_bounds = array<i64: 256, 256>}, {transform_indices = @transform_2, window_bounds = array<i64: 1, 256>}, {transform_indices = @transform_3, window_bounds = array<i64: 32, 256>}]} {
    %c0_i32 = arith.constant 0 : i32
    %0 = arith.cmpi eq, %arg2, %c0_i32 : i32
    %1 = arith.extui %0 : i1 to i32
    %c0_i32_0 = arith.constant 0 : i32
    %2 = arith.cmpi ne, %1, %c0_i32_0 : i32
    scf.if %2 {
      %cst_10 = arith.constant 0.000000e+00 : f32
      %12 = vector.broadcast %cst_10 : f32 to vector<32x256xf32>
      %c0_11 = arith.constant 0 : index
      %c0_12 = arith.constant 0 : index
      %13 = vector.load %arg7[%c0_11, %c0_12] : memref<32x256xf32, #tpu.memory_space<vmem>>, vector<32x256xf32>
      tpu.vector_store %arg7[%c0_11, %c0_12], %12 {strides = array<i32>} : memref<32x256xf32, #tpu.memory_space<vmem>>, vector<32x256xf32>,
    } else {
    }
    %c0 = arith.constant 0 : index
    %c0_1 = arith.constant 0 : index
    %3 = vector.load %arg3[%c0, %c0_1] : memref<32x256xbf16, #tpu.memory_space<vmem>>, vector<32x256xbf16>
    %c0_2 = arith.constant 0 : index
    %c0_3 = arith.constant 0 : index
    %4 = vector.load %arg7[%c0_2, %c0_3] : memref<32x256xf32, #tpu.memory_space<vmem>>, vector<32x256xf32>
    %c0_4 = arith.constant 0 : index
    %c0_5 = arith.constant 0 : index
    %5 = vector.load %arg4[%c0_4, %c0_5] : memref<256x256xbf16, #tpu.memory_space<vmem>>, vector<256x256xbf16>
    %cst = arith.constant dense<0.000000e+00> : vector<32x256xf32>
    %6 = tpu.matmul %3, %5, %cst {dimension_numbers = #tpu.dot_dimension_numbers<[1], [0], [0], [1], [0, 0, 1, 1], [], []>} : vector<32x256xbf16>, vector<256x256xbf16>, vector<32x256xf32> -> vector<32x256xf32>
    %7 = arith.addf %4, %6 : vector<32x256xf32>
    %c0_6 = arith.constant 0 : index
    %c0_7 = arith.constant 0 : index
    %8 = vector.load %arg7[%c0_6, %c0_7] : memref<32x256xf32, #tpu.memory_space<vmem>>, vector<32x256xf32>
    tpu.vector_store %arg7[%c0_6, %c0_7], %7 {strides = array<i32>} : memref<32x256xf32, #tpu.memory_space<vmem>>, vector<32x256xf32>,
    %c0_i32_8 = arith.constant 0 : i32
    %9 = arith.cmpi eq, %arg2, %c0_i32_8 : i32
    %10 = arith.extui %9 : i1 to i32
    %c0_i32_9 = arith.constant 0 : i32
    %11 = arith.cmpi ne, %10, %c0_i32_9 : i32
    scf.if %11 {
      %c0_10 = arith.constant 0 : index
      %c0_11 = arith.constant 0 : index
      %12 = vector.load %arg7[%c0_10, %c0_11] : memref<32x256xf32, #tpu.memory_space<vmem>>, vector<32x256xf32>
      %c0_12 = arith.constant 0 : index
      %c0_13 = arith.constant 0 : index
      %13 = vector.load %arg5[%c0_12, %c0_13] : memref<1x256xf32, #tpu.memory_space<vmem>>, vector<1x256xf32>
      %14 = vector.broadcast %13 : vector<1x256xf32> to vector<32x256xf32>
      %15 = arith.addf %12, %14 : vector<32x256xf32>
      %c0_14 = arith.constant 0 : index
      %c0_15 = arith.constant 0 : index
      %16 = vector.load %arg6[%c0_14, %c0_15] : memref<32x256xf32, #tpu.memory_space<vmem>>, vector<32x256xf32>
      tpu.vector_store %arg6[%c0_14, %c0_15], %15 {strides = array<i32>} : memref<32x256xf32, #tpu.memory_space<vmem>>, vector<32x256xf32>,
    } else {
    }
    return
  }
  func.func @transform_0(%arg0: i32, %arg1: i32, %arg2: i32) -> (i32, i32) {
    %c0_i32 = arith.constant 0 : i32
    return %arg0, %arg2 : i32, i32
  }
  func.func @transform_1(%arg0: i32, %arg1: i32, %arg2: i32) -> (i32, i32) {
    %c0_i32 = arith.constant 0 : i32
    return %arg2, %arg1 : i32, i32
  }
  func.func @transform_2(%arg0: i32, %arg1: i32, %arg2: i32) -> (i32, i32) {
    %c0_i32 = arith.constant 0 : i32
    %c0_i32_0 = arith.constant 0 : i32
    return %c0_i32, %arg1 : i32, i32
  }
  func.func @transform_3(%arg0: i32, %arg1: i32, %arg2: i32) -> (i32, i32) {
    %c0_i32 = arith.constant 0 : i32
    return %arg0, %arg1 : i32, i32
  }
}

module attributes {stable_mosaic.version = 11 : i64} {
  func.func @kernel(%arg0: i32, %arg1: memref<64x256xf32, #tpu.memory_space<vmem>>, %arg2: memref<1x256xf32, #tpu.memory_space<vmem>>, %arg3: memref<1x256xf32, #tpu.memory_space<vmem>>, %arg4: memref<64x256xbf16, #tpu.memory_space<vmem>>) attributes {dimension_semantics = [#tpu.dimension_semantics<parallel>], iteration_bounds = array<i64: 1>, scalar_prefetch = 0 : i64, scratch_operands = 0 : i64, tpu.core_type = #tpu.core_type<tc>, window_params = [{transform_indices = @transform_0, window_bounds = array<i64: 64, 256>}, {pipeline_mode = #tpu.pipeline_mode<synchronous>, transform_indices = @transform_1, window_bounds = array<i64: 1, 256>}, {pipeline_mode = #tpu.pipeline_mode<synchronous>, transform_indices = @transform_2, window_bounds = array<i64: 1, 256>}, {transform_indices = @transform_3, window_bounds = array<i64: 64, 256>}]} {
    %c0 = arith.constant 0 : index
    %c0_0 = arith.constant 0 : index
    %0 = vector.load %arg1[%c0, %c0_0] : memref<64x256xf32, #tpu.memory_space<vmem>>, vector<64x256xf32>
    %cst = arith.constant dense<0.000000e+00> : vector<64xf32>
    %1 = vector.multi_reduction <add>, %0, %cst [1] : vector<64x256xf32> to vector<64xf32>
    %2 = vector.shape_cast %1 : vector<64xf32> to vector<64x1xf32>
    %cst_1 = arith.constant 2.560000e+02 : f32
    %3 = vector.broadcast %cst_1 : f32 to vector<64x1xf32>
    %4 = arith.divf %2, %3 : vector<64x1xf32>
    %5 = vector.broadcast %4 : vector<64x1xf32> to vector<64x256xf32>
    %6 = arith.subf %0, %5 : vector<64x256xf32>
    %7 = arith.mulf %6, %6 : vector<64x256xf32>
    %cst_2 = arith.constant dense<0.000000e+00> : vector<64xf32>
    %8 = vector.multi_reduction <add>, %7, %cst_2 [1] : vector<64x256xf32> to vector<64xf32>
    %9 = vector.shape_cast %8 : vector<64xf32> to vector<64x1xf32>
    %cst_3 = arith.constant 2.560000e+02 : f32
    %10 = vector.broadcast %cst_3 : f32 to vector<64x1xf32>
    %11 = arith.divf %9, %10 : vector<64x1xf32>
    %cst_4 = arith.constant 9.99999997E-7 : f32
    %12 = vector.broadcast %cst_4 : f32 to vector<64x1xf32>
    %13 = arith.addf %11, %12 : vector<64x1xf32>
    %14 = math.rsqrt %13 : vector<64x1xf32>
    %15 = vector.broadcast %14 : vector<64x1xf32> to vector<64x256xf32>
    %16 = arith.mulf %6, %15 : vector<64x256xf32>
    %c0_5 = arith.constant 0 : index
    %c0_6 = arith.constant 0 : index
    %17 = vector.load %arg2[%c0_5, %c0_6] : memref<1x256xf32, #tpu.memory_space<vmem>>, vector<1x256xf32>
    %18 = vector.broadcast %17 : vector<1x256xf32> to vector<64x256xf32>
    %19 = arith.mulf %16, %18 : vector<64x256xf32>
    %c0_7 = arith.constant 0 : index
    %c0_8 = arith.constant 0 : index
    %20 = vector.load %arg3[%c0_7, %c0_8] : memref<1x256xf32, #tpu.memory_space<vmem>>, vector<1x256xf32>
    %21 = vector.broadcast %20 : vector<1x256xf32> to vector<64x256xf32>
    %22 = arith.addf %19, %21 : vector<64x256xf32>
    %23 = arith.truncf %22 : vector<64x256xf32> to vector<64x256xbf16>
    %c0_9 = arith.constant 0 : index
    %c0_10 = arith.constant 0 : index
    %24 = vector.load %arg4[%c0_9, %c0_10] : memref<64x256xbf16, #tpu.memory_space<vmem>>, vector<64x256xbf16>
    tpu.vector_store %arg4[%c0_9, %c0_10], %23 {strides = array<i32>} : memref<64x256xbf16, #tpu.memory_space<vmem>>, vector<64x256xbf16>,
    return
  }
  func.func @transform_0(%arg0: i32) -> (i32, i32) {
    %c0_i32 = arith.constant 0 : i32
    %c0_i32_0 = arith.constant 0 : i32
    return %arg0, %c0_i32 : i32, i32
  }
  func.func @transform_1(%arg0: i32) -> (i32, i32) {
    %c0_i32 = arith.constant 0 : i32
    %c0_i32_0 = arith.constant 0 : i32
    %c0_i32_1 = arith.constant 0 : i32
    return %c0_i32, %c0_i32_0 : i32, i32
  }
  func.func @transform_2(%arg0: i32) -> (i32, i32) {
    %c0_i32 = arith.constant 0 : i32
    %c0_i32_0 = arith.constant 0 : i32
    %c0_i32_1 = arith.constant 0 : i32
    return %c0_i32, %c0_i32_0 : i32, i32
  }
  func.func @transform_3(%arg0: i32) -> (i32, i32) {
    %c0_i32 = arith.constant 0 : i32
    %c0_i32_0 = arith.constant 0 : i32
    return %arg0, %c0_i32 : i32, i32
  }
}

module attributes {stable_mosaic.version = 11 : i64} {
  func.func @kernel(%arg0: i32, %arg1: i32, %arg2: i32, %arg3: memref<64x256xbf16, #tpu.memory_space<vmem>>, %arg4: memref<256x768xbf16, #tpu.memory_space<vmem>>, %arg5: memref<1x768xf32, #tpu.memory_space<vmem>>, %arg6: memref<64x768xbf16, #tpu.memory_space<vmem>>, %arg7: memref<64x768xf32, #tpu.memory_space<vmem>>) attributes {dimension_semantics = [#tpu.dimension_semantics<parallel>, #tpu.dimension_semantics<parallel>, #tpu.dimension_semantics<arbitrary>], iteration_bounds = array<i64: 1, 1, 1>, scalar_prefetch = 0 : i64, scratch_operands = 1 : i64, tpu.core_type = #tpu.core_type<tc>, window_params = [{transform_indices = @transform_0, window_bounds = array<i64: 64, 256>}, {transform_indices = @transform_1, window_bounds = array<i64: 256, 768>}, {transform_indices = @transform_2, window_bounds = array<i64: 1, 768>}, {transform_indices = @transform_3, window_bounds = array<i64: 64, 768>}]} {
    %c0_i32 = arith.constant 0 : i32
    %0 = arith.cmpi eq, %arg2, %c0_i32 : i32
    %1 = arith.extui %0 : i1 to i32
    %c0_i32_0 = arith.constant 0 : i32
    %2 = arith.cmpi ne, %1, %c0_i32_0 : i32
    scf.if %2 {
      %cst_10 = arith.constant 0.000000e+00 : f32
      %12 = vector.broadcast %cst_10 : f32 to vector<64x768xf32>
      %c0_11 = arith.constant 0 : index
      %c0_12 = arith.constant 0 : index
      %13 = vector.load %arg7[%c0_11, %c0_12] : memref<64x768xf32, #tpu.memory_space<vmem>>, vector<64x768xf32>
      tpu.vector_store %arg7[%c0_11, %c0_12], %12 {strides = array<i32>} : memref<64x768xf32, #tpu.memory_space<vmem>>, vector<64x768xf32>,
    } else {
    }
    %c0 = arith.constant 0 : index
    %c0_1 = arith.constant 0 : index
    %3 = vector.load %arg3[%c0, %c0_1] : memref<64x256xbf16, #tpu.memory_space<vmem>>, vector<64x256xbf16>
    %c0_2 = arith.constant 0 : index
    %c0_3 = arith.constant 0 : index
    %4 = vector.load %arg7[%c0_2, %c0_3] : memref<64x768xf32, #tpu.memory_space<vmem>>, vector<64x768xf32>
    %c0_4 = arith.constant 0 : index
    %c0_5 = arith.constant 0 : index
    %5 = vector.load %arg4[%c0_4, %c0_5] : memref<256x768xbf16, #tpu.memory_space<vmem>>, vector<256x768xbf16>
    %cst = arith.constant dense<0.000000e+00> : vector<64x768xf32>
    %6 = tpu.matmul %3, %5, %cst {dimension_numbers = #tpu.dot_dimension_numbers<[1], [0], [0], [1], [0, 0, 1, 1], [], []>} : vector<64x256xbf16>, vector<256x768xbf16>, vector<64x768xf32> -> vector<64x768xf32>
    %7 = arith.addf %4, %6 : vector<64x768xf32>
    %c0_6 = arith.constant 0 : index
    %c0_7 = arith.constant 0 : index
    %8 = vector.load %arg7[%c0_6, %c0_7] : memref<64x768xf32, #tpu.memory_space<vmem>>, vector<64x768xf32>
    tpu.vector_store %arg7[%c0_6, %c0_7], %7 {strides = array<i32>} : memref<64x768xf32, #tpu.memory_space<vmem>>, vector<64x768xf32>,
    %c0_i32_8 = arith.constant 0 : i32
    %9 = arith.cmpi eq, %arg2, %c0_i32_8 : i32
    %10 = arith.extui %9 : i1 to i32
    %c0_i32_9 = arith.constant 0 : i32
    %11 = arith.cmpi ne, %10, %c0_i32_9 : i32
    scf.if %11 {
      %c0_10 = arith.constant 0 : index
      %c0_11 = arith.constant 0 : index
      %12 = vector.load %arg7[%c0_10, %c0_11] : memref<64x768xf32, #tpu.memory_space<vmem>>, vector<64x768xf32>
      %c0_12 = arith.constant 0 : index
      %c0_13 = arith.constant 0 : index
      %13 = vector.load %arg5[%c0_12, %c0_13] : memref<1x768xf32, #tpu.memory_space<vmem>>, vector<1x768xf32>
      %14 = vector.broadcast %13 : vector<1x768xf32> to vector<64x768xf32>
      %15 = arith.addf %12, %14 : vector<64x768xf32>
      %16 = arith.truncf %15 : vector<64x768xf32> to vector<64x768xbf16>
      %c0_14 = arith.constant 0 : index
      %c0_15 = arith.constant 0 : index
      %17 = vector.load %arg6[%c0_14, %c0_15] : memref<64x768xbf16, #tpu.memory_space<vmem>>, vector<64x768xbf16>
      tpu.vector_store %arg6[%c0_14, %c0_15], %16 {strides = array<i32>} : memref<64x768xbf16, #tpu.memory_space<vmem>>, vector<64x768xbf16>,
    } else {
    }
    return
  }
  func.func @transform_0(%arg0: i32, %arg1: i32, %arg2: i32) -> (i32, i32) {
    %c0_i32 = arith.constant 0 : i32
    return %arg0, %arg2 : i32, i32
  }
  func.func @transform_1(%arg0: i32, %arg1: i32, %arg2: i32) -> (i32, i32) {
    %c0_i32 = arith.constant 0 : i32
    return %arg2, %arg1 : i32, i32
  }
  func.func @transform_2(%arg0: i32, %arg1: i32, %arg2: i32) -> (i32, i32) {
    %c0_i32 = arith.constant 0 : i32
    %c0_i32_0 = arith.constant 0 : i32
    return %c0_i32, %arg1 : i32, i32
  }
  func.func @transform_3(%arg0: i32, %arg1: i32, %arg2: i32) -> (i32, i32) {
    %c0_i32 = arith.constant 0 : i32
    return %arg0, %arg1 : i32, i32
  }
}

module attributes {stable_mosaic.version = 11 : i64} {
  func.func @kernel(%arg0: i32, %arg1: memref<1x32x768xbf16, #tpu.memory_space<vmem>>, %arg2: memref<1x32x256xbf16, #tpu.memory_space<vmem>>) attributes {dimension_semantics = [#tpu.dimension_semantics<parallel>], iteration_bounds = array<i64: 2>, scalar_prefetch = 0 : i64, scratch_operands = 0 : i64, tpu.core_type = #tpu.core_type<tc>, window_params = [{transform_indices = @transform_0, window_bounds = array<i64: 1, 32, 768>}, {transform_indices = @transform_1, window_bounds = array<i64: 1, 32, 256>}]} {
    %0 = tpu.iota {dimensions = array<i32: 1>} : vector<1x32xi32>
    %c17_i32 = arith.constant 17 : i32
    %1 = vector.broadcast %c17_i32 : i32 to vector<1x32xi32>
    %2 = arith.cmpi slt, %0, %1 : vector<1x32xi32>
    %c0 = arith.constant 0 : index
    %c0_0 = arith.constant 0 : index
    %c0_1 = arith.constant 0 : index
    %3 = vector.load %arg1[%c0, %c0_0, %c0_1] : memref<1x32x768xbf16, #tpu.memory_space<vmem>>, vector<1x32x64xbf16>
    %4 = vector.shape_cast %3 : vector<1x32x64xbf16> to vector<32x64xbf16>
    %cst = arith.constant 1.250000e-01 : bf16
    %5 = vector.broadcast %cst : bf16 to vector<32x64xbf16>
    %6 = arith.mulf %4, %5 : vector<32x64xbf16>
    %c0_2 = arith.constant 0 : index
    %c0_3 = arith.constant 0 : index
    %c256 = arith.constant 256 : index
    %7 = vector.load %arg1[%c0_2, %c0_3, %c256] : memref<1x32x768xbf16, #tpu.memory_space<vmem>>, vector<1x32x64xbf16>
    %8 = vector.shape_cast %7 : vector<1x32x64xbf16> to vector<32x64xbf16>
    %c0_4 = arith.constant 0 : index
    %c0_5 = arith.constant 0 : index
    %c512 = arith.constant 512 : index
    %9 = vector.load %arg1[%c0_4, %c0_5, %c512] : memref<1x32x768xbf16, #tpu.memory_space<vmem>>, vector<1x32x64xbf16>
    %10 = vector.shape_cast %9 : vector<1x32x64xbf16> to vector<32x64xbf16>
    %cst_6 = arith.constant dense<0.000000e+00> : vector<32x32xf32>
    %11 = tpu.matmul %6, %8, %cst_6 {dimension_numbers = #tpu.dot_dimension_numbers<[1], [1], [0], [0], [0, 0, 1, 0], [], []>} : vector<32x64xbf16>, vector<32x64xbf16>, vector<32x32xf32> -> vector<32x32xf32>
    %cst_7 = arith.constant -1.000000e+30 : f32
    %12 = vector.shape_cast %2 : vector<1x32xi1> to vector<1x32xi1>
    %13 = vector.broadcast %12 : vector<1x32xi1> to vector<32x32xi1>
    %14 = vector.broadcast %cst_7 : f32 to vector<32x32xf32>
    %15 = arith.select %13, %11, %14 : vector<32x32xi1>, vector<32x32xf32>
    %cst_8 = arith.constant dense<0xFF800000> : vector<32xf32>
    %16 = vector.multi_reduction <maximumf>, %15, %cst_8 [1] : vector<32x32xf32> to vector<32xf32>
    %17 = vector.shape_cast %16 : vector<32xf32> to vector<32x1xf32>
    %18 = vector.broadcast %17 : vector<32x1xf32> to vector<32x32xf32>
    %19 = arith.subf %15, %18 : vector<32x32xf32>
    %20 = math.exp %19 : vector<32x32xf32>
    %cst_9 = arith.constant dense<0.000000e+00> : vector<32xf32>
    %21 = vector.multi_reduction <add>, %20, %cst_9 [1] : vector<32x32xf32> to vector<32xf32>
    %22 = vector.shape_cast %21 : vector<32xf32> to vector<32x1xf32>
    %23 = tpu.reciprocal %22 {approx = true} : vector<32x1xf32> -> vector<32x1xf32>
    %24 = vector.broadcast %23 : vector<32x1xf32> to vector<32x32xf32>
    %25 = arith.mulf %20, %24 : vector<32x32xf32>
    %26 = arith.truncf %25 : vector<32x32xf32> to vector<32x32xbf16>
    %cst_10 = arith.constant dense<0.000000e+00> : vector<32x64xf32>
    %27 = tpu.matmul %26, %10, %cst_10 {dimension_numbers = #tpu.dot_dimension_numbers<[1], [0], [0], [1], [0, 0, 1, 1], [], []>} : vector<32x32xbf16>, vector<32x64xbf16>, vector<32x64xf32> -> vector<32x64xf32>
    %c0_11 = arith.constant 0 : index
    %c0_12 = arith.constant 0 : index
    %c64 = arith.constant 64 : index
    %28 = vector.load %arg1[%c0_11, %c0_12, %c64] : memref<1x32x768xbf16, #tpu.memory_space<vmem>>, vector<1x32x64xbf16>
    %29 = vector.shape_cast %28 : vector<1x32x64xbf16> to vector<32x64xbf16>
    %cst_13 = arith.constant 1.250000e-01 : bf16
    %30 = vector.broadcast %cst_13 : bf16 to vector<32x64xbf16>
    %31 = arith.mulf %29, %30 : vector<32x64xbf16>
    %c0_14 = arith.constant 0 : index
    %c0_15 = arith.constant 0 : index
    %c320 = arith.constant 320 : index
    %32 = vector.load %arg1[%c0_14, %c0_15, %c320] : memref<1x32x768xbf16, #tpu.memory_space<vmem>>, vector<1x32x64xbf16>
    %33 = vector.shape_cast %32 : vector<1x32x64xbf16> to vector<32x64xbf16>
    %c0_16 = arith.constant 0 : index
    %c0_17 = arith.constant 0 : index
    %c576 = arith.constant 576 : index
    %34 = vector.load %arg1[%c0_16, %c0_17, %c576] : memref<1x32x768xbf16, #tpu.memory_space<vmem>>, vector<1x32x64xbf16>
    %35 = vector.shape_cast %34 : vector<1x32x64xbf16> to vector<32x64xbf16>
    %cst_18 = arith.constant dense<0.000000e+00> : vector<32x32xf32>
    %36 = tpu.matmul %31, %33, %cst_18 {dimension_numbers = #tpu.dot_dimension_numbers<[1], [1], [0], [0], [0, 0, 1, 0], [], []>} : vector<32x64xbf16>, vector<32x64xbf16>, vector<32x32xf32> -> vector<32x32xf32>
    %cst_19 = arith.constant -1.000000e+30 : f32
    %37 = vector.shape_cast %2 : vector<1x32xi1> to vector<1x32xi1>
    %38 = vector.broadcast %37 : vector<1x32xi1> to vector<32x32xi1>
    %39 = vector.broadcast %cst_19 : f32 to vector<32x32xf32>
    %40 = arith.select %38, %36, %39 : vector<32x32xi1>, vector<32x32xf32>
    %cst_20 = arith.constant dense<0xFF800000> : vector<32xf32>
    %41 = vector.multi_reduction <maximumf>, %40, %cst_20 [1] : vector<32x32xf32> to vector<32xf32>
    %42 = vector.shape_cast %41 : vector<32xf32> to vector<32x1xf32>
    %43 = vector.broadcast %42 : vector<32x1xf32> to vector<32x32xf32>
    %44 = arith.subf %40, %43 : vector<32x32xf32>
    %45 = math.exp %44 : vector<32x32xf32>
    %cst_21 = arith.constant dense<0.000000e+00> : vector<32xf32>
    %46 = vector.multi_reduction <add>, %45, %cst_21 [1] : vector<32x32xf32> to vector<32xf32>
    %47 = vector.shape_cast %46 : vector<32xf32> to vector<32x1xf32>
    %48 = tpu.reciprocal %47 {approx = true} : vector<32x1xf32> -> vector<32x1xf32>
    %49 = vector.broadcast %48 : vector<32x1xf32> to vector<32x32xf32>
    %50 = arith.mulf %45, %49 : vector<32x32xf32>
    %51 = arith.truncf %50 : vector<32x32xf32> to vector<32x32xbf16>
    %cst_22 = arith.constant dense<0.000000e+00> : vector<32x64xf32>
    %52 = tpu.matmul %51, %35, %cst_22 {dimension_numbers = #tpu.dot_dimension_numbers<[1], [0], [0], [1], [0, 0, 1, 1], [], []>} : vector<32x32xbf16>, vector<32x64xbf16>, vector<32x64xf32> -> vector<32x64xf32>
    %c0_23 = arith.constant 0 : index
    %c0_24 = arith.constant 0 : index
    %c128 = arith.constant 128 : index
    %53 = vector.load %arg1[%c0_23, %c0_24, %c128] : memref<1x32x768xbf16, #tpu.memory_space<vmem>>, vector<1x32x64xbf16>
    %54 = vector.shape_cast %53 : vector<1x32x64xbf16> to vector<32x64xbf16>
    %cst_25 = arith.constant 1.250000e-01 : bf16
    %55 = vector.broadcast %cst_25 : bf16 to vector<32x64xbf16>
    %56 = arith.mulf %54, %55 : vector<32x64xbf16>
    %c0_26 = arith.constant 0 : index
    %c0_27 = arith.constant 0 : index
    %c384 = arith.constant 384 : index
    %57 = vector.load %arg1[%c0_26, %c0_27, %c384] : memref<1x32x768xbf16, #tpu.memory_space<vmem>>, vector<1x32x64xbf16>
    %58 = vector.shape_cast %57 : vector<1x32x64xbf16> to vector<32x64xbf16>
    %c0_28 = arith.constant 0 : index
    %c0_29 = arith.constant 0 : index
    %c640 = arith.constant 640 : index
    %59 = vector.load %arg1[%c0_28, %c0_29, %c640] : memref<1x32x768xbf16, #tpu.memory_space<vmem>>, vector<1x32x64xbf16>
    %60 = vector.shape_cast %59 : vector<1x32x64xbf16> to vector<32x64xbf16>
    %cst_30 = arith.constant dense<0.000000e+00> : vector<32x32xf32>
    %61 = tpu.matmul %56, %58, %cst_30 {dimension_numbers = #tpu.dot_dimension_numbers<[1], [1], [0], [0], [0, 0, 1, 0], [], []>} : vector<32x64xbf16>, vector<32x64xbf16>, vector<32x32xf32> -> vector<32x32xf32>
    %cst_31 = arith.constant -1.000000e+30 : f32
    %62 = vector.shape_cast %2 : vector<1x32xi1> to vector<1x32xi1>
    %63 = vector.broadcast %62 : vector<1x32xi1> to vector<32x32xi1>
    %64 = vector.broadcast %cst_31 : f32 to vector<32x32xf32>
    %65 = arith.select %63, %61, %64 : vector<32x32xi1>, vector<32x32xf32>
    %cst_32 = arith.constant dense<0xFF800000> : vector<32xf32>
    %66 = vector.multi_reduction <maximumf>, %65, %cst_32 [1] : vector<32x32xf32> to vector<32xf32>
    %67 = vector.shape_cast %66 : vector<32xf32> to vector<32x1xf32>
    %68 = vector.broadcast %67 : vector<32x1xf32> to vector<32x32xf32>
    %69 = arith.subf %65, %68 : vector<32x32xf32>
    %70 = math.exp %69 : vector<32x32xf32>
    %cst_33 = arith.constant dense<0.000000e+00> : vector<32xf32>
    %71 = vector.multi_reduction <add>, %70, %cst_33 [1] : vector<32x32xf32> to vector<32xf32>
    %72 = vector.shape_cast %71 : vector<32xf32> to vector<32x1xf32>
    %73 = tpu.reciprocal %72 {approx = true} : vector<32x1xf32> -> vector<32x1xf32>
    %74 = vector.broadcast %73 : vector<32x1xf32> to vector<32x32xf32>
    %75 = arith.mulf %70, %74 : vector<32x32xf32>
    %76 = arith.truncf %75 : vector<32x32xf32> to vector<32x32xbf16>
    %cst_34 = arith.constant dense<0.000000e+00> : vector<32x64xf32>
    %77 = tpu.matmul %76, %60, %cst_34 {dimension_numbers = #tpu.dot_dimension_numbers<[1], [0], [0], [1], [0, 0, 1, 1], [], []>} : vector<32x32xbf16>, vector<32x64xbf16>, vector<32x64xf32> -> vector<32x64xf32>
    %c0_35 = arith.constant 0 : index
    %c0_36 = arith.constant 0 : index
    %c192 = arith.constant 192 : index
    %78 = vector.load %arg1[%c0_35, %c0_36, %c192] : memref<1x32x768xbf16, #tpu.memory_space<vmem>>, vector<1x32x64xbf16>
    %79 = vector.shape_cast %78 : vector<1x32x64xbf16> to vector<32x64xbf16>
    %cst_37 = arith.constant 1.250000e-01 : bf16
    %80 = vector.broadcast %cst_37 : bf16 to vector<32x64xbf16>
    %81 = arith.mulf %79, %80 : vector<32x64xbf16>
    %c0_38 = arith.constant 0 : index
    %c0_39 = arith.constant 0 : index
    %c448 = arith.constant 448 : index
    %82 = vector.load %arg1[%c0_38, %c0_39, %c448] : memref<1x32x768xbf16, #tpu.memory_space<vmem>>, vector<1x32x64xbf16>
    %83 = vector.shape_cast %82 : vector<1x32x64xbf16> to vector<32x64xbf16>
    %c0_40 = arith.constant 0 : index
    %c0_41 = arith.constant 0 : index
    %c704 = arith.constant 704 : index
    %84 = vector.load %arg1[%c0_40, %c0_41, %c704] : memref<1x32x768xbf16, #tpu.memory_space<vmem>>, vector<1x32x64xbf16>
    %85 = vector.shape_cast %84 : vector<1x32x64xbf16> to vector<32x64xbf16>
    %cst_42 = arith.constant dense<0.000000e+00> : vector<32x32xf32>
    %86 = tpu.matmul %81, %83, %cst_42 {dimension_numbers = #tpu.dot_dimension_numbers<[1], [1], [0], [0], [0, 0, 1, 0], [], []>} : vector<32x64xbf16>, vector<32x64xbf16>, vector<32x32xf32> -> vector<32x32xf32>
    %cst_43 = arith.constant -1.000000e+30 : f32
    %87 = vector.shape_cast %2 : vector<1x32xi1> to vector<1x32xi1>
    %88 = vector.broadcast %87 : vector<1x32xi1> to vector<32x32xi1>
    %89 = vector.broadcast %cst_43 : f32 to vector<32x32xf32>
    %90 = arith.select %88, %86, %89 : vector<32x32xi1>, vector<32x32xf32>
    %cst_44 = arith.constant dense<0xFF800000> : vector<32xf32>
    %91 = vector.multi_reduction <maximumf>, %90, %cst_44 [1] : vector<32x32xf32> to vector<32xf32>
    %92 = vector.shape_cast %91 : vector<32xf32> to vector<32x1xf32>
    %93 = vector.broadcast %92 : vector<32x1xf32> to vector<32x32xf32>
    %94 = arith.subf %90, %93 : vector<32x32xf32>
    %95 = math.exp %94 : vector<32x32xf32>
    %cst_45 = arith.constant dense<0.000000e+00> : vector<32xf32>
    %96 = vector.multi_reduction <add>, %95, %cst_45 [1] : vector<32x32xf32> to vector<32xf32>
    %97 = vector.shape_cast %96 : vector<32xf32> to vector<32x1xf32>
    %98 = tpu.reciprocal %97 {approx = true} : vector<32x1xf32> -> vector<32x1xf32>
    %99 = vector.broadcast %98 : vector<32x1xf32> to vector<32x32xf32>
    %100 = arith.mulf %95, %99 : vector<32x32xf32>
    %101 = arith.truncf %100 : vector<32x32xf32> to vector<32x32xbf16>
    %cst_46 = arith.constant dense<0.000000e+00> : vector<32x64xf32>
    %102 = tpu.matmul %101, %85, %cst_46 {dimension_numbers = #tpu.dot_dimension_numbers<[1], [0], [0], [1], [0, 0, 1, 1], [], []>} : vector<32x32xbf16>, vector<32x64xbf16>, vector<32x64xf32> -> vector<32x64xf32>
    %103 = tpu.concatenate %27, %52, %77, %102 in 1 : vector<32x64xf32>, vector<32x64xf32>, vector<32x64xf32>, vector<32x64xf32> -> vector<32x256xf32>
    %104 = arith.truncf %103 : vector<32x256xf32> to vector<32x256xbf16>
    %c0_47 = arith.constant 0 : index
    %c0_48 = arith.constant 0 : index
    %c0_49 = arith.constant 0 : index
    %105 = vector.load %arg2[%c0_47, %c0_48, %c0_49] : memref<1x32x256xbf16, #tpu.memory_space<vmem>>, vector<1x32x256xbf16>
    %106 = vector.shape_cast %105 : vector<1x32x256xbf16> to vector<32x256xbf16>
    %107 = vector.shape_cast %104 : vector<32x256xbf16> to vector<1x32x256xbf16>
    tpu.vector_store %arg2[%c0_47, %c0_48, %c0_49], %107 {strides = array<i32>} : memref<1x32x256xbf16, #tpu.memory_space<vmem>>, vector<1x32x256xbf16>,
    return
  }
  func.func @transform_0(%arg0: i32) -> (i32, i32, i32) {
    %c0_i32 = arith.constant 0 : i32
    %c0_i32_0 = arith.constant 0 : i32
    %c0_i32_1 = arith.constant 0 : i32
    return %arg0, %c0_i32, %c0_i32_0 : i32, i32, i32
  }
  func.func @transform_1(%arg0: i32) -> (i32, i32, i32) {
    %c0_i32 = arith.constant 0 : i32
    %c0_i32_0 = arith.constant 0 : i32
    %c0_i32_1 = arith.constant 0 : i32
    return %arg0, %c0_i32, %c0_i32_0 : i32, i32, i32
  }
}

module attributes {stable_mosaic.version = 11 : i64} {
  func.func @kernel(%arg0: i32, %arg1: i32, %arg2: i32, %arg3: memref<64x256xbf16, #tpu.memory_space<vmem>>, %arg4: memref<256x256xbf16, #tpu.memory_space<vmem>>, %arg5: memref<1x256xf32, #tpu.memory_space<vmem>>, %arg6: memref<1x256xf32, #tpu.memory_space<vmem>>, %arg7: memref<64x256xf32, #tpu.memory_space<vmem>>, %arg8: memref<1x256xf32, #tpu.memory_space<vmem>>, %arg9: memref<1x256xf32, #tpu.memory_space<vmem>>, %arg10: memref<64x256xf32, #tpu.memory_space<vmem>>, %arg11: memref<64x256xbf16, #tpu.memory_space<vmem>>, %arg12: memref<64x256xf32, #tpu.memory_space<vmem>>) attributes {dimension_semantics = [#tpu.dimension_semantics<parallel>, #tpu.dimension_semantics<parallel>, #tpu.dimension_semantics<arbitrary>], iteration_bounds = array<i64: 1, 1, 1>, scalar_prefetch = 0 : i64, scratch_operands = 1 : i64, tpu.core_type = #tpu.core_type<tc>, window_params = [{transform_indices = @transform_0, window_bounds = array<i64: 64, 256>}, {transform_indices = @transform_1, window_bounds = array<i64: 256, 256>}, {transform_indices = @transform_2, window_bounds = array<i64: 1, 256>}, {transform_indices = @transform_3, window_bounds = array<i64: 1, 256>}, {transform_indices = @transform_4, window_bounds = array<i64: 64, 256>}, {transform_indices = @transform_5, window_bounds = array<i64: 1, 256>}, {transform_indices = @transform_6, window_bounds = array<i64: 1, 256>}, {transform_indices = @transform_7, window_bounds = array<i64: 64, 256>}, {transform_indices = @transform_8, window_bounds = array<i64: 64, 256>}]} {
    %c0_i32 = arith.constant 0 : i32
    %0 = arith.cmpi eq, %arg2, %c0_i32 : i32
    %1 = arith.extui %0 : i1 to i32
    %c0_i32_0 = arith.constant 0 : i32
    %2 = arith.cmpi ne, %1, %c0_i32_0 : i32
    scf.if %2 {
      %cst_10 = arith.constant 0.000000e+00 : f32
      %12 = vector.broadcast %cst_10 : f32 to vector<64x256xf32>
      %c0_11 = arith.constant 0 : index
      %c0_12 = arith.constant 0 : index
      %13 = vector.load %arg12[%c0_11, %c0_12] : memref<64x256xf32, #tpu.memory_space<vmem>>, vector<64x256xf32>
      tpu.vector_store %arg12[%c0_11, %c0_12], %12 {strides = array<i32>} : memref<64x256xf32, #tpu.memory_space<vmem>>, vector<64x256xf32>,
    } else {
    }
    %c0 = arith.constant 0 : index
    %c0_1 = arith.constant 0 : index
    %3 = vector.load %arg3[%c0, %c0_1] : memref<64x256xbf16, #tpu.memory_space<vmem>>, vector<64x256xbf16>
    %c0_2 = arith.constant 0 : index
    %c0_3 = arith.constant 0 : index
    %4 = vector.load %arg12[%c0_2, %c0_3] : memref<64x256xf32, #tpu.memory_space<vmem>>, vector<64x256xf32>
    %c0_4 = arith.constant 0 : index
    %c0_5 = arith.constant 0 : index
    %5 = vector.load %arg4[%c0_4, %c0_5] : memref<256x256xbf16, #tpu.memory_space<vmem>>, vector<256x256xbf16>
    %cst = arith.constant dense<0.000000e+00> : vector<64x256xf32>
    %6 = tpu.matmul %3, %5, %cst {dimension_numbers = #tpu.dot_dimension_numbers<[1], [0], [0], [1], [0, 0, 1, 1], [], []>} : vector<64x256xbf16>, vector<256x256xbf16>, vector<64x256xf32> -> vector<64x256xf32>
    %7 = arith.addf %4, %6 : vector<64x256xf32>
    %c0_6 = arith.constant 0 : index
    %c0_7 = arith.constant 0 : index
    %8 = vector.load %arg12[%c0_6, %c0_7] : memref<64x256xf32, #tpu.memory_space<vmem>>, vector<64x256xf32>
    tpu.vector_store %arg12[%c0_6, %c0_7], %7 {strides = array<i32>} : memref<64x256xf32, #tpu.memory_space<vmem>>, vector<64x256xf32>,
    %c0_i32_8 = arith.constant 0 : i32
    %9 = arith.cmpi eq, %arg2, %c0_i32_8 : i32
    %10 = arith.extui %9 : i1 to i32
    %c0_i32_9 = arith.constant 0 : i32
    %11 = arith.cmpi ne, %10, %c0_i32_9 : i32
    scf.if %11 {
      %c0_10 = arith.constant 0 : index
      %c0_11 = arith.constant 0 : index
      %12 = vector.load %arg12[%c0_10, %c0_11] : memref<64x256xf32, #tpu.memory_space<vmem>>, vector<64x256xf32>
      %c0_12 = arith.constant 0 : index
      %c0_13 = arith.constant 0 : index
      %13 = vector.load %arg5[%c0_12, %c0_13] : memref<1x256xf32, #tpu.memory_space<vmem>>, vector<1x256xf32>
      %14 = vector.broadcast %13 : vector<1x256xf32> to vector<64x256xf32>
      %15 = arith.addf %12, %14 : vector<64x256xf32>
      %c0_14 = arith.constant 0 : index
      %c0_15 = arith.constant 0 : index
      %16 = vector.load %arg6[%c0_14, %c0_15] : memref<1x256xf32, #tpu.memory_space<vmem>>, vector<1x256xf32>
      %17 = vector.broadcast %16 : vector<1x256xf32> to vector<64x256xf32>
      %18 = arith.mulf %15, %17 : vector<64x256xf32>
      %c0_16 = arith.constant 0 : index
      %c0_17 = arith.constant 0 : index
      %19 = vector.load %arg7[%c0_16, %c0_17] : memref<64x256xf32, #tpu.memory_space<vmem>>, vector<64x256xf32>
      %20 = arith.addf %18, %19 : vector<64x256xf32>
      %c0_18 = arith.constant 0 : index
      %c0_19 = arith.constant 0 : index
      %21 = vector.load %arg10[%c0_18, %c0_19] : memref<64x256xf32, #tpu.memory_space<vmem>>, vector<64x256xf32>
      tpu.vector_store %arg10[%c0_18, %c0_19], %20 {strides = array<i32>} : memref<64x256xf32, #tpu.memory_space<vmem>>, vector<64x256xf32>,
      %cst_20 = arith.constant dense<0.000000e+00> : vector<64xf32>
      %22 = vector.multi_reduction <add>, %20, %cst_20 [1] : vector<64x256xf32> to vector<64xf32>
      %23 = vector.shape_cast %22 : vector<64xf32> to vector<64x1xf32>
      %cst_21 = arith.constant 2.560000e+02 : f32
      %24 = vector.broadcast %cst_21 : f32 to vector<64x1xf32>
      %25 = arith.divf %23, %24 : vector<64x1xf32>
      %26 = vector.broadcast %25 : vector<64x1xf32> to vector<64x256xf32>
      %27 = arith.subf %20, %26 : vector<64x256xf32>
      %28 = arith.mulf %27, %27 : vector<64x256xf32>
      %cst_22 = arith.constant dense<0.000000e+00> : vector<64xf32>
      %29 = vector.multi_reduction <add>, %28, %cst_22 [1] : vector<64x256xf32> to vector<64xf32>
      %30 = vector.shape_cast %29 : vector<64xf32> to vector<64x1xf32>
      %cst_23 = arith.constant 2.560000e+02 : f32
      %31 = vector.broadcast %cst_23 : f32 to vector<64x1xf32>
      %32 = arith.divf %30, %31 : vector<64x1xf32>
      %cst_24 = arith.constant 9.99999997E-7 : f32
      %33 = vector.broadcast %cst_24 : f32 to vector<64x1xf32>
      %34 = arith.addf %32, %33 : vector<64x1xf32>
      %35 = math.rsqrt %34 : vector<64x1xf32>
      %36 = vector.broadcast %35 : vector<64x1xf32> to vector<64x256xf32>
      %37 = arith.mulf %27, %36 : vector<64x256xf32>
      %c0_25 = arith.constant 0 : index
      %c0_26 = arith.constant 0 : index
      %38 = vector.load %arg8[%c0_25, %c0_26] : memref<1x256xf32, #tpu.memory_space<vmem>>, vector<1x256xf32>
      %39 = vector.broadcast %38 : vector<1x256xf32> to vector<64x256xf32>
      %40 = arith.mulf %37, %39 : vector<64x256xf32>
      %c0_27 = arith.constant 0 : index
      %c0_28 = arith.constant 0 : index
      %41 = vector.load %arg9[%c0_27, %c0_28] : memref<1x256xf32, #tpu.memory_space<vmem>>, vector<1x256xf32>
      %42 = vector.broadcast %41 : vector<1x256xf32> to vector<64x256xf32>
      %43 = arith.addf %40, %42 : vector<64x256xf32>
      %44 = arith.truncf %43 : vector<64x256xf32> to vector<64x256xbf16>
      %c0_29 = arith.constant 0 : index
      %c0_30 = arith.constant 0 : index
      %45 = vector.load %arg11[%c0_29, %c0_30] : memref<64x256xbf16, #tpu.memory_space<vmem>>, vector<64x256xbf16>
      tpu.vector_store %arg11[%c0_29, %c0_30], %44 {strides = array<i32>} : memref<64x256xbf16, #tpu.memory_space<vmem>>, vector<64x256xbf16>,
    } else {
    }
    return
  }
  func.func @transform_0(%arg0: i32, %arg1: i32, %arg2: i32) -> (i32, i32) {
    %c0_i32 = arith.constant 0 : i32
    return %arg0, %arg2 : i32, i32
  }
  func.func @transform_1(%arg0: i32, %arg1: i32, %arg2: i32) -> (i32, i32) {
    %c0_i32 = arith.constant 0 : i32
    return %arg2, %arg1 : i32, i32
  }
  func.func @transform_2(%arg0: i32, %arg1: i32, %arg2: i32) -> (i32, i32) {
    %c0_i32 = arith.constant 0 : i32
    %c0_i32_0 = arith.constant 0 : i32
    return %c0_i32, %arg1 : i32, i32
  }
  func.func @transform_3(%arg0: i32, %arg1: i32, %arg2: i32) -> (i32, i32) {
    %c0_i32 = arith.constant 0 : i32
    %c0_i32_0 = arith.constant 0 : i32
    return %c0_i32, %arg1 : i32, i32
  }
  func.func @transform_4(%arg0: i32, %arg1: i32, %arg2: i32) -> (i32, i32) {
    %c0_i32 = arith.constant 0 : i32
    return %arg0, %arg1 : i32, i32
  }
  func.func @transform_5(%arg0: i32, %arg1: i32, %arg2: i32) -> (i32, i32) {
    %c0_i32 = arith.constant 0 : i32
    %c0_i32_0 = arith.constant 0 : i32
    return %c0_i32, %arg1 : i32, i32
  }
  func.func @transform_6(%arg0: i32, %arg1: i32, %arg2: i32) -> (i32, i32) {
    %c0_i32 = arith.constant 0 : i32
    %c0_i32_0 = arith.constant 0 : i32
    return %c0_i32, %arg1 : i32, i32
  }
  func.func @transform_7(%arg0: i32, %arg1: i32, %arg2: i32) -> (i32, i32) {
    %c0_i32 = arith.constant 0 : i32
    return %arg0, %arg1 : i32, i32
  }
  func.func @transform_8(%arg0: i32, %arg1: i32, %arg2: i32) -> (i32, i32) {
    %c0_i32 = arith.constant 0 : i32
    return %arg0, %arg1 : i32, i32
  }
}

module attributes {stable_mosaic.version = 11 : i64} {
  func.func @kernel(%arg0: i32, %arg1: i32, %arg2: i32, %arg3: memref<64x256xbf16, #tpu.memory_space<vmem>>, %arg4: memref<256x512xbf16, #tpu.memory_space<vmem>>, %arg5: memref<1x512xf32, #tpu.memory_space<vmem>>, %arg6: memref<64x512xbf16, #tpu.memory_space<vmem>>, %arg7: memref<64x512xf32, #tpu.memory_space<vmem>>) attributes {dimension_semantics = [#tpu.dimension_semantics<parallel>, #tpu.dimension_semantics<parallel>, #tpu.dimension_semantics<arbitrary>], iteration_bounds = array<i64: 1, 2, 1>, scalar_prefetch = 0 : i64, scratch_operands = 1 : i64, tpu.core_type = #tpu.core_type<tc>, window_params = [{transform_indices = @transform_0, window_bounds = array<i64: 64, 256>}, {transform_indices = @transform_1, window_bounds = array<i64: 256, 512>}, {transform_indices = @transform_2, window_bounds = array<i64: 1, 512>}, {transform_indices = @transform_3, window_bounds = array<i64: 64, 512>}]} {
    %c0_i32 = arith.constant 0 : i32
    %0 = arith.cmpi eq, %arg2, %c0_i32 : i32
    %1 = arith.extui %0 : i1 to i32
    %c0_i32_0 = arith.constant 0 : i32
    %2 = arith.cmpi ne, %1, %c0_i32_0 : i32
    scf.if %2 {
      %cst_10 = arith.constant 0.000000e+00 : f32
      %12 = vector.broadcast %cst_10 : f32 to vector<64x512xf32>
      %c0_11 = arith.constant 0 : index
      %c0_12 = arith.constant 0 : index
      %13 = vector.load %arg7[%c0_11, %c0_12] : memref<64x512xf32, #tpu.memory_space<vmem>>, vector<64x512xf32>
      tpu.vector_store %arg7[%c0_11, %c0_12], %12 {strides = array<i32>} : memref<64x512xf32, #tpu.memory_space<vmem>>, vector<64x512xf32>,
    } else {
    }
    %c0 = arith.constant 0 : index
    %c0_1 = arith.constant 0 : index
    %3 = vector.load %arg3[%c0, %c0_1] : memref<64x256xbf16, #tpu.memory_space<vmem>>, vector<64x256xbf16>
    %c0_2 = arith.constant 0 : index
    %c0_3 = arith.constant 0 : index
    %4 = vector.load %arg7[%c0_2, %c0_3] : memref<64x512xf32, #tpu.memory_space<vmem>>, vector<64x512xf32>
    %c0_4 = arith.constant 0 : index
    %c0_5 = arith.constant 0 : index
    %5 = vector.load %arg4[%c0_4, %c0_5] : memref<256x512xbf16, #tpu.memory_space<vmem>>, vector<256x512xbf16>
    %cst = arith.constant dense<0.000000e+00> : vector<64x512xf32>
    %6 = tpu.matmul %3, %5, %cst {dimension_numbers = #tpu.dot_dimension_numbers<[1], [0], [0], [1], [0, 0, 1, 1], [], []>} : vector<64x256xbf16>, vector<256x512xbf16>, vector<64x512xf32> -> vector<64x512xf32>
    %7 = arith.addf %4, %6 : vector<64x512xf32>
    %c0_6 = arith.constant 0 : index
    %c0_7 = arith.constant 0 : index
    %8 = vector.load %arg7[%c0_6, %c0_7] : memref<64x512xf32, #tpu.memory_space<vmem>>, vector<64x512xf32>
    tpu.vector_store %arg7[%c0_6, %c0_7], %7 {strides = array<i32>} : memref<64x512xf32, #tpu.memory_space<vmem>>, vector<64x512xf32>,
    %c0_i32_8 = arith.constant 0 : i32
    %9 = arith.cmpi eq, %arg2, %c0_i32_8 : i32
    %10 = arith.extui %9 : i1 to i32
    %c0_i32_9 = arith.constant 0 : i32
    %11 = arith.cmpi ne, %10, %c0_i32_9 : i32
    scf.if %11 {
      %c0_10 = arith.constant 0 : index
      %c0_11 = arith.constant 0 : index
      %12 = vector.load %arg7[%c0_10, %c0_11] : memref<64x512xf32, #tpu.memory_space<vmem>>, vector<64x512xf32>
      %c0_12 = arith.constant 0 : index
      %c0_13 = arith.constant 0 : index
      %13 = vector.load %arg5[%c0_12, %c0_13] : memref<1x512xf32, #tpu.memory_space<vmem>>, vector<1x512xf32>
      %14 = vector.broadcast %13 : vector<1x512xf32> to vector<64x512xf32>
      %15 = arith.addf %12, %14 : vector<64x512xf32>
      %16 = arith.mulf %15, %15 : vector<64x512xf32>
      %17 = arith.mulf %15, %16 : vector<64x512xf32>
      %cst_14 = arith.constant 4.471500e-02 : f32
      %18 = vector.broadcast %cst_14 : f32 to vector<64x512xf32>
      %19 = arith.mulf %18, %17 : vector<64x512xf32>
      %20 = arith.addf %15, %19 : vector<64x512xf32>
      %cst_15 = arith.constant 0.797884583 : f32
      %21 = vector.broadcast %cst_15 : f32 to vector<64x512xf32>
      %22 = arith.mulf %21, %20 : vector<64x512xf32>
      %23 = math.tanh %22 : vector<64x512xf32>
      %cst_16 = arith.constant 1.000000e+00 : f32
      %24 = vector.broadcast %cst_16 : f32 to vector<64x512xf32>
      %25 = arith.addf %24, %23 : vector<64x512xf32>
      %cst_17 = arith.constant 5.000000e-01 : f32
      %26 = vector.broadcast %cst_17 : f32 to vector<64x512xf32>
      %27 = arith.mulf %26, %25 : vector<64x512xf32>
      %28 = arith.mulf %15, %27 : vector<64x512xf32>
      %29 = arith.truncf %28 : vector<64x512xf32> to vector<64x512xbf16>
      %c0_18 = arith.constant 0 : index
      %c0_19 = arith.constant 0 : index
      %30 = vector.load %arg6[%c0_18, %c0_19] : memref<64x512xbf16, #tpu.memory_space<vmem>>, vector<64x512xbf16>
      tpu.vector_store %arg6[%c0_18, %c0_19], %29 {strides = array<i32>} : memref<64x512xbf16, #tpu.memory_space<vmem>>, vector<64x512xbf16>,
    } else {
    }
    return
  }
  func.func @transform_0(%arg0: i32, %arg1: i32, %arg2: i32) -> (i32, i32) {
    %c0_i32 = arith.constant 0 : i32
    return %arg0, %arg2 : i32, i32
  }
  func.func @transform_1(%arg0: i32, %arg1: i32, %arg2: i32) -> (i32, i32) {
    %c0_i32 = arith.constant 0 : i32
    return %arg2, %arg1 : i32, i32
  }
  func.func @transform_2(%arg0: i32, %arg1: i32, %arg2: i32) -> (i32, i32) {
    %c0_i32 = arith.constant 0 : i32
    %c0_i32_0 = arith.constant 0 : i32
    return %c0_i32, %arg1 : i32, i32
  }
  func.func @transform_3(%arg0: i32, %arg1: i32, %arg2: i32) -> (i32, i32) {
    %c0_i32 = arith.constant 0 : i32
    return %arg0, %arg1 : i32, i32
  }
}

module attributes {stable_mosaic.version = 11 : i64} {
  func.func @kernel(%arg0: i32, %arg1: i32, %arg2: i32, %arg3: memref<64x1024xbf16, #tpu.memory_space<vmem>>, %arg4: memref<1024x256xbf16, #tpu.memory_space<vmem>>, %arg5: memref<1x256xf32, #tpu.memory_space<vmem>>, %arg6: memref<1x256xf32, #tpu.memory_space<vmem>>, %arg7: memref<64x256xf32, #tpu.memory_space<vmem>>, %arg8: memref<1x256xf32, #tpu.memory_space<vmem>>, %arg9: memref<1x256xf32, #tpu.memory_space<vmem>>, %arg10: memref<64x256xf32, #tpu.memory_space<vmem>>, %arg11: memref<64x256xbf16, #tpu.memory_space<vmem>>, %arg12: memref<64x256xf32, #tpu.memory_space<vmem>>) attributes {dimension_semantics = [#tpu.dimension_semantics<parallel>, #tpu.dimension_semantics<parallel>, #tpu.dimension_semantics<arbitrary>], iteration_bounds = array<i64: 1, 1, 1>, scalar_prefetch = 0 : i64, scratch_operands = 1 : i64, tpu.core_type = #tpu.core_type<tc>, window_params = [{transform_indices = @transform_0, window_bounds = array<i64: 64, 1024>}, {transform_indices = @transform_1, window_bounds = array<i64: 1024, 256>}, {transform_indices = @transform_2, window_bounds = array<i64: 1, 256>}, {transform_indices = @transform_3, window_bounds = array<i64: 1, 256>}, {transform_indices = @transform_4, window_bounds = array<i64: 64, 256>}, {transform_indices = @transform_5, window_bounds = array<i64: 1, 256>}, {transform_indices = @transform_6, window_bounds = array<i64: 1, 256>}, {transform_indices = @transform_7, window_bounds = array<i64: 64, 256>}, {transform_indices = @transform_8, window_bounds = array<i64: 64, 256>}]} {
    %c0_i32 = arith.constant 0 : i32
    %0 = arith.cmpi eq, %arg2, %c0_i32 : i32
    %1 = arith.extui %0 : i1 to i32
    %c0_i32_0 = arith.constant 0 : i32
    %2 = arith.cmpi ne, %1, %c0_i32_0 : i32
    scf.if %2 {
      %cst_10 = arith.constant 0.000000e+00 : f32
      %12 = vector.broadcast %cst_10 : f32 to vector<64x256xf32>
      %c0_11 = arith.constant 0 : index
      %c0_12 = arith.constant 0 : index
      %13 = vector.load %arg12[%c0_11, %c0_12] : memref<64x256xf32, #tpu.memory_space<vmem>>, vector<64x256xf32>
      tpu.vector_store %arg12[%c0_11, %c0_12], %12 {strides = array<i32>} : memref<64x256xf32, #tpu.memory_space<vmem>>, vector<64x256xf32>,
    } else {
    }
    %c0 = arith.constant 0 : index
    %c0_1 = arith.constant 0 : index
    %3 = vector.load %arg3[%c0, %c0_1] : memref<64x1024xbf16, #tpu.memory_space<vmem>>, vector<64x1024xbf16>
    %c0_2 = arith.constant 0 : index
    %c0_3 = arith.constant 0 : index
    %4 = vector.load %arg12[%c0_2, %c0_3] : memref<64x256xf32, #tpu.memory_space<vmem>>, vector<64x256xf32>
    %c0_4 = arith.constant 0 : index
    %c0_5 = arith.constant 0 : index
    %5 = vector.load %arg4[%c0_4, %c0_5] : memref<1024x256xbf16, #tpu.memory_space<vmem>>, vector<1024x256xbf16>
    %cst = arith.constant dense<0.000000e+00> : vector<64x256xf32>
    %6 = tpu.matmul %3, %5, %cst {dimension_numbers = #tpu.dot_dimension_numbers<[1], [0], [0], [1], [0, 0, 1, 1], [], []>} : vector<64x1024xbf16>, vector<1024x256xbf16>, vector<64x256xf32> -> vector<64x256xf32>
    %7 = arith.addf %4, %6 : vector<64x256xf32>
    %c0_6 = arith.constant 0 : index
    %c0_7 = arith.constant 0 : index
    %8 = vector.load %arg12[%c0_6, %c0_7] : memref<64x256xf32, #tpu.memory_space<vmem>>, vector<64x256xf32>
    tpu.vector_store %arg12[%c0_6, %c0_7], %7 {strides = array<i32>} : memref<64x256xf32, #tpu.memory_space<vmem>>, vector<64x256xf32>,
    %c0_i32_8 = arith.constant 0 : i32
    %9 = arith.cmpi eq, %arg2, %c0_i32_8 : i32
    %10 = arith.extui %9 : i1 to i32
    %c0_i32_9 = arith.constant 0 : i32
    %11 = arith.cmpi ne, %10, %c0_i32_9 : i32
    scf.if %11 {
      %c0_10 = arith.constant 0 : index
      %c0_11 = arith.constant 0 : index
      %12 = vector.load %arg12[%c0_10, %c0_11] : memref<64x256xf32, #tpu.memory_space<vmem>>, vector<64x256xf32>
      %c0_12 = arith.constant 0 : index
      %c0_13 = arith.constant 0 : index
      %13 = vector.load %arg5[%c0_12, %c0_13] : memref<1x256xf32, #tpu.memory_space<vmem>>, vector<1x256xf32>
      %14 = vector.broadcast %13 : vector<1x256xf32> to vector<64x256xf32>
      %15 = arith.addf %12, %14 : vector<64x256xf32>
      %c0_14 = arith.constant 0 : index
      %c0_15 = arith.constant 0 : index
      %16 = vector.load %arg6[%c0_14, %c0_15] : memref<1x256xf32, #tpu.memory_space<vmem>>, vector<1x256xf32>
      %17 = vector.broadcast %16 : vector<1x256xf32> to vector<64x256xf32>
      %18 = arith.mulf %15, %17 : vector<64x256xf32>
      %c0_16 = arith.constant 0 : index
      %c0_17 = arith.constant 0 : index
      %19 = vector.load %arg7[%c0_16, %c0_17] : memref<64x256xf32, #tpu.memory_space<vmem>>, vector<64x256xf32>
      %20 = arith.addf %18, %19 : vector<64x256xf32>
      %c0_18 = arith.constant 0 : index
      %c0_19 = arith.constant 0 : index
      %21 = vector.load %arg10[%c0_18, %c0_19] : memref<64x256xf32, #tpu.memory_space<vmem>>, vector<64x256xf32>
      tpu.vector_store %arg10[%c0_18, %c0_19], %20 {strides = array<i32>} : memref<64x256xf32, #tpu.memory_space<vmem>>, vector<64x256xf32>,
      %cst_20 = arith.constant dense<0.000000e+00> : vector<64xf32>
      %22 = vector.multi_reduction <add>, %20, %cst_20 [1] : vector<64x256xf32> to vector<64xf32>
      %23 = vector.shape_cast %22 : vector<64xf32> to vector<64x1xf32>
      %cst_21 = arith.constant 2.560000e+02 : f32
      %24 = vector.broadcast %cst_21 : f32 to vector<64x1xf32>
      %25 = arith.divf %23, %24 : vector<64x1xf32>
      %26 = vector.broadcast %25 : vector<64x1xf32> to vector<64x256xf32>
      %27 = arith.subf %20, %26 : vector<64x256xf32>
      %28 = arith.mulf %27, %27 : vector<64x256xf32>
      %cst_22 = arith.constant dense<0.000000e+00> : vector<64xf32>
      %29 = vector.multi_reduction <add>, %28, %cst_22 [1] : vector<64x256xf32> to vector<64xf32>
      %30 = vector.shape_cast %29 : vector<64xf32> to vector<64x1xf32>
      %cst_23 = arith.constant 2.560000e+02 : f32
      %31 = vector.broadcast %cst_23 : f32 to vector<64x1xf32>
      %32 = arith.divf %30, %31 : vector<64x1xf32>
      %cst_24 = arith.constant 9.99999997E-7 : f32
      %33 = vector.broadcast %cst_24 : f32 to vector<64x1xf32>
      %34 = arith.addf %32, %33 : vector<64x1xf32>
      %35 = math.rsqrt %34 : vector<64x1xf32>
      %36 = vector.broadcast %35 : vector<64x1xf32> to vector<64x256xf32>
      %37 = arith.mulf %27, %36 : vector<64x256xf32>
      %c0_25 = arith.constant 0 : index
      %c0_26 = arith.constant 0 : index
      %38 = vector.load %arg8[%c0_25, %c0_26] : memref<1x256xf32, #tpu.memory_space<vmem>>, vector<1x256xf32>
      %39 = vector.broadcast %38 : vector<1x256xf32> to vector<64x256xf32>
      %40 = arith.mulf %37, %39 : vector<64x256xf32>
      %c0_27 = arith.constant 0 : index
      %c0_28 = arith.constant 0 : index
      %41 = vector.load %arg9[%c0_27, %c0_28] : memref<1x256xf32, #tpu.memory_space<vmem>>, vector<1x256xf32>
      %42 = vector.broadcast %41 : vector<1x256xf32> to vector<64x256xf32>
      %43 = arith.addf %40, %42 : vector<64x256xf32>
      %44 = arith.truncf %43 : vector<64x256xf32> to vector<64x256xbf16>
      %c0_29 = arith.constant 0 : index
      %c0_30 = arith.constant 0 : index
      %45 = vector.load %arg11[%c0_29, %c0_30] : memref<64x256xbf16, #tpu.memory_space<vmem>>, vector<64x256xbf16>
      tpu.vector_store %arg11[%c0_29, %c0_30], %44 {strides = array<i32>} : memref<64x256xbf16, #tpu.memory_space<vmem>>, vector<64x256xbf16>,
    } else {
    }
    return
  }
  func.func @transform_0(%arg0: i32, %arg1: i32, %arg2: i32) -> (i32, i32) {
    %c0_i32 = arith.constant 0 : i32
    return %arg0, %arg2 : i32, i32
  }
  func.func @transform_1(%arg0: i32, %arg1: i32, %arg2: i32) -> (i32, i32) {
    %c0_i32 = arith.constant 0 : i32
    return %arg2, %arg1 : i32, i32
  }
  func.func @transform_2(%arg0: i32, %arg1: i32, %arg2: i32) -> (i32, i32) {
    %c0_i32 = arith.constant 0 : i32
    %c0_i32_0 = arith.constant 0 : i32
    return %c0_i32, %arg1 : i32, i32
  }
  func.func @transform_3(%arg0: i32, %arg1: i32, %arg2: i32) -> (i32, i32) {
    %c0_i32 = arith.constant 0 : i32
    %c0_i32_0 = arith.constant 0 : i32
    return %c0_i32, %arg1 : i32, i32
  }
  func.func @transform_4(%arg0: i32, %arg1: i32, %arg2: i32) -> (i32, i32) {
    %c0_i32 = arith.constant 0 : i32
    return %arg0, %arg1 : i32, i32
  }
  func.func @transform_5(%arg0: i32, %arg1: i32, %arg2: i32) -> (i32, i32) {
    %c0_i32 = arith.constant 0 : i32
    %c0_i32_0 = arith.constant 0 : i32
    return %c0_i32, %arg1 : i32, i32
  }
  func.func @transform_6(%arg0: i32, %arg1: i32, %arg2: i32) -> (i32, i32) {
    %c0_i32 = arith.constant 0 : i32
    %c0_i32_0 = arith.constant 0 : i32
    return %c0_i32, %arg1 : i32, i32
  }
  func.func @transform_7(%arg0: i32, %arg1: i32, %arg2: i32) -> (i32, i32) {
    %c0_i32 = arith.constant 0 : i32
    return %arg0, %arg1 : i32, i32
  }
  func.func @transform_8(%arg0: i32, %arg1: i32, %arg2: i32) -> (i32, i32) {
    %c0_i32 = arith.constant 0 : i32
    return %arg0, %arg1 : i32, i32
  }
}

module attributes {stable_mosaic.version = 11 : i64} {
  func.func @kernel(%arg0: i32, %arg1: i32, %arg2: i32, %arg3: memref<64x1024xbf16, #tpu.memory_space<vmem>>, %arg4: memref<1024x256xbf16, #tpu.memory_space<vmem>>, %arg5: memref<1x256xf32, #tpu.memory_space<vmem>>, %arg6: memref<1x256xf32, #tpu.memory_space<vmem>>, %arg7: memref<64x256xf32, #tpu.memory_space<vmem>>, %arg8: memref<1x256xf32, #tpu.memory_space<vmem>>, %arg9: memref<1x256xf32, #tpu.memory_space<vmem>>, %arg10: memref<64x256xf32, #tpu.memory_space<vmem>>, %arg11: memref<64x256xbf16, #tpu.memory_space<vmem>>, %arg12: memref<64x256xf32, #tpu.memory_space<vmem>>) attributes {dimension_semantics = [#tpu.dimension_semantics<parallel>, #tpu.dimension_semantics<parallel>, #tpu.dimension_semantics<arbitrary>], iteration_bounds = array<i64: 1, 1, 1>, scalar_prefetch = 0 : i64, scratch_operands = 1 : i64, tpu.core_type = #tpu.core_type<tc>, window_params = [{transform_indices = @transform_0, window_bounds = array<i64: 64, 1024>}, {transform_indices = @transform_1, window_bounds = array<i64: 1024, 256>}, {transform_indices = @transform_2, window_bounds = array<i64: 1, 256>}, {transform_indices = @transform_3, window_bounds = array<i64: 1, 256>}, {transform_indices = @transform_4, window_bounds = array<i64: 64, 256>}, {transform_indices = @transform_5, window_bounds = array<i64: 1, 256>}, {transform_indices = @transform_6, window_bounds = array<i64: 1, 256>}, {transform_indices = @transform_7, window_bounds = array<i64: 64, 256>}, {transform_indices = @transform_8, window_bounds = array<i64: 64, 256>}]} {
    %c0_i32 = arith.constant 0 : i32
    %0 = arith.cmpi eq, %arg2, %c0_i32 : i32
    %1 = arith.extui %0 : i1 to i32
    %c0_i32_0 = arith.constant 0 : i32
    %2 = arith.cmpi ne, %1, %c0_i32_0 : i32
    scf.if %2 {
      %cst_10 = arith.constant 0.000000e+00 : f32
      %12 = vector.broadcast %cst_10 : f32 to vector<64x256xf32>
      %c0_11 = arith.constant 0 : index
      %c0_12 = arith.constant 0 : index
      %13 = vector.load %arg12[%c0_11, %c0_12] : memref<64x256xf32, #tpu.memory_space<vmem>>, vector<64x256xf32>
      tpu.vector_store %arg12[%c0_11, %c0_12], %12 {strides = array<i32>} : memref<64x256xf32, #tpu.memory_space<vmem>>, vector<64x256xf32>,
    } else {
    }
    %c0 = arith.constant 0 : index
    %c0_1 = arith.constant 0 : index
    %3 = vector.load %arg3[%c0, %c0_1] : memref<64x1024xbf16, #tpu.memory_space<vmem>>, vector<64x1024xbf16>
    %c0_2 = arith.constant 0 : index
    %c0_3 = arith.constant 0 : index
    %4 = vector.load %arg12[%c0_2, %c0_3] : memref<64x256xf32, #tpu.memory_space<vmem>>, vector<64x256xf32>
    %c0_4 = arith.constant 0 : index
    %c0_5 = arith.constant 0 : index
    %5 = vector.load %arg4[%c0_4, %c0_5] : memref<1024x256xbf16, #tpu.memory_space<vmem>>, vector<1024x256xbf16>
    %cst = arith.constant dense<0.000000e+00> : vector<64x256xf32>
    %6 = tpu.matmul %3, %5, %cst {dimension_numbers = #tpu.dot_dimension_numbers<[1], [0], [0], [1], [0, 0, 1, 1], [], []>} : vector<64x1024xbf16>, vector<1024x256xbf16>, vector<64x256xf32> -> vector<64x256xf32>
    %7 = arith.addf %4, %6 : vector<64x256xf32>
    %c0_6 = arith.constant 0 : index
    %c0_7 = arith.constant 0 : index
    %8 = vector.load %arg12[%c0_6, %c0_7] : memref<64x256xf32, #tpu.memory_space<vmem>>, vector<64x256xf32>
    tpu.vector_store %arg12[%c0_6, %c0_7], %7 {strides = array<i32>} : memref<64x256xf32, #tpu.memory_space<vmem>>, vector<64x256xf32>,
    %c0_i32_8 = arith.constant 0 : i32
    %9 = arith.cmpi eq, %arg2, %c0_i32_8 : i32
    %10 = arith.extui %9 : i1 to i32
    %c0_i32_9 = arith.constant 0 : i32
    %11 = arith.cmpi ne, %10, %c0_i32_9 : i32
    scf.if %11 {
      %c0_10 = arith.constant 0 : index
      %c0_11 = arith.constant 0 : index
      %12 = vector.load %arg12[%c0_10, %c0_11] : memref<64x256xf32, #tpu.memory_space<vmem>>, vector<64x256xf32>
      %c0_12 = arith.constant 0 : index
      %c0_13 = arith.constant 0 : index
      %13 = vector.load %arg5[%c0_12, %c0_13] : memref<1x256xf32, #tpu.memory_space<vmem>>, vector<1x256xf32>
      %14 = vector.broadcast %13 : vector<1x256xf32> to vector<64x256xf32>
      %15 = arith.addf %12, %14 : vector<64x256xf32>
      %c0_14 = arith.constant 0 : index
      %c0_15 = arith.constant 0 : index
      %16 = vector.load %arg6[%c0_14, %c0_15] : memref<1x256xf32, #tpu.memory_space<vmem>>, vector<1x256xf32>
      %17 = vector.broadcast %16 : vector<1x256xf32> to vector<64x256xf32>
      %18 = arith.mulf %15, %17 : vector<64x256xf32>
      %c0_16 = arith.constant 0 : index
      %c0_17 = arith.constant 0 : index
      %19 = vector.load %arg7[%c0_16, %c0_17] : memref<64x256xf32, #tpu.memory_space<vmem>>, vector<64x256xf32>
      %20 = arith.addf %18, %19 : vector<64x256xf32>
      %c0_18 = arith.constant 0 : index
      %c0_19 = arith.constant 0 : index
      %21 = vector.load %arg10[%c0_18, %c0_19] : memref<64x256xf32, #tpu.memory_space<vmem>>, vector<64x256xf32>
      tpu.vector_store %arg10[%c0_18, %c0_19], %20 {strides = array<i32>} : memref<64x256xf32, #tpu.memory_space<vmem>>, vector<64x256xf32>,
      %cst_20 = arith.constant dense<0.000000e+00> : vector<64xf32>
      %22 = vector.multi_reduction <add>, %20, %cst_20 [1] : vector<64x256xf32> to vector<64xf32>
      %23 = vector.shape_cast %22 : vector<64xf32> to vector<64x1xf32>
      %cst_21 = arith.constant 2.560000e+02 : f32
      %24 = vector.broadcast %cst_21 : f32 to vector<64x1xf32>
      %25 = arith.divf %23, %24 : vector<64x1xf32>
      %26 = vector.broadcast %25 : vector<64x1xf32> to vector<64x256xf32>
      %27 = arith.subf %20, %26 : vector<64x256xf32>
      %28 = arith.mulf %27, %27 : vector<64x256xf32>
      %cst_22 = arith.constant dense<0.000000e+00> : vector<64xf32>
      %29 = vector.multi_reduction <add>, %28, %cst_22 [1] : vector<64x256xf32> to vector<64xf32>
      %30 = vector.shape_cast %29 : vector<64xf32> to vector<64x1xf32>
      %cst_23 = arith.constant 2.560000e+02 : f32
      %31 = vector.broadcast %cst_23 : f32 to vector<64x1xf32>
      %32 = arith.divf %30, %31 : vector<64x1xf32>
      %cst_24 = arith.constant 9.99999997E-7 : f32
      %33 = vector.broadcast %cst_24 : f32 to vector<64x1xf32>
      %34 = arith.addf %32, %33 : vector<64x1xf32>
      %35 = math.rsqrt %34 : vector<64x1xf32>
      %36 = vector.broadcast %35 : vector<64x1xf32> to vector<64x256xf32>
      %37 = arith.mulf %27, %36 : vector<64x256xf32>
      %c0_25 = arith.constant 0 : index
      %c0_26 = arith.constant 0 : index
      %38 = vector.load %arg8[%c0_25, %c0_26] : memref<1x256xf32, #tpu.memory_space<vmem>>, vector<1x256xf32>
      %39 = vector.broadcast %38 : vector<1x256xf32> to vector<64x256xf32>
      %40 = arith.mulf %37, %39 : vector<64x256xf32>
      %c0_27 = arith.constant 0 : index
      %c0_28 = arith.constant 0 : index
      %41 = vector.load %arg9[%c0_27, %c0_28] : memref<1x256xf32, #tpu.memory_space<vmem>>, vector<1x256xf32>
      %42 = vector.broadcast %41 : vector<1x256xf32> to vector<64x256xf32>
      %43 = arith.addf %40, %42 : vector<64x256xf32>
      %44 = arith.truncf %43 : vector<64x256xf32> to vector<64x256xbf16>
      %c0_29 = arith.constant 0 : index
      %c0_30 = arith.constant 0 : index
      %45 = vector.load %arg11[%c0_29, %c0_30] : memref<64x256xbf16, #tpu.memory_space<vmem>>, vector<64x256xbf16>
      tpu.vector_store %arg11[%c0_29, %c0_30], %44 {strides = array<i32>} : memref<64x256xbf16, #tpu.memory_space<vmem>>, vector<64x256xbf16>,
    } else {
    }
    return
  }
  func.func @transform_0(%arg0: i32, %arg1: i32, %arg2: i32) -> (i32, i32) {
    %c0_i32 = arith.constant 0 : i32
    return %arg0, %arg2 : i32, i32
  }
  func.func @transform_1(%arg0: i32, %arg1: i32, %arg2: i32) -> (i32, i32) {
    %c0_i32 = arith.constant 0 : i32
    return %arg2, %arg1 : i32, i32
  }
  func.func @transform_2(%arg0: i32, %arg1: i32, %arg2: i32) -> (i32, i32) {
    %c0_i32 = arith.constant 0 : i32
    %c0_i32_0 = arith.constant 0 : i32
    return %c0_i32, %arg1 : i32, i32
  }
  func.func @transform_3(%arg0: i32, %arg1: i32, %arg2: i32) -> (i32, i32) {
    %c0_i32 = arith.constant 0 : i32
    %c0_i32_0 = arith.constant 0 : i32
    return %c0_i32, %arg1 : i32, i32
  }
  func.func @transform_4(%arg0: i32, %arg1: i32, %arg2: i32) -> (i32, i32) {
    %c0_i32 = arith.constant 0 : i32
    return %arg0, %arg1 : i32, i32
  }
  func.func @transform_5(%arg0: i32, %arg1: i32, %arg2: i32) -> (i32, i32) {
    %c0_i32 = arith.constant 0 : i32
    %c0_i32_0 = arith.constant 0 : i32
    return %c0_i32, %arg1 : i32, i32
  }
  func.func @transform_6(%arg0: i32, %arg1: i32, %arg2: i32) -> (i32, i32) {
    %c0_i32 = arith.constant 0 : i32
    %c0_i32_0 = arith.constant 0 : i32
    return %c0_i32, %arg1 : i32, i32
  }
  func.func @transform_7(%arg0: i32, %arg1: i32, %arg2: i32) -> (i32, i32) {
    %c0_i32 = arith.constant 0 : i32
    return %arg0, %arg1 : i32, i32
  }
  func.func @transform_8(%arg0: i32, %arg1: i32, %arg2: i32) -> (i32, i32) {
    %c0_i32 = arith.constant 0 : i32
    return %arg0, %arg1 : i32, i32
  }
}

module attributes {stable_mosaic.version = 11 : i64} {
  func.func @kernel(%arg0: i32, %arg1: i32, %arg2: i32, %arg3: memref<16x256xbf16, #tpu.memory_space<vmem>>, %arg4: memref<256x512xbf16, #tpu.memory_space<vmem>>, %arg5: memref<1x512xf32, #tpu.memory_space<vmem>>, %arg6: memref<16x512xf32, #tpu.memory_space<vmem>>, %arg7: memref<16x512xf32, #tpu.memory_space<vmem>>) attributes {dimension_semantics = [#tpu.dimension_semantics<parallel>, #tpu.dimension_semantics<parallel>, #tpu.dimension_semantics<arbitrary>], iteration_bounds = array<i64: 1, 1, 1>, scalar_prefetch = 0 : i64, scratch_operands = 1 : i64, tpu.core_type = #tpu.core_type<tc>, window_params = [{transform_indices = @transform_0, window_bounds = array<i64: 16, 256>}, {transform_indices = @transform_1, window_bounds = array<i64: 256, 512>}, {transform_indices = @transform_2, window_bounds = array<i64: 1, 512>}, {transform_indices = @transform_3, window_bounds = array<i64: 16, 512>}]} {
    %c0_i32 = arith.constant 0 : i32
    %0 = arith.cmpi eq, %arg2, %c0_i32 : i32
    %1 = arith.extui %0 : i1 to i32
    %c0_i32_0 = arith.constant 0 : i32
    %2 = arith.cmpi ne, %1, %c0_i32_0 : i32
    scf.if %2 {
      %cst_10 = arith.constant 0.000000e+00 : f32
      %12 = vector.broadcast %cst_10 : f32 to vector<16x512xf32>
      %c0_11 = arith.constant 0 : index
      %c0_12 = arith.constant 0 : index
      %13 = vector.load %arg7[%c0_11, %c0_12] : memref<16x512xf32, #tpu.memory_space<vmem>>, vector<16x512xf32>
      tpu.vector_store %arg7[%c0_11, %c0_12], %12 {strides = array<i32>} : memref<16x512xf32, #tpu.memory_space<vmem>>, vector<16x512xf32>,
    } else {
    }
    %c0 = arith.constant 0 : index
    %c0_1 = arith.constant 0 : index
    %3 = vector.load %arg3[%c0, %c0_1] : memref<16x256xbf16, #tpu.memory_space<vmem>>, vector<16x256xbf16>
    %c0_2 = arith.constant 0 : index
    %c0_3 = arith.constant 0 : index
    %4 = vector.load %arg7[%c0_2, %c0_3] : memref<16x512xf32, #tpu.memory_space<vmem>>, vector<16x512xf32>
    %c0_4 = arith.constant 0 : index
    %c0_5 = arith.constant 0 : index
    %5 = vector.load %arg4[%c0_4, %c0_5] : memref<256x512xbf16, #tpu.memory_space<vmem>>, vector<256x512xbf16>
    %cst = arith.constant dense<0.000000e+00> : vector<16x512xf32>
    %6 = tpu.matmul %3, %5, %cst {dimension_numbers = #tpu.dot_dimension_numbers<[1], [0], [0], [1], [0, 0, 1, 1], [], []>} : vector<16x256xbf16>, vector<256x512xbf16>, vector<16x512xf32> -> vector<16x512xf32>
    %7 = arith.addf %4, %6 : vector<16x512xf32>
    %c0_6 = arith.constant 0 : index
    %c0_7 = arith.constant 0 : index
    %8 = vector.load %arg7[%c0_6, %c0_7] : memref<16x512xf32, #tpu.memory_space<vmem>>, vector<16x512xf32>
    tpu.vector_store %arg7[%c0_6, %c0_7], %7 {strides = array<i32>} : memref<16x512xf32, #tpu.memory_space<vmem>>, vector<16x512xf32>,
    %c0_i32_8 = arith.constant 0 : i32
    %9 = arith.cmpi eq, %arg2, %c0_i32_8 : i32
    %10 = arith.extui %9 : i1 to i32
    %c0_i32_9 = arith.constant 0 : i32
    %11 = arith.cmpi ne, %10, %c0_i32_9 : i32
    scf.if %11 {
      %c0_10 = arith.constant 0 : index
      %c0_11 = arith.constant 0 : index
      %12 = vector.load %arg7[%c0_10, %c0_11] : memref<16x512xf32, #tpu.memory_space<vmem>>, vector<16x512xf32>
      %c0_12 = arith.constant 0 : index
      %c0_13 = arith.constant 0 : index
      %13 = vector.load %arg5[%c0_12, %c0_13] : memref<1x512xf32, #tpu.memory_space<vmem>>, vector<1x512xf32>
      %14 = vector.broadcast %13 : vector<1x512xf32> to vector<16x512xf32>
      %15 = arith.addf %12, %14 : vector<16x512xf32>
      %c0_14 = arith.constant 0 : index
      %c0_15 = arith.constant 0 : index
      %16 = vector.load %arg6[%c0_14, %c0_15] : memref<16x512xf32, #tpu.memory_space<vmem>>, vector<16x512xf32>
      tpu.vector_store %arg6[%c0_14, %c0_15], %15 {strides = array<i32>} : memref<16x512xf32, #tpu.memory_space<vmem>>, vector<16x512xf32>,
    } else {
    }
    return
  }
  func.func @transform_0(%arg0: i32, %arg1: i32, %arg2: i32) -> (i32, i32) {
    %c0_i32 = arith.constant 0 : i32
    return %arg0, %arg2 : i32, i32
  }
  func.func @transform_1(%arg0: i32, %arg1: i32, %arg2: i32) -> (i32, i32) {
    %c0_i32 = arith.constant 0 : i32
    return %arg2, %arg1 : i32, i32
  }
  func.func @transform_2(%arg0: i32, %arg1: i32, %arg2: i32) -> (i32, i32) {
    %c0_i32 = arith.constant 0 : i32
    %c0_i32_0 = arith.constant 0 : i32
    return %c0_i32, %arg1 : i32, i32
  }
  func.func @transform_3(%arg0: i32, %arg1: i32, %arg2: i32) -> (i32, i32) {
    %c0_i32 = arith.constant 0 : i32
    return %arg0, %arg1 : i32, i32
  }
}

</mosaic_0001>

<bundles_post_ra>
// kernel: dinov2_forward.24
= control target key start
LH: loop header
LB: loop body
LE: loop exit
PB: predicated region body
PF: predicated region fallthrough
CT: control target
= control target key end

     0   :  { %s525_s0 = inlined_call_operand.vmem [shape: f32[64,256], index: 0, kind: input, shape index: {}]   ;;  %s526_s1 = inlined_call_operand.vmem [shape: f32[1,256], index: 1, kind: input, shape index: {}]   ;;  %s527_s2 = inlined_call_operand.vmem [shape: f32[1,256], index: 2, kind: input, shape index: {}]   ;;  %s528_s3 = inlined_call_operand.vmem [shape: bf16[64,256], index: 3, kind: output, shape index: {}]  }
   0x1   :  { %v14_v0 = vld [vmem:[%s525_s0] sm:$0xff]  ;;  %v15_v1 = vld [vmem:[%s525_s0 + $0x8] sm:$0xff]  ;;  %v16_v5 = vld [vmem:[%s525_s0 + $0x10] sm:$0xff] }
   0x2   :  { %v18_v2 = vld [vmem:[%s525_s0 + $0x20] sm:$0xff]  ;;  %v30_v3 = vadd.f32 %v15_v1, %v14_v0  ;;  %v19_v4 = vld [vmem:[%s525_s0 + $0x28] sm:$0xff]  ;;  %v17_v6 = vld [vmem:[%s525_s0 + $0x18] sm:$0xff] }
   0x3   :  { %v36_v7 = vadd.f32 %v19_v4, %v18_v2  ;;  %v20_v8 = vld [vmem:[%s525_s0 + $0x30] sm:$0xff]  ;;  %v21_v9 = vld [vmem:[%s525_s0 + $0x38] sm:$0xff]  ;;  %v33_v10 = vadd.f32 %v17_v6, %v16_v5  ;;  %v22_v12 = vld [vmem:[%s525_s0 + $0x40] sm:$0xff] }
   0x4   :  { %31 = vadd.xlane.f32.xlu0 %v30_v3  ;;  %v39_v11 = vadd.f32 %v21_v9, %v20_v8  ;;  %v23_v13 = vld [vmem:[%s525_s0 + $0x48] sm:$0xff]  ;;  %v24_v14 = vld [vmem:[%s525_s0 + $0x50] sm:$0xff]  ;;  %v25_v15 = vld [vmem:[%s525_s0 + $0x58] sm:$0xff] }
   0x5   :  { %37 = vadd.xlane.f32.xlu1 %v36_v7  ;;  %v42_v16 = vadd.f32 %v23_v13, %v22_v12  ;;  %v45_v17 = vadd.f32 %v25_v15, %v24_v14  ;;  %v26_v18 = vld [vmem:[%s525_s0 + $0x60] sm:$0xff]  ;;  %v27_v19 = vld [vmem:[%s525_s0 + $0x68] sm:$0xff]  ;;  %v28_v20 = vld [vmem:[%s525_s0 + $0x70] sm:$0xff] }
   0x6   :  { %v29_v21 = vld [vmem:[%s525_s0 + $0x78] sm:$0xff]  ;;  %v48_v22 = vadd.f32 %v27_v19, %v26_v18 }
   0x7   :  { %v51_v23 = vadd.f32 %v29_v21, %v28_v20 }
   0x8   :  { %34 = vadd.xlane.f32.xlu0 %v33_v10 }
   0x9   :  { %40 = vadd.xlane.f32.xlu1 %v39_v11 }
   0xc   :  { %43 = vadd.xlane.f32.xlu0 %v42_v16 }
   0xd   :  { %46 = vadd.xlane.f32.xlu1 %v45_v17 }
  0x10   :  { %49 = vadd.xlane.f32.xlu0 %v48_v22 }
  0x11   :  { %52 = vadd.xlane.f32.xlu1 %v51_v23 }
  0x91   :  { %v32_v24 = vpop.xlane.xlu0 %31 }
  0x92   :  { %v55_v25 = vmul.f32 0.00390625, %v32_v24  ;;  %v38_v26 = vpop.xlane.xlu1 %37 }
  0x93   :  { %v57_v27 = vmul.f32 0.00390625, %v38_v26 }
  0x94   :  { %v375_v28 = vsub.f32 %v14_v0, %v55_v25  ;;  %v377_v29 = vsub.f32 %v15_v1, %v55_v25 }
  0x95   :  { %v379_v30 = vsub.f32 %v18_v2, %v57_v27  ;;  %v381_v31 = vsub.f32 %v19_v4, %v57_v27  ;;  %v35_v32 = vpop.xlane.xlu0 %34 }
  0x96   :  { %v56_v33 = vmul.f32 0.00390625, %v35_v32  ;;  %v41_v34 = vpop.xlane.xlu1 %40  ;;  %v79_v35 = vmul.f32 %v375_v28, %v375_v28  ;;  %v80_v36 = vmul.f32 %v377_v29, %v377_v29 }
  0x97   :  { %v58_v37 = vmul.f32 0.00390625, %v41_v34  ;;  %v83_v38 = vmul.f32 %v379_v30, %v379_v30  ;;  %v84_v39 = vmul.f32 %v381_v31, %v381_v31 }
  0x98   :  { %v391_v40 = vsub.f32 %v16_v5, %v56_v33  ;;  %v393_v41 = vsub.f32 %v17_v6, %v56_v33  ;;  %v95_v42 = vadd.f32 %v80_v36, %v79_v35 }
  0x99   :  { %v395_v43 = vsub.f32 %v20_v8, %v58_v37  ;;  %v397_v44 = vsub.f32 %v21_v9, %v58_v37  ;;  %v44_v45 = vpop.xlane.xlu0 %43  ;;  %v101_v48 = vadd.f32 %v84_v39, %v83_v38  ;;  %v159_v37 = vld [vmem:[%s526_s1] sm:$0x3] }
  0x9a   :  { %v59_v46 = vmul.f32 0.00390625, %v44_v45  ;;  %96 = vadd.xlane.f32.xlu0 %v95_v42  ;;  %v47_v47 = vpop.xlane.xlu1 %46  ;;  %v81_v49 = vmul.f32 %v391_v40, %v391_v40  ;;  %v82_v50 = vmul.f32 %v393_v41, %v393_v41 }
  0x9b   :  { %v60_v51 = vmul.f32 0.00390625, %v47_v47  ;;  %v85_v52 = vmul.f32 %v395_v43, %v395_v43  ;;  %v86_v53 = vmul.f32 %v397_v44, %v397_v44 }
  0x9c   :  { %v407_v54 = vsub.f32 %v22_v12, %v59_v46  ;;  %v409_v55 = vsub.f32 %v23_v13, %v59_v46  ;;  %v98_v56 = vadd.f32 %v82_v50, %v81_v49  ;;  %v187_v46 = vld [vmem:[%s527_s2] sm:$0x3] }
  0x9d   :  { %v411_v57 = vsub.f32 %v24_v14, %v60_v51  ;;  %v413_v58 = vsub.f32 %v25_v15, %v60_v51  ;;  %v50_v59 = vpop.xlane.xlu0 %49  ;;  %v104_v62 = vadd.f32 %v86_v53, %v85_v52 }
  0x9e   :  { %v61_v60 = vmul.f32 0.00390625, %v50_v59  ;;  %102 = vadd.xlane.f32.xlu0 %v101_v48  ;;  %99 = vadd.xlane.f32.xlu1 %v98_v56  ;;  %v53_v61 = vpop.xlane.xlu1 %52  ;;  %v87_v63 = vmul.f32 %v407_v54, %v407_v54  ;;  %v88_v0 = vmul.f32 %v409_v55, %v409_v55 }
  0x9f   :  { %v62_v1 = vmul.f32 0.00390625, %v53_v61  ;;  %v89_v2 = vmul.f32 %v411_v57, %v411_v57  ;;  %v90_v3 = vmul.f32 %v413_v58, %v413_v58 }
  0xa0   :  { %v423_v4 = vsub.f32 %v26_v18, %v61_v60  ;;  %v425_v5 = vsub.f32 %v27_v19, %v61_v60  ;;  %v107_v6 = vadd.f32 %v88_v0, %v87_v63  ;;  %v161_v18 = vlaneseq }
  0xa1   :  { %v427_v7 = vsub.f32 %v28_v20, %v62_v1  ;;  %v429_v8 = vsub.f32 %v29_v21, %v62_v1  ;;  %v110_v9 = vadd.f32 %v90_v3, %v89_v2 }
  0xa2   :  { %105 = vadd.xlane.f32.xlu1 %v104_v62  ;;  %108 = vadd.xlane.f32.xlu0 %v107_v6  ;;  %v91_v10 = vmul.f32 %v423_v4, %v423_v4  ;;  %v92_v11 = vmul.f32 %v425_v5, %v425_v5  ;;  %v162_v24 = vshrl.u32 %v161_v18, 7 }
  0xa3   :  { %v93_v12 = vmul.f32 %v427_v7, %v427_v7  ;;  %v94_v13 = vmul.f32 %v429_v8, %v429_v8 }
  0xa4   :  { %v113_v14 = vadd.f32 %v92_v11, %v91_v10  ;;  %v163_v35 = vsub.s32 0, %v162_v24  ;;  %v167_v36 = vsub.s32 1, %v162_v24 }
  0xa5   :  { %v116_v15 = vadd.f32 %v94_v13, %v93_v12 }
  0xa6   :  { %111 = vadd.xlane.f32.xlu1 %v110_v9  ;;  %114 = vadd.xlane.f32.xlu0 %v113_v14  ;;  %v445_v49 = vrot.slane %v159_v37, %v163_v35  ;;  %v447_v50 = vrot.slane %v159_v37, %v167_v36  ;;  %v449_v56 = vrot.slane %v187_v46, %v163_v35 }
  0xa7   :  { %v451_v59 = vrot.slane %v187_v46, %v167_v36 }
  0xaa   :  { %117 = vadd.xlane.f32.xlu1 %v116_v15 }
 0x127   :  { %v97_v16 = vpop.xlane.xlu0 %96 }
 0x128   :  { %v119_v17 = vmul.f32 0.00390625, %v97_v16 }
 0x12a   :  { %v127_v19 = vadd.f32 1e-06, %v119_v17 }
 0x12b   :  { %v100_v20 = vpop.xlane.xlu1 %99  ;;  %v103_v21 = vpop.xlane.xlu0 %102 }
 0x12c   :  { %291 = vrsqrt.f32 %v127_v19  ;;  %v120_v22 = vmul.f32 0.00390625, %v100_v20  ;;  %v121_v23 = vmul.f32 0.00390625, %v103_v21 }
 0x12e   :  { %v128_v25 = vadd.f32 1e-06, %v120_v22  ;;  %v129_v26 = vadd.f32 1e-06, %v121_v23 }
 0x12f   :  { %v106_v27 = vpop.xlane.xlu1 %105  ;;  %v109_v32 = vpop.xlane.xlu0 %108 }
 0x130   :  { %293 = vrsqrt.f32 %v128_v25  ;;  %v122_v33 = vmul.f32 0.00390625, %v106_v27  ;;  %v123_v34 = vmul.f32 0.00390625, %v109_v32 }
 0x131   :  { %295 = vrsqrt.f32 %v129_v26 }
 0x132   :  { %v130_v38 = vadd.f32 1e-06, %v122_v33  ;;  %v131_v39 = vadd.f32 1e-06, %v123_v34 }
 0x133   :  { %v112_v42 = vpop.xlane.xlu1 %111  ;;  %v115_v45 = vpop.xlane.xlu0 %114 }
 0x134   :  { %297 = vrsqrt.f32 %v130_v38  ;;  %v124_v47 = vmul.f32 0.00390625, %v112_v42  ;;  %v125_v48 = vmul.f32 0.00390625, %v115_v45 }
 0x135   :  { %299 = vrsqrt.f32 %v131_v39 }
 0x136   :  { %v292_v51 = vpop.eup %291  ;;  %v132_v52 = vadd.f32 1e-06, %v124_v47  ;;  %v133_v53 = vadd.f32 1e-06, %v125_v48 }
 0x137   :  { %v143_v60 = vmul.f32 %v292_v51, %v375_v28  ;;  %v144_v61 = vmul.f32 %v292_v51, %v377_v29  ;;  %v118_v62 = vpop.xlane.xlu1 %117 }
 0x138   :  { %301 = vrsqrt.f32 %v132_v52  ;;  %v126_v63 = vmul.f32 0.00390625, %v118_v62 }
 0x139   :  { %v171_v0 = vmul.f32 %v445_v49, %v143_v60  ;;  %v172_v1 = vmul.f32 %v447_v50, %v144_v61  ;;  %303 = vrsqrt.f32 %v133_v53 }
 0x13a   :  { %v294_v2 = vpop.eup %293  ;;  %v134_v3 = vadd.f32 1e-06, %v126_v63 }
 0x13b   :  { %v296_v6 = vpop.eup %295  ;;  %v199_v9 = vadd.f32 %v449_v56, %v171_v0  ;;  %v200_v10 = vadd.f32 %v451_v59, %v172_v1  ;;  %v145_v11 = vmul.f32 %v294_v2, %v391_v40  ;;  %v146_v28 = vmul.f32 %v294_v2, %v393_v41 }
 0x13c   :  { %v147_v29 = vmul.f32 %v296_v6, %v379_v30  ;;  %v148_v12 = vmul.f32 %v296_v6, %v381_v31  ;;  %305 = vrsqrt.f32 %v134_v3 }
 0x13d   :  { %v283_v13 = vpack.c.bf16 %v200_v10, %v199_v9  ;;  %v173_v14 = vmul.f32 %v445_v49, %v145_v11  ;;  %v174_v15 = vmul.f32 %v447_v50, %v146_v28 }
 0x13e   :  { %v298_v16 = vpop.eup %297  ;;  %v175_v17 = vmul.f32 %v445_v49, %v147_v29  ;;  %v176_v18 = vmul.f32 %v447_v50, %v148_v12 }
 0x13f   :  { %v300_v19 = vpop.eup %299  ;;  %263 = vst [vmem:[%s528_s3] sm:$0xff] %v283_v13  ;;  %v201_v30 = vadd.f32 %v449_v56, %v173_v14  ;;  %v202_v31 = vadd.f32 %v451_v59, %v174_v15  ;;  %v149_v40 = vmul.f32 %v298_v16, %v395_v43  ;;  %v150_v41 = vmul.f32 %v298_v16, %v397_v44 }
 0x140   :  { %v203_v20 = vadd.f32 %v449_v56, %v175_v17  ;;  %v204_v21 = vadd.f32 %v451_v59, %v176_v18  ;;  %v151_v22 = vmul.f32 %v300_v19, %v407_v54  ;;  %v152_v23 = vmul.f32 %v300_v19, %v409_v55 }
 0x141   :  { %v284_v24 = vpack.c.bf16 %v202_v31, %v201_v30  ;;  %v177_v25 = vmul.f32 %v445_v49, %v149_v40  ;;  %v178_v26 = vmul.f32 %v447_v50, %v150_v41 }
 0x142   :  { %v302_v27 = vpop.eup %301  ;;  %v285_v32 = vpack.c.bf16 %v204_v21, %v203_v20  ;;  %v179_v33 = vmul.f32 %v445_v49, %v151_v22  ;;  %v180_v43 = vmul.f32 %v447_v50, %v152_v23 }
 0x143   :  { %v304_v44 = vpop.eup %303  ;;  %264 = vst [vmem:[%s528_s3 + $0x8] sm:$0xff] %v284_v24  ;;  %v205_v54 = vadd.f32 %v449_v56, %v177_v25  ;;  %v206_v55 = vadd.f32 %v451_v59, %v178_v26  ;;  %v153_v34 = vmul.f32 %v302_v27, %v411_v57  ;;  %v154_v35 = vmul.f32 %v302_v27, %v413_v58 }
 0x144   :  { %265 = vst [vmem:[%s528_s3 + $0x10] sm:$0xff] %v285_v32  ;;  %v207_v36 = vadd.f32 %v449_v56, %v179_v33  ;;  %v208_v37 = vadd.f32 %v451_v59, %v180_v43  ;;  %v155_v38 = vmul.f32 %v304_v44, %v423_v4  ;;  %v156_v39 = vmul.f32 %v304_v44, %v425_v5 }
 0x145   :  { %v286_v42 = vpack.c.bf16 %v206_v55, %v205_v54  ;;  %v181_v45 = vmul.f32 %v445_v49, %v153_v34  ;;  %v182_v46 = vmul.f32 %v447_v50, %v154_v35 }
 0x146   :  { %v306_v57 = vpop.eup %305  ;;  %v287_v47 = vpack.c.bf16 %v208_v37, %v207_v36  ;;  %v183_v58 = vmul.f32 %v445_v49, %v155_v38  ;;  %v184_v48 = vmul.f32 %v447_v50, %v156_v39 }
 0x147   :  { %266 = vst [vmem:[%s528_s3 + $0x18] sm:$0xff] %v286_v42  ;;  %v209_v51 = vadd.f32 %v449_v56, %v181_v45  ;;  %v210_v4 = vadd.f32 %v451_v59, %v182_v46  ;;  %v157_v5 = vmul.f32 %v306_v57, %v427_v7  ;;  %v158_v52 = vmul.f32 %v306_v57, %v429_v8 }
 0x148   :  { %267 = vst [vmem:[%s528_s3 + $0x20] sm:$0xff] %v287_v47  ;;  %v211_v53 = vadd.f32 %v449_v56, %v183_v58  ;;  %v212_v60 = vadd.f32 %v451_v59, %v184_v48 }
 0x149   :  { %v288_v61 = vpack.c.bf16 %v210_v4, %v209_v51  ;;  %v185_v62 = vmul.f32 %v445_v49, %v157_v5  ;;  %v186_v63 = vmul.f32 %v447_v50, %v158_v52 }
 0x14a   :  { %v289_v0 = vpack.c.bf16 %v212_v60, %v211_v53 }
 0x14b   :  { %268 = vst [vmem:[%s528_s3 + $0x28] sm:$0xff] %v288_v61  ;;  %v213_v7 = vadd.f32 %v449_v56, %v185_v62  ;;  %v214_v8 = vadd.f32 %v451_v59, %v186_v63 }
 0x14c   :  { %269 = vst [vmem:[%s528_s3 + $0x30] sm:$0xff] %v289_v0 }
 0x14d   :  { %v290_v1 = vpack.c.bf16 %v214_v8, %v213_v7 }
 0x14f   :  { %270 = vst [vmem:[%s528_s3 + $0x38] sm:$0xff] %v290_v1 }

// kernel: dinov2_forward.23
= control target key start
LH: loop header
LB: loop body
LE: loop exit
PB: predicated region body
PF: predicated region fallthrough
CT: control target
= control target key end

     0   :  { %v332_v36 = vlaneseq  ;;  %s639_s1 = inlined_call_operand.vmem [shape: bf16[256,256], index: 1, kind: input, shape index: {}]   ;;  %s640_s0 = inlined_call_operand.vmem [shape: bf16[32,256], index: 0, kind: input, shape index: {}]   ;;  %s641_s2 = inlined_call_operand.vmem [shape: f32[1,256], index: 2, kind: input, shape index: {}]   ;;  %s642_s3 = inlined_call_operand.vmem [shape: f32[32,256], index: 3, kind: output, shape index: {}]  }
   0x1   :  { %v430_v0 = vld [vmem:[%s639_s1 + $0x4] ss:$8 sps:$4 sm:$0xff]   ;;  %v432_v1 = vld [vmem:[%s639_s1] ss:$8 sps:$4 sm:$0xff]   ;;  %v433_v2 = vld [vmem:[%s639_s1 + $0x14] ss:$8 sps:$4 sm:$0xff]  }
   0x2   :  { %250 = vmatprep.subr.bf16.mxu0 %v430_v0  ;;  %398 = vmatprep.subr.bf16.mxu1 %v430_v0  ;;  %v435_v3 = vld [vmem:[%s639_s1 + $0x10] ss:$8 sps:$4 sm:$0xff]   ;;  %v436_v4 = vld [vmem:[%s639_s1 + $0x24] ss:$8 sps:$4 sm:$0xff]   ;;  %v438_v5 = vld [vmem:[%s639_s1 + $0x20] ss:$8 sps:$4 sm:$0xff]  }
   0x3   :  { %251 = vmatpush1.bf16.msra.mxu0 %v432_v1  ;;  %414 = vmatpush1.bf16.msra.mxu1 %v432_v1  ;;  %v439_v6 = vld [vmem:[%s639_s1 + $0x34] ss:$8 sps:$4 sm:$0xff]   ;;  %v441_v7 = vld [vmem:[%s639_s1 + $0x30] ss:$8 sps:$4 sm:$0xff]   ;;  %v442_v8 = vld [vmem:[%s639_s1 + $0x44] ss:$8 sps:$4 sm:$0xff]  }
   0x4   :  { %252 = vmatprep.subr.bf16.mxu0 %v433_v2  ;;  %399 = vmatprep.subr.bf16.mxu1 %v433_v2  ;;  %v444_v9 = vld [vmem:[%s639_s1 + $0x40] ss:$8 sps:$4 sm:$0xff]   ;;  %v445_v10 = vld [vmem:[%s639_s1 + $0x54] ss:$8 sps:$4 sm:$0xff]   ;;  %v447_v11 = vld [vmem:[%s639_s1 + $0x50] ss:$8 sps:$4 sm:$0xff]  }
   0x5   :  { %v448_v12 = vld [vmem:[%s639_s1 + $0x64] ss:$8 sps:$4 sm:$0xff]   ;;  %v450_v14 = vld [vmem:[%s639_s1 + $0x60] ss:$8 sps:$4 sm:$0xff]   ;;  %v483_v15 = vld [vmem:[%s640_s0 + $0x14] ss:$8 sps:$4 sm:$0xff]  }
   0x6   :  { %v480_v13 = vld [vmem:[%s640_s0 + $0x4] ss:$8 sps:$4 sm:$0xff]   ;;  %v451_v16 = vld [vmem:[%s639_s1 + $0x74] ss:$8 sps:$4 sm:$0xff]   ;;  %292 = vmatprep.mubr.bf16.mxu1 %v483_v15  ;;  %v453_v17 = vld [vmem:[%s639_s1 + $0x70] ss:$8 sps:$4 sm:$0xff]  }
   0x7   :  { %253 = vmatpush1.bf16.msra.mxu0 %v435_v3  ;;  %415 = vmatpush1.bf16.msra.mxu1 %v435_v3  ;;  %v454_v18 = vld [vmem:[%s639_s1 + $0x84] ss:$8 sps:$4 sm:$0xff]   ;;  %v456_v19 = vld [vmem:[%s639_s1 + $0x80] ss:$8 sps:$4 sm:$0xff]   ;;  %v457_v20 = vld [vmem:[%s639_s1 + $0x94] ss:$8 sps:$4 sm:$0xff]  }
   0x8   :  { %254 = vmatprep.subr.bf16.mxu0 %v436_v4  ;;  %400 = vmatprep.subr.bf16.mxu1 %v436_v4  ;;  %v459_v21 = vld [vmem:[%s639_s1 + $0x90] ss:$8 sps:$4 sm:$0xff]   ;;  %v460_v22 = vld [vmem:[%s639_s1 + $0xa4] ss:$8 sps:$4 sm:$0xff]   ;;  %v462_v23 = vld [vmem:[%s639_s1 + $0xa0] ss:$8 sps:$4 sm:$0xff]  }
   0x9   :  { %282 = vmatprep.mubr.bf16.mxu0 %v480_v13  ;;  %v463_v24 = vld [vmem:[%s639_s1 + $0xb4] ss:$8 sps:$4 sm:$0xff]   ;;  %v465_v25 = vld [vmem:[%s639_s1 + $0xb0] ss:$8 sps:$4 sm:$0xff]   ;;  %v466_v26 = vld [vmem:[%s639_s1 + $0xc4] ss:$8 sps:$4 sm:$0xff]  }
   0xa   :  { %v468_v27 = vld [vmem:[%s639_s1 + $0xc0] ss:$8 sps:$4 sm:$0xff]   ;;  %v469_v28 = vld [vmem:[%s639_s1 + $0xd4] ss:$8 sps:$4 sm:$0xff]   ;;  %v471_v29 = vld [vmem:[%s639_s1 + $0xd0] ss:$8 sps:$4 sm:$0xff]  }
   0xb   :  { %255 = vmatpush1.bf16.msra.mxu0 %v438_v5  ;;  %416 = vmatpush1.bf16.msra.mxu1 %v438_v5  ;;  %v472_v30 = vld [vmem:[%s639_s1 + $0xe4] ss:$8 sps:$4 sm:$0xff]   ;;  %v474_v31 = vld [vmem:[%s639_s1 + $0xe0] ss:$8 sps:$4 sm:$0xff]   ;;  %v475_v32 = vld [vmem:[%s639_s1 + $0xf4] ss:$8 sps:$4 sm:$0xff]  }
   0xc   :  { %256 = vmatprep.subr.bf16.mxu0 %v439_v6  ;;  %401 = vmatprep.subr.bf16.mxu1 %v439_v6  ;;  %v477_v33 = vld [vmem:[%s639_s1 + $0xf0] ss:$8 sps:$4 sm:$0xff]   ;;  %v478_v34 = vld [vmem:[%s640_s0] ss:$8 sps:$4 sm:$0xff]   ;;  %v333_v37 = vshrl.u32 %v332_v36, 7 }
   0xd   :  { %v481_v35 = vld [vmem:[%s640_s0 + $0x10] ss:$8 sps:$4 sm:$0xff]   ;;  %v330_v39 = vld [vmem:[%s641_s2] sm:$0x3] }
   0xe   :  { %v334_v38 = vsub.s32 0, %v333_v37  ;;  %v338_v40 = vsub.s32 1, %v333_v37 }
   0xf   :  { %257 = vmatpush1.bf16.msra.mxu0 %v441_v7  ;;  %417 = vmatpush1.bf16.msra.mxu1 %v441_v7 }
  0x10   :  { %258 = vmatprep.subr.bf16.mxu0 %v442_v8  ;;  %402 = vmatprep.subr.bf16.mxu1 %v442_v8  ;;  %v335_v41 = vrot.slane %v330_v39, %v334_v38  ;;  %v339_v42 = vrot.slane %v330_v39, %v338_v40 }
  0x13   :  { %259 = vmatpush1.bf16.msra.mxu0 %v444_v9  ;;  %418 = vmatpush1.bf16.msra.mxu1 %v444_v9 }
  0x14   :  { %260 = vmatprep.subr.bf16.mxu0 %v445_v10  ;;  %403 = vmatprep.subr.bf16.mxu1 %v445_v10 }
  0x17   :  { %261 = vmatpush1.bf16.msra.mxu0 %v447_v11  ;;  %419 = vmatpush1.bf16.msra.mxu1 %v447_v11 }
  0x18   :  { %262 = vmatprep.subr.bf16.mxu0 %v448_v12  ;;  %404 = vmatprep.subr.bf16.mxu1 %v448_v12 }
  0x1b   :  { %263 = vmatpush1.bf16.msra.mxu0 %v450_v14  ;;  %420 = vmatpush1.bf16.msra.mxu1 %v450_v14 }
  0x1c   :  { %264 = vmatprep.subr.bf16.mxu0 %v451_v16  ;;  %405 = vmatprep.subr.bf16.mxu1 %v451_v16 }
  0x1f   :  { %265 = vmatpush1.bf16.msra.mxu0 %v453_v17  ;;  %421 = vmatpush1.bf16.msra.mxu1 %v453_v17 }
  0x20   :  { %266 = vmatprep.subr.bf16.mxu0 %v454_v18  ;;  %406 = vmatprep.subr.bf16.mxu1 %v454_v18 }
  0x23   :  { %267 = vmatpush1.bf16.msra.mxu0 %v456_v19  ;;  %422 = vmatpush1.bf16.msra.mxu1 %v456_v19 }
  0x24   :  { %268 = vmatprep.subr.bf16.mxu0 %v457_v20  ;;  %407 = vmatprep.subr.bf16.mxu1 %v457_v20 }
  0x27   :  { %269 = vmatpush1.bf16.msra.mxu0 %v459_v21  ;;  %423 = vmatpush1.bf16.msra.mxu1 %v459_v21 }
  0x28   :  { %270 = vmatprep.subr.bf16.mxu0 %v460_v22  ;;  %408 = vmatprep.subr.bf16.mxu1 %v460_v22 }
  0x2b   :  { %271 = vmatpush1.bf16.msra.mxu0 %v462_v23  ;;  %424 = vmatpush1.bf16.msra.mxu1 %v462_v23 }
  0x2c   :  { %272 = vmatprep.subr.bf16.mxu0 %v463_v24  ;;  %409 = vmatprep.subr.bf16.mxu1 %v463_v24 }
  0x2f   :  { %273 = vmatpush1.bf16.msra.mxu0 %v465_v25  ;;  %425 = vmatpush1.bf16.msra.mxu1 %v465_v25 }
  0x30   :  { %274 = vmatprep.subr.bf16.mxu0 %v466_v26  ;;  %410 = vmatprep.subr.bf16.mxu1 %v466_v26 }
  0x33   :  { %275 = vmatpush1.bf16.msra.mxu0 %v468_v27  ;;  %426 = vmatpush1.bf16.msra.mxu1 %v468_v27 }
  0x34   :  { %276 = vmatprep.subr.bf16.mxu0 %v469_v28  ;;  %411 = vmatprep.subr.bf16.mxu1 %v469_v28 }
  0x37   :  { %277 = vmatpush1.bf16.msra.mxu0 %v471_v29  ;;  %427 = vmatpush1.bf16.msra.mxu1 %v471_v29 }
  0x38   :  { %278 = vmatprep.subr.bf16.mxu0 %v472_v30  ;;  %412 = vmatprep.subr.bf16.mxu1 %v472_v30 }
  0x3b   :  { %279 = vmatpush1.bf16.msra.mxu0 %v474_v31  ;;  %428 = vmatpush1.bf16.msra.mxu1 %v474_v31 }
  0x3c   :  { %280 = vmatprep.subr.bf16.mxu0 %v475_v32  ;;  %413 = vmatprep.subr.bf16.mxu1 %v475_v32 }
  0x3f   :  { %281 = vmatpush1.bf16.msra.mxu0 %v477_v33  ;;  %429 = vmatpush1.bf16.msra.mxu1 %v477_v33 }
  0x42   :  { %283 = vmatmul.mubr.bf16.vlgmr.msra.gmra.mrb[0].mxu0 %v478_v34  ;;  %293 = vmatmul.mubr.bf16.vlgmr.msra.gmra.mrb[0].mxu1 %v481_v35 }
 0x115   :  { %v284_v43 = vpop.f32.mrb[0].mxu0  ;;  %v294_v44 = vpop.f32.mrb[0].mxu1 }
 0x116   :  { %v342_v45 = vadd.f32 %v335_v41, %v284_v43  ;;  %v346_v46 = vadd.f32 %v335_v41, %v294_v44  ;;  %v286_v47 = vpop.f32.mrb[1].mxu0  ;;  %v296_v48 = vpop.f32.mrb[1].mxu1 }
 0x117   :  { %v343_v49 = vadd.f32 %v339_v42, %v286_v47  ;;  %v347_v50 = vadd.f32 %v339_v42, %v296_v48  ;;  %v288_v51 = vpop.f32.mrb[2].mxu0  ;;  %v298_v52 = vpop.f32.mrb[2].mxu1 }
 0x118   :  { %350 = vst [vmem:[%s642_s3] sm:$0xff] %v342_v45  ;;  %354 = vst [vmem:[%s642_s3 + $0x20] sm:$0xff] %v346_v46  ;;  %v344_v53 = vadd.f32 %v335_v41, %v288_v51  ;;  %v348_v54 = vadd.f32 %v335_v41, %v298_v52  ;;  %v290_v55 = vpop.f32.mrb[3].mxu0  ;;  %v300_v56 = vpop.f32.mrb[3].mxu1 }
 0x119   :  { %351 = vst [vmem:[%s642_s3 + $0x8] sm:$0xff] %v343_v49  ;;  %355 = vst [vmem:[%s642_s3 + $0x28] sm:$0xff] %v347_v50  ;;  %v345_v57 = vadd.f32 %v339_v42, %v290_v55  ;;  %v349_v58 = vadd.f32 %v339_v42, %v300_v56 }
 0x11a   :  { %352 = vst [vmem:[%s642_s3 + $0x10] sm:$0xff] %v344_v53  ;;  %356 = vst [vmem:[%s642_s3 + $0x30] sm:$0xff] %v348_v54 }
 0x11b   :  { %353 = vst [vmem:[%s642_s3 + $0x18] sm:$0xff] %v345_v57  ;;  %357 = vst [vmem:[%s642_s3 + $0x38] sm:$0xff] %v349_v58 }

// kernel: dinov2_forward.26
= control target key start
LH: loop header
LB: loop body
LE: loop exit
PB: predicated region body
PF: predicated region fallthrough
CT: control target
= control target key end

     0   :  { %s1309_s6 = smov 0   ;;  %s1561_s0 = inlined_call_operand.vmem [shape: bf16[2,32,768], index: 0, kind: input, shape index: {}]   ;;  %s1562_s1 = inlined_call_operand.vmem [shape: bf16[2,32,256], index: 1, kind: output, shape index: {}]  }
   0x1 LB: > { %s1037_s7 = sadd.s32 4294967295, %s1296_s6   ;;  %p1041_p0 = scmp.ge.s32.totalorder %s1296_s6, 1  ;;  %s1296_s6 = sphi %s1309_s6, %s11_s6  }
   0x2   : > { %p87_p1 = scmp.lt.s32.totalorder %s1296_s6, 3 }
   0x4   : > { %p88_p2 = pnand %p1041_p0, %p87_p1 }
   0x5   : > { %p107_p3 = scmp.lt.s32.totalorder (!%p88_p2), %s1037_s7, 1  ;;  %vm158_vm0 = vcmask (!%p88_p2), 523264   ;;  %v119_v14 = vlaneseq (!%p88_p2)  ;;  %vm226_vm2 = vcmask (!%p88_p2), 261120   ;;  %s1298_s12 = smov (!%p88_p2), 64  }
   0x6   : > { %91 = sbr.rel (%p88_p2) target bundleno = 2585 (0xa19), region = 24 }
   0x7   : > { %v1348_v15 = vand.u32 (!%p88_p2), 127, %v119_v14 }
   0x9   : > { %vm121_vm1 = vcmp.lt.s32.totalorder (!%p88_p2), %v1348_v15, 17 }
   0xd   : > { %s1564_s7 = smov (!%p107_p3, %s1037_s7), 1 }
   0xe   : > { %s1188_s8 = smul.u32 96, %s1564_s7  ;;  %s1079_s13 = sshll.u32 %s1564_s7, 5 }
   0xf   : > { %s116_s16 = scalar_lea.vmem %s1562_s1, %s1079_s13 }
  0x10   : > { %s1323_s11 = scalar_lea.vmem %s1561_s0, %s1188_s8 }
  0x11   : > { %v1326_v0 = vld [vmem:[%s1323_s11 + $0x8] ss:$24 sps:$4 sm:$0xff]   ;;  %v1329_v1 = vld [vmem:[%s1323_s11 + $0x38] ss:$24 sps:$4 sm:$0xff]  }
  0x12   : > { %1180 = vmatprep.subr.msk.bf16.mxu0 %vm158_vm0, %v1326_v0  ;;  %v166_v2 = vsel %vm158_vm0, %v1326_v0, 0  ;;  %v122_v3 = vld [vmem:[%s1323_s11] sm:$0xf]  ;;  %v123_v4 = vld [vmem:[%s1323_s11 + $0x18] sm:$0xf]  ;;  %v169_v7 = vsel %vm158_vm0, %v1329_v1, 0 }
  0x13   : > { %1117 = vmatpush3.bf16.xpose.msra.mxu0 %v166_v2  ;;  %v126_v5 = vmul.bf16 1040203264, %v122_v3  ;;  %v127_v6 = vmul.bf16 1040203264, %v123_v4  ;;  %v124_v9 = vld [vmem:[%s1323_s11 + $0x30] sm:$0xf] }
  0x14   : > { %1181 = vmatprep.subr.msk.bf16.mxu0 %vm158_vm0, %v1329_v1  ;;  %v125_v10 = vld [vmem:[%s1323_s11 + $0x48] sm:$0xf]  ;;  %v128_v11 = vmul.bf16 1040203264, %v124_v9  ;;  %v1371_v49 = vld [vmem:[%s1323_s11 + $0x40] ss:$24 sps:$4 sm:$0xff]  }
  0x15   : > { %v1341_v8 = vcombine.low %v126_v5, %v127_v6  ;;  %v129_v12 = vmul.bf16 1040203264, %v125_v10  ;;  %v1368_v48 = vld [vmem:[%s1323_s11 + $0x10] ss:$24 sps:$4 sm:$0xff]  }
  0x16   : > { %1124 = vmatprep.subr.bf16.mxu1 %v1368_v48 }
  0x17   : > { %1120 = vmatprep.mubr.msk.bf16.mxu0 %vm158_vm0, %v1341_v8  ;;  %v1046_v13 = vcombine.low %v128_v11, %v129_v12  ;;  %1125 = vmatpush3.bf16.msra.mxu1 %v1368_v48 }
  0x18   : > { %1126 = vmatprep.subr.bf16.mxu1 %v1371_v49 }
  0x1b   : > { %1119 = vmatpush3.bf16.xpose.msra.mxu0 %v169_v7  ;;  %1127 = vmatpush3.bf16.msra.mxu1 %v1371_v49 }
  0x22   : > { %1121 = vmatmul.mubr.msk.bf16.vlgmr.msra.gmra.mrb[0].mxu0 %vm158_vm0, %v1046_v13 }
  0xf5   : > { %v1122_v16 = vpop.f32.mrb[0].mxu0 }
  0xf6   : > { %v224_v17 = vsel %vm121_vm1, %v1122_v16, -1e+30  ;;  %v205_v18 = vpop.f32.mrb[1].mxu0 }
  0xf7   : > { %v222_v19 = vsel %vm121_vm1, %v205_v18, -1e+30  ;;  %v1123_v20 = vpop.f32.mrb[2].mxu0  ;;  %v233_v21 = vsel %vm226_vm2, %v224_v17, -inf }
  0xf8   : > { %v225_v22 = vsel %vm121_vm1, %v1123_v20, -1e+30  ;;  %234 = vmax.xlane.f32.xlu1 %v233_v21  ;;  %v208_v23 = vpop.f32.mrb[3].mxu0  ;;  %v227_v24 = vsel %vm226_vm2, %v222_v19, -inf }
  0xf9   : > { %v223_v25 = vsel %vm121_vm1, %v208_v23, -1e+30  ;;  %228 = vmax.xlane.f32.xlu0 %v227_v24  ;;  %v236_v26 = vsel %vm226_vm2, %v225_v22, -inf }
  0xfa   : > { %v230_v27 = vsel %vm226_vm2, %v223_v25, -inf }
  0xfc   : > { %237 = vmax.xlane.f32.xlu1 %v236_v26 }
  0xfd   : > { %231 = vmax.xlane.f32.xlu0 %v230_v27 }
 0x185   : > { %v235_v28 = vpop.xlane.xlu1 %234 }
 0x186   : > { %v241_v29 = vsub.f32 %v224_v17, %v235_v28  ;;  %v229_v30 = vpop.xlane.xlu0 %228 }
 0x187   : > { %v239_v31 = vsub.f32 %v222_v19, %v229_v30 }
 0x188   : > { %v247_v32 = vmul.f32 1.442695, %v241_v29 }
 0x189   : > { %v243_v33 = vmul.f32 1.442695, %v239_v31  ;;  %v238_v34 = vpop.xlane.xlu1 %237 }
 0x18a   : > { %1226 = vpow2.f32 %v247_v32  ;;  %v242_v35 = vsub.f32 %v225_v22, %v238_v34  ;;  %v232_v36 = vpop.xlane.xlu0 %231 }
 0x18b   : > { %v240_v37 = vsub.f32 %v223_v25, %v232_v36  ;;  %1228 = vpow2.f32 %v243_v33 }
 0x18c   : > { %v249_v38 = vmul.f32 1.442695, %v242_v35 }
 0x18d   : > { %v245_v39 = vmul.f32 1.442695, %v240_v37 }
 0x18f   : > { %1230 = vpow2.f32 %v245_v39 }
 0x190   : > { %1232 = vpow2.f32 %v249_v38 }
 0x194   : > { %v1227_v40 = vpop.eup %1226 }
 0x195   : > { %v257_v41 = vsel %vm226_vm2, %v1227_v40, 0.0  ;;  %v1229_v42 = vpop.eup %1228 }
 0x196   : > { %258 = vadd.xlane.f32.xlu0 %v257_v41  ;;  %v251_v44 = vsel %vm226_vm2, %v1229_v42, 0.0 }
 0x199   : > { %v1231_v43 = vpop.eup %1230 }
 0x19a   : > { %252 = vadd.xlane.f32.xlu0 %v251_v44  ;;  %v254_v45 = vsel %vm226_vm2, %v1231_v43, 0.0  ;;  %v1233_v46 = vpop.eup %1232 }
 0x19b   : > { %255 = vadd.xlane.f32.xlu1 %v254_v45  ;;  %v260_v47 = vsel %vm226_vm2, %v1233_v46, 0.0 }
 0x19f   : > { %261 = vadd.xlane.f32.xlu1 %v260_v47 }
 0x1b0   : > { %344 = vrot.lane.b32.xlu0 %v1326_v0, %s1298_s12  ;;  %346 = vrot.lane.b32.xlu1 %v1329_v1, %s1298_s12 }
 0x1b4   : > { %340 = vrot.lane.b32.xlu1 %v1341_v8, %s1298_s12 }
 0x1b8   : > { %342 = vrot.lane.b32.xlu1 %v1046_v13, %s1298_s12 }
 0x223   : > { %v259_v50 = vpop.xlane.xlu0 %258 }
 0x227   : > { %v253_v51 = vpop.xlane.xlu0 %252 }
 0x228   : > { %1234 = vrcp.f32 %v253_v51  ;;  %v256_v52 = vpop.xlane.xlu1 %255 }
 0x229   : > { %1236 = vrcp.f32 %v256_v52 }
 0x22a   : > { %1238 = vrcp.f32 %v259_v50  ;;  %v1421_v50 = vld [vmem:[%s1323_s11 + $0xc] ss:$24 sps:$4 sm:$0xff]  }
 0x22b   : > { %v345_v53 = vpop.permute.xlu0 %344 }
 0x22c   : > { %v262_v54 = vpop.xlane.xlu1 %261  ;;  %1182 = vmatprep.subr.msk.bf16.mxu1 %vm158_vm0, %v345_v53  ;;  %v355_v1 = vsel %vm158_vm0, %v345_v53, 0 }
 0x22d   : > { %1240 = vrcp.f32 %v262_v54 }
 0x230   : > { %v347_v59 = vpop.permute.xlu1 %346 }
 0x231   : > { %v358_v4 = vsel %vm158_vm0, %v347_v59, 0 }
 0x232   : > { %v1235_v55 = vpop.eup %1234 }
 0x233   : > { %v1237_v56 = vpop.eup %1236  ;;  %v267_v57 = vmul.f32 %v1235_v55, %v1229_v42 }
 0x234   : > { %v268_v58 = vmul.f32 %v1237_v56, %v1231_v43  ;;  %v1239_v60 = vpop.eup %1238  ;;  %v341_v3 = vpop.permute.xlu1 %340 }
 0x235   : > { %v269_v63 = vmul.f32 %v1239_v60, %v1227_v40 }
 0x236   : > { %v271_v61 = vpack.c.bf16 %v268_v58, %v267_v57 }
 0x237   : > { %v1241_v62 = vpop.eup %1240 }
 0x238   : > { %1128 = vmatprep.mubr.msk.bf16.mxu1 %vm226_vm2, %v271_v61  ;;  %v270_v0 = vmul.f32 %v1241_v62, %v1233_v46  ;;  %v343_v5 = vpop.permute.xlu1 %342 }
 0x23a   : > { %v272_v2 = vpack.c.bf16 %v270_v0, %v269_v63 }
 0x23c   : > { %1129 = vmatmul.mubr.msk.bf16.vlgmr.msra.gmra.mrb[0].mxu1 %vm226_vm2, %v272_v2  ;;  %v1432_v2 = vld [vmem:[%s1323_s11 + $0x3c] ss:$24 sps:$4 sm:$0xff]  }
 0x23d   : > { %1133 = vmatpush3.bf16.xpose.msra.mxu1 %v355_v1  ;;  %1136 = vmatprep.mubr.msk.bf16.mxu1 %vm158_vm0, %v341_v3  ;;  %v563_v1 = vsel %vm158_vm0, %v1421_v50, 0  ;;  %v522_v3 = vld [vmem:[%s1323_s11 + $0x34] sm:$0xf] }
 0x23e   : > { %1183 = vmatprep.subr.msk.bf16.mxu1 %vm158_vm0, %v347_v59 }
 0x245   : > { %1135 = vmatpush3.bf16.xpose.msra.mxu1 %v358_v4  ;;  %v523_v4 = vld [vmem:[%s1323_s11 + $0x4c] sm:$0xf] }
 0x24c   : > { %1137 = vmatmul.mubr.msk.bf16.vlgmr.msra.gmra.mrb[4].mxu1 %vm158_vm0, %v343_v5  ;;  %v566_v5 = vsel %vm158_vm0, %v1432_v2, 0 }
 0x30f   : > { %v1392_v6 = vpop.f32.mrb[0].mxu1 }
 0x310   : > { %v1394_v7 = vpop.f32.mrb[1].mxu1 }
 0x311   : > { %v1396_v8 = vpop.f32.mrb[2].mxu1 }
 0x312   : > { %v1398_v9 = vpop.f32.mrb[3].mxu1 }
 0x31f   : > { %v1138_v10 = vpop.f32.mrb[4].mxu1 }
 0x320   : > { %v394_v11 = vpop.f32.mrb[5].mxu1  ;;  %v411_v17 = vsel %vm121_vm1, %v1138_v10, -1e+30  ;;  %v526_v10 = vmul.bf16 1040203264, %v522_v3 }
 0x321   : > { %v409_v12 = vsel %vm121_vm1, %v394_v11, -1e+30  ;;  %v1139_v13 = vpop.f32.mrb[6].mxu1  ;;  %v419_v20 = vsel %vm226_vm2, %v411_v17, -inf  ;;  %v527_v11 = vmul.bf16 1040203264, %v523_v4 }
 0x322   : > { %v397_v14 = vpop.f32.mrb[7].mxu1  ;;  %v413_v16 = vsel %vm226_vm2, %v409_v12, -inf  ;;  %v412_v21 = vsel %vm121_vm1, %v1139_v13, -1e+30 }
 0x323   : > { %v410_v18 = vsel %vm121_vm1, %v397_v14, -1e+30  ;;  %414 = vmax.xlane.f32.xlu0 %v413_v16  ;;  %v422_v22 = vsel %vm226_vm2, %v412_v21, -inf }
 0x324   : > { %v416_v19 = vsel %vm226_vm2, %v410_v18, -inf }
 0x325   : > { %417 = vmax.xlane.f32.xlu1 %v416_v19 }
 0x327   : > { %420 = vmax.xlane.f32.xlu0 %v419_v20 }
 0x32b   : > { %423 = vmax.xlane.f32.xlu0 %v422_v22 }
 0x3b0   : > { %v415_v23 = vpop.xlane.xlu0 %414 }
 0x3b1   : > { %v425_v24 = vsub.f32 %v409_v12, %v415_v23  ;;  %v1060_v12 = vcombine.low %v526_v10, %v527_v11 }
 0x3b2   : > { %v418_v25 = vpop.xlane.xlu1 %417 }
 0x3b3   : > { %v429_v28 = vmul.f32 1.442695, %v425_v24  ;;  %v426_v29 = vsub.f32 %v410_v18, %v418_v25 }
 0x3b4   : > { %v421_v26 = vpop.xlane.xlu0 %420 }
 0x3b5   : > { %v427_v27 = vsub.f32 %v411_v17, %v421_v26  ;;  %v431_v33 = vmul.f32 1.442695, %v426_v29 }
 0x3b7   : > { %v433_v30 = vmul.f32 1.442695, %v427_v27 }
 0x3b8   : > { %v424_v31 = vpop.xlane.xlu0 %423 }
 0x3b9   : > { %1242 = vpow2.f32 %v433_v30  ;;  %v428_v32 = vsub.f32 %v412_v21, %v424_v31 }
 0x3ba   : > { %1244 = vpow2.f32 %v429_v28 }
 0x3bb   : > { %v435_v34 = vmul.f32 1.442695, %v428_v32 }
 0x3bd   : > { %1246 = vpow2.f32 %v435_v34 }
 0x3be   : > { %1248 = vpow2.f32 %v431_v33 }
 0x3c3   : > { %v1243_v35 = vpop.eup %1242 }
 0x3c4   : > { %v443_v36 = vsel %vm226_vm2, %v1243_v35, 0.0  ;;  %v1245_v37 = vpop.eup %1244 }
 0x3c5   : > { %444 = vadd.xlane.f32.xlu0 %v443_v36  ;;  %v437_v39 = vsel %vm226_vm2, %v1245_v37, 0.0 }
 0x3c7   : > { %v1247_v38 = vpop.eup %1246 }
 0x3c8   : > { %v446_v40 = vsel %vm226_vm2, %v1247_v38, 0.0  ;;  %v1249_v41 = vpop.eup %1248 }
 0x3c9   : > { %438 = vadd.xlane.f32.xlu0 %v437_v39  ;;  %447 = vadd.xlane.f32.xlu1 %v446_v40  ;;  %v440_v42 = vsel %vm226_vm2, %v1249_v41, 0.0 }
 0x3cd   : > { %441 = vadd.xlane.f32.xlu1 %v440_v42 }
 0x3de   : > { %461 = vrot.lane.b32.xlu1 %v1371_v49, %s1298_s12  ;;  %v521_v49 = vld [vmem:[%s1323_s11 + $0x1c] sm:$0xf] }
 0x3df   : > { %459 = vrot.lane.b32.xlu0 %v1368_v48, %s1298_s12  ;;  %v520_v48 = vld [vmem:[%s1323_s11 + $0x4] sm:$0xf]  ;;  %v525_v56 = vmul.bf16 1040203264, %v521_v49 }
 0x3e0   : > { %v524_v55 = vmul.bf16 1040203264, %v520_v48 }
 0x3e2   : > { %v1427_v63 = vcombine.low %v524_v55, %v525_v56 }
 0x452   : > { %v445_v43 = vpop.xlane.xlu0 %444 }
 0x456   : > { %v439_v44 = vpop.xlane.xlu0 %438  ;;  %v448_v45 = vpop.xlane.xlu1 %447 }
 0x457   : > { %1250 = vrcp.f32 %v448_v45 }
 0x458   : > { %1252 = vrcp.f32 %v439_v44 }
 0x459   : > { %1254 = vrcp.f32 %v445_v43 }
 0x45a   : > { %v442_v46 = vpop.xlane.xlu1 %441  ;;  %v460_v47 = vpop.permute.xlu0 %459 }
 0x45b   : > { %1256 = vrcp.f32 %v442_v46  ;;  %1140 = vmatprep.subr.bf16.mxu0 %v460_v47 }
 0x45c   : > { %1141 = vmatpush3.bf16.msra.mxu0 %v460_v47 }
 0x45e   : > { %v462_v51 = vpop.permute.xlu1 %461 }
 0x45f   : > { %1142 = vmatprep.subr.bf16.mxu0 %v462_v51 }
 0x460   : > { %1143 = vmatpush3.bf16.msra.mxu0 %v462_v51 }
 0x461   : > { %1184 = vmatprep.subr.msk.bf16.mxu0 %vm158_vm0, %v1421_v50  ;;  %v1251_v52 = vpop.eup %1250 }
 0x462   : > { %v1253_v53 = vpop.eup %1252  ;;  %v456_v58 = vmul.f32 %v1251_v52, %v1247_v38 }
 0x463   : > { %v1255_v54 = vpop.eup %1254  ;;  %v453_v59 = vmul.f32 %v1253_v53, %v1245_v37  ;;  %v1476_v53 = vld [vmem:[%s1323_s11 + $0x14] ss:$24 sps:$4 sm:$0xff]  }
 0x464   : > { %v455_v61 = vmul.f32 %v1255_v54, %v1243_v35  ;;  %1156 = vmatprep.subr.bf16.mxu1 %v1476_v53  ;;  %v1483_v54 = vld [vmem:[%s1323_s11 + $0x44] ss:$24 sps:$4 sm:$0xff]  }
 0x465   : > { %v1257_v57 = vpop.eup %1256  ;;  %1157 = vmatpush3.bf16.msra.mxu1 %v1476_v53 }
 0x466   : > { %v454_v60 = vmul.f32 %v1257_v57, %v1249_v41  ;;  %v458_v0 = vpack.c.bf16 %v456_v58, %v455_v61  ;;  %1158 = vmatprep.subr.bf16.mxu1 %v1483_v54 }
 0x468   : > { %v457_v62 = vpack.c.bf16 %v454_v60, %v453_v59 }
 0x469   : > { %1159 = vmatpush3.bf16.msra.mxu1 %v1483_v54 }
 0x46a   : > { %1144 = vmatprep.mubr.msk.bf16.mxu0 %vm226_vm2, %v457_v62 }
 0x46b   : > { %1145 = vmatmul.mubr.msk.bf16.vlgmr.msra.gmra.mrb[4].mxu0 %vm226_vm2, %v458_v0 }
 0x46c   : > { %1149 = vmatpush3.bf16.xpose.msra.mxu0 %v563_v1  ;;  %1152 = vmatprep.mubr.msk.bf16.mxu0 %vm158_vm0, %v1427_v63 }
 0x46d   : > { %1185 = vmatprep.subr.msk.bf16.mxu0 %vm158_vm0, %v1432_v2 }
 0x474   : > { %1151 = vmatpush3.bf16.xpose.msra.mxu0 %v566_v5 }
 0x47b   : > { %1153 = vmatmul.mubr.msk.bf16.vlgmr.msra.gmra.mrb[8].mxu0 %vm158_vm0, %v1060_v12 }
 0x53e   : > { %v1445_v13 = vpop.f32.mrb[4].mxu0 }
 0x53f   : > { %v1447_v14 = vpop.f32.mrb[5].mxu0 }
 0x540   : > { %v1449_v16 = vpop.f32.mrb[6].mxu0 }
 0x541   : > { %v1203_v17 = vpack.i.bf16 %v1449_v16, %v1445_v13  ;;  %v1453_v18 = vpop.f32.mrb[7].mxu0 }
 0x542   : > { %v1198_v19 = vpack.i.bf16 %v1453_v18, %v1447_v14 }
 0x54e   : > { %v1154_v20 = vpop.f32.mrb[8].mxu0 }
 0x54f   : > { %v602_v21 = vpop.f32.mrb[9].mxu0  ;;  %v619_v29 = vsel %vm121_vm1, %v1154_v20, -1e+30 }
 0x550   : > { %v617_v22 = vsel %vm121_vm1, %v602_v21, -1e+30  ;;  %v1155_v23 = vpop.f32.mrb[10].mxu0  ;;  %v627_v31 = vsel %vm226_vm2, %v619_v29, -inf }
 0x551   : > { %v605_v24 = vpop.f32.mrb[11].mxu0  ;;  %v621_v25 = vsel %vm226_vm2, %v617_v22, -inf  ;;  %v620_v26 = vsel %vm121_vm1, %v1155_v23, -1e+30 }
 0x552   : > { %v618_v27 = vsel %vm121_vm1, %v605_v24, -1e+30  ;;  %622 = vmax.xlane.f32.xlu1 %v621_v25  ;;  %v630_v30 = vsel %vm226_vm2, %v620_v26, -inf }
 0x553   : > { %v624_v28 = vsel %vm226_vm2, %v618_v27, -inf }
 0x554   : > { %625 = vmax.xlane.f32.xlu0 %v624_v28 }
 0x556   : > { %631 = vmax.xlane.f32.xlu1 %v630_v30 }
 0x558   : > { %628 = vmax.xlane.f32.xlu0 %v627_v31 }
 0x5df   : > { %v623_v32 = vpop.xlane.xlu1 %622 }
 0x5e0   : > { %v633_v36 = vsub.f32 %v617_v22, %v623_v32 }
 0x5e1   : > { %v626_v33 = vpop.xlane.xlu0 %625 }
 0x5e2   : > { %v634_v34 = vsub.f32 %v618_v27, %v626_v33  ;;  %v637_v42 = vmul.f32 1.442695, %v633_v36 }
 0x5e3   : > { %v632_v35 = vpop.xlane.xlu1 %631 }
 0x5e4   : > { %v639_v37 = vmul.f32 1.442695, %v634_v34  ;;  %v636_v38 = vsub.f32 %v620_v26, %v632_v35 }
 0x5e5   : > { %v629_v39 = vpop.xlane.xlu0 %628 }
 0x5e6   : > { %1258 = vpow2.f32 %v639_v37  ;;  %v643_v40 = vmul.f32 1.442695, %v636_v38  ;;  %v635_v41 = vsub.f32 %v619_v29, %v629_v39 }
 0x5e8   : > { %1260 = vpow2.f32 %v643_v40  ;;  %v641_v43 = vmul.f32 1.442695, %v635_v41 }
 0x5ea   : > { %1262 = vpow2.f32 %v641_v43 }
 0x5eb   : > { %1264 = vpow2.f32 %v637_v42 }
 0x5f0   : > { %v1259_v44 = vpop.eup %1258 }
 0x5f1   : > { %v648_v45 = vsel %vm226_vm2, %v1259_v44, 0.0 }
 0x5f2   : > { %v1261_v46 = vpop.eup %1260  ;;  %649 = vadd.xlane.f32.xlu1 %v648_v45 }
 0x5f3   : > { %v654_v51 = vsel %vm226_vm2, %v1261_v46, 0.0 }
 0x5f4   : > { %v1263_v47 = vpop.eup %1262 }
 0x5f5   : > { %v651_v48 = vsel %vm226_vm2, %v1263_v47, 0.0  ;;  %v1265_v49 = vpop.eup %1264 }
 0x5f6   : > { %655 = vadd.xlane.f32.xlu1 %v654_v51  ;;  %652 = vadd.xlane.f32.xlu0 %v651_v48  ;;  %v645_v52 = vsel %vm226_vm2, %v1265_v49, 0.0 }
 0x5fa   : > { %646 = vadd.xlane.f32.xlu0 %v645_v52 }
 0x607   : > { %740 = vrot.lane.b32.xlu1 %v1432_v2, %s1298_s12 }
 0x60b   : > { %734 = vrot.lane.b32.xlu1 %v1427_v63, %s1298_s12 }
 0x60f   : > { %736 = vrot.lane.b32.xlu1 %v1060_v12, %s1298_s12 }
 0x610   : > { %738 = vrot.lane.b32.xlu0 %v1421_v50, %s1298_s12 }
 0x67f   : > { %v650_v55 = vpop.xlane.xlu1 %649 }
 0x683   : > { %v656_v56 = vpop.xlane.xlu1 %655  ;;  %v653_v57 = vpop.xlane.xlu0 %652 }
 0x684   : > { %1266 = vrcp.f32 %v656_v56 }
 0x685   : > { %1268 = vrcp.f32 %v653_v57 }
 0x686   : > { %1270 = vrcp.f32 %v650_v55 }
 0x687   : > { %v647_v58 = vpop.xlane.xlu0 %646  ;;  %v741_v63 = vpop.permute.xlu1 %740 }
 0x688   : > { %1272 = vrcp.f32 %v647_v58  ;;  %v752_v12 = vsel %vm158_vm0, %v741_v63, 0 }
 0x68b   : > { %v739_v59 = vpop.permute.xlu0 %738  ;;  %v735_v11 = vpop.permute.xlu1 %734 }
 0x68c   : > { %1186 = vmatprep.subr.msk.bf16.mxu1 %vm158_vm0, %v739_v59  ;;  %v749_v5 = vsel %vm158_vm0, %v739_v59, 0 }
 0x68e   : > { %v1267_v60 = vpop.eup %1266 }
 0x68f   : > { %v1269_v61 = vpop.eup %1268  ;;  %v664_v1 = vmul.f32 %v1267_v60, %v1261_v46  ;;  %v737_v20 = vpop.permute.xlu1 %736 }
 0x690   : > { %v1271_v62 = vpop.eup %1270  ;;  %v663_v50 = vmul.f32 %v1269_v61, %v1263_v47 }
 0x691   : > { %v662_v3 = vmul.f32 %v1271_v62, %v1259_v44 }
 0x692   : > { %v1273_v0 = vpop.eup %1272  ;;  %v666_v10 = vpack.c.bf16 %v664_v1, %v663_v50 }
 0x693   : > { %v661_v2 = vmul.f32 %v1273_v0, %v1265_v49 }
 0x695   : > { %v665_v4 = vpack.c.bf16 %v662_v3, %v661_v2 }
 0x697   : > { %1160 = vmatprep.mubr.msk.bf16.mxu1 %vm226_vm2, %v665_v4 }
 0x698   : > { %1161 = vmatmul.mubr.msk.bf16.vlgmr.msra.gmra.mrb[8].mxu1 %vm226_vm2, %v666_v10 }
 0x699   : > { %1165 = vmatpush3.bf16.xpose.msra.mxu1 %v749_v5  ;;  %1168 = vmatprep.mubr.msk.bf16.mxu1 %vm158_vm0, %v735_v11 }
 0x69a   : > { %1187 = vmatprep.subr.msk.bf16.mxu1 %vm158_vm0, %v741_v63 }
 0x6a1   : > { %1167 = vmatpush3.bf16.xpose.msra.mxu1 %v752_v12 }
 0x6a8   : > { %1169 = vmatmul.mubr.msk.bf16.vlgmr.msra.gmra.mrb[12].mxu1 %vm158_vm0, %v737_v20 }
 0x76b   : > { %v1498_v21 = vpop.f32.mrb[8].mxu1 }
 0x76c   : > { %v1500_v22 = vpop.f32.mrb[9].mxu1 }
 0x76d   : > { %v1502_v23 = vpop.f32.mrb[10].mxu1 }
 0x76e   : > { %v1504_v24 = vpop.f32.mrb[11].mxu1 }
 0x77b   : > { %v1170_v25 = vpop.f32.mrb[12].mxu1 }
 0x77c   : > { %v788_v26 = vpop.f32.mrb[13].mxu1  ;;  %v805_v31 = vsel %vm121_vm1, %v1170_v25, -1e+30 }
 0x77d   : > { %v803_v27 = vsel %vm121_vm1, %v788_v26, -1e+30  ;;  %v1171_v28 = vpop.f32.mrb[14].mxu1  ;;  %v813_v34 = vsel %vm226_vm2, %v805_v31, -inf }
 0x77e   : > { %v791_v29 = vpop.f32.mrb[15].mxu1  ;;  %v807_v30 = vsel %vm226_vm2, %v803_v27, -inf  ;;  %v806_v35 = vsel %vm121_vm1, %v1171_v28, -1e+30 }
 0x77f   : > { %v804_v32 = vsel %vm121_vm1, %v791_v29, -1e+30  ;;  %808 = vmax.xlane.f32.xlu0 %v807_v30  ;;  %v816_v36 = vsel %vm226_vm2, %v806_v35, -inf }
 0x780   : > { %v810_v33 = vsel %vm226_vm2, %v804_v32, -inf }
 0x781   : > { %811 = vmax.xlane.f32.xlu1 %v810_v33 }
 0x783   : > { %814 = vmax.xlane.f32.xlu0 %v813_v34 }
 0x787   : > { %817 = vmax.xlane.f32.xlu0 %v816_v36 }
 0x80c   : > { %v809_v37 = vpop.xlane.xlu0 %808 }
 0x80d   : > { %v819_v38 = vsub.f32 %v803_v27, %v809_v37 }
 0x80e   : > { %v812_v39 = vpop.xlane.xlu1 %811 }
 0x80f   : > { %v823_v42 = vmul.f32 1.442695, %v819_v38  ;;  %v820_v43 = vsub.f32 %v804_v32, %v812_v39 }
 0x810   : > { %v815_v40 = vpop.xlane.xlu0 %814 }
 0x811   : > { %v821_v41 = vsub.f32 %v805_v31, %v815_v40  ;;  %v825_v47 = vmul.f32 1.442695, %v820_v43 }
 0x813   : > { %v827_v44 = vmul.f32 1.442695, %v821_v41 }
 0x814   : > { %v818_v45 = vpop.xlane.xlu0 %817 }
 0x815   : > { %1274 = vpow2.f32 %v827_v44  ;;  %v822_v46 = vsub.f32 %v806_v35, %v818_v45 }
 0x816   : > { %1276 = vpow2.f32 %v823_v42 }
 0x817   : > { %v829_v51 = vmul.f32 1.442695, %v822_v46 }
 0x819   : > { %1278 = vpow2.f32 %v829_v51 }
 0x81a   : > { %1280 = vpow2.f32 %v825_v47 }
 0x81f   : > { %v1275_v15 = vpop.eup %1274 }
 0x820   : > { %v837_v48 = vsel %vm226_vm2, %v1275_v15, 0.0  ;;  %v1277_v49 = vpop.eup %1276 }
 0x821   : > { %838 = vadd.xlane.f32.xlu0 %v837_v48  ;;  %v831_v55 = vsel %vm226_vm2, %v1277_v49, 0.0 }
 0x823   : > { %v1279_v52 = vpop.eup %1278 }
 0x824   : > { %v840_v56 = vsel %vm226_vm2, %v1279_v52, 0.0  ;;  %v1281_v57 = vpop.eup %1280 }
 0x825   : > { %832 = vadd.xlane.f32.xlu0 %v831_v55  ;;  %841 = vadd.xlane.f32.xlu1 %v840_v56  ;;  %v834_v58 = vsel %vm226_vm2, %v1281_v57, 0.0 }
 0x829   : > { %835 = vadd.xlane.f32.xlu1 %v834_v58 }
 0x83a   : > { %855 = vrot.lane.b32.xlu1 %v1483_v54, %s1298_s12 }
 0x83b   : > { %853 = vrot.lane.b32.xlu0 %v1476_v53, %s1298_s12 }
 0x83e   : > { %1199 = vrot.lane.b32.xlu1 %v1198_v19, %s1298_s12 }
 0x842   : > { %1204 = vrot.lane.b32.xlu1 %v1203_v17, %s1298_s12 }
 0x8ae   : > { %v839_v59 = vpop.xlane.xlu0 %838 }
 0x8b2   : > { %v833_v60 = vpop.xlane.xlu0 %832  ;;  %v842_v61 = vpop.xlane.xlu1 %841 }
 0x8b3   : > { %1282 = vrcp.f32 %v842_v61 }
 0x8b4   : > { %1284 = vrcp.f32 %v833_v60 }
 0x8b5   : > { %1286 = vrcp.f32 %v839_v59 }
 0x8b6   : > { %v836_v54 = vpop.xlane.xlu1 %835  ;;  %v854_v62 = vpop.permute.xlu0 %853 }
 0x8b7   : > { %1288 = vrcp.f32 %v836_v54  ;;  %1172 = vmatprep.subr.bf16.mxu0 %v854_v62 }
 0x8b8   : > { %1173 = vmatpush3.bf16.msra.mxu0 %v854_v62 }
 0x8ba   : > { %v856_v53 = vpop.permute.xlu1 %855 }
 0x8bb   : > { %1174 = vmatprep.subr.bf16.mxu0 %v856_v53 }
 0x8bc   : > { %1175 = vmatpush3.bf16.msra.mxu0 %v856_v53 }
 0x8bd   : > { %v1283_v14 = vpop.eup %1282 }
 0x8be   : > { %v1285_v18 = vpop.eup %1284  ;;  %v850_v13 = vmul.f32 %v1283_v14, %v1279_v52  ;;  %v1200_v12 = vpop.permute.xlu1 %1199 }
 0x8bf   : > { %v1287_v19 = vpop.eup %1286  ;;  %v847_v16 = vmul.f32 %v1285_v18, %v1277_v49  ;;  %v1202_v25 = vunpack.i.h.bf16 %v1200_v12  ;;  %v1201_v26 = vunpack.i.l.bf16 %v1200_v12 }
 0x8c0   : > { %v849_v0 = vmul.f32 %v1287_v19, %v1275_v15 }
 0x8c1   : > { %v1289_v63 = vpop.eup %1288  ;;  %v947_v33 = vsel %vm158_vm0, %v1398_v9, %v1202_v25  ;;  %v946_v34 = vsel %vm158_vm0, %v1394_v7, %v1201_v26 }
 0x8c2   : > { %v848_v17 = vmul.f32 %v1289_v63, %v1281_v57  ;;  %v852_v50 = vpack.c.bf16 %v850_v13, %v849_v0  ;;  %v1205_v20 = vpop.permute.xlu1 %1204 }
 0x8c3   : > { %v1207_v27 = vunpack.i.h.bf16 %v1205_v20  ;;  %v1206_v28 = vunpack.i.l.bf16 %v1205_v20 }
 0x8c4   : > { %v851_v1 = vpack.c.bf16 %v848_v17, %v847_v16 }
 0x8c5   : > { %v949_v37 = vsel %vm158_vm0, %v1396_v8, %v1207_v27  ;;  %v948_v38 = vsel %vm158_vm0, %v1392_v6, %v1206_v28 }
 0x8c6   : > { %1176 = vmatprep.mubr.msk.bf16.mxu0 %vm226_vm2, %v851_v1 }
 0x8c7   : > { %1177 = vmatmul.mubr.msk.bf16.vlgmr.msra.gmra.mrb[12].mxu0 %vm226_vm2, %v852_v50 }
 0x99a   : > { %v1178_v2 = vpop.f32.mrb[12].mxu0 }
 0x99b   : > { %v899_v3 = vpop.f32.mrb[13].mxu0 }
 0x99c   : > { %v1179_v4 = vpop.f32.mrb[14].mxu0 }
 0x99d   : > { %v1213_v5 = vpack.i.bf16 %v1179_v4, %v1178_v2  ;;  %v902_v10 = vpop.f32.mrb[15].mxu0 }
 0x99e   : > { %v1208_v11 = vpack.i.bf16 %v902_v10, %v899_v3 }
 0x99f   : > { %1214 = vrot.lane.b32.xlu1 %v1213_v5, %s1298_s12 }
 0x9a0   : > { %1209 = vrot.lane.b32.xlu0 %v1208_v11, %s1298_s12 }
 0xa11   : > { %v1215_v29 = vpop.permute.xlu1 %1214 }
 0xa12   : > { %v1217_v30 = vunpack.i.h.bf16 %v1215_v29  ;;  %v1216_v31 = vunpack.i.l.bf16 %v1215_v29  ;;  %v1210_v32 = vpop.permute.xlu0 %1209 }
 0xa13   : > { %v1212_v35 = vunpack.i.h.bf16 %v1210_v32  ;;  %v1211_v36 = vunpack.i.l.bf16 %v1210_v32 }
 0xa14   : > { %v953_v39 = vsel %vm158_vm0, %v1502_v23, %v1217_v30  ;;  %v952_v9 = vsel %vm158_vm0, %v1498_v21, %v1216_v31 }
 0xa15   : > { %v1082_v40 = vpack.c.bf16 %v952_v9, %v948_v38  ;;  %v1083_v7 = vpack.c.bf16 %v953_v39, %v949_v37  ;;  %v951_v41 = vsel %vm158_vm0, %v1504_v24, %v1212_v35  ;;  %v950_v8 = vsel %vm158_vm0, %v1500_v22, %v1211_v36 }
 0xa16   : > { %v1080_v42 = vpack.c.bf16 %v950_v8, %v946_v34  ;;  %v1081_v6 = vpack.c.bf16 %v951_v41, %v947_v33 }
 0xa17   : > { %980 = vst [vmem:[%s116_s16 + $0x10] sm:$0xff] %v1082_v40  ;;  %981 = vst [vmem:[%s116_s16 + $0x18] sm:$0xff] %v1083_v7 }
 0xa18   : > { %978 = vst [vmem:[%s116_s16] sm:$0xff] %v1080_v42  ;;  %979 = vst [vmem:[%s116_s16 + $0x8] sm:$0xff] %v1081_v6 }
 0xa19 PF: > { %s11_s6 = sadd.s32 1, %s1296_s6  }
 0xa1a   : > { %p8_p4 = scmp.ge.s32.totalorder %s11_s6, 4  }
 0xa1c   :  { %10 = sbr.rel (!%p8_p4) target bundleno = 1 (0x1), region = 54 }

// kernel: dinov2_forward.25
= control target key start
LH: loop header
LB: loop body
LE: loop exit
PB: predicated region body
PF: predicated region fallthrough
CT: control target
= control target key end

     0   :  { %s2198_s1 = inlined_call_operand.vmem [shape: bf16[256,768], index: 1, kind: input, shape index: {}]   ;;  %s2199_s0 = inlined_call_operand.vmem [shape: bf16[64,256], index: 0, kind: input, shape index: {}]   ;;  %s2200_s2 = inlined_call_operand.vmem [shape: f32[1,768], index: 2, kind: input, shape index: {}]   ;;  %s2201_s3 = inlined_call_operand.vmem [shape: bf16[64,768], index: 3, kind: output, shape index: {}]  }
   0x1   :  { %v1540_v0 = vld [vmem:[%s2198_s1 + $0x4] ss:$24 sps:$4 sm:$0xff]   ;;  %v1544_v2 = vld [vmem:[%s2198_s1] ss:$24 sps:$4 sm:$0xff]   ;;  %v1546_v4 = vld [vmem:[%s2198_s1 + $0x34] ss:$24 sps:$4 sm:$0xff]  }
   0x2   :  { %v1542_v1 = vld [vmem:[%s2198_s1 + $0xc] ss:$24 sps:$4 sm:$0xff]   ;;  %738 = vmatprep.subr.bf16.mxu0 %v1540_v0  ;;  %v1545_v3 = vld [vmem:[%s2198_s1 + $0x8] ss:$24 sps:$4 sm:$0xff]   ;;  %v1548_v5 = vld [vmem:[%s2198_s1 + $0x3c] ss:$24 sps:$4 sm:$0xff]  }
   0x3   :  { %811 = vmatprep.subr.bf16.mxu1 %v1542_v1  ;;  %739 = vmatpush1.bf16.msra.mxu0 %v1544_v2  ;;  %v1550_v6 = vld [vmem:[%s2198_s1 + $0x30] ss:$24 sps:$4 sm:$0xff]   ;;  %v1552_v8 = vld [vmem:[%s2198_s1 + $0x64] ss:$24 sps:$4 sm:$0xff]   ;;  %v1556_v10 = vld [vmem:[%s2198_s1 + $0x60] ss:$24 sps:$4 sm:$0xff]  }
   0x4   :  { %812 = vmatpush1.bf16.msra.mxu1 %v1545_v3  ;;  %740 = vmatprep.subr.bf16.mxu0 %v1546_v4  ;;  %v1551_v7 = vld [vmem:[%s2198_s1 + $0x38] ss:$24 sps:$4 sm:$0xff]   ;;  %v1554_v9 = vld [vmem:[%s2198_s1 + $0x6c] ss:$24 sps:$4 sm:$0xff]   ;;  %v1557_v11 = vld [vmem:[%s2198_s1 + $0x68] ss:$24 sps:$4 sm:$0xff]  }
   0x5   :  { %813 = vmatprep.subr.bf16.mxu1 %v1548_v5  ;;  %v1558_v12 = vld [vmem:[%s2198_s1 + $0x94] ss:$24 sps:$4 sm:$0xff]   ;;  %v1562_v14 = vld [vmem:[%s2198_s1 + $0x90] ss:$24 sps:$4 sm:$0xff]   ;;  %v1564_v16 = vld [vmem:[%s2198_s1 + $0xc4] ss:$24 sps:$4 sm:$0xff]  }
   0x6   :  { %v1560_v13 = vld [vmem:[%s2198_s1 + $0x9c] ss:$24 sps:$4 sm:$0xff]   ;;  %v1563_v15 = vld [vmem:[%s2198_s1 + $0x98] ss:$24 sps:$4 sm:$0xff]   ;;  %v1566_v17 = vld [vmem:[%s2198_s1 + $0xcc] ss:$24 sps:$4 sm:$0xff]  }
   0x7   :  { %741 = vmatpush1.bf16.msra.mxu0 %v1550_v6  ;;  %v1568_v18 = vld [vmem:[%s2198_s1 + $0xc0] ss:$24 sps:$4 sm:$0xff]   ;;  %v1570_v20 = vld [vmem:[%s2198_s1 + $0xf4] ss:$24 sps:$4 sm:$0xff]   ;;  %v1574_v22 = vld [vmem:[%s2198_s1 + $0xf0] ss:$24 sps:$4 sm:$0xff]  }
   0x8   :  { %814 = vmatpush1.bf16.msra.mxu1 %v1551_v7  ;;  %742 = vmatprep.subr.bf16.mxu0 %v1552_v8  ;;  %v1569_v19 = vld [vmem:[%s2198_s1 + $0xc8] ss:$24 sps:$4 sm:$0xff]   ;;  %v1572_v21 = vld [vmem:[%s2198_s1 + $0xfc] ss:$24 sps:$4 sm:$0xff]   ;;  %v1575_v23 = vld [vmem:[%s2198_s1 + $0xf8] ss:$24 sps:$4 sm:$0xff]  }
   0x9   :  { %815 = vmatprep.subr.bf16.mxu1 %v1554_v9  ;;  %v1576_v24 = vld [vmem:[%s2198_s1 + $0x124] ss:$24 sps:$4 sm:$0xff]   ;;  %v1580_v26 = vld [vmem:[%s2198_s1 + $0x120] ss:$24 sps:$4 sm:$0xff]   ;;  %v1582_v28 = vld [vmem:[%s2198_s1 + $0x154] ss:$24 sps:$4 sm:$0xff]  }
   0xa   :  { %v1578_v25 = vld [vmem:[%s2198_s1 + $0x12c] ss:$24 sps:$4 sm:$0xff]   ;;  %v1581_v27 = vld [vmem:[%s2198_s1 + $0x128] ss:$24 sps:$4 sm:$0xff]   ;;  %v1584_v29 = vld [vmem:[%s2198_s1 + $0x15c] ss:$24 sps:$4 sm:$0xff]  }
   0xb   :  { %743 = vmatpush1.bf16.msra.mxu0 %v1556_v10  ;;  %v1586_v30 = vld [vmem:[%s2198_s1 + $0x150] ss:$24 sps:$4 sm:$0xff]   ;;  %v1588_v32 = vld [vmem:[%s2198_s1 + $0x184] ss:$24 sps:$4 sm:$0xff]   ;;  %v1592_v34 = vld [vmem:[%s2198_s1 + $0x180] ss:$24 sps:$4 sm:$0xff]  }
   0xc   :  { %816 = vmatpush1.bf16.msra.mxu1 %v1557_v11  ;;  %744 = vmatprep.subr.bf16.mxu0 %v1558_v12  ;;  %v1587_v31 = vld [vmem:[%s2198_s1 + $0x158] ss:$24 sps:$4 sm:$0xff]   ;;  %v1590_v33 = vld [vmem:[%s2198_s1 + $0x18c] ss:$24 sps:$4 sm:$0xff]   ;;  %v1593_v35 = vld [vmem:[%s2198_s1 + $0x188] ss:$24 sps:$4 sm:$0xff]  }
   0xd   :  { %817 = vmatprep.subr.bf16.mxu1 %v1560_v13  ;;  %v1594_v36 = vld [vmem:[%s2198_s1 + $0x1b4] ss:$24 sps:$4 sm:$0xff]   ;;  %v1598_v38 = vld [vmem:[%s2198_s1 + $0x1b0] ss:$24 sps:$4 sm:$0xff]   ;;  %v1600_v40 = vld [vmem:[%s2198_s1 + $0x1e4] ss:$24 sps:$4 sm:$0xff]  }
   0xe   :  { %v1596_v37 = vld [vmem:[%s2198_s1 + $0x1bc] ss:$24 sps:$4 sm:$0xff]   ;;  %v1599_v39 = vld [vmem:[%s2198_s1 + $0x1b8] ss:$24 sps:$4 sm:$0xff]   ;;  %v1602_v41 = vld [vmem:[%s2198_s1 + $0x1ec] ss:$24 sps:$4 sm:$0xff]  }
   0xf   :  { %745 = vmatpush1.bf16.msra.mxu0 %v1562_v14  ;;  %v1604_v42 = vld [vmem:[%s2198_s1 + $0x1e0] ss:$24 sps:$4 sm:$0xff]   ;;  %v1606_v44 = vld [vmem:[%s2198_s1 + $0x214] ss:$24 sps:$4 sm:$0xff]   ;;  %v1610_v46 = vld [vmem:[%s2198_s1 + $0x210] ss:$24 sps:$4 sm:$0xff]  }
  0x10   :  { %818 = vmatpush1.bf16.msra.mxu1 %v1563_v15  ;;  %746 = vmatprep.subr.bf16.mxu0 %v1564_v16  ;;  %v1605_v43 = vld [vmem:[%s2198_s1 + $0x1e8] ss:$24 sps:$4 sm:$0xff]   ;;  %v1608_v45 = vld [vmem:[%s2198_s1 + $0x21c] ss:$24 sps:$4 sm:$0xff]   ;;  %v1611_v47 = vld [vmem:[%s2198_s1 + $0x218] ss:$24 sps:$4 sm:$0xff]  }
  0x11   :  { %819 = vmatprep.subr.bf16.mxu1 %v1566_v17  ;;  %v1863_v48 = vld [vmem:[%s2199_s0 + $0x4] ss:$8 sps:$4 sm:$0xff]   ;;  %v1616_v51 = vld [vmem:[%s2198_s1 + $0x240] ss:$24 sps:$4 sm:$0xff]   ;;  %v1620_v54 = vld [vmem:[%s2198_s1 + $0x27c] ss:$24 sps:$4 sm:$0xff]  }
  0x12   :  { %v1612_v49 = vld [vmem:[%s2198_s1 + $0x244] ss:$24 sps:$4 sm:$0xff]   ;;  %770 = vmatprep.mubr.bf16.mxu0 %v1863_v48  ;;  %843 = vmatprep.mubr.bf16.mxu1 %v1863_v48  ;;  %v1617_v52 = vld [vmem:[%s2198_s1 + $0x248] ss:$24 sps:$4 sm:$0xff]   ;;  %v1618_v53 = vld [vmem:[%s2198_s1 + $0x274] ss:$24 sps:$4 sm:$0xff]  }
  0x13   :  { %747 = vmatpush1.bf16.msra.mxu0 %v1568_v18  ;;  %v1614_v50 = vld [vmem:[%s2198_s1 + $0x24c] ss:$24 sps:$4 sm:$0xff]   ;;  %v1622_v55 = vld [vmem:[%s2198_s1 + $0x270] ss:$24 sps:$4 sm:$0xff]   ;;  %v1628_v59 = vld [vmem:[%s2198_s1 + $0x2a0] ss:$24 sps:$4 sm:$0xff]  }
  0x14   :  { %820 = vmatpush1.bf16.msra.mxu1 %v1569_v19  ;;  %748 = vmatprep.subr.bf16.mxu0 %v1570_v20  ;;  %v1623_v56 = vld [vmem:[%s2198_s1 + $0x278] ss:$24 sps:$4 sm:$0xff]   ;;  %v1624_v57 = vld [vmem:[%s2198_s1 + $0x2a4] ss:$24 sps:$4 sm:$0xff]   ;;  %v1629_v60 = vld [vmem:[%s2198_s1 + $0x2a8] ss:$24 sps:$4 sm:$0xff]  }
  0x15   :  { %821 = vmatprep.subr.bf16.mxu1 %v1572_v21  ;;  %v1626_v58 = vld [vmem:[%s2198_s1 + $0x2ac] ss:$24 sps:$4 sm:$0xff]   ;;  %v1632_v62 = vld [vmem:[%s2198_s1 + $0x2dc] ss:$24 sps:$4 sm:$0xff]   ;;  %v1634_v63 = vld [vmem:[%s2198_s1 + $0x2d0] ss:$24 sps:$4 sm:$0xff]  }
  0x16   :  { %v1630_v61 = vld [vmem:[%s2198_s1 + $0x2d4] ss:$24 sps:$4 sm:$0xff]   ;;  %v1635_v0 = vld [vmem:[%s2198_s1 + $0x2d8] ss:$24 sps:$4 sm:$0xff]   ;;  %v1921_v2 = vld [vmem:[%s2199_s0] ss:$8 sps:$4 sm:$0xff]  }
  0x17   :  { %749 = vmatpush1.bf16.msra.mxu0 %v1574_v22  ;;  %v1641_v1 = vld [vmem:[%s2198_s1 + $0x14] ss:$24 sps:$4 sm:$0xff]   ;;  %v1639_v3 = vld [vmem:[%s2198_s1 + $0x10] ss:$24 sps:$4 sm:$0xff]   ;;  %v1644_v4 = vld [vmem:[%s2198_s1 + $0x44] ss:$24 sps:$4 sm:$0xff]  }
  0x18   :  { %822 = vmatpush1.bf16.msra.mxu1 %v1575_v23  ;;  %750 = vmatprep.subr.bf16.mxu0 %v1576_v24  ;;  %v1932_v5 = vld [vmem:[%s2199_s0 + $0x14] ss:$8 sps:$4 sm:$0xff]   ;;  %v1642_v6 = vld [vmem:[%s2198_s1 + $0x40] ss:$24 sps:$4 sm:$0xff]   ;;  %v1645_v9 = vld [vmem:[%s2198_s1 + $0x70] ss:$24 sps:$4 sm:$0xff]  }
  0x19   :  { %823 = vmatprep.subr.bf16.mxu1 %v1578_v25  ;;  %v1647_v7 = vld [vmem:[%s2198_s1 + $0x74] ss:$24 sps:$4 sm:$0xff]   ;;  %v1947_v8 = vld [vmem:[%s2199_s0 + $0x10] ss:$8 sps:$4 sm:$0xff]   ;;  %v1650_v10 = vld [vmem:[%s2198_s1 + $0xa4] ss:$24 sps:$4 sm:$0xff]  }
  0x1a   :  { %v1675_v11 = vld [vmem:[%s2199_s0 + $0x24] ss:$8 sps:$4 sm:$0xff]   ;;  %v1648_v12 = vld [vmem:[%s2198_s1 + $0xa0] ss:$24 sps:$4 sm:$0xff]   ;;  %v1651_v15 = vld [vmem:[%s2198_s1 + $0xd0] ss:$24 sps:$4 sm:$0xff]  }
  0x1b   :  { %751 = vmatpush1.bf16.msra.mxu0 %v1580_v26  ;;  %v1653_v13 = vld [vmem:[%s2198_s1 + $0xd4] ss:$24 sps:$4 sm:$0xff]   ;;  %v1969_v14 = vld [vmem:[%s2199_s0 + $0x20] ss:$8 sps:$4 sm:$0xff]   ;;  %v1656_v16 = vld [vmem:[%s2198_s1 + $0x104] ss:$24 sps:$4 sm:$0xff]  }
  0x1c   :  { %824 = vmatpush1.bf16.msra.mxu1 %v1581_v27  ;;  %752 = vmatprep.subr.bf16.mxu0 %v1582_v28  ;;  %v1980_v17 = vld [vmem:[%s2199_s0 + $0x34] ss:$8 sps:$4 sm:$0xff]   ;;  %v1654_v18 = vld [vmem:[%s2198_s1 + $0x100] ss:$24 sps:$4 sm:$0xff]   ;;  %v1657_v21 = vld [vmem:[%s2198_s1 + $0x130] ss:$24 sps:$4 sm:$0xff]  }
  0x1d   :  { %825 = vmatprep.subr.bf16.mxu1 %v1584_v29  ;;  %v1659_v19 = vld [vmem:[%s2198_s1 + $0x134] ss:$24 sps:$4 sm:$0xff]   ;;  %v1995_v20 = vld [vmem:[%s2199_s0 + $0x30] ss:$8 sps:$4 sm:$0xff]   ;;  %v1662_v22 = vld [vmem:[%s2198_s1 + $0x164] ss:$24 sps:$4 sm:$0xff]  }
  0x1e   :  { %v1660_v23 = vld [vmem:[%s2198_s1 + $0x160] ss:$24 sps:$4 sm:$0xff]   ;;  %v1665_v24 = vld [vmem:[%s2198_s1 + $0x194] ss:$24 sps:$4 sm:$0xff]   ;;  %v1663_v25 = vld [vmem:[%s2198_s1 + $0x190] ss:$24 sps:$4 sm:$0xff]  }
  0x1f   :  { %753 = vmatpush1.bf16.msra.mxu0 %v1586_v30  ;;  %v1670_v26 = vld [vmem:[%s2198_s1 + $0x1c4] ss:$24 sps:$4 sm:$0xff]   ;;  %v1668_v27 = vld [vmem:[%s2198_s1 + $0x1c0] ss:$24 sps:$4 sm:$0xff]   ;;  %v1674_v28 = vld [vmem:[%s2198_s1 + $0x1f4] ss:$24 sps:$4 sm:$0xff]  }
  0x20   :  { %826 = vmatpush1.bf16.msra.mxu1 %v1587_v31  ;;  %754 = vmatprep.subr.bf16.mxu0 %v1588_v32  ;;  %v1672_v29 = vld [vmem:[%s2198_s1 + $0x1f0] ss:$24 sps:$4 sm:$0xff]   ;;  %v1679_v30 = vld [vmem:[%s2198_s1 + $0x224] ss:$24 sps:$4 sm:$0xff]   ;;  %v1677_v31 = vld [vmem:[%s2198_s1 + $0x220] ss:$24 sps:$4 sm:$0xff]  }
  0x21   :  { %827 = vmatprep.subr.bf16.mxu1 %v1590_v33  ;;  %v1683_v32 = vld [vmem:[%s2198_s1 + $0x254] ss:$24 sps:$4 sm:$0xff]   ;;  %v1681_v33 = vld [vmem:[%s2198_s1 + $0x250] ss:$24 sps:$4 sm:$0xff]  }
  0x23   :  { %755 = vmatpush1.bf16.msra.mxu0 %v1592_v34  ;;  %v1688_v34 = vld [vmem:[%s2198_s1 + $0x284] ss:$24 sps:$4 sm:$0xff]  }
  0x24   :  { %828 = vmatpush1.bf16.msra.mxu1 %v1593_v35  ;;  %756 = vmatprep.subr.bf16.mxu0 %v1594_v36  ;;  %v1686_v35 = vld [vmem:[%s2198_s1 + $0x280] ss:$24 sps:$4 sm:$0xff]   ;;  %v1692_v36 = vld [vmem:[%s2198_s1 + $0x2b4] ss:$24 sps:$4 sm:$0xff]  }
  0x25   :  { %829 = vmatprep.subr.bf16.mxu1 %v1596_v37  ;;  %v1690_v37 = vld [vmem:[%s2198_s1 + $0x2b0] ss:$24 sps:$4 sm:$0xff]  }
  0x27   :  { %757 = vmatpush1.bf16.msra.mxu0 %v1598_v38  ;;  %v1695_v38 = vld [vmem:[%s2198_s1 + $0x2e4] ss:$24 sps:$4 sm:$0xff]  }
  0x28   :  { %830 = vmatpush1.bf16.msra.mxu1 %v1599_v39  ;;  %758 = vmatprep.subr.bf16.mxu0 %v1600_v40  ;;  %v1693_v39 = vld [vmem:[%s2198_s1 + $0x2e0] ss:$24 sps:$4 sm:$0xff]   ;;  %v1106_v40 = vlaneseq }
  0x29   :  { %831 = vmatprep.subr.bf16.mxu1 %v1602_v41 }
  0x2a   :  { %v1107_v41 = vshrl.u32 %v1106_v40, 7 }
  0x2b   :  { %759 = vmatpush1.bf16.msra.mxu0 %v1604_v42 }
  0x2c   :  { %832 = vmatpush1.bf16.msra.mxu1 %v1605_v43  ;;  %760 = vmatprep.subr.bf16.mxu0 %v1606_v44  ;;  %v1124_v42 = vsub.s32 4, %v1107_v41  ;;  %v1104_v43 = vld [vmem:[%s2200_s2] sm:$0x3f]  ;;  %v1128_v44 = vsub.s32 5, %v1107_v41 }
  0x2d   :  { %833 = vmatprep.subr.bf16.mxu1 %v1608_v45 }
  0x2e   :  { %v2066_v45 = vrot.slane %v1104_v43, %v1124_v42 }
  0x2f   :  { %761 = vmatpush1.bf16.msra.mxu0 %v1610_v46  ;;  %v2068_v46 = vrot.slane %v1104_v43, %v1128_v44 }
  0x30   :  { %834 = vmatpush1.bf16.msra.mxu1 %v1611_v47  ;;  %762 = vmatprep.subr.bf16.mxu0 %v1612_v49  ;;  %v1108_v47 = vsub.s32 0, %v1107_v41  ;;  %v1112_v49 = vsub.s32 1, %v1107_v41 }
  0x31   :  { %835 = vmatprep.subr.bf16.mxu1 %v1614_v50  ;;  %v1120_v50 = vsub.s32 3, %v1107_v41 }
  0x33   :  { %763 = vmatpush1.bf16.msra.mxu0 %v1616_v51  ;;  %v2070_v51 = vrot.slane %v1104_v43, %v1108_v47 }
  0x34   :  { %836 = vmatpush1.bf16.msra.mxu1 %v1617_v52  ;;  %764 = vmatprep.subr.bf16.mxu0 %v1618_v53  ;;  %v2074_v53 = vrot.slane %v1104_v43, %v1112_v49 }
  0x35   :  { %837 = vmatprep.subr.bf16.mxu1 %v1620_v54  ;;  %v2076_v54 = vrot.slane %v1104_v43, %v1120_v50 }
  0x37   :  { %765 = vmatpush1.bf16.msra.mxu0 %v1622_v55 }
  0x38   :  { %838 = vmatpush1.bf16.msra.mxu1 %v1623_v56  ;;  %766 = vmatprep.subr.bf16.mxu0 %v1624_v57 }
  0x39   :  { %839 = vmatprep.subr.bf16.mxu1 %v1626_v58 }
  0x3b   :  { %767 = vmatpush1.bf16.msra.mxu0 %v1628_v59 }
  0x3c   :  { %840 = vmatpush1.bf16.msra.mxu1 %v1629_v60  ;;  %768 = vmatprep.subr.bf16.mxu0 %v1630_v61 }
  0x3d   :  { %841 = vmatprep.subr.bf16.mxu1 %v1632_v62 }
  0x3f   :  { %769 = vmatpush1.bf16.msra.mxu0 %v1634_v63 }
  0x40   :  { %842 = vmatpush1.bf16.msra.mxu1 %v1635_v0  ;;  %884 = vmatprep.subr.bf16.mxu0 %v1641_v1 }
  0x41   :  { %1508 = vmatprep.subr.bf16.mxu1 %v1641_v1 }
  0x42   :  { %771 = vmatmul.mubr.bf16.vlgmr.msra.gmra.mrb[0].mxu0 %v1921_v2 }
  0x43   :  { %844 = vmatmul.mubr.bf16.vlgmr.msra.gmra.mrb[0].mxu1 %v1921_v2  ;;  %885 = vmatpush1.bf16.msra.mxu0 %v1639_v3 }
  0x44   :  { %1524 = vmatpush1.bf16.msra.mxu1 %v1639_v3  ;;  %886 = vmatprep.subr.bf16.mxu0 %v1644_v4 }
  0x45   :  { %1509 = vmatprep.subr.bf16.mxu1 %v1644_v4  ;;  %780 = vmatprep.mubr.bf16.mxu0 %v1932_v5 }
  0x46   :  { %853 = vmatprep.mubr.bf16.mxu1 %v1932_v5 }
  0x47   :  { %887 = vmatpush1.bf16.msra.mxu0 %v1642_v6 }
  0x48   :  { %1525 = vmatpush1.bf16.msra.mxu1 %v1642_v6  ;;  %888 = vmatprep.subr.bf16.mxu0 %v1647_v7 }
  0x49   :  { %1510 = vmatprep.subr.bf16.mxu1 %v1647_v7 }
  0x4a   :  { %781 = vmatmul.mubr.bf16.gmra.mrb[4].mxu0 %v1947_v8 }
  0x4b   :  { %854 = vmatmul.mubr.bf16.gmra.mrb[4].mxu1 %v1947_v8  ;;  %889 = vmatpush1.bf16.msra.mxu0 %v1645_v9 }
  0x4c   :  { %1526 = vmatpush1.bf16.msra.mxu1 %v1645_v9  ;;  %890 = vmatprep.subr.bf16.mxu0 %v1650_v10 }
  0x4d   :  { %1511 = vmatprep.subr.bf16.mxu1 %v1650_v10  ;;  %790 = vmatprep.mubr.bf16.mxu0 %v1675_v11 }
  0x4e   :  { %863 = vmatprep.mubr.bf16.mxu1 %v1675_v11 }
  0x4f   :  { %891 = vmatpush1.bf16.msra.mxu0 %v1648_v12 }
  0x50   :  { %1527 = vmatpush1.bf16.msra.mxu1 %v1648_v12  ;;  %892 = vmatprep.subr.bf16.mxu0 %v1653_v13 }
  0x51   :  { %1512 = vmatprep.subr.bf16.mxu1 %v1653_v13 }
  0x52   :  { %791 = vmatmul.mubr.bf16.gmra.mrb[8].mxu0 %v1969_v14 }
  0x53   :  { %864 = vmatmul.mubr.bf16.gmra.mrb[8].mxu1 %v1969_v14  ;;  %893 = vmatpush1.bf16.msra.mxu0 %v1651_v15 }
  0x54   :  { %1528 = vmatpush1.bf16.msra.mxu1 %v1651_v15  ;;  %894 = vmatprep.subr.bf16.mxu0 %v1656_v16 }
  0x55   :  { %1513 = vmatprep.subr.bf16.mxu1 %v1656_v16  ;;  %800 = vmatprep.mubr.bf16.mxu0 %v1980_v17 }
  0x56   :  { %873 = vmatprep.mubr.bf16.mxu1 %v1980_v17 }
  0x57   :  { %895 = vmatpush1.bf16.msra.mxu0 %v1654_v18 }
  0x58   :  { %1529 = vmatpush1.bf16.msra.mxu1 %v1654_v18  ;;  %896 = vmatprep.subr.bf16.mxu0 %v1659_v19 }
  0x59   :  { %1514 = vmatprep.subr.bf16.mxu1 %v1659_v19 }
  0x5a   :  { %801 = vmatmul.mubr.bf16.gmra.mrb[12].mxu0 %v1995_v20 }
  0x5b   :  { %874 = vmatmul.mubr.bf16.gmra.mrb[12].mxu1 %v1995_v20  ;;  %897 = vmatpush1.bf16.msra.mxu0 %v1657_v21 }
  0x5c   :  { %1530 = vmatpush1.bf16.msra.mxu1 %v1657_v21  ;;  %898 = vmatprep.subr.bf16.mxu0 %v1662_v22 }
  0x5d   :  { %1515 = vmatprep.subr.bf16.mxu1 %v1662_v22  ;;  %916 = vmatprep.mubr.bf16.mxu0 %v1863_v48  ;;  %v1116_v48 = vsub.s32 2, %v1107_v41 }
  0x5e   :  { %936 = vmatprep.mubr.bf16.mxu1 %v1675_v11 }
  0x5f   :  { %899 = vmatpush1.bf16.msra.mxu0 %v1660_v23  ;;  %v2072_v52 = vrot.slane %v1104_v43, %v1116_v48 }
  0x60   :  { %1531 = vmatpush1.bf16.msra.mxu1 %v1660_v23  ;;  %900 = vmatprep.subr.bf16.mxu0 %v1665_v24 }
  0x61   :  { %1516 = vmatprep.subr.bf16.mxu1 %v1665_v24 }
  0x63   :  { %901 = vmatpush1.bf16.msra.mxu0 %v1663_v25 }
  0x64   :  { %1532 = vmatpush1.bf16.msra.mxu1 %v1663_v25  ;;  %902 = vmatprep.subr.bf16.mxu0 %v1670_v26 }
  0x65   :  { %1517 = vmatprep.subr.bf16.mxu1 %v1670_v26 }
  0x67   :  { %903 = vmatpush1.bf16.msra.mxu0 %v1668_v27 }
  0x68   :  { %1533 = vmatpush1.bf16.msra.mxu1 %v1668_v27  ;;  %904 = vmatprep.subr.bf16.mxu0 %v1674_v28 }
  0x69   :  { %1518 = vmatprep.subr.bf16.mxu1 %v1674_v28 }
  0x6b   :  { %905 = vmatpush1.bf16.msra.mxu0 %v1672_v29 }
  0x6c   :  { %1534 = vmatpush1.bf16.msra.mxu1 %v1672_v29  ;;  %906 = vmatprep.subr.bf16.mxu0 %v1679_v30 }
  0x6d   :  { %1519 = vmatprep.subr.bf16.mxu1 %v1679_v30 }
  0x6f   :  { %907 = vmatpush1.bf16.msra.mxu0 %v1677_v31 }
  0x70   :  { %1535 = vmatpush1.bf16.msra.mxu1 %v1677_v31  ;;  %908 = vmatprep.subr.bf16.mxu0 %v1683_v32 }
  0x71   :  { %1520 = vmatprep.subr.bf16.mxu1 %v1683_v32 }
  0x73   :  { %909 = vmatpush1.bf16.msra.mxu0 %v1681_v33 }
  0x74   :  { %1536 = vmatpush1.bf16.msra.mxu1 %v1681_v33  ;;  %910 = vmatprep.subr.bf16.mxu0 %v1688_v34 }
  0x75   :  { %1521 = vmatprep.subr.bf16.mxu1 %v1688_v34 }
  0x77   :  { %911 = vmatpush1.bf16.msra.mxu0 %v1686_v35 }
  0x78   :  { %1537 = vmatpush1.bf16.msra.mxu1 %v1686_v35  ;;  %912 = vmatprep.subr.bf16.mxu0 %v1692_v36 }
  0x79   :  { %1522 = vmatprep.subr.bf16.mxu1 %v1692_v36 }
  0x7b   :  { %913 = vmatpush1.bf16.msra.mxu0 %v1690_v37 }
  0x7c   :  { %1538 = vmatpush1.bf16.msra.mxu1 %v1690_v37  ;;  %914 = vmatprep.subr.bf16.mxu0 %v1695_v38 }
  0x7d   :  { %1523 = vmatprep.subr.bf16.mxu1 %v1695_v38 }
  0x7f   :  { %915 = vmatpush1.bf16.msra.mxu0 %v1693_v39 }
  0x80   :  { %1539 = vmatpush1.bf16.msra.mxu1 %v1693_v39 }
  0x82   :  { %917 = vmatmul.mubr.bf16.vlgmr.msra.gmra.mrb[16].mxu0 %v1921_v2 }
  0x83   :  { %937 = vmatmul.mubr.bf16.vlgmr.msra.gmra.mrb[16].mxu1 %v1969_v14  ;;  %926 = vmatprep.mubr.bf16.mxu0 %v1932_v5 }
  0x84   :  { %946 = vmatprep.mubr.bf16.mxu1 %v1980_v17 }
  0x8a   :  { %927 = vmatmul.mubr.bf16.gmra.mrb[20].mxu0 %v1947_v8 }
  0x8b   :  { %947 = vmatmul.mubr.bf16.gmra.mrb[20].mxu1 %v1995_v20 }
 0x115   :  { %v772_v55 = vpop.f32.mrb[0].mxu0 }
 0x116   :  { %v845_v56 = vpop.f32.mrb[0].mxu1  ;;  %v1136_v57 = vadd.f32 %v2070_v51, %v772_v55  ;;  %v774_v59 = vpop.f32.mrb[1].mxu0 }
 0x117   :  { %v1138_v58 = vadd.f32 %v2072_v52, %v845_v56  ;;  %v847_v60 = vpop.f32.mrb[1].mxu1  ;;  %v1137_v61 = vadd.f32 %v2074_v53, %v774_v59  ;;  %v776_v63 = vpop.f32.mrb[2].mxu0 }
 0x118   :  { %v1139_v62 = vadd.f32 %v2076_v54, %v847_v60  ;;  %v849_v0 = vpop.f32.mrb[2].mxu1  ;;  %v1142_v1 = vadd.f32 %v2070_v51, %v776_v63  ;;  %v778_v3 = vpop.f32.mrb[3].mxu0 }
 0x119   :  { %v1144_v2 = vadd.f32 %v2072_v52, %v849_v0  ;;  %v851_v4 = vpop.f32.mrb[3].mxu1  ;;  %v1484_v5 = vpack.c.bf16 %v1137_v61, %v1136_v57  ;;  %v1143_v7 = vadd.f32 %v2074_v53, %v778_v3 }
 0x11a   :  { %v1485_v6 = vpack.c.bf16 %v1139_v62, %v1138_v58  ;;  %v1145_v8 = vadd.f32 %v2076_v54, %v851_v4 }
 0x11b   :  { %1328 = vst [vmem:[%s2201_s3] sm:$0xff] %v1484_v5  ;;  %v1487_v9 = vpack.c.bf16 %v1143_v7, %v1142_v1 }
 0x11c   :  { %1329 = vst [vmem:[%s2201_s3 + $0x8] sm:$0xff] %v1485_v6  ;;  %v1488_v10 = vpack.c.bf16 %v1145_v8, %v1144_v2 }
 0x11d   :  { %1331 = vst [vmem:[%s2201_s3 + $0x18] sm:$0xff] %v1487_v9  ;;  %v782_v11 = vpop.f32.mrb[4].mxu0 }
 0x11e   :  { %1332 = vst [vmem:[%s2201_s3 + $0x20] sm:$0xff] %v1488_v10  ;;  %v855_v12 = vpop.f32.mrb[4].mxu1  ;;  %v1148_v13 = vadd.f32 %v2070_v51, %v782_v11  ;;  %v784_v15 = vpop.f32.mrb[5].mxu0 }
 0x11f   :  { %v1150_v14 = vadd.f32 %v2072_v52, %v855_v12  ;;  %v857_v16 = vpop.f32.mrb[5].mxu1  ;;  %v1149_v17 = vadd.f32 %v2074_v53, %v784_v15  ;;  %v786_v19 = vpop.f32.mrb[6].mxu0 }
 0x120   :  { %v1151_v18 = vadd.f32 %v2076_v54, %v857_v16  ;;  %v859_v20 = vpop.f32.mrb[6].mxu1  ;;  %v1154_v21 = vadd.f32 %v2070_v51, %v786_v19  ;;  %v788_v23 = vpop.f32.mrb[7].mxu0 }
 0x121   :  { %v1156_v22 = vadd.f32 %v2072_v52, %v859_v20  ;;  %v861_v24 = vpop.f32.mrb[7].mxu1  ;;  %v1490_v25 = vpack.c.bf16 %v1149_v17, %v1148_v13  ;;  %v1155_v27 = vadd.f32 %v2074_v53, %v788_v23 }
 0x122   :  { %v1491_v26 = vpack.c.bf16 %v1151_v18, %v1150_v14  ;;  %v1157_v28 = vadd.f32 %v2076_v54, %v861_v24 }
 0x123   :  { %1334 = vst [vmem:[%s2201_s3 + $0x30] sm:$0xff] %v1490_v25  ;;  %v1493_v29 = vpack.c.bf16 %v1155_v27, %v1154_v21 }
 0x124   :  { %1335 = vst [vmem:[%s2201_s3 + $0x38] sm:$0xff] %v1491_v26  ;;  %v1494_v30 = vpack.c.bf16 %v1157_v28, %v1156_v22 }
 0x125   :  { %1337 = vst [vmem:[%s2201_s3 + $0x48] sm:$0xff] %v1493_v29  ;;  %v792_v31 = vpop.f32.mrb[8].mxu0 }
 0x126   :  { %1338 = vst [vmem:[%s2201_s3 + $0x50] sm:$0xff] %v1494_v30  ;;  %v865_v32 = vpop.f32.mrb[8].mxu1  ;;  %v1160_v33 = vadd.f32 %v2070_v51, %v792_v31  ;;  %v794_v35 = vpop.f32.mrb[9].mxu0 }
 0x127   :  { %v1162_v34 = vadd.f32 %v2072_v52, %v865_v32  ;;  %v867_v36 = vpop.f32.mrb[9].mxu1  ;;  %v1161_v37 = vadd.f32 %v2074_v53, %v794_v35  ;;  %v796_v39 = vpop.f32.mrb[10].mxu0 }
 0x128   :  { %v1163_v38 = vadd.f32 %v2076_v54, %v867_v36  ;;  %v869_v40 = vpop.f32.mrb[10].mxu1  ;;  %v1166_v41 = vadd.f32 %v2070_v51, %v796_v39  ;;  %v798_v43 = vpop.f32.mrb[11].mxu0 }
 0x129   :  { %v1168_v42 = vadd.f32 %v2072_v52, %v869_v40  ;;  %v871_v44 = vpop.f32.mrb[11].mxu1  ;;  %v1496_v47 = vpack.c.bf16 %v1161_v37, %v1160_v33  ;;  %v1167_v49 = vadd.f32 %v2074_v53, %v798_v43 }
 0x12a   :  { %v1497_v48 = vpack.c.bf16 %v1163_v38, %v1162_v34  ;;  %v1169_v50 = vadd.f32 %v2076_v54, %v871_v44 }
 0x12b   :  { %1340 = vst [vmem:[%s2201_s3 + $0x60] sm:$0xff] %v1496_v47  ;;  %v1499_v55 = vpack.c.bf16 %v1167_v49, %v1166_v41 }
 0x12c   :  { %1341 = vst [vmem:[%s2201_s3 + $0x68] sm:$0xff] %v1497_v48  ;;  %v1500_v56 = vpack.c.bf16 %v1169_v50, %v1168_v42 }
 0x12d   :  { %1343 = vst [vmem:[%s2201_s3 + $0x78] sm:$0xff] %v1499_v55  ;;  %v802_v57 = vpop.f32.mrb[12].mxu0 }
 0x12e   :  { %1344 = vst [vmem:[%s2201_s3 + $0x80] sm:$0xff] %v1500_v56  ;;  %v875_v58 = vpop.f32.mrb[12].mxu1  ;;  %v1172_v59 = vadd.f32 %v2070_v51, %v802_v57  ;;  %v804_v61 = vpop.f32.mrb[13].mxu0 }
 0x12f   :  { %v1174_v60 = vadd.f32 %v2072_v52, %v875_v58  ;;  %v877_v62 = vpop.f32.mrb[13].mxu1  ;;  %v1173_v63 = vadd.f32 %v2074_v53, %v804_v61  ;;  %v806_v1 = vpop.f32.mrb[14].mxu0 }
 0x130   :  { %v1175_v0 = vadd.f32 %v2076_v54, %v877_v62  ;;  %v879_v2 = vpop.f32.mrb[14].mxu1  ;;  %v1178_v3 = vadd.f32 %v2070_v51, %v806_v1  ;;  %v808_v5 = vpop.f32.mrb[15].mxu0 }
 0x131   :  { %v1180_v4 = vadd.f32 %v2072_v52, %v879_v2  ;;  %v881_v6 = vpop.f32.mrb[15].mxu1  ;;  %v1502_v7 = vpack.c.bf16 %v1173_v63, %v1172_v59  ;;  %v1179_v9 = vadd.f32 %v2074_v53, %v808_v5 }
 0x132   :  { %v1503_v8 = vpack.c.bf16 %v1175_v0, %v1174_v60  ;;  %v1181_v10 = vadd.f32 %v2076_v54, %v881_v6 }
 0x133   :  { %1346 = vst [vmem:[%s2201_s3 + $0x90] sm:$0xff] %v1502_v7  ;;  %v1505_v11 = vpack.c.bf16 %v1179_v9, %v1178_v3 }
 0x134   :  { %1347 = vst [vmem:[%s2201_s3 + $0x98] sm:$0xff] %v1503_v8  ;;  %v1506_v51 = vpack.c.bf16 %v1181_v10, %v1180_v4 }
 0x135   :  { %1349 = vst [vmem:[%s2201_s3 + $0xa8] sm:$0xff] %v1505_v11 }
 0x136   :  { %1350 = vst [vmem:[%s2201_s3 + $0xb0] sm:$0xff] %v1506_v51 }
 0x155   :  { %v918_v52 = vpop.f32.mrb[16].mxu0 }
 0x156   :  { %v938_v53 = vpop.f32.mrb[16].mxu1  ;;  %v1140_v54 = vadd.f32 %v2066_v45, %v918_v52  ;;  %v920_v13 = vpop.f32.mrb[17].mxu0 }
 0x157   :  { %v1164_v12 = vadd.f32 %v2066_v45, %v938_v53  ;;  %v940_v14 = vpop.f32.mrb[17].mxu1  ;;  %v1141_v15 = vadd.f32 %v2068_v46, %v920_v13  ;;  %v922_v17 = vpop.f32.mrb[18].mxu0 }
 0x158   :  { %v1165_v16 = vadd.f32 %v2068_v46, %v940_v14  ;;  %v942_v18 = vpop.f32.mrb[18].mxu1  ;;  %v1146_v19 = vadd.f32 %v2066_v45, %v922_v17  ;;  %v924_v21 = vpop.f32.mrb[19].mxu0 }
 0x159   :  { %v1170_v20 = vadd.f32 %v2066_v45, %v942_v18  ;;  %v944_v22 = vpop.f32.mrb[19].mxu1  ;;  %v1486_v23 = vpack.c.bf16 %v1141_v15, %v1140_v54  ;;  %v1147_v25 = vadd.f32 %v2068_v46, %v924_v21 }
 0x15a   :  { %v1498_v24 = vpack.c.bf16 %v1165_v16, %v1164_v12  ;;  %v1171_v26 = vadd.f32 %v2068_v46, %v944_v22 }
 0x15b   :  { %1330 = vst [vmem:[%s2201_s3 + $0x10] sm:$0xff] %v1486_v23  ;;  %v1489_v27 = vpack.c.bf16 %v1147_v25, %v1146_v19 }
 0x15c   :  { %1342 = vst [vmem:[%s2201_s3 + $0x70] sm:$0xff] %v1498_v24  ;;  %v1501_v28 = vpack.c.bf16 %v1171_v26, %v1170_v20 }
 0x15d   :  { %1333 = vst [vmem:[%s2201_s3 + $0x28] sm:$0xff] %v1489_v27  ;;  %v928_v29 = vpop.f32.mrb[20].mxu0 }
 0x15e   :  { %1345 = vst [vmem:[%s2201_s3 + $0x88] sm:$0xff] %v1501_v28  ;;  %v948_v30 = vpop.f32.mrb[20].mxu1  ;;  %v1152_v31 = vadd.f32 %v2066_v45, %v928_v29  ;;  %v930_v33 = vpop.f32.mrb[21].mxu0 }
 0x15f   :  { %v1176_v32 = vadd.f32 %v2066_v45, %v948_v30  ;;  %v950_v34 = vpop.f32.mrb[21].mxu1  ;;  %v1153_v35 = vadd.f32 %v2068_v46, %v930_v33  ;;  %v932_v37 = vpop.f32.mrb[22].mxu0 }
 0x160   :  { %v1177_v36 = vadd.f32 %v2068_v46, %v950_v34  ;;  %v952_v38 = vpop.f32.mrb[22].mxu1  ;;  %v1158_v39 = vadd.f32 %v2066_v45, %v932_v37  ;;  %v934_v41 = vpop.f32.mrb[23].mxu0 }
 0x161   :  { %v1182_v40 = vadd.f32 %v2066_v45, %v952_v38  ;;  %v954_v42 = vpop.f32.mrb[23].mxu1  ;;  %v1492_v43 = vpack.c.bf16 %v1153_v35, %v1152_v31  ;;  %v1159_v47 = vadd.f32 %v2068_v46, %v934_v41 }
 0x162   :  { %v1504_v44 = vpack.c.bf16 %v1177_v36, %v1176_v32  ;;  %v1183_v48 = vadd.f32 %v2068_v46, %v954_v42 }
 0x163   :  { %1336 = vst [vmem:[%s2201_s3 + $0x40] sm:$0xff] %v1492_v43  ;;  %v1495_v49 = vpack.c.bf16 %v1159_v47, %v1158_v39 }
 0x164   :  { %1348 = vst [vmem:[%s2201_s3 + $0xa0] sm:$0xff] %v1504_v44  ;;  %v1507_v50 = vpack.c.bf16 %v1183_v48, %v1182_v40 }
 0x165   :  { %1339 = vst [vmem:[%s2201_s3 + $0x58] sm:$0xff] %v1495_v49 }
 0x166   :  { %1351 = vst [vmem:[%s2201_s3 + $0xb8] sm:$0xff] %v1507_v50 }

// kernel: dinov2_forward.27
= control target key start
LH: loop header
LB: loop body
LE: loop exit
PB: predicated region body
PF: predicated region fallthrough
CT: control target
= control target key end

     0   :  { %v430_v40 = vlaneseq  ;;  %s1469_s1 = inlined_call_operand.vmem [shape: bf16[256,256], index: 1, kind: input, shape index: {}]   ;;  %s1470_s0 = inlined_call_operand.vmem [shape: bf16[64,256], index: 0, kind: input, shape index: {}]   ;;  %s1471_s2 = inlined_call_operand.vmem [shape: f32[1,256], index: 2, kind: input, shape index: {}]   ;;  %s1472_s3 = inlined_call_operand.vmem [shape: f32[1,256], index: 3, kind: input, shape index: {}]   ;;  %s1473_s4 = inlined_call_operand.vmem [shape: f32[64,256], index: 4, kind: input, shape index: {}]   ;;  %s1474_s7 = inlined_call_operand.vmem [shape: f32[64,256], index: 7, kind: output, shape index: {0}]   ;;  %s1475_s5 = inlined_call_operand.vmem [shape: f32[1,256], index: 5, kind: input, shape index: {}]   ;;  %s1476_s6 = inlined_call_operand.vmem [shape: f32[1,256], index: 6, kind: input, shape index: {}]   ;;  %s1477_s8 = inlined_call_operand.vmem [shape: bf16[64,256], index: 8, kind: output, shape index: {1}]  }
   0x1   :  { %v869_v0 = vld [vmem:[%s1469_s1 + $0x4] ss:$8 sps:$4 sm:$0xff]   ;;  %v871_v1 = vld [vmem:[%s1469_s1] ss:$8 sps:$4 sm:$0xff]   ;;  %v872_v2 = vld [vmem:[%s1469_s1 + $0x14] ss:$8 sps:$4 sm:$0xff]  }
   0x2   :  { %304 = vmatprep.subr.bf16.mxu0 %v869_v0  ;;  %837 = vmatprep.subr.bf16.mxu1 %v869_v0  ;;  %v874_v3 = vld [vmem:[%s1469_s1 + $0x10] ss:$8 sps:$4 sm:$0xff]   ;;  %v875_v4 = vld [vmem:[%s1469_s1 + $0x24] ss:$8 sps:$4 sm:$0xff]   ;;  %v877_v5 = vld [vmem:[%s1469_s1 + $0x20] ss:$8 sps:$4 sm:$0xff]  }
   0x3   :  { %305 = vmatpush1.bf16.msra.mxu0 %v871_v1  ;;  %853 = vmatpush1.bf16.msra.mxu1 %v871_v1  ;;  %v878_v6 = vld [vmem:[%s1469_s1 + $0x34] ss:$8 sps:$4 sm:$0xff]   ;;  %v880_v7 = vld [vmem:[%s1469_s1 + $0x30] ss:$8 sps:$4 sm:$0xff]   ;;  %v881_v8 = vld [vmem:[%s1469_s1 + $0x44] ss:$8 sps:$4 sm:$0xff]  }
   0x4   :  { %306 = vmatprep.subr.bf16.mxu0 %v872_v2  ;;  %838 = vmatprep.subr.bf16.mxu1 %v872_v2  ;;  %v883_v9 = vld [vmem:[%s1469_s1 + $0x40] ss:$8 sps:$4 sm:$0xff]   ;;  %v884_v10 = vld [vmem:[%s1469_s1 + $0x54] ss:$8 sps:$4 sm:$0xff]   ;;  %v886_v11 = vld [vmem:[%s1469_s1 + $0x50] ss:$8 sps:$4 sm:$0xff]  }
   0x5   :  { %v887_v12 = vld [vmem:[%s1469_s1 + $0x64] ss:$8 sps:$4 sm:$0xff]   ;;  %v889_v14 = vld [vmem:[%s1469_s1 + $0x60] ss:$8 sps:$4 sm:$0xff]   ;;  %v890_v16 = vld [vmem:[%s1469_s1 + $0x74] ss:$8 sps:$4 sm:$0xff]  }
   0x6   :  { %v919_v13 = vld [vmem:[%s1470_s0 + $0x4] ss:$8 sps:$4 sm:$0xff]   ;;  %v892_v17 = vld [vmem:[%s1469_s1 + $0x70] ss:$8 sps:$4 sm:$0xff]   ;;  %v895_v19 = vld [vmem:[%s1469_s1 + $0x80] ss:$8 sps:$4 sm:$0xff]  }
   0x7   :  { %307 = vmatpush1.bf16.msra.mxu0 %v874_v3  ;;  %854 = vmatpush1.bf16.msra.mxu1 %v874_v3  ;;  %v922_v15 = vld [vmem:[%s1470_s0 + $0x24] ss:$8 sps:$4 sm:$0xff]   ;;  %v896_v20 = vld [vmem:[%s1469_s1 + $0x94] ss:$8 sps:$4 sm:$0xff]   ;;  %v898_v21 = vld [vmem:[%s1469_s1 + $0x90] ss:$8 sps:$4 sm:$0xff]  }
   0x8   :  { %308 = vmatprep.subr.bf16.mxu0 %v875_v4  ;;  %839 = vmatprep.subr.bf16.mxu1 %v875_v4  ;;  %v893_v18 = vld [vmem:[%s1469_s1 + $0x84] ss:$8 sps:$4 sm:$0xff]   ;;  %v901_v23 = vld [vmem:[%s1469_s1 + $0xa0] ss:$8 sps:$4 sm:$0xff]   ;;  %v902_v24 = vld [vmem:[%s1469_s1 + $0xb4] ss:$8 sps:$4 sm:$0xff]  }
   0x9   :  { %336 = vmatprep.mubr.bf16.mxu0 %v919_v13  ;;  %356 = vmatprep.mubr.bf16.mxu1 %v922_v15  ;;  %v899_v22 = vld [vmem:[%s1469_s1 + $0xa4] ss:$8 sps:$4 sm:$0xff]   ;;  %v904_v25 = vld [vmem:[%s1469_s1 + $0xb0] ss:$8 sps:$4 sm:$0xff]   ;;  %v907_v27 = vld [vmem:[%s1469_s1 + $0xc0] ss:$8 sps:$4 sm:$0xff]  }
   0xa   :  { %v905_v26 = vld [vmem:[%s1469_s1 + $0xc4] ss:$8 sps:$4 sm:$0xff]   ;;  %v908_v28 = vld [vmem:[%s1469_s1 + $0xd4] ss:$8 sps:$4 sm:$0xff]   ;;  %v910_v29 = vld [vmem:[%s1469_s1 + $0xd0] ss:$8 sps:$4 sm:$0xff]  }
   0xb   :  { %309 = vmatpush1.bf16.msra.mxu0 %v877_v5  ;;  %855 = vmatpush1.bf16.msra.mxu1 %v877_v5  ;;  %v911_v30 = vld [vmem:[%s1469_s1 + $0xe4] ss:$8 sps:$4 sm:$0xff]   ;;  %v913_v31 = vld [vmem:[%s1469_s1 + $0xe0] ss:$8 sps:$4 sm:$0xff]   ;;  %v914_v32 = vld [vmem:[%s1469_s1 + $0xf4] ss:$8 sps:$4 sm:$0xff]  }
   0xc   :  { %310 = vmatprep.subr.bf16.mxu0 %v878_v6  ;;  %840 = vmatprep.subr.bf16.mxu1 %v878_v6  ;;  %v916_v33 = vld [vmem:[%s1469_s1 + $0xf0] ss:$8 sps:$4 sm:$0xff]   ;;  %v917_v34 = vld [vmem:[%s1470_s0] ss:$8 sps:$4 sm:$0xff]   ;;  %v923_v36 = vld [vmem:[%s1470_s0 + $0x14] ss:$8 sps:$4 sm:$0xff]  }
   0xd   :  { %v920_v35 = vld [vmem:[%s1470_s0 + $0x20] ss:$8 sps:$4 sm:$0xff]   ;;  %v926_v37 = vld [vmem:[%s1470_s0 + $0x34] ss:$8 sps:$4 sm:$0xff]   ;;  %v925_v38 = vld [vmem:[%s1470_s0 + $0x10] ss:$8 sps:$4 sm:$0xff]  }
   0xe   :  { %v928_v39 = vld [vmem:[%s1470_s0 + $0x30] ss:$8 sps:$4 sm:$0xff]   ;;  %v431_v41 = vshrl.u32 %v430_v40, 7  ;;  %v428_v43 = vld [vmem:[%s1471_s2] sm:$0x3]  ;;  %v493_v0 = vld [vmem:[%s1473_s4 + $0x48] sm:$0xff] }
   0xf   :  { %311 = vmatpush1.bf16.msra.mxu0 %v880_v7  ;;  %856 = vmatpush1.bf16.msra.mxu1 %v880_v7  ;;  %v456_v45 = vld [vmem:[%s1472_s3] sm:$0x3]  ;;  %v485_v5 = vld [vmem:[%s1473_s4 + $0x8] sm:$0xff]  ;;  %v487_v15 = vld [vmem:[%s1473_s4 + $0x18] sm:$0xff] }
  0x10   :  { %312 = vmatprep.subr.bf16.mxu0 %v881_v8  ;;  %841 = vmatprep.subr.bf16.mxu1 %v881_v8  ;;  %v1110_v42 = vsub.s32 0, %v431_v41  ;;  %v1115_v44 = vsub.s32 1, %v431_v41  ;;  %v492_v56 = vld [vmem:[%s1473_s4 + $0x40] sm:$0xff]  ;;  %v486_v8 = vld [vmem:[%s1473_s4 + $0x10] sm:$0xff] }
  0x11   :  { %v484_v61 = vld [vmem:[%s1473_s4] sm:$0xff] }
  0x12   :  { %v1121_v46 = vrot.slane %v428_v43, %v1110_v42  ;;  %v1124_v47 = vrot.slane %v428_v43, %v1115_v44  ;;  %v1127_v48 = vrot.slane %v456_v45, %v1110_v42  ;;  %v1130_v51 = vrot.slane %v456_v45, %v1115_v44  ;;  %v489_v43 = vld [vmem:[%s1473_s4 + $0x28] sm:$0xff] }
  0x13   :  { %313 = vmatpush1.bf16.msra.mxu0 %v883_v9  ;;  %857 = vmatpush1.bf16.msra.mxu1 %v883_v9 }
  0x14   :  { %314 = vmatprep.subr.bf16.mxu0 %v884_v10  ;;  %842 = vmatprep.subr.bf16.mxu1 %v884_v10 }
  0x17   :  { %315 = vmatpush1.bf16.msra.mxu0 %v886_v11  ;;  %858 = vmatpush1.bf16.msra.mxu1 %v886_v11  ;;  %v494_v11 = vld [vmem:[%s1473_s4 + $0x50] sm:$0xff] }
  0x18   :  { %316 = vmatprep.subr.bf16.mxu0 %v887_v12  ;;  %843 = vmatprep.subr.bf16.mxu1 %v887_v12 }
  0x1b   :  { %317 = vmatpush1.bf16.msra.mxu0 %v889_v14  ;;  %859 = vmatpush1.bf16.msra.mxu1 %v889_v14 }
  0x1c   :  { %318 = vmatprep.subr.bf16.mxu0 %v890_v16  ;;  %844 = vmatprep.subr.bf16.mxu1 %v890_v16 }
  0x1f   :  { %319 = vmatpush1.bf16.msra.mxu0 %v892_v17  ;;  %860 = vmatpush1.bf16.msra.mxu1 %v892_v17  ;;  %v495_v17 = vld [vmem:[%s1473_s4 + $0x58] sm:$0xff] }
  0x20   :  { %320 = vmatprep.subr.bf16.mxu0 %v893_v18  ;;  %845 = vmatprep.subr.bf16.mxu1 %v893_v18 }
  0x23   :  { %321 = vmatpush1.bf16.msra.mxu0 %v895_v19  ;;  %861 = vmatpush1.bf16.msra.mxu1 %v895_v19 }
  0x24   :  { %322 = vmatprep.subr.bf16.mxu0 %v896_v20  ;;  %846 = vmatprep.subr.bf16.mxu1 %v896_v20 }
  0x27   :  { %323 = vmatpush1.bf16.msra.mxu0 %v898_v21  ;;  %862 = vmatpush1.bf16.msra.mxu1 %v898_v21 }
  0x28   :  { %324 = vmatprep.subr.bf16.mxu0 %v899_v22  ;;  %847 = vmatprep.subr.bf16.mxu1 %v899_v22 }
  0x2b   :  { %325 = vmatpush1.bf16.msra.mxu0 %v901_v23  ;;  %863 = vmatpush1.bf16.msra.mxu1 %v901_v23 }
  0x2c   :  { %326 = vmatprep.subr.bf16.mxu0 %v902_v24  ;;  %848 = vmatprep.subr.bf16.mxu1 %v902_v24 }
  0x2f   :  { %327 = vmatpush1.bf16.msra.mxu0 %v904_v25  ;;  %864 = vmatpush1.bf16.msra.mxu1 %v904_v25 }
  0x30   :  { %328 = vmatprep.subr.bf16.mxu0 %v905_v26  ;;  %849 = vmatprep.subr.bf16.mxu1 %v905_v26 }
  0x33   :  { %329 = vmatpush1.bf16.msra.mxu0 %v907_v27  ;;  %865 = vmatpush1.bf16.msra.mxu1 %v907_v27 }
  0x34   :  { %330 = vmatprep.subr.bf16.mxu0 %v908_v28  ;;  %850 = vmatprep.subr.bf16.mxu1 %v908_v28 }
  0x37   :  { %331 = vmatpush1.bf16.msra.mxu0 %v910_v29  ;;  %866 = vmatpush1.bf16.msra.mxu1 %v910_v29 }
  0x38   :  { %332 = vmatprep.subr.bf16.mxu0 %v911_v30  ;;  %851 = vmatprep.subr.bf16.mxu1 %v911_v30 }
  0x3b   :  { %333 = vmatpush1.bf16.msra.mxu0 %v913_v31  ;;  %867 = vmatpush1.bf16.msra.mxu1 %v913_v31 }
  0x3c   :  { %334 = vmatprep.subr.bf16.mxu0 %v914_v32  ;;  %852 = vmatprep.subr.bf16.mxu1 %v914_v32 }
  0x3f   :  { %335 = vmatpush1.bf16.msra.mxu0 %v916_v33  ;;  %868 = vmatpush1.bf16.msra.mxu1 %v916_v33  ;;  %v488_v33 = vld [vmem:[%s1473_s4 + $0x20] sm:$0xff] }
  0x42   :  { %337 = vmatmul.mubr.bf16.vlgmr.msra.gmra.mrb[0].mxu0 %v917_v34  ;;  %357 = vmatmul.mubr.bf16.vlgmr.msra.gmra.mrb[0].mxu1 %v920_v35 }
  0x43   :  { %346 = vmatprep.mubr.bf16.mxu0 %v923_v36  ;;  %366 = vmatprep.mubr.bf16.mxu1 %v926_v37  ;;  %v496_v37 = vld [vmem:[%s1473_s4 + $0x60] sm:$0xff] }
  0x4a   :  { %347 = vmatmul.mubr.bf16.gmra.mrb[4].mxu0 %v925_v38  ;;  %367 = vmatmul.mubr.bf16.gmra.mrb[4].mxu1 %v928_v39 }
 0x115   :  { %v338_v49 = vpop.f32.mrb[0].mxu0  ;;  %v358_v50 = vpop.f32.mrb[0].mxu1 }
 0x116   :  { %v440_v52 = vadd.f32 %v1121_v46, %v338_v49  ;;  %v448_v53 = vadd.f32 %v1121_v46, %v358_v50  ;;  %v340_v54 = vpop.f32.mrb[1].mxu0  ;;  %v360_v55 = vpop.f32.mrb[1].mxu1 }
 0x117   :  { %v441_v57 = vadd.f32 %v1124_v47, %v340_v54  ;;  %v449_v58 = vadd.f32 %v1124_v47, %v360_v55  ;;  %v342_v59 = vpop.f32.mrb[2].mxu0  ;;  %v362_v60 = vpop.f32.mrb[2].mxu1 }
 0x118   :  { %v468_v62 = vmul.f32 %v1127_v48, %v440_v52  ;;  %v476_v63 = vmul.f32 %v1127_v48, %v448_v53  ;;  %v442_v1 = vadd.f32 %v1121_v46, %v342_v59  ;;  %v450_v2 = vadd.f32 %v1121_v46, %v362_v60  ;;  %v344_v3 = vpop.f32.mrb[3].mxu0  ;;  %v364_v4 = vpop.f32.mrb[3].mxu1  ;;  %v497_v52 = vld [vmem:[%s1473_s4 + $0x68] sm:$0xff]  ;;  %v498_v59 = vld [vmem:[%s1473_s4 + $0x70] sm:$0xff] }
 0x119   :  { %v469_v6 = vmul.f32 %v1130_v51, %v441_v57  ;;  %v477_v7 = vmul.f32 %v1130_v51, %v449_v58  ;;  %v443_v9 = vadd.f32 %v1124_v47, %v344_v3  ;;  %v451_v10 = vadd.f32 %v1124_v47, %v364_v4 }
 0x11a   :  { %v1162_v12 = vadd.f32 %v492_v56, %v476_v63  ;;  %v470_v13 = vmul.f32 %v1127_v48, %v442_v1  ;;  %v478_v14 = vmul.f32 %v1127_v48, %v450_v2  ;;  %v1169_v16 = vadd.f32 %v484_v61, %v468_v62  ;;  %v490_v56 = vld [vmem:[%s1473_s4 + $0x30] sm:$0xff]  ;;  %v491_v62 = vld [vmem:[%s1473_s4 + $0x38] sm:$0xff] }
 0x11b   :  { %v1174_v18 = vadd.f32 %v493_v0, %v477_v7  ;;  %v471_v19 = vmul.f32 %v1130_v51, %v443_v9  ;;  %v479_v20 = vmul.f32 %v1130_v51, %v451_v10  ;;  %v1178_v21 = vadd.f32 %v485_v5, %v469_v6  ;;  %v499_v1 = vld [vmem:[%s1473_s4 + $0x78] sm:$0xff] }
 0x11c   :  { %524 = vst [vmem:[%s1474_s7 + $0x40] sm:$0xff] %v1162_v12  ;;  %v1184_v22 = vadd.f32 %v486_v8, %v470_v13  ;;  %516 = vst [vmem:[%s1474_s7] sm:$0xff] %v1169_v16  ;;  %v1190_v23 = vadd.f32 %v494_v11, %v478_v14 }
 0x11d   :  { %525 = vst [vmem:[%s1474_s7 + $0x48] sm:$0xff] %v1174_v18  ;;  %v1196_v24 = vadd.f32 %v487_v15, %v471_v19  ;;  %v348_v25 = vpop.f32.mrb[4].mxu0  ;;  %v532_v26 = vadd.f32 %v1178_v21, %v1169_v16  ;;  %517 = vst [vmem:[%s1474_s7 + $0x8] sm:$0xff] %v1178_v21  ;;  %v1204_v27 = vadd.f32 %v495_v17, %v479_v20  ;;  %v368_v28 = vpop.f32.mrb[4].mxu1 }
 0x11e   :  { %518 = vst [vmem:[%s1474_s7 + $0x10] sm:$0xff] %v1184_v22  ;;  %v444_v29 = vadd.f32 %v1121_v46, %v348_v25  ;;  %v350_v30 = vpop.f32.mrb[5].mxu0  ;;  %526 = vst [vmem:[%s1474_s7 + $0x50] sm:$0xff] %v1190_v23  ;;  %v452_v31 = vadd.f32 %v1121_v46, %v368_v28  ;;  %v370_v32 = vpop.f32.mrb[5].mxu1  ;;  %v544_v39 = vadd.f32 %v1174_v18, %v1162_v12 }
 0x11f   :  { %519 = vst [vmem:[%s1474_s7 + $0x18] sm:$0xff] %v1196_v24  ;;  %v445_v34 = vadd.f32 %v1124_v47, %v350_v30  ;;  %533 = vadd.xlane.f32.xlu0 %v532_v26  ;;  %v352_v35 = vpop.f32.mrb[6].mxu0  ;;  %v547_v36 = vadd.f32 %v1204_v27, %v1190_v23  ;;  %527 = vst [vmem:[%s1474_s7 + $0x58] sm:$0xff] %v1204_v27  ;;  %v453_v38 = vadd.f32 %v1124_v47, %v370_v32  ;;  %v372_v40 = vpop.f32.mrb[6].mxu1 }
 0x120   :  { %v472_v41 = vmul.f32 %v1127_v48, %v444_v29  ;;  %v446_v45 = vadd.f32 %v1121_v46, %v352_v35  ;;  %v354_v49 = vpop.f32.mrb[7].mxu0  ;;  %v480_v50 = vmul.f32 %v1127_v48, %v452_v31  ;;  %v454_v53 = vadd.f32 %v1121_v46, %v372_v40  ;;  %v374_v54 = vpop.f32.mrb[7].mxu1 }
 0x121   :  { %v473_v55 = vmul.f32 %v1130_v51, %v445_v34  ;;  %548 = vadd.xlane.f32.xlu1 %v547_v36  ;;  %v447_v57 = vadd.f32 %v1124_v47, %v354_v49  ;;  %v481_v58 = vmul.f32 %v1130_v51, %v453_v38  ;;  %v455_v60 = vadd.f32 %v1124_v47, %v374_v54 }
 0x122   :  { %v504_v61 = vadd.f32 %v488_v33, %v472_v41  ;;  %v474_v46 = vmul.f32 %v1127_v48, %v446_v45  ;;  %v1260_v63 = vadd.f32 %v496_v37, %v480_v50  ;;  %v482_v0 = vmul.f32 %v1127_v48, %v454_v53 }
 0x123   :  { %v505_v2 = vadd.f32 %v489_v43, %v473_v55  ;;  %v475_v3 = vmul.f32 %v1130_v51, %v447_v57  ;;  %v513_v4 = vadd.f32 %v497_v52, %v481_v58  ;;  %545 = vadd.xlane.f32.xlu0 %v544_v39  ;;  %v483_v47 = vmul.f32 %v1130_v51, %v455_v60 }
 0x124   :  { %520 = vst [vmem:[%s1474_s7 + $0x20] sm:$0xff] %v504_v61  ;;  %v506_v5 = vadd.f32 %v490_v56, %v474_v46  ;;  %528 = vst [vmem:[%s1474_s7 + $0x60] sm:$0xff] %v1260_v63  ;;  %v1275_v48 = vadd.f32 %v498_v59, %v482_v0  ;;  %v535_v7 = vadd.f32 %v1196_v24, %v1184_v22 }
 0x125   :  { %521 = vst [vmem:[%s1474_s7 + $0x28] sm:$0xff] %v505_v2  ;;  %v507_v6 = vadd.f32 %v491_v62, %v475_v3  ;;  %529 = vst [vmem:[%s1474_s7 + $0x68] sm:$0xff] %v513_v4  ;;  %v1283_v51 = vadd.f32 %v499_v1, %v483_v47  ;;  %v538_v8 = vadd.f32 %v505_v2, %v504_v61 }
 0x126   :  { %522 = vst [vmem:[%s1474_s7 + $0x30] sm:$0xff] %v506_v5  ;;  %530 = vst [vmem:[%s1474_s7 + $0x70] sm:$0xff] %v1275_v48  ;;  %v550_v9 = vadd.f32 %v513_v4, %v1260_v63 }
 0x127   :  { %523 = vst [vmem:[%s1474_s7 + $0x38] sm:$0xff] %v507_v6  ;;  %531 = vst [vmem:[%s1474_s7 + $0x78] sm:$0xff] %v1283_v51  ;;  %536 = vadd.xlane.f32.xlu0 %v535_v7  ;;  %539 = vadd.xlane.f32.xlu1 %v538_v8  ;;  %v541_v10 = vadd.f32 %v507_v6, %v506_v5  ;;  %v553_v11 = vadd.f32 %v1283_v51, %v1275_v48 }
 0x12b   :  { %551 = vadd.xlane.f32.xlu0 %v550_v9  ;;  %542 = vadd.xlane.f32.xlu1 %v541_v10 }
 0x12f   :  { %554 = vadd.xlane.f32.xlu1 %v553_v11 }
 0x1ac   :  { %v534_v13 = vpop.xlane.xlu0 %533 }
 0x1ad   :  { %v557_v14 = vmul.f32 0.00390625, %v534_v13 }
 0x1ae   :  { %v549_v19 = vpop.xlane.xlu1 %548 }
 0x1af   :  { %v1305_v15 = vsub.f32 %v1169_v16, %v557_v14  ;;  %v1308_v17 = vsub.f32 %v1178_v21, %v557_v14  ;;  %v562_v28 = vmul.f32 0.00390625, %v549_v19 }
 0x1b0   :  { %v546_v20 = vpop.xlane.xlu0 %545 }
 0x1b1   :  { %v561_v25 = vmul.f32 0.00390625, %v546_v20  ;;  %v581_v26 = vmul.f32 %v1305_v15, %v1305_v15  ;;  %v582_v29 = vmul.f32 %v1308_v17, %v1308_v17  ;;  %v1325_v37 = vsub.f32 %v1190_v23, %v562_v28 }
 0x1b3   :  { %v1315_v30 = vsub.f32 %v1162_v12, %v561_v25  ;;  %v1318_v31 = vsub.f32 %v1174_v18, %v561_v25  ;;  %v597_v21 = vadd.f32 %v582_v29, %v581_v26  ;;  %v1328_v12 = vsub.f32 %v1204_v27, %v562_v28  ;;  %v661_v25 = vld [vmem:[%s1475_s5] sm:$0x3] }
 0x1b4   :  { %v537_v16 = vpop.xlane.xlu0 %536  ;;  %v540_v32 = vpop.xlane.xlu1 %539  ;;  %v591_v54 = vmul.f32 %v1325_v37, %v1325_v37 }
 0x1b5   :  { %v558_v33 = vmul.f32 0.00390625, %v537_v16  ;;  %v559_v34 = vmul.f32 0.00390625, %v540_v32  ;;  %v589_v35 = vmul.f32 %v1315_v30, %v1315_v30  ;;  %v590_v36 = vmul.f32 %v1318_v31, %v1318_v31  ;;  %598 = vadd.xlane.f32.xlu0 %v597_v21  ;;  %v689_v32 = vld [vmem:[%s1476_s6] sm:$0x3] }
 0x1b6   :  { %v592_v55 = vmul.f32 %v1328_v12, %v1328_v12 }
 0x1b7   :  { %v1331_v18 = vsub.f32 %v1184_v22, %v558_v33  ;;  %v1334_v38 = vsub.f32 %v1196_v24, %v558_v33  ;;  %v1336_v39 = vsub.f32 %v504_v61, %v559_v34  ;;  %v1338_v40 = vsub.f32 %v505_v2, %v559_v34 }
 0x1b8   :  { %v552_v41 = vpop.xlane.xlu0 %551  ;;  %v543_v43 = vpop.xlane.xlu1 %542  ;;  %v609_v45 = vadd.f32 %v590_v36, %v589_v35  ;;  %v612_v0 = vadd.f32 %v592_v55, %v591_v54  ;;  %v1386_v34 = vrot.slane %v661_v25, %v1110_v42  ;;  %v1389_v35 = vrot.slane %v661_v25, %v1115_v44 }
 0x1b9   :  { %v563_v49 = vmul.f32 0.00390625, %v552_v41  ;;  %v560_v23 = vmul.f32 0.00390625, %v543_v43  ;;  %v585_v27 = vmul.f32 %v1336_v39, %v1336_v39  ;;  %v586_v50 = vmul.f32 %v1338_v40, %v1338_v40 }
 0x1ba   :  { %610 = vadd.xlane.f32.xlu0 %v609_v45  ;;  %v583_v22 = vmul.f32 %v1331_v18, %v1331_v18  ;;  %v584_v24 = vmul.f32 %v1334_v38, %v1334_v38  ;;  %v1392_v45 = vrot.slane %v689_v32, %v1110_v42 }
 0x1bb   :  { %v1349_v52 = vsub.f32 %v1260_v63, %v563_v49  ;;  %v1351_v53 = vsub.f32 %v513_v4, %v563_v49  ;;  %v1357_v56 = vsub.f32 %v506_v5, %v560_v23  ;;  %v1359_v57 = vsub.f32 %v507_v6, %v560_v23 }
 0x1bc   :  { %v555_v58 = vpop.xlane.xlu1 %554  ;;  %v603_v59 = vadd.f32 %v586_v50, %v585_v27  ;;  %v600_v60 = vadd.f32 %v584_v24, %v583_v22  ;;  %v1395_v49 = vrot.slane %v689_v32, %v1115_v44 }
 0x1bd   :  { %v564_v61 = vmul.f32 0.00390625, %v555_v58  ;;  %v593_v46 = vmul.f32 %v1349_v52, %v1349_v52  ;;  %v594_v62 = vmul.f32 %v1351_v53, %v1351_v53  ;;  %v587_v3 = vmul.f32 %v1357_v56, %v1357_v56 }
 0x1be   :  { %604 = vadd.xlane.f32.xlu0 %v603_v59  ;;  %601 = vadd.xlane.f32.xlu1 %v600_v60  ;;  %v588_v4 = vmul.f32 %v1359_v57, %v1359_v57 }
 0x1bf   :  { %v615_v63 = vadd.f32 %v594_v62, %v593_v46  ;;  %v1366_v1 = vsub.f32 %v1275_v48, %v564_v61  ;;  %v1369_v2 = vsub.f32 %v1283_v51, %v564_v61 }
 0x1c0   :  { %v606_v47 = vadd.f32 %v588_v4, %v587_v3 }
 0x1c1   :  { %v595_v5 = vmul.f32 %v1366_v1, %v1366_v1  ;;  %v596_v6 = vmul.f32 %v1369_v2, %v1369_v2 }
 0x1c2   :  { %616 = vadd.xlane.f32.xlu0 %v615_v63  ;;  %613 = vadd.xlane.f32.xlu1 %v612_v0 }
 0x1c3   :  { %v618_v48 = vadd.f32 %v596_v6, %v595_v5 }
 0x1c6   :  { %607 = vadd.xlane.f32.xlu1 %v606_v47 }
 0x1ca   :  { %619 = vadd.xlane.f32.xlu1 %v618_v48 }
 0x242   :  { %v599_v51 = vpop.xlane.xlu0 %598 }
 0x243   :  { %v621_v7 = vmul.f32 0.00390625, %v599_v51 }
 0x245   :  { %v629_v8 = vadd.f32 1e-06, %v621_v7 }
 0x247   :  { %v611_v9 = vpop.xlane.xlu0 %610  ;;  %929 = vrsqrt.f32 %v629_v8 }
 0x248   :  { %v625_v10 = vmul.f32 0.00390625, %v611_v9 }
 0x24a   :  { %v633_v11 = vadd.f32 1e-06, %v625_v10 }
 0x24b   :  { %v605_v13 = vpop.xlane.xlu0 %604  ;;  %v602_v14 = vpop.xlane.xlu1 %601 }
 0x24c   :  { %931 = vrsqrt.f32 %v633_v11  ;;  %v623_v19 = vmul.f32 0.00390625, %v605_v13  ;;  %v622_v20 = vmul.f32 0.00390625, %v602_v14 }
 0x24e   :  { %v631_v26 = vadd.f32 1e-06, %v623_v19  ;;  %v630_v28 = vadd.f32 1e-06, %v622_v20 }
 0x24f   :  { %v617_v29 = vpop.xlane.xlu0 %616  ;;  %v614_v16 = vpop.xlane.xlu1 %613 }
 0x250   :  { %933 = vrsqrt.f32 %v631_v26  ;;  %v627_v21 = vmul.f32 0.00390625, %v617_v29  ;;  %v626_v33 = vmul.f32 0.00390625, %v614_v16 }
 0x251   :  { %935 = vrsqrt.f32 %v630_v28  ;;  %v930_v36 = vpop.eup %929 }
 0x252   :  { %v635_v41 = vadd.f32 1e-06, %v627_v21  ;;  %v634_v43 = vadd.f32 1e-06, %v626_v33  ;;  %v645_v23 = vmul.f32 %v930_v36, %v1305_v15  ;;  %v646_v27 = vmul.f32 %v930_v36, %v1308_v17 }
 0x253   :  { %v608_v50 = vpop.xlane.xlu1 %607 }
 0x254   :  { %937 = vrsqrt.f32 %v635_v41  ;;  %v624_v22 = vmul.f32 0.00390625, %v608_v50  ;;  %v673_v24 = vmul.f32 %v1386_v34, %v645_v23  ;;  %v674_v54 = vmul.f32 %v1389_v35, %v646_v27 }
 0x255   :  { %939 = vrsqrt.f32 %v634_v43 }
 0x256   :  { %v932_v55 = vpop.eup %931  ;;  %v632_v58 = vadd.f32 1e-06, %v624_v22  ;;  %v701_v42 = vadd.f32 %v1392_v45, %v673_v24  ;;  %v702_v59 = vadd.f32 %v1395_v49, %v674_v54 }
 0x257   :  { %v653_v44 = vmul.f32 %v932_v55, %v1315_v30  ;;  %v654_v15 = vmul.f32 %v932_v55, %v1318_v31  ;;  %v620_v60 = vpop.xlane.xlu1 %619 }
 0x258   :  { %941 = vrsqrt.f32 %v632_v58  ;;  %v628_v17 = vmul.f32 0.00390625, %v620_v60  ;;  %v829_v61 = vpack.c.bf16 %v702_v59, %v701_v42 }
 0x259   :  { %v681_v46 = vmul.f32 %v1386_v34, %v653_v44  ;;  %v682_v62 = vmul.f32 %v1389_v35, %v654_v15 }
 0x25a   :  { %v934_v63 = vpop.eup %933  ;;  %v636_v0 = vadd.f32 1e-06, %v628_v17  ;;  %765 = vst [vmem:[%s1477_s8] sm:$0xff] %v829_v61 }
 0x25b   :  { %v936_v3 = vpop.eup %935  ;;  %v709_v4 = vadd.f32 %v1392_v45, %v681_v46  ;;  %v710_v30 = vadd.f32 %v1395_v49, %v682_v62  ;;  %v649_v31 = vmul.f32 %v934_v63, %v1336_v39  ;;  %v650_v47 = vmul.f32 %v934_v63, %v1338_v40 }
 0x25c   :  { %v647_v5 = vmul.f32 %v936_v3, %v1331_v18  ;;  %v648_v6 = vmul.f32 %v936_v3, %v1334_v38  ;;  %943 = vrsqrt.f32 %v636_v0 }
 0x25d   :  { %v833_v48 = vpack.c.bf16 %v710_v30, %v709_v4  ;;  %v677_v51 = vmul.f32 %v1386_v34, %v649_v31  ;;  %v678_v7 = vmul.f32 %v1389_v35, %v650_v47 }
 0x25e   :  { %v938_v8 = vpop.eup %937  ;;  %v675_v9 = vmul.f32 %v1386_v34, %v647_v5  ;;  %v676_v10 = vmul.f32 %v1389_v35, %v648_v6 }
 0x25f   :  { %v940_v11 = vpop.eup %939  ;;  %769 = vst [vmem:[%s1477_s8 + $0x20] sm:$0xff] %v833_v48  ;;  %v705_v18 = vadd.f32 %v1392_v45, %v677_v51  ;;  %v706_v38 = vadd.f32 %v1395_v49, %v678_v7  ;;  %v657_v39 = vmul.f32 %v938_v8, %v1349_v52  ;;  %v658_v40 = vmul.f32 %v938_v8, %v1351_v53 }
 0x260   :  { %v703_v13 = vadd.f32 %v1392_v45, %v675_v9  ;;  %v704_v14 = vadd.f32 %v1395_v49, %v676_v10  ;;  %v655_v19 = vmul.f32 %v940_v11, %v1325_v37  ;;  %v656_v20 = vmul.f32 %v940_v11, %v1328_v12 }
 0x261   :  { %v831_v25 = vpack.c.bf16 %v706_v38, %v705_v18  ;;  %v685_v26 = vmul.f32 %v1386_v34, %v657_v39  ;;  %v686_v28 = vmul.f32 %v1389_v35, %v658_v40 }
 0x262   :  { %v942_v29 = vpop.eup %941  ;;  %v830_v16 = vpack.c.bf16 %v704_v14, %v703_v13  ;;  %v683_v32 = vmul.f32 %v1386_v34, %v655_v19  ;;  %v684_v52 = vmul.f32 %v1389_v35, %v656_v20 }
 0x263   :  { %767 = vst [vmem:[%s1477_s8 + $0x10] sm:$0xff] %v831_v25  ;;  %v713_v53 = vadd.f32 %v1392_v45, %v685_v26  ;;  %v714_v37 = vadd.f32 %v1395_v49, %v686_v28  ;;  %v651_v12 = vmul.f32 %v942_v29, %v1357_v56  ;;  %v652_v21 = vmul.f32 %v942_v29, %v1359_v57 }
 0x264   :  { %766 = vst [vmem:[%s1477_s8 + $0x8] sm:$0xff] %v830_v16  ;;  %v711_v33 = vadd.f32 %v1392_v45, %v683_v32  ;;  %v712_v36 = vadd.f32 %v1395_v49, %v684_v52 }
 0x265   :  { %v835_v41 = vpack.c.bf16 %v714_v37, %v713_v53  ;;  %v679_v43 = vmul.f32 %v1386_v34, %v651_v12  ;;  %v680_v23 = vmul.f32 %v1389_v35, %v652_v21 }
 0x266   :  { %v944_v27 = vpop.eup %943  ;;  %v834_v50 = vpack.c.bf16 %v712_v36, %v711_v33 }
 0x267   :  { %771 = vst [vmem:[%s1477_s8 + $0x30] sm:$0xff] %v835_v41  ;;  %v707_v56 = vadd.f32 %v1392_v45, %v679_v43  ;;  %v708_v57 = vadd.f32 %v1395_v49, %v680_v23  ;;  %v659_v22 = vmul.f32 %v944_v27, %v1366_v1  ;;  %v660_v24 = vmul.f32 %v944_v27, %v1369_v2 }
 0x268   :  { %770 = vst [vmem:[%s1477_s8 + $0x28] sm:$0xff] %v834_v50 }
 0x269   :  { %v832_v54 = vpack.c.bf16 %v708_v57, %v707_v56  ;;  %v687_v55 = vmul.f32 %v1386_v34, %v659_v22  ;;  %v688_v58 = vmul.f32 %v1389_v35, %v660_v24 }
 0x26b   :  { %768 = vst [vmem:[%s1477_s8 + $0x18] sm:$0xff] %v832_v54  ;;  %v715_v42 = vadd.f32 %v1392_v45, %v687_v55  ;;  %v716_v59 = vadd.f32 %v1395_v49, %v688_v58 }
 0x26d   :  { %v836_v1 = vpack.c.bf16 %v716_v59, %v715_v42 }
 0x26f   :  { %772 = vst [vmem:[%s1477_s8 + $0x38] sm:$0xff] %v836_v1 }

// kernel: dinov2_forward.28
= control target key start
LH: loop header
LB: loop body
LE: loop exit
PB: predicated region body
PF: predicated region fallthrough
CT: control target
= control target key end

     0   :  { %s2159_s12 = smov 0   ;;  %s2161_s13 = smov 0   ;;  %s2810_s0 = inlined_call_operand.vmem [shape: bf16[64,256], index: 0, kind: input, shape index: {}]   ;;  %s2811_s1 = inlined_call_operand.vmem [shape: bf16[256,1024], index: 1, kind: input, shape index: {}]   ;;  %s2812_s2 = inlined_call_operand.vmem [shape: f32[1,1024], index: 2, kind: input, shape index: {}]   ;;  %s2813_s3 = inlined_call_operand.vmem [shape: bf16[64,1024], index: 3, kind: output, shape index: {}]  }
   0x1   :  { %s2163_s14 = smov 0   ;;  %s2165_s15 = smov 0  }
   0x2   :  { %s2167_s16 = smov 0  }
   0x3 LB: > { %s28_s17 = sadd.s32 1, %s2133_s15  ;;  %s1764_s18 = sadd.s32 4294967295, %s2137_s16   ;;  %s2137_s16 = sphi %s2167_s16, %s13_s16   ;;  %s2133_s15 = sphi %s2165_s15, %s2818_s15   ;;  %s2129_s14 = sphi %s2163_s14, %s2817_s14   ;;  %s2125_s13 = sphi %s2161_s13, %s2816_s13   ;;  %s2121_s12 = sphi %s2159_s12, %s2815_s12  }
   0x4   : > { %p30_p0 = scmp.ge.s32.totalorder %s28_s17, 2  ;;  %p76_p1 = scmp.ne.s32.totalorder %s2125_s13, %s2121_s12 }
   0x5   : > { %p77_p2 = scmp.eq.s32.totalorder %s2137_s16, 0  ;;  %p134_p4 = scmp.eq.s32.totalorder %s1764_s18, 1 }
   0x6   : > { %s2820_s17 = smov (%p30_p0, %s28_s17), 0  ;;  %s69_s20 = sadd.s32 1, %s2125_s13 }
   0x7   : > { %p78_p3 = por %p77_p2, %p76_p1  ;;  %s65_s19 = ssub.s32 %s2133_s15, %s2820_s17 }
   0x8   : > { %p67_p5 = scmp.eq.s32.totalorder %s65_s19, 0  ;;  %p2194_p6 = por %p134_p4, %p76_p1 }
   0x9   : > { %p1768_p7 = scmp.ge.s32.totalorder %s2137_s16, 2 }
   0xa   : > { %s2199_s22 = scalar_select %p67_p5, %s2125_s13, %s69_s20  }
   0xb   : > { %171 = sbr.rel (%p1768_p7) target bundleno = 54 (0x36), region = 20 }
  0x12   : > { %174 = sbr.rel (!%p78_p3) target bundleno = 54 (0x36), region = 24  ;;  %s176_s23 = sand.u32 (%p78_p3), 1, %s2125_s13  }
  0x13   : > { %s1869_s24 = sshll.u32 (%p78_p3), %s2133_s15, 4  ;;  %s1769_s25 = sshll.u32 (%p78_p3), %s176_s23, 9 }
  0x14   : > { %s2207_s28 = scalar_lea.vmem (%p78_p3), %s2811_s1, %s1869_s24  ;;  %s2212_s29 = scalar_lea.vmem (%p78_p3), [#allocation3], %s1769_s25 }
  0x15   : > { %v197_v0 = vld [vmem:[%s2207_s28] sm:$0xff] (%p78_p3)  ;;  %v199_v1 = vld [vmem:[%s2207_s28 + $0x8] sm:$0xff] (%p78_p3) }
  0x16   : > { %v201_v2 = vld [vmem:[%s2207_s28 + $0x20] sm:$0xff] (%p78_p3)  ;;  %198 = vst [vmem:[%s2212_s29] sm:$0xff] (%p78_p3), %v197_v0  ;;  %200 = vst [vmem:[%s2212_s29 + $0x8] sm:$0xff] (%p78_p3), %v199_v1  ;;  %v203_v3 = vld [vmem:[%s2207_s28 + $0x28] sm:$0xff] (%p78_p3) }
  0x17   : > { %202 = vst [vmem:[%s2212_s29 + $0x10] sm:$0xff] (%p78_p3), %v201_v2  ;;  %v205_v4 = vld [vmem:[%s2207_s28 + $0x40] sm:$0xff] (%p78_p3)  ;;  %v207_v5 = vld [vmem:[%s2207_s28 + $0x48] sm:$0xff] (%p78_p3)  ;;  %204 = vst [vmem:[%s2212_s29 + $0x18] sm:$0xff] (%p78_p3), %v203_v3 }
  0x18   : > { %206 = vst [vmem:[%s2212_s29 + $0x20] sm:$0xff] (%p78_p3), %v205_v4  ;;  %208 = vst [vmem:[%s2212_s29 + $0x28] sm:$0xff] (%p78_p3), %v207_v5  ;;  %v209_v6 = vld [vmem:[%s2207_s28 + $0x60] sm:$0xff] (%p78_p3)  ;;  %v211_v7 = vld [vmem:[%s2207_s28 + $0x68] sm:$0xff] (%p78_p3) }
  0x19   : > { %v213_v8 = vld [vmem:[%s2207_s28 + $0x80] sm:$0xff]  ;;  %210 = vst [vmem:[%s2212_s29 + $0x30] sm:$0xff] %v209_v6  ;;  %212 = vst [vmem:[%s2212_s29 + $0x38] sm:$0xff] %v211_v7  ;;  %v215_v9 = vld [vmem:[%s2207_s28 + $0x88] sm:$0xff] }
  0x1a   : > { %214 = vst [vmem:[%s2212_s29 + $0x40] sm:$0xff] %v213_v8  ;;  %v217_v10 = vld [vmem:[%s2207_s28 + $0xa0] sm:$0xff]  ;;  %v219_v11 = vld [vmem:[%s2207_s28 + $0xa8] sm:$0xff]  ;;  %216 = vst [vmem:[%s2212_s29 + $0x48] sm:$0xff] %v215_v9 }
  0x1b   : > { %218 = vst [vmem:[%s2212_s29 + $0x50] sm:$0xff] %v217_v10  ;;  %220 = vst [vmem:[%s2212_s29 + $0x58] sm:$0xff] %v219_v11  ;;  %v221_v12 = vld [vmem:[%s2207_s28 + $0xc0] sm:$0xff]  ;;  %v223_v13 = vld [vmem:[%s2207_s28 + $0xc8] sm:$0xff] }
  0x1c   : > { %v225_v14 = vld [vmem:[%s2207_s28 + $0xe0] sm:$0xff]  ;;  %222 = vst [vmem:[%s2212_s29 + $0x60] sm:$0xff] %v221_v12  ;;  %224 = vst [vmem:[%s2212_s29 + $0x68] sm:$0xff] %v223_v13  ;;  %v227_v15 = vld [vmem:[%s2207_s28 + $0xe8] sm:$0xff] }
  0x1d   : > { %226 = vst [vmem:[%s2212_s29 + $0x70] sm:$0xff] %v225_v14  ;;  %v229_v16 = vld [vmem:[%s2207_s28 + $0x100] sm:$0xff]  ;;  %v231_v17 = vld [vmem:[%s2207_s28 + $0x108] sm:$0xff]  ;;  %228 = vst [vmem:[%s2212_s29 + $0x78] sm:$0xff] %v227_v15 }
  0x1e   : > { %230 = vst [vmem:[%s2212_s29 + $0x80] sm:$0xff] %v229_v16  ;;  %232 = vst [vmem:[%s2212_s29 + $0x88] sm:$0xff] %v231_v17  ;;  %v233_v18 = vld [vmem:[%s2207_s28 + $0x120] sm:$0xff]  ;;  %v235_v19 = vld [vmem:[%s2207_s28 + $0x128] sm:$0xff] }
  0x1f   : > { %v237_v20 = vld [vmem:[%s2207_s28 + $0x140] sm:$0xff]  ;;  %234 = vst [vmem:[%s2212_s29 + $0x90] sm:$0xff] %v233_v18  ;;  %236 = vst [vmem:[%s2212_s29 + $0x98] sm:$0xff] %v235_v19  ;;  %v239_v21 = vld [vmem:[%s2207_s28 + $0x148] sm:$0xff] }
  0x20   : > { %238 = vst [vmem:[%s2212_s29 + $0xa0] sm:$0xff] %v237_v20  ;;  %v241_v22 = vld [vmem:[%s2207_s28 + $0x160] sm:$0xff]  ;;  %v243_v23 = vld [vmem:[%s2207_s28 + $0x168] sm:$0xff]  ;;  %240 = vst [vmem:[%s2212_s29 + $0xa8] sm:$0xff] %v239_v21 }
  0x21   : > { %242 = vst [vmem:[%s2212_s29 + $0xb0] sm:$0xff] %v241_v22  ;;  %244 = vst [vmem:[%s2212_s29 + $0xb8] sm:$0xff] %v243_v23  ;;  %v245_v24 = vld [vmem:[%s2207_s28 + $0x180] sm:$0xff]  ;;  %v247_v25 = vld [vmem:[%s2207_s28 + $0x188] sm:$0xff] }
  0x22   : > { %v249_v26 = vld [vmem:[%s2207_s28 + $0x1a0] sm:$0xff]  ;;  %246 = vst [vmem:[%s2212_s29 + $0xc0] sm:$0xff] %v245_v24  ;;  %248 = vst [vmem:[%s2212_s29 + $0xc8] sm:$0xff] %v247_v25  ;;  %v251_v27 = vld [vmem:[%s2207_s28 + $0x1a8] sm:$0xff] }
  0x23   : > { %250 = vst [vmem:[%s2212_s29 + $0xd0] sm:$0xff] %v249_v26  ;;  %v253_v28 = vld [vmem:[%s2207_s28 + $0x1c0] sm:$0xff]  ;;  %v255_v29 = vld [vmem:[%s2207_s28 + $0x1c8] sm:$0xff]  ;;  %252 = vst [vmem:[%s2212_s29 + $0xd8] sm:$0xff] %v251_v27 }
  0x24   : > { %254 = vst [vmem:[%s2212_s29 + $0xe0] sm:$0xff] %v253_v28  ;;  %256 = vst [vmem:[%s2212_s29 + $0xe8] sm:$0xff] %v255_v29  ;;  %v257_v30 = vld [vmem:[%s2207_s28 + $0x1e0] sm:$0xff]  ;;  %v259_v31 = vld [vmem:[%s2207_s28 + $0x1e8] sm:$0xff] }
  0x25   : > { %v261_v32 = vld [vmem:[%s2207_s28 + $0x200] sm:$0xff]  ;;  %258 = vst [vmem:[%s2212_s29 + $0xf0] sm:$0xff] %v257_v30  ;;  %260 = vst [vmem:[%s2212_s29 + $0xf8] sm:$0xff] %v259_v31  ;;  %v263_v33 = vld [vmem:[%s2207_s28 + $0x208] sm:$0xff] }
  0x26   : > { %262 = vst [vmem:[%s2212_s29 + $0x100] sm:$0xff] %v261_v32  ;;  %v265_v34 = vld [vmem:[%s2207_s28 + $0x220] sm:$0xff]  ;;  %v267_v35 = vld [vmem:[%s2207_s28 + $0x228] sm:$0xff]  ;;  %264 = vst [vmem:[%s2212_s29 + $0x108] sm:$0xff] %v263_v33 }
  0x27   : > { %266 = vst [vmem:[%s2212_s29 + $0x110] sm:$0xff] %v265_v34  ;;  %268 = vst [vmem:[%s2212_s29 + $0x118] sm:$0xff] %v267_v35  ;;  %v269_v36 = vld [vmem:[%s2207_s28 + $0x240] sm:$0xff]  ;;  %v271_v37 = vld [vmem:[%s2207_s28 + $0x248] sm:$0xff] }
  0x28   : > { %v273_v38 = vld [vmem:[%s2207_s28 + $0x260] sm:$0xff]  ;;  %270 = vst [vmem:[%s2212_s29 + $0x120] sm:$0xff] %v269_v36  ;;  %272 = vst [vmem:[%s2212_s29 + $0x128] sm:$0xff] %v271_v37  ;;  %v275_v39 = vld [vmem:[%s2207_s28 + $0x268] sm:$0xff] }
  0x29   : > { %274 = vst [vmem:[%s2212_s29 + $0x130] sm:$0xff] %v273_v38  ;;  %v277_v40 = vld [vmem:[%s2207_s28 + $0x280] sm:$0xff]  ;;  %v279_v41 = vld [vmem:[%s2207_s28 + $0x288] sm:$0xff]  ;;  %276 = vst [vmem:[%s2212_s29 + $0x138] sm:$0xff] %v275_v39 }
  0x2a   : > { %278 = vst [vmem:[%s2212_s29 + $0x140] sm:$0xff] %v277_v40  ;;  %280 = vst [vmem:[%s2212_s29 + $0x148] sm:$0xff] %v279_v41  ;;  %v281_v42 = vld [vmem:[%s2207_s28 + $0x2a0] sm:$0xff]  ;;  %v283_v43 = vld [vmem:[%s2207_s28 + $0x2a8] sm:$0xff] }
  0x2b   : > { %v285_v44 = vld [vmem:[%s2207_s28 + $0x2c0] sm:$0xff]  ;;  %282 = vst [vmem:[%s2212_s29 + $0x150] sm:$0xff] %v281_v42  ;;  %284 = vst [vmem:[%s2212_s29 + $0x158] sm:$0xff] %v283_v43  ;;  %v287_v45 = vld [vmem:[%s2207_s28 + $0x2c8] sm:$0xff] }
  0x2c   : > { %286 = vst [vmem:[%s2212_s29 + $0x160] sm:$0xff] %v285_v44  ;;  %v289_v46 = vld [vmem:[%s2207_s28 + $0x2e0] sm:$0xff]  ;;  %v291_v47 = vld [vmem:[%s2207_s28 + $0x2e8] sm:$0xff]  ;;  %288 = vst [vmem:[%s2212_s29 + $0x168] sm:$0xff] %v287_v45 }
  0x2d   : > { %290 = vst [vmem:[%s2212_s29 + $0x170] sm:$0xff] %v289_v46  ;;  %292 = vst [vmem:[%s2212_s29 + $0x178] sm:$0xff] %v291_v47  ;;  %v293_v48 = vld [vmem:[%s2207_s28 + $0x300] sm:$0xff]  ;;  %v295_v49 = vld [vmem:[%s2207_s28 + $0x308] sm:$0xff] }
  0x2e   : > { %v297_v50 = vld [vmem:[%s2207_s28 + $0x320] sm:$0xff]  ;;  %294 = vst [vmem:[%s2212_s29 + $0x180] sm:$0xff] %v293_v48  ;;  %296 = vst [vmem:[%s2212_s29 + $0x188] sm:$0xff] %v295_v49  ;;  %v299_v51 = vld [vmem:[%s2207_s28 + $0x328] sm:$0xff] }
  0x2f   : > { %298 = vst [vmem:[%s2212_s29 + $0x190] sm:$0xff] %v297_v50  ;;  %v301_v52 = vld [vmem:[%s2207_s28 + $0x340] sm:$0xff]  ;;  %v303_v53 = vld [vmem:[%s2207_s28 + $0x348] sm:$0xff]  ;;  %300 = vst [vmem:[%s2212_s29 + $0x198] sm:$0xff] %v299_v51 }
  0x30   : > { %302 = vst [vmem:[%s2212_s29 + $0x1a0] sm:$0xff] %v301_v52  ;;  %304 = vst [vmem:[%s2212_s29 + $0x1a8] sm:$0xff] %v303_v53  ;;  %v305_v54 = vld [vmem:[%s2207_s28 + $0x360] sm:$0xff]  ;;  %v307_v55 = vld [vmem:[%s2207_s28 + $0x368] sm:$0xff] }
  0x31   : > { %v309_v56 = vld [vmem:[%s2207_s28 + $0x380] sm:$0xff]  ;;  %306 = vst [vmem:[%s2212_s29 + $0x1b0] sm:$0xff] %v305_v54  ;;  %308 = vst [vmem:[%s2212_s29 + $0x1b8] sm:$0xff] %v307_v55  ;;  %v311_v57 = vld [vmem:[%s2207_s28 + $0x388] sm:$0xff] }
  0x32   : > { %310 = vst [vmem:[%s2212_s29 + $0x1c0] sm:$0xff] %v309_v56  ;;  %v313_v58 = vld [vmem:[%s2207_s28 + $0x3a0] sm:$0xff]  ;;  %v315_v59 = vld [vmem:[%s2207_s28 + $0x3a8] sm:$0xff]  ;;  %312 = vst [vmem:[%s2212_s29 + $0x1c8] sm:$0xff] %v311_v57 }
  0x33   : > { %314 = vst [vmem:[%s2212_s29 + $0x1d0] sm:$0xff] %v313_v58  ;;  %316 = vst [vmem:[%s2212_s29 + $0x1d8] sm:$0xff] %v315_v59  ;;  %v317_v60 = vld [vmem:[%s2207_s28 + $0x3c0] sm:$0xff]  ;;  %v319_v61 = vld [vmem:[%s2207_s28 + $0x3c8] sm:$0xff] }
  0x34   : > { %v321_v62 = vld [vmem:[%s2207_s28 + $0x3e0] sm:$0xff]  ;;  %318 = vst [vmem:[%s2212_s29 + $0x1e0] sm:$0xff] %v317_v60  ;;  %320 = vst [vmem:[%s2212_s29 + $0x1e8] sm:$0xff] %v319_v61  ;;  %v323_v63 = vld [vmem:[%s2207_s28 + $0x3e8] sm:$0xff] }
  0x35   : > { %322 = vst [vmem:[%s2212_s29 + $0x1f0] sm:$0xff] %v321_v62  ;;  %324 = vst [vmem:[%s2212_s29 + $0x1f8] sm:$0xff] %v323_v63 }
  0x36 PF: > { %p1772_p8 = scmp.ge.s32.totalorder %s2137_s16, 1  ;;  %p337_p9 = scmp.lt.s32.totalorder %s2137_s16, 3 }
  0x38   : > { %p338_p10 = pnand %p1772_p8, %p337_p9 }
  0x39   : > { %s344_s30 = sand.u32 (!%p338_p10), 1, %s2121_s12   ;;  %v2025_v0 = vld [vmem:[%s2810_s0 + $0x4] ss:$8 sps:$4 sm:$0xff] (!%p338_p10)  }
  0x3a   : > { %341 = sbr.rel (%p338_p10) target bundleno = 449 (0x1c1), region = 51  ;;  %s1773_s4 = sshll.u32 (!%p338_p10), %s344_s30, 9  ;;  %933 = vmatprep.mubr.bf16.mxu0 (!%p338_p10), %v2025_v0  ;;  %1006 = vmatprep.mubr.bf16.mxu1 (!%p338_p10), %v2025_v0 }
  0x3b   : > { %s2347_s7 = scalar_lea.vmem (!%p338_p10), [#allocation3], %s1773_s4  ;;  %s1775_s4 = sshll.u32 (!%p338_p10), %s2129_s14, 2 }
  0x3c   : > { %v1927_v1 = vld [vmem:[%s2347_s7 + $0x4] ss:$16 sps:$4 sm:$0xff] (!%p338_p10)   ;;  %v1929_v2 = vld [vmem:[%s2347_s7 + $0xc] ss:$16 sps:$4 sm:$0xff] (!%p338_p10)   ;;  %v1931_v3 = vld [vmem:[%s2347_s7] ss:$16 sps:$4 sm:$0xff] (!%p338_p10)  }
  0x3d   : > { %901 = vmatprep.subr.bf16.mxu0 (!%p338_p10), %v1927_v1  ;;  %v1932_v4 = vld [vmem:[%s2347_s7 + $0x8] ss:$16 sps:$4 sm:$0xff] (!%p338_p10)   ;;  %974 = vmatprep.subr.bf16.mxu1 (!%p338_p10), %v1929_v2  ;;  %v1933_v5 = vld [vmem:[%s2347_s7 + $0x24] ss:$16 sps:$4 sm:$0xff] (!%p338_p10)   ;;  %v1935_v6 = vld [vmem:[%s2347_s7 + $0x2c] ss:$16 sps:$4 sm:$0xff] (!%p338_p10)  }
  0x3e   : > { %902 = vmatpush1.bf16.msra.mxu0 (!%p338_p10), %v1931_v3  ;;  %975 = vmatpush1.bf16.msra.mxu1 (!%p338_p10), %v1932_v4  ;;  %v1937_v7 = vld [vmem:[%s2347_s7 + $0x20] ss:$16 sps:$4 sm:$0xff] (!%p338_p10)   ;;  %v1938_v8 = vld [vmem:[%s2347_s7 + $0x28] ss:$16 sps:$4 sm:$0xff] (!%p338_p10)   ;;  %v1939_v9 = vld [vmem:[%s2347_s7 + $0x44] ss:$16 sps:$4 sm:$0xff] (!%p338_p10)  }
  0x3f   : > { %903 = vmatprep.subr.bf16.mxu0 (!%p338_p10), %v1933_v5  ;;  %976 = vmatprep.subr.bf16.mxu1 (!%p338_p10), %v1935_v6  ;;  %v1941_v10 = vld [vmem:[%s2347_s7 + $0x4c] ss:$16 sps:$4 sm:$0xff] (!%p338_p10)   ;;  %v1943_v11 = vld [vmem:[%s2347_s7 + $0x40] ss:$16 sps:$4 sm:$0xff] (!%p338_p10)   ;;  %v1944_v12 = vld [vmem:[%s2347_s7 + $0x48] ss:$16 sps:$4 sm:$0xff] (!%p338_p10)  }
  0x40   : > { %v1945_v13 = vld [vmem:[%s2347_s7 + $0x64] ss:$16 sps:$4 sm:$0xff] (!%p338_p10)   ;;  %v1947_v14 = vld [vmem:[%s2347_s7 + $0x6c] ss:$16 sps:$4 sm:$0xff] (!%p338_p10)   ;;  %v1949_v15 = vld [vmem:[%s2347_s7 + $0x60] ss:$16 sps:$4 sm:$0xff] (!%p338_p10)  }
  0x41   : > { %v1950_v16 = vld [vmem:[%s2347_s7 + $0x68] ss:$16 sps:$4 sm:$0xff]   ;;  %v1951_v17 = vld [vmem:[%s2347_s7 + $0x84] ss:$16 sps:$4 sm:$0xff]   ;;  %v1953_v18 = vld [vmem:[%s2347_s7 + $0x8c] ss:$16 sps:$4 sm:$0xff]  }
  0x42   : > { %904 = vmatpush1.bf16.msra.mxu0 %v1937_v7  ;;  %977 = vmatpush1.bf16.msra.mxu1 %v1938_v8  ;;  %v1955_v19 = vld [vmem:[%s2347_s7 + $0x80] ss:$16 sps:$4 sm:$0xff]   ;;  %v1956_v20 = vld [vmem:[%s2347_s7 + $0x88] ss:$16 sps:$4 sm:$0xff]   ;;  %v1957_v21 = vld [vmem:[%s2347_s7 + $0xa4] ss:$16 sps:$4 sm:$0xff]   ;;  %v1148_v8 = vlaneseq }
  0x43   : > { %905 = vmatprep.subr.bf16.mxu0 %v1939_v9  ;;  %978 = vmatprep.subr.bf16.mxu1 %v1941_v10  ;;  %v1959_v22 = vld [vmem:[%s2347_s7 + $0xac] ss:$16 sps:$4 sm:$0xff]   ;;  %v1961_v23 = vld [vmem:[%s2347_s7 + $0xa0] ss:$16 sps:$4 sm:$0xff]   ;;  %v1962_v24 = vld [vmem:[%s2347_s7 + $0xa8] ss:$16 sps:$4 sm:$0xff]  }
  0x44   : > { %v1963_v25 = vld [vmem:[%s2347_s7 + $0xc4] ss:$16 sps:$4 sm:$0xff]   ;;  %v1965_v26 = vld [vmem:[%s2347_s7 + $0xcc] ss:$16 sps:$4 sm:$0xff]   ;;  %v1967_v27 = vld [vmem:[%s2347_s7 + $0xc0] ss:$16 sps:$4 sm:$0xff]  }
  0x45   : > { %v1968_v28 = vld [vmem:[%s2347_s7 + $0xc8] ss:$16 sps:$4 sm:$0xff]   ;;  %v1969_v29 = vld [vmem:[%s2347_s7 + $0xe4] ss:$16 sps:$4 sm:$0xff]   ;;  %v1971_v30 = vld [vmem:[%s2347_s7 + $0xec] ss:$16 sps:$4 sm:$0xff]  }
  0x46   : > { %906 = vmatpush1.bf16.msra.mxu0 %v1943_v11  ;;  %979 = vmatpush1.bf16.msra.mxu1 %v1944_v12  ;;  %v1973_v31 = vld [vmem:[%s2347_s7 + $0xe0] ss:$16 sps:$4 sm:$0xff]   ;;  %v1974_v32 = vld [vmem:[%s2347_s7 + $0xe8] ss:$16 sps:$4 sm:$0xff]   ;;  %v1975_v33 = vld [vmem:[%s2347_s7 + $0x104] ss:$16 sps:$4 sm:$0xff]  }
  0x47   : > { %907 = vmatprep.subr.bf16.mxu0 %v1945_v13  ;;  %980 = vmatprep.subr.bf16.mxu1 %v1947_v14  ;;  %v1977_v34 = vld [vmem:[%s2347_s7 + $0x10c] ss:$16 sps:$4 sm:$0xff]   ;;  %v1979_v35 = vld [vmem:[%s2347_s7 + $0x100] ss:$16 sps:$4 sm:$0xff]   ;;  %v1980_v36 = vld [vmem:[%s2347_s7 + $0x108] ss:$16 sps:$4 sm:$0xff]  }
  0x48   : > { %v1981_v37 = vld [vmem:[%s2347_s7 + $0x124] ss:$16 sps:$4 sm:$0xff]   ;;  %v1983_v38 = vld [vmem:[%s2347_s7 + $0x12c] ss:$16 sps:$4 sm:$0xff]   ;;  %v1985_v39 = vld [vmem:[%s2347_s7 + $0x120] ss:$16 sps:$4 sm:$0xff]  }
  0x49   : > { %v1986_v40 = vld [vmem:[%s2347_s7 + $0x128] ss:$16 sps:$4 sm:$0xff]   ;;  %v1987_v41 = vld [vmem:[%s2347_s7 + $0x144] ss:$16 sps:$4 sm:$0xff]   ;;  %v1989_v42 = vld [vmem:[%s2347_s7 + $0x14c] ss:$16 sps:$4 sm:$0xff]  }
  0x4a   : > { %908 = vmatpush1.bf16.msra.mxu0 %v1949_v15  ;;  %981 = vmatpush1.bf16.msra.mxu1 %v1950_v16  ;;  %v1991_v43 = vld [vmem:[%s2347_s7 + $0x140] ss:$16 sps:$4 sm:$0xff]   ;;  %v1992_v44 = vld [vmem:[%s2347_s7 + $0x148] ss:$16 sps:$4 sm:$0xff]   ;;  %v1993_v45 = vld [vmem:[%s2347_s7 + $0x164] ss:$16 sps:$4 sm:$0xff]  }
  0x4b   : > { %909 = vmatprep.subr.bf16.mxu0 %v1951_v17  ;;  %982 = vmatprep.subr.bf16.mxu1 %v1953_v18  ;;  %v1995_v46 = vld [vmem:[%s2347_s7 + $0x16c] ss:$16 sps:$4 sm:$0xff]   ;;  %v1997_v47 = vld [vmem:[%s2347_s7 + $0x160] ss:$16 sps:$4 sm:$0xff]   ;;  %v1998_v48 = vld [vmem:[%s2347_s7 + $0x168] ss:$16 sps:$4 sm:$0xff]  }
  0x4c   : > { %v1999_v49 = vld [vmem:[%s2347_s7 + $0x184] ss:$16 sps:$4 sm:$0xff]   ;;  %v2001_v50 = vld [vmem:[%s2347_s7 + $0x18c] ss:$16 sps:$4 sm:$0xff]   ;;  %v2003_v51 = vld [vmem:[%s2347_s7 + $0x180] ss:$16 sps:$4 sm:$0xff]  }
  0x4d   : > { %v2004_v52 = vld [vmem:[%s2347_s7 + $0x188] ss:$16 sps:$4 sm:$0xff]   ;;  %v2005_v53 = vld [vmem:[%s2347_s7 + $0x1a4] ss:$16 sps:$4 sm:$0xff]   ;;  %v2007_v54 = vld [vmem:[%s2347_s7 + $0x1ac] ss:$16 sps:$4 sm:$0xff]  }
  0x4e   : > { %910 = vmatpush1.bf16.msra.mxu0 %v1955_v19  ;;  %983 = vmatpush1.bf16.msra.mxu1 %v1956_v20  ;;  %v2009_v55 = vld [vmem:[%s2347_s7 + $0x1a0] ss:$16 sps:$4 sm:$0xff]   ;;  %v2010_v56 = vld [vmem:[%s2347_s7 + $0x1a8] ss:$16 sps:$4 sm:$0xff]   ;;  %v2011_v57 = vld [vmem:[%s2347_s7 + $0x1c4] ss:$16 sps:$4 sm:$0xff]  }
  0x4f   : > { %911 = vmatprep.subr.bf16.mxu0 %v1957_v21  ;;  %984 = vmatprep.subr.bf16.mxu1 %v1959_v22  ;;  %v2013_v58 = vld [vmem:[%s2347_s7 + $0x1cc] ss:$16 sps:$4 sm:$0xff]   ;;  %v2015_v59 = vld [vmem:[%s2347_s7 + $0x1c0] ss:$16 sps:$4 sm:$0xff]   ;;  %v2016_v60 = vld [vmem:[%s2347_s7 + $0x1c8] ss:$16 sps:$4 sm:$0xff]  }
  0x50   : > { %v2017_v61 = vld [vmem:[%s2347_s7 + $0x1e4] ss:$16 sps:$4 sm:$0xff]   ;;  %v2019_v62 = vld [vmem:[%s2347_s7 + $0x1ec] ss:$16 sps:$4 sm:$0xff]   ;;  %v2021_v63 = vld [vmem:[%s2347_s7 + $0x1e0] ss:$16 sps:$4 sm:$0xff]  }
  0x51   : > { %v2022_v0 = vld [vmem:[%s2347_s7 + $0x1e8] ss:$16 sps:$4 sm:$0xff]   ;;  %v2026_v2 = vld [vmem:[%s2810_s0 + $0x14] ss:$8 sps:$4 sm:$0xff]   ;;  %v2029_v4 = vld [vmem:[%s2810_s0 + $0x24] ss:$8 sps:$4 sm:$0xff]  }
  0x52   : > { %912 = vmatpush1.bf16.msra.mxu0 %v1961_v23  ;;  %985 = vmatpush1.bf16.msra.mxu1 %v1962_v24  ;;  %v2023_v1 = vld [vmem:[%s2810_s0] ss:$8 sps:$4 sm:$0xff]   ;;  %v2028_v3 = vld [vmem:[%s2810_s0 + $0x10] ss:$8 sps:$4 sm:$0xff]   ;;  %v2032_v6 = vld [vmem:[%s2810_s0 + $0x34] ss:$8 sps:$4 sm:$0xff]  }
  0x53   : > { %913 = vmatprep.subr.bf16.mxu0 %v1963_v25  ;;  %986 = vmatprep.subr.bf16.mxu1 %v1965_v26  ;;  %v2031_v5 = vld [vmem:[%s2810_s0 + $0x20] ss:$8 sps:$4 sm:$0xff]   ;;  %v2034_v7 = vld [vmem:[%s2810_s0 + $0x30] ss:$8 sps:$4 sm:$0xff]   ;;  %p395_p11 = scmp.lt.s32.totalorder %s1775_s4, 7  ;;  %v1149_v9 = vshrl.u32 %v1148_v8, 7 }
  0x54   : > { %s1774_s8 = sshll.u32 %s344_s30, 7  ;;  %s1886_s30 = sshll.u32 (%p2194_p6), %s2129_s14, 4 }
  0x55   : > { %s2822_s4 = smov (!%p395_p11, %s1775_s4), 7  ;;  %v1150_v10 = vsub.s32 0, %v1149_v9  ;;  %v1158_v11 = vsub.s32 2, %v1149_v9  ;;  %v1154_v13 = vsub.s32 1, %v1149_v9  ;;  %v1162_v14 = vsub.s32 3, %v1149_v9  ;;  %s2595_s12 = scalar_lea.vmem [#allocation4], %s1774_s8 }
  0x56   : > { %914 = vmatpush1.bf16.msra.mxu0 %v1967_v27  ;;  %987 = vmatpush1.bf16.msra.mxu1 %v1968_v28  ;;  %s397_s7 = scalar_lea.vmem %s2812_s2, %s2822_s4  ;;  %s1612_s11 = scalar_lea.vmem (%p2194_p6), %s2813_s3, %s1886_s30 }
  0x57   : > { %915 = vmatprep.subr.bf16.mxu0 %v1969_v29  ;;  %988 = vmatprep.subr.bf16.mxu1 %v1971_v30  ;;  %v1146_v12 = vld [vmem:[%s397_s7] sm:$0xf] }
  0x58   : > { %v2438_v15 = vrot.slane %v1146_v12, %v1150_v10  ;;  %v2440_v16 = vrot.slane %v1146_v12, %v1158_v11  ;;  %v2442_v17 = vrot.slane %v1146_v12, %v1154_v13  ;;  %v2444_v18 = vrot.slane %v1146_v12, %v1162_v14 }
  0x5a   : > { %916 = vmatpush1.bf16.msra.mxu0 %v1973_v31  ;;  %989 = vmatpush1.bf16.msra.mxu1 %v1974_v32 }
  0x5b   : > { %917 = vmatprep.subr.bf16.mxu0 %v1975_v33  ;;  %990 = vmatprep.subr.bf16.mxu1 %v1977_v34 }
  0x5e   : > { %918 = vmatpush1.bf16.msra.mxu0 %v1979_v35  ;;  %991 = vmatpush1.bf16.msra.mxu1 %v1980_v36 }
  0x5f   : > { %919 = vmatprep.subr.bf16.mxu0 %v1981_v37  ;;  %992 = vmatprep.subr.bf16.mxu1 %v1983_v38 }
  0x62   : > { %920 = vmatpush1.bf16.msra.mxu0 %v1985_v39  ;;  %993 = vmatpush1.bf16.msra.mxu1 %v1986_v40 }
  0x63   : > { %921 = vmatprep.subr.bf16.mxu0 %v1987_v41  ;;  %994 = vmatprep.subr.bf16.mxu1 %v1989_v42 }
  0x66   : > { %922 = vmatpush1.bf16.msra.mxu0 %v1991_v43  ;;  %995 = vmatpush1.bf16.msra.mxu1 %v1992_v44 }
  0x67   : > { %923 = vmatprep.subr.bf16.mxu0 %v1993_v45  ;;  %996 = vmatprep.subr.bf16.mxu1 %v1995_v46 }
  0x6a   : > { %924 = vmatpush1.bf16.msra.mxu0 %v1997_v47  ;;  %997 = vmatpush1.bf16.msra.mxu1 %v1998_v48 }
  0x6b   : > { %925 = vmatprep.subr.bf16.mxu0 %v1999_v49  ;;  %998 = vmatprep.subr.bf16.mxu1 %v2001_v50 }
  0x6e   : > { %926 = vmatpush1.bf16.msra.mxu0 %v2003_v51  ;;  %999 = vmatpush1.bf16.msra.mxu1 %v2004_v52 }
  0x6f   : > { %927 = vmatprep.subr.bf16.mxu0 %v2005_v53  ;;  %1000 = vmatprep.subr.bf16.mxu1 %v2007_v54 }
  0x72   : > { %928 = vmatpush1.bf16.msra.mxu0 %v2009_v55  ;;  %1001 = vmatpush1.bf16.msra.mxu1 %v2010_v56 }
  0x73   : > { %929 = vmatprep.subr.bf16.mxu0 %v2011_v57  ;;  %1002 = vmatprep.subr.bf16.mxu1 %v2013_v58 }
  0x76   : > { %930 = vmatpush1.bf16.msra.mxu0 %v2015_v59  ;;  %1003 = vmatpush1.bf16.msra.mxu1 %v2016_v60 }
  0x77   : > { %931 = vmatprep.subr.bf16.mxu0 %v2017_v61  ;;  %1004 = vmatprep.subr.bf16.mxu1 %v2019_v62 }
  0x7a   : > { %932 = vmatpush1.bf16.msra.mxu0 %v2021_v63  ;;  %1005 = vmatpush1.bf16.msra.mxu1 %v2022_v0 }
  0x7d   : > { %934 = vmatmul.mubr.bf16.vlgmr.msra.gmra.mrb[0].mxu0 %v2023_v1  ;;  %1007 = vmatmul.mubr.bf16.vlgmr.msra.gmra.mrb[0].mxu1 %v2023_v1 }
  0x7e   : > { %943 = vmatprep.mubr.bf16.mxu0 %v2026_v2  ;;  %1016 = vmatprep.mubr.bf16.mxu1 %v2026_v2 }
  0x85   : > { %944 = vmatmul.mubr.bf16.gmra.mrb[4].mxu0 %v2028_v3  ;;  %1017 = vmatmul.mubr.bf16.gmra.mrb[4].mxu1 %v2028_v3 }
  0x86   : > { %953 = vmatprep.mubr.bf16.mxu0 %v2029_v4  ;;  %1026 = vmatprep.mubr.bf16.mxu1 %v2029_v4 }
  0x8d   : > { %954 = vmatmul.mubr.bf16.gmra.mrb[8].mxu0 %v2031_v5  ;;  %1027 = vmatmul.mubr.bf16.gmra.mrb[8].mxu1 %v2031_v5 }
  0x8e   : > { %963 = vmatprep.mubr.bf16.mxu0 %v2032_v6  ;;  %1036 = vmatprep.mubr.bf16.mxu1 %v2032_v6 }
  0x95   : > { %964 = vmatmul.mubr.bf16.gmra.mrb[12].mxu0 %v2034_v7  ;;  %1037 = vmatmul.mubr.bf16.gmra.mrb[12].mxu1 %v2034_v7 }
 0x150   : > { %v935_v19 = vpop.f32.mrb[0].mxu0  ;;  %v1008_v20 = vpop.f32.mrb[0].mxu1 }
 0x151   : > { %v2447_v21 = vadd.f32 %v2438_v15, %v935_v19  ;;  %v2450_v22 = vadd.f32 %v2440_v16, %v1008_v20  ;;  %v937_v23 = vpop.f32.mrb[1].mxu0  ;;  %v1010_v24 = vpop.f32.mrb[1].mxu1 }
 0x152   : > { %v2453_v25 = vadd.f32 %v2442_v17, %v937_v23  ;;  %v2456_v26 = vadd.f32 %v2444_v18, %v1010_v24  ;;  %v939_v27 = vpop.f32.mrb[2].mxu0  ;;  %v1012_v28 = vpop.f32.mrb[2].mxu1 }
 0x153   : > { %v1200_v29 = vmul.f32 %v2447_v21, %v2447_v21  ;;  %v1202_v30 = vmul.f32 %v2450_v22, %v2450_v22  ;;  %v2463_v31 = vadd.f32 %v2438_v15, %v939_v27  ;;  %v2466_v32 = vadd.f32 %v2440_v16, %v1012_v28  ;;  %v941_v33 = vpop.f32.mrb[3].mxu0  ;;  %v1014_v34 = vpop.f32.mrb[3].mxu1 }
 0x154   : > { %v1201_v35 = vmul.f32 %v2453_v25, %v2453_v25  ;;  %v1203_v36 = vmul.f32 %v2456_v26, %v2456_v26  ;;  %v2473_v37 = vadd.f32 %v2442_v17, %v941_v33  ;;  %v2476_v38 = vadd.f32 %v2444_v18, %v1014_v34 }
 0x155   : > { %v1232_v39 = vmul.f32 %v1200_v29, %v2447_v21  ;;  %v1234_v40 = vmul.f32 %v1202_v30, %v2450_v22  ;;  %v1204_v41 = vmul.f32 %v2463_v31, %v2463_v31  ;;  %v1206_v42 = vmul.f32 %v2466_v32, %v2466_v32 }
 0x156   : > { %v1233_v43 = vmul.f32 %v1201_v35, %v2453_v25  ;;  %v1235_v44 = vmul.f32 %v1203_v36, %v2456_v26  ;;  %v1205_v45 = vmul.f32 %v2473_v37, %v2473_v37  ;;  %v1207_v46 = vmul.f32 %v2476_v38, %v2476_v38 }
 0x157   : > { %v1264_v47 = vmul.f32 0.044715, %v1232_v39  ;;  %v1266_v48 = vmul.f32 0.044715, %v1234_v40  ;;  %v1236_v49 = vmul.f32 %v1204_v41, %v2463_v31  ;;  %v1238_v50 = vmul.f32 %v1206_v42, %v2466_v32 }
 0x158   : > { %v1265_v51 = vmul.f32 0.044715, %v1233_v43  ;;  %v1267_v52 = vmul.f32 0.044715, %v1235_v44  ;;  %v1237_v53 = vmul.f32 %v1205_v45, %v2473_v37  ;;  %v1239_v54 = vmul.f32 %v1207_v46, %v2476_v38  ;;  %v945_v55 = vpop.f32.mrb[4].mxu0  ;;  %v1018_v56 = vpop.f32.mrb[4].mxu1 }
 0x159   : > { %v1296_v57 = vadd.f32 %v1264_v47, %v2447_v21  ;;  %v1298_v58 = vadd.f32 %v1266_v48, %v2450_v22  ;;  %v1268_v59 = vmul.f32 0.044715, %v1236_v49  ;;  %v1270_v60 = vmul.f32 0.044715, %v1238_v50  ;;  %v947_v61 = vpop.f32.mrb[5].mxu0  ;;  %v1020_v62 = vpop.f32.mrb[5].mxu1 }
 0x15a   : > { %v1297_v63 = vadd.f32 %v1265_v51, %v2453_v25  ;;  %v1299_v0 = vadd.f32 %v1267_v52, %v2456_v26  ;;  %v1269_v1 = vmul.f32 0.044715, %v1237_v53  ;;  %v1271_v2 = vmul.f32 0.044715, %v1239_v54  ;;  %v949_v3 = vpop.f32.mrb[6].mxu0  ;;  %v1022_v4 = vpop.f32.mrb[6].mxu1 }
 0x15b   : > { %v1328_v5 = vmul.f32 0.7978846, %v1296_v57  ;;  %v1330_v6 = vmul.f32 0.7978846, %v1298_v58  ;;  %v1300_v7 = vadd.f32 %v1268_v59, %v2463_v31  ;;  %v1302_v8 = vadd.f32 %v1270_v60, %v2466_v32  ;;  %v951_v9 = vpop.f32.mrb[7].mxu0  ;;  %v1024_v10 = vpop.f32.mrb[7].mxu1 }
 0x15c   : > { %v1329_v11 = vmul.f32 0.7978846, %v1297_v63  ;;  %v1331_v12 = vmul.f32 0.7978846, %v1299_v0  ;;  %v1301_v13 = vadd.f32 %v1269_v1, %v2473_v37  ;;  %v1303_v14 = vadd.f32 %v1271_v2, %v2476_v38 }
 0x15d   : > { %2035 = vtanh.f32 %v1328_v5  ;;  %v1332_v19 = vmul.f32 0.7978846, %v1300_v7  ;;  %v1334_v20 = vmul.f32 0.7978846, %v1302_v8  ;;  %v2503_v23 = vadd.f32 %v2438_v15, %v945_v55 }
 0x15e   : > { %2037 = vtanh.f32 %v1330_v6  ;;  %v1333_v24 = vmul.f32 0.7978846, %v1301_v13  ;;  %v1335_v27 = vmul.f32 0.7978846, %v1303_v14  ;;  %v2506_v28 = vadd.f32 %v2440_v16, %v1018_v56 }
 0x15f   : > { %2039 = vtanh.f32 %v1329_v11  ;;  %v1208_v29 = vmul.f32 %v2503_v23, %v2503_v23  ;;  %v2511_v30 = vadd.f32 %v2442_v17, %v947_v61  ;;  %v2514_v33 = vadd.f32 %v2444_v18, %v1020_v62 }
 0x160   : > { %2041 = vtanh.f32 %v1331_v12  ;;  %v1210_v34 = vmul.f32 %v2506_v28, %v2506_v28  ;;  %v2519_v35 = vadd.f32 %v2438_v15, %v949_v3  ;;  %v2522_v36 = vadd.f32 %v2440_v16, %v1022_v4  ;;  %v2524_v39 = vpop.f32.mrb[8].mxu0  ;;  %v2526_v40 = vpop.f32.mrb[8].mxu1 }
 0x161   : > { %2043 = vtanh.f32 %v1332_v19  ;;  %v1240_v41 = vmul.f32 %v1208_v29, %v2503_v23  ;;  %v1209_v42 = vmul.f32 %v2511_v30, %v2511_v30  ;;  %v1211_v43 = vmul.f32 %v2514_v33, %v2514_v33  ;;  %v2533_v44 = vpop.f32.mrb[9].mxu0  ;;  %v2535_v45 = vpop.f32.mrb[9].mxu1 }
 0x162   : > { %2045 = vtanh.f32 %v1334_v20  ;;  %v1242_v46 = vmul.f32 %v1210_v34, %v2506_v28  ;;  %v1212_v47 = vmul.f32 %v2519_v35, %v2519_v35  ;;  %v1214_v48 = vmul.f32 %v2522_v36, %v2522_v36  ;;  %v2542_v49 = vpop.f32.mrb[10].mxu0  ;;  %v2544_v50 = vpop.f32.mrb[10].mxu1 }
 0x163   : > { %2047 = vtanh.f32 %v1333_v24  ;;  %v1272_v51 = vmul.f32 0.044715, %v1240_v41  ;;  %v1241_v52 = vmul.f32 %v1209_v42, %v2511_v30  ;;  %v1243_v53 = vmul.f32 %v1211_v43, %v2514_v33  ;;  %v2548_v54 = vpop.f32.mrb[11].mxu0  ;;  %v2550_v55 = vpop.f32.mrb[11].mxu1 }
 0x164   : > { %2049 = vtanh.f32 %v1335_v27  ;;  %v1274_v56 = vmul.f32 0.044715, %v1242_v46  ;;  %v1244_v57 = vmul.f32 %v1212_v47, %v2519_v35  ;;  %v1246_v58 = vmul.f32 %v1214_v48, %v2522_v36 }
 0x165   : > { %v1304_v59 = vadd.f32 %v1272_v51, %v2503_v23  ;;  %v1273_v60 = vmul.f32 0.044715, %v1241_v52  ;;  %v1275_v61 = vmul.f32 0.044715, %v1243_v53  ;;  %v2556_v62 = vadd.f32 %v2442_v17, %v951_v9 }
 0x166   : > { %v1306_v63 = vadd.f32 %v1274_v56, %v2506_v28  ;;  %v1276_v0 = vmul.f32 0.044715, %v1244_v57  ;;  %v1278_v1 = vmul.f32 0.044715, %v1246_v58  ;;  %v2560_v2 = vadd.f32 %v2444_v18, %v1024_v10 }
 0x167   : > { %v2036_v3 = vpop.eup %2035  ;;  %v1336_v4 = vmul.f32 0.7978846, %v1304_v59  ;;  %v1305_v5 = vadd.f32 %v1273_v60, %v2511_v30  ;;  %v1307_v6 = vadd.f32 %v1275_v61, %v2514_v33  ;;  %v1213_v7 = vmul.f32 %v2556_v62, %v2556_v62 }
 0x168   : > { %v2038_v8 = vpop.eup %2037  ;;  %v1392_v11 = vadd.f32 1.0, %v2036_v3  ;;  %v1338_v9 = vmul.f32 0.7978846, %v1306_v63  ;;  %v1308_v12 = vadd.f32 %v1276_v0, %v2519_v35  ;;  %v1310_v13 = vadd.f32 %v1278_v1, %v2522_v36  ;;  %v2568_v14 = vpop.f32.mrb[12].mxu0 }
 0x169   : > { %v2570_v10 = vpop.f32.mrb[12].mxu1  ;;  %v2040_v19 = vpop.eup %2039  ;;  %v1394_v20 = vadd.f32 1.0, %v2038_v8  ;;  %2051 = vtanh.f32 %v1336_v4  ;;  %v1337_v24 = vmul.f32 0.7978846, %v1305_v5  ;;  %v1339_v27 = vmul.f32 0.7978846, %v1307_v6 }
 0x16a   : > { %v2572_v29 = vpop.f32.mrb[13].mxu0  ;;  %v2042_v34 = vpop.eup %2041  ;;  %v1424_v41 = vmul.f32 0.5, %v1392_v11  ;;  %v1393_v42 = vadd.f32 1.0, %v2040_v19  ;;  %2053 = vtanh.f32 %v1338_v9  ;;  %v1340_v43 = vmul.f32 0.7978846, %v1308_v12 }
 0x16b   : > { %v2574_v46 = vpop.f32.mrb[13].mxu1  ;;  %v2576_v47 = vpop.f32.mrb[14].mxu0  ;;  %v1426_v51 = vmul.f32 0.5, %v1394_v20  ;;  %v1395_v52 = vadd.f32 1.0, %v2042_v34  ;;  %2055 = vtanh.f32 %v1337_v24  ;;  %v1342_v53 = vmul.f32 0.7978846, %v1310_v13 }
 0x16c   : > { %v2044_v48 = vpop.eup %2043  ;;  %v2578_v56 = vpop.f32.mrb[14].mxu1  ;;  %v1456_v59 = vmul.f32 %v1424_v41, %v2447_v21  ;;  %v1425_v60 = vmul.f32 0.5, %v1393_v42  ;;  %2057 = vtanh.f32 %v1339_v27  ;;  %v1245_v13 = vmul.f32 %v1213_v7, %v2556_v62 }
 0x16d   : > { %v2580_v57 = vpop.f32.mrb[15].mxu0  ;;  %v2046_v58 = vpop.eup %2045  ;;  %v1396_v61 = vadd.f32 1.0, %v2044_v48  ;;  %v1458_v1 = vmul.f32 %v1426_v51, %v2450_v22  ;;  %v1427_v3 = vmul.f32 0.5, %v1395_v52  ;;  %2059 = vtanh.f32 %v1340_v43 }
 0x16e   : > { %v2585_v63 = vpop.f32.mrb[15].mxu1  ;;  %v2048_v0 = vpop.eup %2047  ;;  %v1398_v4 = vadd.f32 1.0, %v2046_v58  ;;  %v1457_v6 = vmul.f32 %v1425_v60, %v2453_v25  ;;  %2061 = vtanh.f32 %v1342_v53  ;;  %v1215_v22 = vmul.f32 %v2560_v2, %v2560_v2 }
 0x16f   : > { %v2050_v5 = vpop.eup %2049  ;;  %v1428_v8 = vmul.f32 0.5, %v1396_v61  ;;  %v1397_v11 = vadd.f32 1.0, %v2048_v0  ;;  %v1459_v21 = vmul.f32 %v1427_v3, %v2456_v26  ;;  %v1277_v41 = vmul.f32 0.044715, %v1245_v13 }
 0x170   : > { %v1430_v9 = vmul.f32 0.5, %v1398_v4  ;;  %v1399_v12 = vadd.f32 1.0, %v2050_v5  ;;  %v1870_v19 = vpack.c.bf16 %v1457_v6, %v1456_v59  ;;  %v1247_v7 = vmul.f32 %v1215_v22, %v2560_v2 }
 0x171   : > { %v1460_v20 = vmul.f32 %v1428_v8, %v2463_v31  ;;  %v1429_v24 = vmul.f32 0.5, %v1397_v11  ;;  %v1871_v27 = vpack.c.bf16 %v1459_v21, %v1458_v1  ;;  %v2602_v31 = vadd.f32 %v2438_v15, %v2524_v39 }
 0x172   : > { %v1462_v34 = vmul.f32 %v1430_v9, %v2466_v32  ;;  %v1431_v25 = vmul.f32 0.5, %v1399_v12  ;;  %1584 = vst [vmem:[%s2595_s12] sm:$0xff] %v1870_v19  ;;  %v2606_v42 = vadd.f32 %v2440_v16, %v2526_v40  ;;  %v1309_v48 = vadd.f32 %v1277_v41, %v2556_v62 }
 0x173   : > { %v1461_v26 = vmul.f32 %v1429_v24, %v2473_v37  ;;  %v2052_v32 = vpop.eup %2051  ;;  %1585 = vst [vmem:[%s2595_s12 + $0x8] sm:$0xff] %v1871_v27  ;;  %v2613_v37 = vadd.f32 %v2442_v17, %v2533_v44  ;;  %v2617_v51 = vadd.f32 %v2444_v18, %v2535_v45  ;;  %v1279_v53 = vmul.f32 0.044715, %v1247_v7 }
 0x174   : > { %v1463_v43 = vmul.f32 %v1431_v25, %v2476_v38  ;;  %v2054_v39 = vpop.eup %2053  ;;  %v1400_v40 = vadd.f32 1.0, %v2052_v32  ;;  %v1216_v58 = vmul.f32 %v2602_v31, %v2602_v31  ;;  %v1341_v61 = vmul.f32 0.7978846, %v1309_v48 }
 0x175   : > { %v1872_v52 = vpack.c.bf16 %v1461_v26, %v1460_v20  ;;  %v2056_v59 = vpop.eup %2055  ;;  %v1402_v60 = vadd.f32 1.0, %v2054_v39  ;;  %v1218_v44 = vmul.f32 %v2606_v42, %v2606_v42  ;;  %v1311_v3 = vadd.f32 %v1279_v53, %v2560_v2 }
 0x176   : > { %v1873_v38 = vpack.c.bf16 %v1463_v43, %v1462_v34  ;;  %v2058_v0 = vpop.eup %2057  ;;  %v1432_v1 = vmul.f32 0.5, %v1400_v40  ;;  %v1401_v45 = vadd.f32 1.0, %v2056_v59  ;;  %v1248_v4 = vmul.f32 %v1216_v58, %v2602_v31 }
 0x177   : > { %1586 = vst [vmem:[%s2595_s12 + $0x10] sm:$0xff] %v1872_v52  ;;  %v2060_v5 = vpop.eup %2059  ;;  %v1434_v6 = vmul.f32 0.5, %v1402_v60  ;;  %v1403_v8 = vadd.f32 1.0, %v2058_v0  ;;  %2063 = vtanh.f32 %v1341_v61  ;;  %v1250_v11 = vmul.f32 %v1218_v44, %v2606_v42 }
 0x178   : > { %1587 = vst [vmem:[%s2595_s12 + $0x18] sm:$0xff] %v1873_v38  ;;  %v2062_v21 = vpop.eup %2061  ;;  %v1464_v9 = vmul.f32 %v1432_v1, %v2503_v23  ;;  %v1433_v12 = vmul.f32 0.5, %v1401_v45  ;;  %v1404_v13 = vadd.f32 1.0, %v2060_v5  ;;  %v1343_v19 = vmul.f32 0.7978846, %v1311_v3 }
 0x179   : > { %v1466_v20 = vmul.f32 %v1434_v6, %v2506_v28  ;;  %v1435_v24 = vmul.f32 0.5, %v1403_v8  ;;  %v1406_v22 = vadd.f32 1.0, %v2062_v21  ;;  %v1280_v27 = vmul.f32 0.044715, %v1248_v4 }
 0x17a   : > { %v1465_v34 = vmul.f32 %v1433_v12, %v2511_v30  ;;  %v1436_v25 = vmul.f32 0.5, %v1404_v13  ;;  %2065 = vtanh.f32 %v1343_v19  ;;  %v1282_v41 = vmul.f32 0.044715, %v1250_v11 }
 0x17b   : > { %v1467_v26 = vmul.f32 %v1435_v24, %v2514_v33  ;;  %v1438_v7 = vmul.f32 0.5, %v1406_v22  ;;  %v1312_v23 = vadd.f32 %v1280_v27, %v2602_v31  ;;  %v1217_v32 = vmul.f32 %v2613_v37, %v2613_v37 }
 0x17c   : > { %v1874_v43 = vpack.c.bf16 %v1465_v34, %v1464_v9  ;;  %v1468_v28 = vmul.f32 %v1436_v25, %v2519_v35  ;;  %v1314_v48 = vadd.f32 %v1282_v41, %v2606_v42  ;;  %v1219_v30 = vmul.f32 %v2617_v51, %v2617_v51 }
 0x17d   : > { %v1875_v39 = vpack.c.bf16 %v1467_v26, %v1466_v20  ;;  %v2640_v52 = vmul.f32 %v1438_v7, %v2522_v36  ;;  %v1344_v33 = vmul.f32 0.7978846, %v1312_v23  ;;  %v1249_v40 = vmul.f32 %v1217_v32, %v2613_v37 }
 0x17e   : > { %1588 = vst [vmem:[%s2595_s12 + $0x20] sm:$0xff] %v1874_v43  ;;  %v1346_v53 = vmul.f32 0.7978846, %v1314_v48  ;;  %v1251_v58 = vmul.f32 %v1219_v30, %v2617_v51  ;;  %v2647_v59 = vadd.f32 %v2438_v15, %v2542_v49  ;;  %v2651_v35 = vadd.f32 %v2440_v16, %v2544_v50 }
 0x17f   : > { %1589 = vst [vmem:[%s2595_s12 + $0x28] sm:$0xff] %v1875_v39  ;;  %2067 = vtanh.f32 %v1344_v33  ;;  %v1281_v38 = vmul.f32 0.044715, %v1249_v40  ;;  %v2656_v36 = vadd.f32 %v2442_v17, %v2548_v54  ;;  %v2660_v60 = vadd.f32 %v2444_v18, %v2550_v55 }
 0x180   : > { %2069 = vtanh.f32 %v1346_v53  ;;  %v1283_v61 = vmul.f32 0.044715, %v1251_v58  ;;  %v1220_v49 = vmul.f32 %v2647_v59, %v2647_v59  ;;  %v1222_v50 = vmul.f32 %v2651_v35, %v2651_v35 }
 0x181   : > { %v2064_v44 = vpop.eup %2063  ;;  %v1313_v0 = vadd.f32 %v1281_v38, %v2613_v37  ;;  %v1221_v1 = vmul.f32 %v2656_v36, %v2656_v36  ;;  %v1223_v54 = vmul.f32 %v2660_v60, %v2660_v60  ;;  %v2673_v55 = vadd.f32 %v2438_v15, %v2568_v14 }
 0x182   : > { %v1405_v45 = vadd.f32 1.0, %v2064_v44  ;;  %v1315_v3 = vadd.f32 %v1283_v61, %v2617_v51  ;;  %v1252_v4 = vmul.f32 %v1220_v49, %v2647_v59  ;;  %v1254_v5 = vmul.f32 %v1222_v50, %v2651_v35 }
 0x183   : > { %v1345_v6 = vmul.f32 0.7978846, %v1313_v0  ;;  %v1253_v8 = vmul.f32 %v1221_v1, %v2656_v36  ;;  %v1255_v11 = vmul.f32 %v1223_v54, %v2660_v60  ;;  %v1224_v21 = vmul.f32 %v2673_v55, %v2673_v55 }
 0x184   : > { %v2066_v9 = vpop.eup %2065  ;;  %v1437_v12 = vmul.f32 0.5, %v1405_v45  ;;  %v1347_v13 = vmul.f32 0.7978846, %v1315_v3  ;;  %v1284_v14 = vmul.f32 0.044715, %v1252_v4  ;;  %v2684_v19 = vadd.f32 %v2440_v16, %v2570_v10 }
 0x185   : > { %v1407_v20 = vadd.f32 1.0, %v2066_v9  ;;  %2071 = vtanh.f32 %v1345_v6  ;;  %v1286_v24 = vmul.f32 0.044715, %v1254_v5  ;;  %v1285_v22 = vmul.f32 0.044715, %v1253_v8 }
 0x186   : > { %v1469_v27 = vmul.f32 %v1437_v12, %v2556_v62  ;;  %2073 = vtanh.f32 %v1347_v13  ;;  %v1316_v34 = vadd.f32 %v1284_v14, %v2647_v59  ;;  %v1287_v25 = vmul.f32 0.044715, %v1255_v11 }
 0x187   : > { %v1439_v41 = vmul.f32 0.5, %v1407_v20  ;;  %v1318_v26 = vadd.f32 %v1286_v24, %v2651_v35  ;;  %v1317_v7 = vadd.f32 %v1285_v22, %v2656_v36  ;;  %v1256_v23 = vmul.f32 %v1224_v21, %v2673_v55 }
 0x188   : > { %v1876_v10 = vpack.c.bf16 %v1469_v27, %v1468_v28  ;;  %v1348_v32 = vmul.f32 0.7978846, %v1316_v34  ;;  %v1319_v43 = vadd.f32 %v1287_v25, %v2660_v60  ;;  %v1226_v48 = vmul.f32 %v2684_v19, %v2684_v19 }
 0x189   : > { %v2068_v62 = vpop.eup %2067  ;;  %v1471_v30 = vmul.f32 %v1439_v41, %v2560_v2  ;;  %v1350_v39 = vmul.f32 0.7978846, %v1318_v26  ;;  %v1349_v33 = vmul.f32 0.7978846, %v1317_v7  ;;  %v1288_v40 = vmul.f32 0.044715, %v1256_v23 }
 0x18a   : > { %v2070_v53 = vpop.eup %2069  ;;  %1590 = vst [vmem:[%s2595_s12 + $0x30] sm:$0xff] %v1876_v10  ;;  %v1408_v58 = vadd.f32 1.0, %v2068_v62  ;;  %2075 = vtanh.f32 %v1348_v32  ;;  %v1351_v38 = vmul.f32 0.7978846, %v1319_v43  ;;  %v1258_v28 = vmul.f32 %v1226_v48, %v2684_v19 }
 0x18b   : > { %v1877_v61 = vpack.c.bf16 %v1471_v30, %v2640_v52  ;;  %v1410_v49 = vadd.f32 1.0, %v2070_v53  ;;  %2077 = vtanh.f32 %v1350_v39  ;;  %v1320_v50 = vadd.f32 %v1288_v40, %v2673_v55 }
 0x18c   : > { %v1440_v44 = vmul.f32 0.5, %v1408_v58  ;;  %2079 = vtanh.f32 %v1349_v33  ;;  %v1290_v2 = vmul.f32 0.044715, %v1258_v28  ;;  %v2701_v0 = vadd.f32 %v2442_v17, %v2572_v29 }
 0x18d   : > { %1591 = vst [vmem:[%s2595_s12 + $0x38] sm:$0xff] %v1877_v61  ;;  %v1442_v1 = vmul.f32 0.5, %v1410_v49  ;;  %2081 = vtanh.f32 %v1351_v38  ;;  %v1352_v54 = vmul.f32 0.7978846, %v1320_v50  ;;  %v2706_v45 = vadd.f32 %v2444_v18, %v2574_v46 }
 0x18e   : > { %v1472_v52 = vmul.f32 %v1440_v44, %v2602_v31  ;;  %v1322_v3 = vadd.f32 %v1290_v2, %v2684_v19  ;;  %v1225_v4 = vmul.f32 %v2701_v0, %v2701_v0  ;;  %v2714_v5 = vadd.f32 %v2438_v15, %v2576_v47 }
 0x18f   : > { %v2072_v29 = vpop.eup %2071  ;;  %v1474_v6 = vmul.f32 %v1442_v1, %v2606_v42  ;;  %2083 = vtanh.f32 %v1352_v54  ;;  %v1227_v8 = vmul.f32 %v2706_v45, %v2706_v45  ;;  %v2721_v46 = vadd.f32 %v2440_v16, %v2578_v56 }
 0x190   : > { %v2074_v31 = vpop.eup %2073  ;;  %v1409_v11 = vadd.f32 1.0, %v2072_v29  ;;  %v1354_v21 = vmul.f32 0.7978846, %v1322_v3  ;;  %v1257_v9 = vmul.f32 %v1225_v4, %v2701_v0  ;;  %v1228_v15 = vmul.f32 %v2714_v5, %v2714_v5 }
 0x191   : > { %v1411_v47 = vadd.f32 1.0, %v2074_v31  ;;  %v1259_v12 = vmul.f32 %v1227_v8, %v2706_v45  ;;  %v1230_v42 = vmul.f32 %v2721_v46, %v2721_v46  ;;  %v2731_v13 = vadd.f32 %v2442_v17, %v2580_v57 }
 0x192   : > { %v1441_v16 = vmul.f32 0.5, %v1409_v11  ;;  %2085 = vtanh.f32 %v1354_v21  ;;  %v1289_v56 = vmul.f32 0.044715, %v1257_v9  ;;  %v1260_v14 = vmul.f32 %v1228_v15, %v2714_v5 }
 0x193   : > { %v1443_v20 = vmul.f32 0.5, %v1411_v47  ;;  %v1291_v24 = vmul.f32 0.044715, %v1259_v12  ;;  %v1262_v22 = vmul.f32 %v1230_v42, %v2721_v46  ;;  %v1229_v27 = vmul.f32 %v2731_v13, %v2731_v13 }
 0x194   : > { %v2076_v34 = vpop.eup %2075  ;;  %v1473_v25 = vmul.f32 %v1441_v16, %v2613_v37  ;;  %v1321_v41 = vadd.f32 %v1289_v56, %v2701_v0  ;;  %v1292_v26 = vmul.f32 0.044715, %v1260_v14  ;;  %v2741_v17 = vadd.f32 %v2444_v18, %v2585_v63 }
 0x195   : > { %v2078_v57 = vpop.eup %2077  ;;  %v1475_v7 = vmul.f32 %v1443_v20, %v2617_v51  ;;  %v1412_v23 = vadd.f32 1.0, %v2076_v34  ;;  %v1323_v10 = vadd.f32 %v1291_v24, %v2706_v45  ;;  %v1294_v32 = vmul.f32 0.044715, %v1262_v22 }
 0x196   : > { %v2080_v43 = vpop.eup %2079  ;;  %v1878_v48 = vpack.c.bf16 %v1473_v25, %v1472_v52  ;;  %v1414_v62 = vadd.f32 1.0, %v2078_v57  ;;  %v1353_v37 = vmul.f32 0.7978846, %v1321_v41  ;;  %v1324_v30 = vadd.f32 %v1292_v26, %v2714_v5 }
 0x197   : > { %v2082_v39 = vpop.eup %2081  ;;  %v1879_v33 = vpack.c.bf16 %v1475_v7, %v1474_v6  ;;  %v1444_v40 = vmul.f32 0.5, %v1412_v23  ;;  %v1413_v18 = vadd.f32 1.0, %v2080_v43  ;;  %v1355_v63 = vmul.f32 0.7978846, %v1323_v10 }
 0x198   : > { %1592 = vst [vmem:[%s2595_s12 + $0x40] sm:$0xff] %v1878_v48  ;;  %v1446_v53 = vmul.f32 0.5, %v1414_v62  ;;  %v1415_v58 = vadd.f32 1.0, %v2082_v39  ;;  %2087 = vtanh.f32 %v1353_v37  ;;  %v1356_v51 = vmul.f32 0.7978846, %v1324_v30 }
 0x199   : > { %v2084_v38 = vpop.eup %2083  ;;  %1593 = vst [vmem:[%s2595_s12 + $0x48] sm:$0xff] %v1879_v33  ;;  %v1476_v28 = vmul.f32 %v1444_v40, %v2647_v59  ;;  %v1445_v61 = vmul.f32 0.5, %v1413_v18  ;;  %2089 = vtanh.f32 %v1355_v63  ;;  %v1326_v49 = vadd.f32 %v1294_v32, %v2721_v46  ;;  %v1633_v18 = vld [vmem:[%s2595_s12 + $0x20] sm:$0xff] (%p2194_p6)  ;;  %v1635_v63 = vld [vmem:[%s2595_s12 + $0x28] sm:$0xff] (%p2194_p6) }
 0x19a   : > { %v1478_v50 = vmul.f32 %v1446_v53, %v2651_v35  ;;  %v1447_v44 = vmul.f32 0.5, %v1415_v58  ;;  %2091 = vtanh.f32 %v1356_v51  ;;  %v1261_v54 = vmul.f32 %v1229_v27, %v2731_v13  ;;  %1634 = vst [vmem:[%s1612_s11 + $0x40] sm:$0xff] (%p2194_p6), %v1633_v18  ;;  %1636 = vst [vmem:[%s1612_s11 + $0x48] sm:$0xff] (%p2194_p6), %v1635_v63  ;;  %v1637_v53 = vld [vmem:[%s2595_s12 + $0x30] sm:$0xff] (%p2194_p6)  ;;  %v1639_v58 = vld [vmem:[%s2595_s12 + $0x38] sm:$0xff] (%p2194_p6) }
 0x19b   : > { %v1477_v2 = vmul.f32 %v1445_v61, %v2656_v36  ;;  %v1358_v1 = vmul.f32 0.7978846, %v1326_v49  ;;  %v1231_v52 = vmul.f32 %v2741_v17, %v2741_v17  ;;  %v1416_v29 = vadd.f32 1.0, %v2084_v38  ;;  %1638 = vst [vmem:[%s1612_s11 + $0x60] sm:$0xff] (%p2194_p6), %v1637_v53  ;;  %1640 = vst [vmem:[%s1612_s11 + $0x68] sm:$0xff] (%p2194_p6), %v1639_v58 }
 0x19c   : > { %v2086_v3 = vpop.eup %2085  ;;  %v1479_v59 = vmul.f32 %v1447_v44, %v2660_v60  ;;  %v1293_v6 = vmul.f32 0.044715, %v1261_v54 }
 0x19d   : > { %v1880_v4 = vpack.c.bf16 %v1477_v2, %v1476_v28  ;;  %v1418_v35 = vadd.f32 1.0, %v2086_v3  ;;  %2093 = vtanh.f32 %v1358_v1  ;;  %v1263_v31 = vmul.f32 %v1231_v52, %v2741_v17 }
 0x19e   : > { %v1881_v8 = vpack.c.bf16 %v1479_v59, %v1478_v50  ;;  %v1325_v36 = vadd.f32 %v1293_v6, %v2731_v13  ;;  %v1448_v21 = vmul.f32 0.5, %v1416_v29 }
 0x19f   : > { %1594 = vst [vmem:[%s2595_s12 + $0x50] sm:$0xff] %v1880_v4  ;;  %v1295_v11 = vmul.f32 0.044715, %v1263_v31  ;;  %v1450_v47 = vmul.f32 0.5, %v1418_v35  ;;  %v1641_v51 = vld [vmem:[%s2595_s12 + $0x40] sm:$0xff] (%p2194_p6) }
 0x1a0   : > { %1595 = vst [vmem:[%s2595_s12 + $0x58] sm:$0xff] %v1881_v8  ;;  %v1357_v9 = vmul.f32 0.7978846, %v1325_v36  ;;  %v1480_v20 = vmul.f32 %v1448_v21, %v2673_v55  ;;  %1642 = vst [vmem:[%s1612_s11 + $0x80] sm:$0xff] (%p2194_p6), %v1641_v51  ;;  %v1643_v38 = vld [vmem:[%s2595_s12 + $0x48] sm:$0xff] (%p2194_p6) }
 0x1a1   : > { %v1327_v12 = vadd.f32 %v1295_v11, %v2741_v17  ;;  %v1482_v22 = vmul.f32 %v1450_v47, %v2684_v19  ;;  %1644 = vst [vmem:[%s1612_s11 + $0x88] sm:$0xff] (%p2194_p6), %v1643_v38 }
 0x1a2   : > { %v2088_v15 = vpop.eup %2087  ;;  %2095 = vtanh.f32 %v1357_v9 }
 0x1a3   : > { %v2090_v60 = vpop.eup %2089  ;;  %v1417_v42 = vadd.f32 1.0, %v2088_v15  ;;  %v1359_v14 = vmul.f32 0.7978846, %v1327_v12 }
 0x1a4   : > { %v2092_v16 = vpop.eup %2091  ;;  %v1419_v56 = vadd.f32 1.0, %v2090_v60 }
 0x1a5   : > { %v1449_v24 = vmul.f32 0.5, %v1417_v42  ;;  %2097 = vtanh.f32 %v1359_v14  ;;  %v1420_v26 = vadd.f32 1.0, %v2092_v16 }
 0x1a6   : > { %v1451_v27 = vmul.f32 0.5, %v1419_v56  ;;  %v1645_v28 = vld [vmem:[%s2595_s12 + $0x50] sm:$0xff] (%p2194_p6) }
 0x1a7   : > { %v1481_v34 = vmul.f32 %v1449_v24, %v2701_v0  ;;  %v2094_v25 = vpop.eup %2093  ;;  %v1452_v10 = vmul.f32 0.5, %v1420_v26  ;;  %v1647_v61 = vld [vmem:[%s2595_s12 + $0x58] sm:$0xff] (%p2194_p6)  ;;  %1646 = vst [vmem:[%s1612_s11 + $0xa0] sm:$0xff] (%p2194_p6), %v1645_v28 }
 0x1a8   : > { %v1483_v41 = vmul.f32 %v1451_v27, %v2706_v45  ;;  %v1422_v23 = vadd.f32 1.0, %v2094_v25  ;;  %1648 = vst [vmem:[%s1612_s11 + $0xa8] sm:$0xff] (%p2194_p6), %v1647_v61 }
 0x1a9   : > { %v1882_v57 = vpack.c.bf16 %v1481_v34, %v1480_v20  ;;  %v1484_v48 = vmul.f32 %v1452_v10, %v2714_v5  ;;  %v1625_v5 = vld [vmem:[%s2595_s12] sm:$0xff] (%p2194_p6) }
 0x1aa   : > { %v1883_v7 = vpack.c.bf16 %v1483_v41, %v1482_v22  ;;  %v1454_v43 = vmul.f32 0.5, %v1422_v23  ;;  %1626 = vst [vmem:[%s1612_s11] sm:$0xff] (%p2194_p6), %v1625_v5 }
 0x1ab   : > { %1596 = vst [vmem:[%s2595_s12 + $0x60] sm:$0xff] %v1882_v57 }
 0x1ac   : > { %1597 = vst [vmem:[%s2595_s12 + $0x68] sm:$0xff] %v1883_v7  ;;  %v2096_v55 = vpop.eup %2095  ;;  %v1486_v45 = vmul.f32 %v1454_v43, %v2721_v46  ;;  %v1627_v46 = vld [vmem:[%s2595_s12 + $0x8] sm:$0xff] (%p2194_p6) }
 0x1ad   : > { %v1421_v32 = vadd.f32 1.0, %v2096_v55  ;;  %1628 = vst [vmem:[%s1612_s11 + $0x8] sm:$0xff] (%p2194_p6), %v1627_v46 }
 0x1af   : > { %v2098_v19 = vpop.eup %2097  ;;  %v1453_v62 = vmul.f32 0.5, %v1421_v32 }
 0x1b0   : > { %v1423_v0 = vadd.f32 1.0, %v2098_v19 }
 0x1b1   : > { %v1485_v37 = vmul.f32 %v1453_v62, %v2731_v13  ;;  %v1629_v13 = vld [vmem:[%s2595_s12 + $0x10] sm:$0xff] (%p2194_p6) }
 0x1b2   : > { %v1455_v30 = vmul.f32 0.5, %v1423_v0  ;;  %1606 = sbr.rel (!%p2194_p6) target bundleno = 449 (0x1c1), region = 67  ;;  %1630 = vst [vmem:[%s1612_s11 + $0x20] sm:$0xff] (%p2194_p6), %v1629_v13  ;;  %v1649_v49 = vld [vmem:[%s2595_s12 + $0x60] sm:$0xff] (%p2194_p6) }
 0x1b3   : > { %v1884_v39 = vpack.c.bf16 %v1485_v37, %v1484_v48  ;;  %v1651_v50 = vld [vmem:[%s2595_s12 + $0x68] sm:$0xff] (%p2194_p6)  ;;  %1650 = vst [vmem:[%s1612_s11 + $0xc0] sm:$0xff] (%p2194_p6), %v1649_v49 }
 0x1b4   : > { %v1487_v33 = vmul.f32 %v1455_v30, %v2741_v17  ;;  %v1631_v17 = vld [vmem:[%s2595_s12 + $0x18] sm:$0xff] (%p2194_p6)  ;;  %1652 = vst [vmem:[%s1612_s11 + $0xc8] sm:$0xff] (%p2194_p6), %v1651_v50 }
 0x1b5   : > { %1598 = vst [vmem:[%s2595_s12 + $0x70] sm:$0xff] %v1884_v39  ;;  %1632 = vst [vmem:[%s1612_s11 + $0x28] sm:$0xff] (%p2194_p6), %v1631_v17 }
 0x1b6   : > { %v1885_v40 = vpack.c.bf16 %v1487_v33, %v1486_v45 }
 0x1b8   : > { %1599 = vst [vmem:[%s2595_s12 + $0x78] sm:$0xff] %v1885_v40 }
 0x1bc   : > { %v1653_v44 = vld [vmem:[%s2595_s12 + $0x70] sm:$0xff] }
 0x1bd   : > { %1654 = vst [vmem:[%s1612_s11 + $0xe0] sm:$0xff] %v1653_v44 }
 0x1bf   : > { %v1655_v2 = vld [vmem:[%s2595_s12 + $0x78] sm:$0xff] }
 0x1c0   : > { %1656 = vst [vmem:[%s1612_s11 + $0xe8] sm:$0xff] %v1655_v2 }
 0x1c1 PF: > { %s13_s16 = sadd.s32 1, %s2137_s16   ;;  %s2815_s12 = smov %s2125_s13 }
 0x1c2   : > { %p10_p12 = scmp.ge.s32.totalorder %s13_s16, 4   ;;  %s2816_s13 = smov %s2199_s22 }
 0x1c3   : > { %s2817_s14 = smov %s2133_s15  ;;  %s2818_s15 = smov %s2820_s17 }
 0x1c4   :  { %12 = sbr.rel (!%p10_p12) target bundleno = 3 (0x3), region = 127 }

// kernel: dinov2_forward.29
= control target key start
LH: loop header
LB: loop body
LE: loop exit
PB: predicated region body
PF: predicated region fallthrough
CT: control target
= control target key end

     0   :  { %s3067_s1 = inlined_call_operand.vmem [shape: bf16[1024,256], index: 1, kind: input, shape index: {}]   ;;  %s3068_s0 = inlined_call_operand.vmem [shape: bf16[64,1024], index: 0, kind: input, shape index: {}]   ;;  %s3069_s2 = inlined_call_operand.vmem [shape: f32[1,256], index: 2, kind: input, shape index: {}]   ;;  %s3070_s3 = inlined_call_operand.vmem [shape: f32[1,256], index: 3, kind: input, shape index: {}]   ;;  %s3071_s4 = inlined_call_operand.vmem [shape: f32[64,256], index: 4, kind: input, shape index: {}]   ;;  %s3072_s7 = inlined_call_operand.vmem [shape: f32[64,256], index: 7, kind: output, shape index: {0}]   ;;  %s3073_s5 = inlined_call_operand.vmem [shape: f32[1,256], index: 5, kind: input, shape index: {}]   ;;  %s3074_s6 = inlined_call_operand.vmem [shape: f32[1,256], index: 6, kind: input, shape index: {}]   ;;  %s3075_s8 = inlined_call_operand.vmem [shape: bf16[64,256], index: 8, kind: output, shape index: {1}]  }
   0x1   :  { %v1944_v0 = vld [vmem:[%s3067_s1 + $0x4] ss:$8 sps:$4 sm:$0xff]   ;;  %v1948_v2 = vld [vmem:[%s3067_s1] ss:$8 sps:$4 sm:$0xff]   ;;  %v1950_v4 = vld [vmem:[%s3067_s1 + $0x14] ss:$8 sps:$4 sm:$0xff]  }
   0x2   :  { %v1946_v1 = vld [vmem:[%s3067_s1 + $0x204] ss:$8 sps:$4 sm:$0xff]   ;;  %1024 = vmatprep.subr.bf16.mxu1 %v1944_v0  ;;  %v1949_v3 = vld [vmem:[%s3067_s1 + $0x200] ss:$8 sps:$4 sm:$0xff]   ;;  %v1952_v5 = vld [vmem:[%s3067_s1 + $0x214] ss:$8 sps:$4 sm:$0xff]  }
   0x3   :  { %1170 = vmatprep.subr.bf16.mxu0 %v1946_v1  ;;  %1025 = vmatpush1.bf16.msra.mxu1 %v1948_v2  ;;  %v1954_v6 = vld [vmem:[%s3067_s1 + $0x10] ss:$8 sps:$4 sm:$0xff]   ;;  %v1956_v8 = vld [vmem:[%s3067_s1 + $0x24] ss:$8 sps:$4 sm:$0xff]   ;;  %v1960_v10 = vld [vmem:[%s3067_s1 + $0x20] ss:$8 sps:$4 sm:$0xff]  }
   0x4   :  { %1171 = vmatpush1.bf16.msra.mxu0 %v1949_v3  ;;  %1026 = vmatprep.subr.bf16.mxu1 %v1950_v4  ;;  %v1955_v7 = vld [vmem:[%s3067_s1 + $0x210] ss:$8 sps:$4 sm:$0xff]   ;;  %v1958_v9 = vld [vmem:[%s3067_s1 + $0x224] ss:$8 sps:$4 sm:$0xff]   ;;  %v1961_v11 = vld [vmem:[%s3067_s1 + $0x220] ss:$8 sps:$4 sm:$0xff]  }
   0x5   :  { %1172 = vmatprep.subr.bf16.mxu0 %v1952_v5  ;;  %v1962_v12 = vld [vmem:[%s3067_s1 + $0x34] ss:$8 sps:$4 sm:$0xff]   ;;  %v1966_v14 = vld [vmem:[%s3067_s1 + $0x30] ss:$8 sps:$4 sm:$0xff]   ;;  %v1968_v16 = vld [vmem:[%s3067_s1 + $0x44] ss:$8 sps:$4 sm:$0xff]  }
   0x6   :  { %v1964_v13 = vld [vmem:[%s3067_s1 + $0x234] ss:$8 sps:$4 sm:$0xff]   ;;  %v1967_v15 = vld [vmem:[%s3067_s1 + $0x230] ss:$8 sps:$4 sm:$0xff]   ;;  %v1970_v17 = vld [vmem:[%s3067_s1 + $0x244] ss:$8 sps:$4 sm:$0xff]  }
   0x7   :  { %1027 = vmatpush1.bf16.msra.mxu1 %v1954_v6  ;;  %v1972_v18 = vld [vmem:[%s3067_s1 + $0x40] ss:$8 sps:$4 sm:$0xff]   ;;  %v1974_v20 = vld [vmem:[%s3067_s1 + $0x54] ss:$8 sps:$4 sm:$0xff]   ;;  %v1978_v22 = vld [vmem:[%s3067_s1 + $0x50] ss:$8 sps:$4 sm:$0xff]  }
   0x8   :  { %1173 = vmatpush1.bf16.msra.mxu0 %v1955_v7  ;;  %1028 = vmatprep.subr.bf16.mxu1 %v1956_v8  ;;  %v1973_v19 = vld [vmem:[%s3067_s1 + $0x240] ss:$8 sps:$4 sm:$0xff]   ;;  %v1976_v21 = vld [vmem:[%s3067_s1 + $0x254] ss:$8 sps:$4 sm:$0xff]   ;;  %v1979_v23 = vld [vmem:[%s3067_s1 + $0x250] ss:$8 sps:$4 sm:$0xff]  }
   0x9   :  { %1174 = vmatprep.subr.bf16.mxu0 %v1958_v9  ;;  %v1980_v24 = vld [vmem:[%s3067_s1 + $0x64] ss:$8 sps:$4 sm:$0xff]   ;;  %v1984_v26 = vld [vmem:[%s3067_s1 + $0x60] ss:$8 sps:$4 sm:$0xff]   ;;  %v1986_v28 = vld [vmem:[%s3067_s1 + $0x74] ss:$8 sps:$4 sm:$0xff]  }
   0xa   :  { %v1982_v25 = vld [vmem:[%s3067_s1 + $0x264] ss:$8 sps:$4 sm:$0xff]   ;;  %v1985_v27 = vld [vmem:[%s3067_s1 + $0x260] ss:$8 sps:$4 sm:$0xff]   ;;  %v1988_v29 = vld [vmem:[%s3067_s1 + $0x274] ss:$8 sps:$4 sm:$0xff]  }
   0xb   :  { %1029 = vmatpush1.bf16.msra.mxu1 %v1960_v10  ;;  %v1990_v30 = vld [vmem:[%s3067_s1 + $0x70] ss:$8 sps:$4 sm:$0xff]   ;;  %v1992_v32 = vld [vmem:[%s3067_s1 + $0x84] ss:$8 sps:$4 sm:$0xff]   ;;  %v1996_v34 = vld [vmem:[%s3067_s1 + $0x80] ss:$8 sps:$4 sm:$0xff]  }
   0xc   :  { %1175 = vmatpush1.bf16.msra.mxu0 %v1961_v11  ;;  %1030 = vmatprep.subr.bf16.mxu1 %v1962_v12  ;;  %v1991_v31 = vld [vmem:[%s3067_s1 + $0x270] ss:$8 sps:$4 sm:$0xff]   ;;  %v1994_v33 = vld [vmem:[%s3067_s1 + $0x284] ss:$8 sps:$4 sm:$0xff]   ;;  %v1997_v35 = vld [vmem:[%s3067_s1 + $0x280] ss:$8 sps:$4 sm:$0xff]  }
   0xd   :  { %1176 = vmatprep.subr.bf16.mxu0 %v1964_v13  ;;  %v1998_v36 = vld [vmem:[%s3067_s1 + $0x94] ss:$8 sps:$4 sm:$0xff]   ;;  %v2002_v38 = vld [vmem:[%s3067_s1 + $0x90] ss:$8 sps:$4 sm:$0xff]   ;;  %v2004_v40 = vld [vmem:[%s3067_s1 + $0xa4] ss:$8 sps:$4 sm:$0xff]  }
   0xe   :  { %v2000_v37 = vld [vmem:[%s3067_s1 + $0x294] ss:$8 sps:$4 sm:$0xff]   ;;  %v2003_v39 = vld [vmem:[%s3067_s1 + $0x290] ss:$8 sps:$4 sm:$0xff]   ;;  %v2006_v41 = vld [vmem:[%s3067_s1 + $0x2a4] ss:$8 sps:$4 sm:$0xff]  }
   0xf   :  { %1031 = vmatpush1.bf16.msra.mxu1 %v1966_v14  ;;  %v2008_v42 = vld [vmem:[%s3067_s1 + $0xa0] ss:$8 sps:$4 sm:$0xff]   ;;  %v2010_v44 = vld [vmem:[%s3067_s1 + $0xb4] ss:$8 sps:$4 sm:$0xff]   ;;  %v2014_v46 = vld [vmem:[%s3067_s1 + $0xb0] ss:$8 sps:$4 sm:$0xff]  }
  0x10   :  { %1177 = vmatpush1.bf16.msra.mxu0 %v1967_v15  ;;  %1032 = vmatprep.subr.bf16.mxu1 %v1968_v16  ;;  %v2009_v43 = vld [vmem:[%s3067_s1 + $0x2a0] ss:$8 sps:$4 sm:$0xff]   ;;  %v2012_v45 = vld [vmem:[%s3067_s1 + $0x2b4] ss:$8 sps:$4 sm:$0xff]   ;;  %v2015_v47 = vld [vmem:[%s3067_s1 + $0x2b0] ss:$8 sps:$4 sm:$0xff]  }
  0x11   :  { %1178 = vmatprep.subr.bf16.mxu0 %v1970_v17  ;;  %v48_v48 = vld [vmem:[%s3068_s0] sm:$0xff]  ;;  %v50_v53 = vld [vmem:[%s3068_s0 + $0x10] sm:$0xff] }
  0x12   :  { %v52_v49 = vld [vmem:[%s3068_s0 + $0x20] sm:$0xff]  ;;  %v54_v54 = vld [vmem:[%s3068_s0 + $0x30] sm:$0xff] }
  0x13   :  { %1033 = vmatpush1.bf16.msra.mxu1 %v1972_v18  ;;  %v2016_v50 = vld [vmem:[%s3067_s1 + $0xc4] ss:$8 sps:$4 sm:$0xff]   ;;  %v1721_v52 = vcombine.high %v48_v48, %v52_v49  ;;  %v1725_v55 = vcombine.high %v50_v53, %v54_v54  ;;  %v2020_v56 = vld [vmem:[%s3067_s1 + $0xc0] ss:$8 sps:$4 sm:$0xff]   ;;  %v2022_v58 = vld [vmem:[%s3067_s1 + $0xd4] ss:$8 sps:$4 sm:$0xff]   ;;  %v1720_v8 = vcombine.low %v48_v48, %v52_v49  ;;  %v1724_v10 = vcombine.low %v50_v53, %v54_v54 }
  0x14   :  { %1179 = vmatpush1.bf16.msra.mxu0 %v1973_v19  ;;  %1034 = vmatprep.subr.bf16.mxu1 %v1974_v20  ;;  %v2018_v51 = vld [vmem:[%s3067_s1 + $0x2c4] ss:$8 sps:$4 sm:$0xff]   ;;  %v2021_v57 = vld [vmem:[%s3067_s1 + $0x2c0] ss:$8 sps:$4 sm:$0xff]   ;;  %v2024_v59 = vld [vmem:[%s3067_s1 + $0x2d4] ss:$8 sps:$4 sm:$0xff]  }
  0x15   :  { %1180 = vmatprep.subr.bf16.mxu0 %v1976_v21  ;;  %1056 = vmatprep.mubr.bf16.mxu1 %v1721_v52  ;;  %v2026_v60 = vld [vmem:[%s3067_s1 + $0xd0] ss:$8 sps:$4 sm:$0xff]   ;;  %v2028_v62 = vld [vmem:[%s3067_s1 + $0xe4] ss:$8 sps:$4 sm:$0xff]   ;;  %v2032_v0 = vld [vmem:[%s3067_s1 + $0xe0] ss:$8 sps:$4 sm:$0xff]  }
  0x16   :  { %1202 = vmatprep.mubr.bf16.mxu0 %v1725_v55  ;;  %v2027_v61 = vld [vmem:[%s3067_s1 + $0x2d0] ss:$8 sps:$4 sm:$0xff]   ;;  %v2030_v63 = vld [vmem:[%s3067_s1 + $0x2e4] ss:$8 sps:$4 sm:$0xff]   ;;  %v2033_v1 = vld [vmem:[%s3067_s1 + $0x2e0] ss:$8 sps:$4 sm:$0xff]  }
  0x17   :  { %1035 = vmatpush1.bf16.msra.mxu1 %v1978_v22  ;;  %v2034_v2 = vld [vmem:[%s3067_s1 + $0xf4] ss:$8 sps:$4 sm:$0xff]   ;;  %v2038_v4 = vld [vmem:[%s3067_s1 + $0xf0] ss:$8 sps:$4 sm:$0xff]   ;;  %v2042_v6 = vld [vmem:[%s3067_s1 + $0x104] ss:$8 sps:$4 sm:$0xff]  }
  0x18   :  { %1181 = vmatpush1.bf16.msra.mxu0 %v1979_v23  ;;  %1036 = vmatprep.subr.bf16.mxu1 %v1980_v24  ;;  %v2036_v3 = vld [vmem:[%s3067_s1 + $0x2f4] ss:$8 sps:$4 sm:$0xff]   ;;  %v2039_v5 = vld [vmem:[%s3067_s1 + $0x2f0] ss:$8 sps:$4 sm:$0xff]   ;;  %v2045_v7 = vld [vmem:[%s3067_s1 + $0x304] ss:$8 sps:$4 sm:$0xff]  }
  0x19   :  { %1182 = vmatprep.subr.bf16.mxu0 %v1982_v25  ;;  %v2040_v9 = vld [vmem:[%s3067_s1 + $0x100] ss:$8 sps:$4 sm:$0xff]   ;;  %v2048_v12 = vld [vmem:[%s3067_s1 + $0x114] ss:$8 sps:$4 sm:$0xff]   ;;  %v2046_v14 = vld [vmem:[%s3067_s1 + $0x110] ss:$8 sps:$4 sm:$0xff]  }
  0x1a   :  { %v2043_v11 = vld [vmem:[%s3067_s1 + $0x300] ss:$8 sps:$4 sm:$0xff]   ;;  %v2051_v13 = vld [vmem:[%s3067_s1 + $0x314] ss:$8 sps:$4 sm:$0xff]   ;;  %v2049_v15 = vld [vmem:[%s3067_s1 + $0x310] ss:$8 sps:$4 sm:$0xff]  }
  0x1b   :  { %1037 = vmatpush1.bf16.msra.mxu1 %v1984_v26  ;;  %v2054_v16 = vld [vmem:[%s3067_s1 + $0x124] ss:$8 sps:$4 sm:$0xff]   ;;  %v2052_v18 = vld [vmem:[%s3067_s1 + $0x120] ss:$8 sps:$4 sm:$0xff]   ;;  %v58_v22 = vld [vmem:[%s3068_s0 + $0x50] sm:$0xff] }
  0x1c   :  { %1183 = vmatpush1.bf16.msra.mxu0 %v1985_v27  ;;  %1038 = vmatprep.subr.bf16.mxu1 %v1986_v28  ;;  %v2057_v17 = vld [vmem:[%s3067_s1 + $0x324] ss:$8 sps:$4 sm:$0xff]   ;;  %v2055_v19 = vld [vmem:[%s3067_s1 + $0x320] ss:$8 sps:$4 sm:$0xff]   ;;  %v62_v23 = vld [vmem:[%s3068_s0 + $0x70] sm:$0xff] }
  0x1d   :  { %1184 = vmatprep.subr.bf16.mxu0 %v1988_v29  ;;  %v56_v20 = vld [vmem:[%s3068_s0 + $0x40] sm:$0xff]  ;;  %v2060_v24 = vld [vmem:[%s3067_s1 + $0x134] ss:$8 sps:$4 sm:$0xff]   ;;  %v1733_v26 = vcombine.high %v58_v22, %v62_v23  ;;  %v1732_v29 = vcombine.low %v58_v22, %v62_v23 }
  0x1e   :  { %v60_v21 = vld [vmem:[%s3068_s0 + $0x60] sm:$0xff]  ;;  %v2063_v28 = vld [vmem:[%s3067_s1 + $0x334] ss:$8 sps:$4 sm:$0xff]  }
  0x1f   :  { %1039 = vmatpush1.bf16.msra.mxu1 %v1990_v30  ;;  %v1729_v25 = vcombine.high %v56_v20, %v60_v21  ;;  %v1728_v27 = vcombine.low %v56_v20, %v60_v21  ;;  %v2058_v30 = vld [vmem:[%s3067_s1 + $0x130] ss:$8 sps:$4 sm:$0xff]   ;;  %v2078_v48 = vld [vmem:[%s3067_s1 + $0x164] ss:$8 sps:$4 sm:$0xff]  }
  0x20   :  { %1185 = vmatpush1.bf16.msra.mxu0 %v1991_v31  ;;  %1040 = vmatprep.subr.bf16.mxu1 %v1992_v32  ;;  %v2061_v31 = vld [vmem:[%s3067_s1 + $0x330] ss:$8 sps:$4 sm:$0xff]   ;;  %v2066_v32 = vld [vmem:[%s3067_s1 + $0x144] ss:$8 sps:$4 sm:$0xff]  }
  0x21   :  { %1186 = vmatprep.subr.bf16.mxu0 %v1994_v33  ;;  %v2069_v33 = vld [vmem:[%s3067_s1 + $0x344] ss:$8 sps:$4 sm:$0xff]   ;;  %v74_v52 = vld [vmem:[%s3068_s0 + $0xd0] sm:$0xff] }
  0x22   :  { %v2081_v49 = vld [vmem:[%s3067_s1 + $0x364] ss:$8 sps:$4 sm:$0xff]   ;;  %v78_v54 = vld [vmem:[%s3068_s0 + $0xf0] sm:$0xff] }
  0x23   :  { %1041 = vmatpush1.bf16.msra.mxu1 %v1996_v34  ;;  %v64_v34 = vld [vmem:[%s3068_s0 + $0x80] sm:$0xff]  ;;  %v1749_v55 = vcombine.high %v74_v52, %v78_v54  ;;  %v2106_v20 = vld [vmem:[%s3067_s1 + $0x1b0] ss:$8 sps:$4 sm:$0xff]  }
  0x24   :  { %1187 = vmatpush1.bf16.msra.mxu0 %v1997_v35  ;;  %1042 = vmatprep.subr.bf16.mxu1 %v1998_v36  ;;  %v68_v35 = vld [vmem:[%s3068_s0 + $0xa0] sm:$0xff]  ;;  %v2109_v21 = vld [vmem:[%s3067_s1 + $0x3b0] ss:$8 sps:$4 sm:$0xff]  }
  0x25   :  { %1188 = vmatprep.subr.bf16.mxu0 %v2000_v37  ;;  %v1737_v36 = vcombine.high %v64_v34, %v68_v35  ;;  %v66_v37 = vld [vmem:[%s3068_s0 + $0x90] sm:$0xff]  ;;  %v2114_v22 = vld [vmem:[%s3067_s1 + $0x1c4] ss:$8 sps:$4 sm:$0xff]  }
  0x26   :  { %v2117_v23 = vld [vmem:[%s3067_s1 + $0x3c4] ss:$8 sps:$4 sm:$0xff]  }
  0x27   :  { %1043 = vmatpush1.bf16.msra.mxu1 %v2002_v38  ;;  %v70_v38 = vld [vmem:[%s3068_s0 + $0xb0] sm:$0xff] }
  0x28   :  { %1189 = vmatpush1.bf16.msra.mxu0 %v2003_v39  ;;  %1044 = vmatprep.subr.bf16.mxu1 %v2004_v40  ;;  %v2064_v39 = vld [vmem:[%s3067_s1 + $0x140] ss:$8 sps:$4 sm:$0xff]  }
  0x29   :  { %1190 = vmatprep.subr.bf16.mxu0 %v2006_v41  ;;  %v2067_v40 = vld [vmem:[%s3067_s1 + $0x340] ss:$8 sps:$4 sm:$0xff]   ;;  %v1741_v41 = vcombine.high %v66_v37, %v70_v38 }
  0x2b   :  { %1045 = vmatpush1.bf16.msra.mxu1 %v2008_v42  ;;  %v1736_v42 = vcombine.low %v64_v34, %v68_v35  ;;  %v2132_v34 = vld [vmem:[%s3067_s1 + $0x1f4] ss:$8 sps:$4 sm:$0xff]  }
  0x2c   :  { %1191 = vmatpush1.bf16.msra.mxu0 %v2009_v43  ;;  %1046 = vmatprep.subr.bf16.mxu1 %v2010_v44  ;;  %v1740_v43 = vcombine.low %v66_v37, %v70_v38  ;;  %v2072_v44 = vld [vmem:[%s3067_s1 + $0x154] ss:$8 sps:$4 sm:$0xff]   ;;  %v2133_v37 = vld [vmem:[%s3067_s1 + $0x3f0] ss:$8 sps:$4 sm:$0xff]   ;;  %v57_v38 = vld [vmem:[%s3068_s0 + $0x48] sm:$0xff] }
  0x2d   :  { %1192 = vmatprep.subr.bf16.mxu0 %v2012_v45  ;;  %v2075_v45 = vld [vmem:[%s3067_s1 + $0x354] ss:$8 sps:$4 sm:$0xff]  }
  0x2e   :  { %v2135_v35 = vld [vmem:[%s3067_s1 + $0x3f4] ss:$8 sps:$4 sm:$0xff]  }
  0x2f   :  { %1047 = vmatpush1.bf16.msra.mxu1 %v2014_v46  ;;  %v2070_v46 = vld [vmem:[%s3067_s1 + $0x150] ss:$8 sps:$4 sm:$0xff]  }
  0x30   :  { %1193 = vmatpush1.bf16.msra.mxu0 %v2015_v47  ;;  %1048 = vmatprep.subr.bf16.mxu1 %v2016_v50  ;;  %v2073_v47 = vld [vmem:[%s3067_s1 + $0x350] ss:$8 sps:$4 sm:$0xff]   ;;  %v72_v50 = vld [vmem:[%s3068_s0 + $0xc0] sm:$0xff] }
  0x31   :  { %1194 = vmatprep.subr.bf16.mxu0 %v2018_v51  ;;  %v76_v51 = vld [vmem:[%s3068_s0 + $0xe0] sm:$0xff] }
  0x32   :  { %v1745_v53 = vcombine.high %v72_v50, %v76_v51 }
  0x33   :  { %1049 = vmatpush1.bf16.msra.mxu1 %v2020_v56  ;;  %v2076_v56 = vld [vmem:[%s3067_s1 + $0x160] ss:$8 sps:$4 sm:$0xff]  }
  0x34   :  { %1195 = vmatpush1.bf16.msra.mxu0 %v2021_v57  ;;  %1050 = vmatprep.subr.bf16.mxu1 %v2022_v58  ;;  %v2079_v57 = vld [vmem:[%s3067_s1 + $0x360] ss:$8 sps:$4 sm:$0xff]   ;;  %v1744_v58 = vcombine.low %v72_v50, %v76_v51 }
  0x35   :  { %1196 = vmatprep.subr.bf16.mxu0 %v2024_v59  ;;  %v1748_v59 = vcombine.low %v74_v52, %v78_v54  ;;  %v73_v54 = vld [vmem:[%s3068_s0 + $0xc8] sm:$0xff] }
  0x37   :  { %1051 = vmatpush1.bf16.msra.mxu1 %v2026_v60  ;;  %v2084_v60 = vld [vmem:[%s3067_s1 + $0x174] ss:$8 sps:$4 sm:$0xff]  }
  0x38   :  { %1197 = vmatpush1.bf16.msra.mxu0 %v2027_v61  ;;  %1052 = vmatprep.subr.bf16.mxu1 %v2028_v62  ;;  %v2087_v61 = vld [vmem:[%s3067_s1 + $0x374] ss:$8 sps:$4 sm:$0xff]   ;;  %v2530_v62 = vld [vmem:[%s3068_s0 + $0x8] sm:$0xff] }
  0x39   :  { %1198 = vmatprep.subr.bf16.mxu0 %v2030_v63  ;;  %v2535_v63 = vld [vmem:[%s3068_s0 + $0x28] sm:$0xff] }
  0x3b   :  { %1053 = vmatpush1.bf16.msra.mxu1 %v2032_v0  ;;  %v2540_v0 = vld [vmem:[%s3068_s0 + $0x18] sm:$0xff] }
  0x3c   :  { %1199 = vmatpush1.bf16.msra.mxu0 %v2033_v1  ;;  %1054 = vmatprep.subr.bf16.mxu1 %v2034_v2  ;;  %v2545_v1 = vld [vmem:[%s3068_s0 + $0x38] sm:$0xff] }
  0x3d   :  { %1200 = vmatprep.subr.bf16.mxu0 %v2036_v3  ;;  %v2082_v2 = vld [vmem:[%s3067_s1 + $0x170] ss:$8 sps:$4 sm:$0xff]  }
  0x3e   :  { %v2085_v3 = vld [vmem:[%s3067_s1 + $0x370] ss:$8 sps:$4 sm:$0xff]  }
  0x3f   :  { %1055 = vmatpush1.bf16.msra.mxu1 %v2038_v4  ;;  %v1723_v4 = vcombine.high %v2530_v62, %v2535_v63 }
  0x40   :  { %1201 = vmatpush1.bf16.msra.mxu0 %v2039_v5  ;;  %1097 = vmatprep.subr.bf16.mxu1 %v2042_v6  ;;  %v2090_v5 = vld [vmem:[%s3067_s1 + $0x184] ss:$8 sps:$4 sm:$0xff]  }
  0x41   :  { %1243 = vmatprep.subr.bf16.mxu0 %v2045_v7  ;;  %v2093_v6 = vld [vmem:[%s3067_s1 + $0x384] ss:$8 sps:$4 sm:$0xff]   ;;  %v1727_v7 = vcombine.high %v2540_v0, %v2545_v1 }
  0x42   :  { %1057 = vmatmul.mubr.bf16.vlgmr.msra.gmra.mrb[0].mxu1 %v1720_v8  ;;  %v2088_v8 = vld [vmem:[%s3067_s1 + $0x180] ss:$8 sps:$4 sm:$0xff]  }
  0x43   :  { %1203 = vmatmul.mubr.bf16.vlgmr.msra.gmra.mrb[0].mxu0 %v1724_v10  ;;  %1098 = vmatpush1.bf16.msra.mxu1 %v2040_v9  ;;  %v2091_v9 = vld [vmem:[%s3067_s1 + $0x380] ss:$8 sps:$4 sm:$0xff]   ;;  %v2096_v10 = vld [vmem:[%s3067_s1 + $0x194] ss:$8 sps:$4 sm:$0xff]  }
  0x44   :  { %1244 = vmatpush1.bf16.msra.mxu0 %v2043_v11  ;;  %1099 = vmatprep.subr.bf16.mxu1 %v2048_v12  ;;  %v2099_v11 = vld [vmem:[%s3067_s1 + $0x394] ss:$8 sps:$4 sm:$0xff]   ;;  %v2094_v12 = vld [vmem:[%s3067_s1 + $0x190] ss:$8 sps:$4 sm:$0xff]  }
  0x45   :  { %1245 = vmatprep.subr.bf16.mxu0 %v2051_v13  ;;  %1066 = vmatprep.mubr.bf16.mxu1 %v1729_v25  ;;  %v2097_v13 = vld [vmem:[%s3067_s1 + $0x390] ss:$8 sps:$4 sm:$0xff]   ;;  %v2115_v25 = vld [vmem:[%s3067_s1 + $0x3c0] ss:$8 sps:$4 sm:$0xff]  }
  0x46   :  { %1212 = vmatprep.mubr.bf16.mxu0 %v1733_v26  ;;  %v2120_v26 = vld [vmem:[%s3067_s1 + $0x1d4] ss:$8 sps:$4 sm:$0xff]  }
  0x47   :  { %1100 = vmatpush1.bf16.msra.mxu1 %v2046_v14  ;;  %v2102_v14 = vld [vmem:[%s3067_s1 + $0x1a4] ss:$8 sps:$4 sm:$0xff]  }
  0x48   :  { %1246 = vmatpush1.bf16.msra.mxu0 %v2049_v15  ;;  %1101 = vmatprep.subr.bf16.mxu1 %v2054_v16  ;;  %v2105_v15 = vld [vmem:[%s3067_s1 + $0x3a4] ss:$8 sps:$4 sm:$0xff]   ;;  %v2100_v16 = vld [vmem:[%s3067_s1 + $0x1a0] ss:$8 sps:$4 sm:$0xff]  }
  0x49   :  { %1247 = vmatprep.subr.bf16.mxu0 %v2057_v17  ;;  %v2103_v17 = vld [vmem:[%s3067_s1 + $0x3a0] ss:$8 sps:$4 sm:$0xff]  }
  0x4a   :  { %1067 = vmatmul.mubr.bf16.gmra.mrb[4].mxu1 %v1728_v27  ;;  %v2123_v27 = vld [vmem:[%s3067_s1 + $0x3d4] ss:$8 sps:$4 sm:$0xff]  }
  0x4b   :  { %1213 = vmatmul.mubr.bf16.gmra.mrb[4].mxu0 %v1732_v29  ;;  %1102 = vmatpush1.bf16.msra.mxu1 %v2052_v18  ;;  %v2108_v18 = vld [vmem:[%s3067_s1 + $0x1b4] ss:$8 sps:$4 sm:$0xff]   ;;  %v2121_v29 = vld [vmem:[%s3067_s1 + $0x3d0] ss:$8 sps:$4 sm:$0xff]  }
  0x4c   :  { %1248 = vmatpush1.bf16.msra.mxu0 %v2055_v19  ;;  %1103 = vmatprep.subr.bf16.mxu1 %v2060_v24  ;;  %v2111_v19 = vld [vmem:[%s3067_s1 + $0x3b4] ss:$8 sps:$4 sm:$0xff]   ;;  %v2112_v24 = vld [vmem:[%s3067_s1 + $0x1c0] ss:$8 sps:$4 sm:$0xff]  }
  0x4d   :  { %1249 = vmatprep.subr.bf16.mxu0 %v2063_v28  ;;  %1076 = vmatprep.mubr.bf16.mxu1 %v1737_v36  ;;  %v2118_v28 = vld [vmem:[%s3067_s1 + $0x1d0] ss:$8 sps:$4 sm:$0xff]  }
  0x4e   :  { %1222 = vmatprep.mubr.bf16.mxu0 %v1741_v41  ;;  %v2130_v36 = vld [vmem:[%s3067_s1 + $0x1f0] ss:$8 sps:$4 sm:$0xff]  }
  0x4f   :  { %1104 = vmatpush1.bf16.msra.mxu1 %v2058_v30  ;;  %v2126_v30 = vld [vmem:[%s3067_s1 + $0x1e4] ss:$8 sps:$4 sm:$0xff]   ;;  %v63_v41 = vld [vmem:[%s3068_s0 + $0x78] sm:$0xff] }
  0x50   :  { %1250 = vmatpush1.bf16.msra.mxu0 %v2061_v31  ;;  %1105 = vmatprep.subr.bf16.mxu1 %v2066_v32  ;;  %v2129_v31 = vld [vmem:[%s3067_s1 + $0x3e4] ss:$8 sps:$4 sm:$0xff]   ;;  %v2124_v32 = vld [vmem:[%s3067_s1 + $0x1e0] ss:$8 sps:$4 sm:$0xff]  }
  0x51   :  { %1251 = vmatprep.subr.bf16.mxu0 %v2069_v33  ;;  %v2127_v33 = vld [vmem:[%s3067_s1 + $0x3e0] ss:$8 sps:$4 sm:$0xff]  }
  0x52   :  { %1077 = vmatmul.mubr.bf16.gmra.mrb[8].mxu1 %v1736_v42  ;;  %v1722_v42 = vcombine.low %v2530_v62, %v2535_v63 }
  0x53   :  { %1223 = vmatmul.mubr.bf16.gmra.mrb[8].mxu0 %v1740_v43  ;;  %1106 = vmatpush1.bf16.msra.mxu1 %v2064_v39  ;;  %v61_v39 = vld [vmem:[%s3068_s0 + $0x68] sm:$0xff]  ;;  %v1726_v43 = vcombine.low %v2540_v0, %v2545_v1  ;;  %v1369_v0 = vlaneseq }
  0x54   :  { %1252 = vmatpush1.bf16.msra.mxu0 %v2067_v40  ;;  %1107 = vmatprep.subr.bf16.mxu1 %v2072_v44  ;;  %v59_v40 = vld [vmem:[%s3068_s0 + $0x58] sm:$0xff]  ;;  %v1731_v44 = vcombine.high %v57_v38, %v61_v39  ;;  %v1730_v50 = vcombine.low %v57_v38, %v61_v39 }
  0x55   :  { %1253 = vmatprep.subr.bf16.mxu0 %v2075_v45  ;;  %1086 = vmatprep.mubr.bf16.mxu1 %v1745_v53  ;;  %v1735_v45 = vcombine.high %v59_v40, %v63_v41  ;;  %v1734_v51 = vcombine.low %v59_v40, %v63_v41  ;;  %v1370_v1 = vshrl.u32 %v1369_v0, 7 }
  0x56   :  { %1232 = vmatprep.mubr.bf16.mxu0 %v1749_v55  ;;  %v77_v55 = vld [vmem:[%s3068_s0 + $0xe8] sm:$0xff] }
  0x57   :  { %1108 = vmatpush1.bf16.msra.mxu1 %v2070_v46  ;;  %v65_v46 = vld [vmem:[%s3068_s0 + $0x88] sm:$0xff]  ;;  %v1746_v62 = vcombine.low %v73_v54, %v77_v55 }
  0x58   :  { %1254 = vmatpush1.bf16.msra.mxu0 %v2073_v47  ;;  %1109 = vmatprep.subr.bf16.mxu1 %v2078_v48  ;;  %v69_v47 = vld [vmem:[%s3068_s0 + $0xa8] sm:$0xff]  ;;  %v67_v48 = vld [vmem:[%s3068_s0 + $0x98] sm:$0xff] }
  0x59   :  { %1255 = vmatprep.subr.bf16.mxu0 %v2081_v49  ;;  %v71_v49 = vld [vmem:[%s3068_s0 + $0xb8] sm:$0xff]  ;;  %v1739_v52 = vcombine.high %v65_v46, %v69_v47 }
  0x5a   :  { %1087 = vmatmul.mubr.bf16.gmra.mrb[12].mxu1 %v1744_v58  ;;  %v1743_v53 = vcombine.high %v67_v48, %v71_v49  ;;  %v1738_v58 = vcombine.low %v65_v46, %v69_v47 }
  0x5b   :  { %1233 = vmatmul.mubr.bf16.gmra.mrb[12].mxu0 %v1748_v59  ;;  %1110 = vmatpush1.bf16.msra.mxu1 %v2076_v56  ;;  %v75_v56 = vld [vmem:[%s3068_s0 + $0xd8] sm:$0xff]  ;;  %v1742_v59 = vcombine.low %v67_v48, %v71_v49 }
  0x5c   :  { %1256 = vmatpush1.bf16.msra.mxu0 %v2079_v57  ;;  %1111 = vmatprep.subr.bf16.mxu1 %v2084_v60  ;;  %v79_v57 = vld [vmem:[%s3068_s0 + $0xf8] sm:$0xff]  ;;  %v1747_v60 = vcombine.high %v73_v54, %v77_v55 }
  0x5d   :  { %1257 = vmatprep.subr.bf16.mxu0 %v2087_v61  ;;  %1129 = vmatprep.mubr.bf16.mxu1 %v1723_v4  ;;  %v1751_v61 = vcombine.high %v75_v56, %v79_v57  ;;  %v1750_v63 = vcombine.low %v75_v56, %v79_v57  ;;  %v2698_v4 = vsub.s32 1, %v1370_v1  ;;  %v1428_v56 = vld [vmem:[%s3071_s4 + $0x28] sm:$0xff] }
  0x5e   :  { %1275 = vmatprep.mubr.bf16.mxu0 %v1727_v7 }
  0x5f   :  { %1112 = vmatpush1.bf16.msra.mxu1 %v2082_v2  ;;  %v2693_v2 = vsub.s32 0, %v1370_v1 }
  0x60   :  { %1258 = vmatpush1.bf16.msra.mxu0 %v2085_v3  ;;  %1113 = vmatprep.subr.bf16.mxu1 %v2090_v5  ;;  %v1367_v3 = vld [vmem:[%s3069_s2] sm:$0x3] }
  0x61   :  { %1259 = vmatprep.subr.bf16.mxu0 %v2093_v6  ;;  %v1395_v5 = vld [vmem:[%s3070_s3] sm:$0x3]  ;;  %v2704_v6 = vrot.slane %v1367_v3, %v2693_v2 }
  0x63   :  { %1114 = vmatpush1.bf16.msra.mxu1 %v2088_v8 }
  0x64   :  { %1260 = vmatpush1.bf16.msra.mxu0 %v2091_v9  ;;  %1115 = vmatprep.subr.bf16.mxu1 %v2096_v10  ;;  %v2707_v9 = vrot.slane %v1367_v3, %v2698_v4 }
  0x65   :  { %1261 = vmatprep.subr.bf16.mxu0 %v2099_v11  ;;  %v2710_v11 = vrot.slane %v1395_v5, %v2693_v2 }
  0x67   :  { %1116 = vmatpush1.bf16.msra.mxu1 %v2094_v12 }
  0x68   :  { %1262 = vmatpush1.bf16.msra.mxu0 %v2097_v13  ;;  %1117 = vmatprep.subr.bf16.mxu1 %v2102_v14 }
  0x69   :  { %1263 = vmatprep.subr.bf16.mxu0 %v2105_v15  ;;  %v2713_v15 = vrot.slane %v1395_v5, %v2698_v4 }
  0x6b   :  { %1118 = vmatpush1.bf16.msra.mxu1 %v2100_v16 }
  0x6c   :  { %1264 = vmatpush1.bf16.msra.mxu0 %v2103_v17  ;;  %1119 = vmatprep.subr.bf16.mxu1 %v2108_v18 }
  0x6d   :  { %1265 = vmatprep.subr.bf16.mxu0 %v2111_v19 }
  0x6f   :  { %1120 = vmatpush1.bf16.msra.mxu1 %v2106_v20 }
  0x70   :  { %1266 = vmatpush1.bf16.msra.mxu0 %v2109_v21  ;;  %1121 = vmatprep.subr.bf16.mxu1 %v2114_v22 }
  0x71   :  { %1267 = vmatprep.subr.bf16.mxu0 %v2117_v23 }
  0x73   :  { %1122 = vmatpush1.bf16.msra.mxu1 %v2112_v24  ;;  %v1423_v24 = vld [vmem:[%s3071_s4] sm:$0xff] }
  0x74   :  { %1268 = vmatpush1.bf16.msra.mxu0 %v2115_v25  ;;  %1123 = vmatprep.subr.bf16.mxu1 %v2120_v26 }
  0x75   :  { %1269 = vmatprep.subr.bf16.mxu0 %v2123_v27  ;;  %v1424_v27 = vld [vmem:[%s3071_s4 + $0x8] sm:$0xff] }
  0x77   :  { %1124 = vmatpush1.bf16.msra.mxu1 %v2118_v28 }
  0x78   :  { %1270 = vmatpush1.bf16.msra.mxu0 %v2121_v29  ;;  %1125 = vmatprep.subr.bf16.mxu1 %v2126_v30  ;;  %v1425_v30 = vld [vmem:[%s3071_s4 + $0x10] sm:$0xff] }
  0x79   :  { %1271 = vmatprep.subr.bf16.mxu0 %v2129_v31 }
  0x7b   :  { %1126 = vmatpush1.bf16.msra.mxu1 %v2124_v32 }
  0x7c   :  { %1272 = vmatpush1.bf16.msra.mxu0 %v2127_v33  ;;  %1127 = vmatprep.subr.bf16.mxu1 %v2132_v34  ;;  %v1426_v33 = vld [vmem:[%s3071_s4 + $0x18] sm:$0xff] }
  0x7d   :  { %1273 = vmatprep.subr.bf16.mxu0 %v2135_v35 }
  0x7f   :  { %1128 = vmatpush1.bf16.msra.mxu1 %v2130_v36 }
  0x80   :  { %1274 = vmatpush1.bf16.msra.mxu0 %v2133_v37 }
  0x82   :  { %1130 = vmatmul.mubr.bf16.vlgmr.msra.gmra.mrb[0].mxu1 %v1722_v42 }
  0x83   :  { %1276 = vmatmul.mubr.bf16.vlgmr.msra.gmra.mrb[0].mxu0 %v1726_v43  ;;  %1139 = vmatprep.mubr.bf16.mxu1 %v1731_v44 }
  0x84   :  { %1285 = vmatprep.mubr.bf16.mxu0 %v1735_v45 }
  0x8a   :  { %1140 = vmatmul.mubr.bf16.gmra.mrb[4].mxu1 %v1730_v50 }
  0x8b   :  { %1286 = vmatmul.mubr.bf16.gmra.mrb[4].mxu0 %v1734_v51  ;;  %1149 = vmatprep.mubr.bf16.mxu1 %v1739_v52 }
  0x8c   :  { %1295 = vmatprep.mubr.bf16.mxu0 %v1743_v53  ;;  %v1427_v53 = vld [vmem:[%s3071_s4 + $0x20] sm:$0xff] }
  0x92   :  { %1150 = vmatmul.mubr.bf16.gmra.mrb[8].mxu1 %v1738_v58 }
  0x93   :  { %1296 = vmatmul.mubr.bf16.gmra.mrb[8].mxu0 %v1742_v59  ;;  %1159 = vmatprep.mubr.bf16.mxu1 %v1747_v60  ;;  %v1429_v60 = vld [vmem:[%s3071_s4 + $0x30] sm:$0xff] }
  0x94   :  { %1305 = vmatprep.mubr.bf16.mxu0 %v1751_v61 }
  0x9a   :  { %1160 = vmatmul.mubr.bf16.gmra.mrb[12].mxu1 %v1746_v62 }
  0x9b   :  { %1306 = vmatmul.mubr.bf16.gmra.mrb[12].mxu0 %v1750_v63  ;;  %v1430_v63 = vld [vmem:[%s3071_s4 + $0x38] sm:$0xff] }
 0x155   :  { %v1131_v7 = vpop.f32.mrb[0].mxu1 }
 0x156   :  { %v1277_v8 = vpop.f32.mrb[0].mxu0  ;;  %v1133_v12 = vpop.f32.mrb[1].mxu1 }
 0x157   :  { %v1896_v10 = vadd.f32 %v1277_v8, %v1131_v7  ;;  %v1279_v13 = vpop.f32.mrb[1].mxu0  ;;  %v1135_v16 = vpop.f32.mrb[2].mxu1 }
 0x158   :  { %v1897_v14 = vadd.f32 %v1279_v13, %v1133_v12  ;;  %v1281_v17 = vpop.f32.mrb[2].mxu0  ;;  %v1137_v20 = vpop.f32.mrb[3].mxu1 }
 0x159   :  { %v1379_v18 = vadd.f32 %v1896_v10, %v2704_v6  ;;  %v1898_v19 = vadd.f32 %v1281_v17, %v1135_v16  ;;  %v1283_v21 = vpop.f32.mrb[3].mxu0 }
 0x15a   :  { %v1380_v22 = vadd.f32 %v1897_v14, %v2707_v9  ;;  %v1899_v23 = vadd.f32 %v1283_v21, %v1137_v20 }
 0x15b   :  { %v1407_v25 = vmul.f32 %v2710_v11, %v1379_v18  ;;  %v1381_v26 = vadd.f32 %v1898_v19, %v2704_v6 }
 0x15c   :  { %v1408_v28 = vmul.f32 %v2713_v15, %v1380_v22  ;;  %v1382_v29 = vadd.f32 %v1899_v23, %v2707_v9 }
 0x15d   :  { %v1409_v31 = vmul.f32 %v2710_v11, %v1381_v26  ;;  %v2731_v32 = vadd.f32 %v1423_v24, %v1407_v25  ;;  %v1141_v35 = vpop.f32.mrb[4].mxu1  ;;  %v1431_v25 = vld [vmem:[%s3071_s4 + $0x40] sm:$0xff] }
 0x15e   :  { %v1410_v34 = vmul.f32 %v2713_v15, %v1382_v29  ;;  %v1287_v36 = vpop.f32.mrb[4].mxu0  ;;  %v2737_v37 = vadd.f32 %v1424_v27, %v1408_v28  ;;  %v1143_v39 = vpop.f32.mrb[5].mxu1  ;;  %v1432_v28 = vld [vmem:[%s3071_s4 + $0x48] sm:$0xff] }
 0x15f   :  { %v1900_v38 = vadd.f32 %v1287_v36, %v1141_v35  ;;  %v1289_v40 = vpop.f32.mrb[5].mxu0  ;;  %1455 = vst [vmem:[%s3072_s7] sm:$0xff] %v2731_v32  ;;  %v2743_v41 = vadd.f32 %v1425_v30, %v1409_v31  ;;  %v1145_v43 = vpop.f32.mrb[6].mxu1  ;;  %v1434_v36 = vld [vmem:[%s3071_s4 + $0x58] sm:$0xff] }
 0x160   :  { %v1901_v42 = vadd.f32 %v1289_v40, %v1143_v39  ;;  %v1291_v44 = vpop.f32.mrb[6].mxu0  ;;  %v1471_v45 = vadd.f32 %v2737_v37, %v2731_v32  ;;  %1456 = vst [vmem:[%s3072_s7 + $0x8] sm:$0xff] %v2737_v37  ;;  %v2751_v46 = vadd.f32 %v1426_v33, %v1410_v34  ;;  %v1147_v49 = vpop.f32.mrb[7].mxu1  ;;  %v1433_v33 = vld [vmem:[%s3071_s4 + $0x50] sm:$0xff] }
 0x161   :  { %v1383_v47 = vadd.f32 %v1900_v38, %v2704_v6  ;;  %v1902_v48 = vadd.f32 %v1291_v44, %v1145_v43  ;;  %v1293_v50 = vpop.f32.mrb[7].mxu0  ;;  %1457 = vst [vmem:[%s3072_s7 + $0x10] sm:$0xff] %v2743_v41 }
 0x162   :  { %v1384_v51 = vadd.f32 %v1901_v42, %v2707_v9  ;;  %v1903_v52 = vadd.f32 %v1293_v50, %v1147_v49  ;;  %1472 = vadd.xlane.f32.xlu0 %v1471_v45  ;;  %1458 = vst [vmem:[%s3072_s7 + $0x18] sm:$0xff] %v2751_v46  ;;  %v1474_v59 = vadd.f32 %v2751_v46, %v2743_v41 }
 0x163   :  { %v1411_v54 = vmul.f32 %v2710_v11, %v1383_v47  ;;  %v1385_v55 = vadd.f32 %v1902_v48, %v2704_v6 }
 0x164   :  { %v1412_v57 = vmul.f32 %v2713_v15, %v1384_v51  ;;  %v1386_v58 = vadd.f32 %v1903_v52, %v2707_v9 }
 0x165   :  { %v1413_v61 = vmul.f32 %v2710_v11, %v1385_v55  ;;  %v2779_v62 = vadd.f32 %v1427_v53, %v1411_v54  ;;  %v1151_v3 = vpop.f32.mrb[8].mxu1 }
 0x166   :  { %v1414_v0 = vmul.f32 %v2713_v15, %v1386_v58  ;;  %v1297_v1 = vpop.f32.mrb[8].mxu0  ;;  %1475 = vadd.xlane.f32.xlu0 %v1474_v59  ;;  %v2785_v5 = vadd.f32 %v1428_v56, %v1412_v57  ;;  %v1153_v8 = vpop.f32.mrb[9].mxu1 }
 0x167   :  { %v1904_v7 = vadd.f32 %v1297_v1, %v1151_v3  ;;  %v1299_v10 = vpop.f32.mrb[9].mxu0  ;;  %1459 = vst [vmem:[%s3072_s7 + $0x20] sm:$0xff] %v2779_v62  ;;  %v2791_v12 = vadd.f32 %v1429_v60, %v1413_v61  ;;  %v1155_v14 = vpop.f32.mrb[10].mxu1  ;;  %v1435_v60 = vld [vmem:[%s3071_s4 + $0x60] sm:$0xff] }
 0x168   :  { %v1905_v13 = vadd.f32 %v1299_v10, %v1153_v8  ;;  %v1301_v16 = vpop.f32.mrb[10].mxu0  ;;  %v1477_v17 = vadd.f32 %v2785_v5, %v2779_v62  ;;  %1460 = vst [vmem:[%s3072_s7 + $0x28] sm:$0xff] %v2785_v5  ;;  %v2799_v18 = vadd.f32 %v1430_v63, %v1414_v0  ;;  %v1157_v21 = vpop.f32.mrb[11].mxu1  ;;  %v1436_v0 = vld [vmem:[%s3071_s4 + $0x68] sm:$0xff] }
 0x169   :  { %v1387_v19 = vadd.f32 %v1904_v7, %v2704_v6  ;;  %v1906_v20 = vadd.f32 %v1301_v16, %v1155_v14  ;;  %v1303_v22 = vpop.f32.mrb[11].mxu0  ;;  %1461 = vst [vmem:[%s3072_s7 + $0x30] sm:$0xff] %v2791_v12  ;;  %v1437_v7 = vld [vmem:[%s3071_s4 + $0x70] sm:$0xff] }
 0x16a   :  { %v1388_v23 = vadd.f32 %v1905_v13, %v2707_v9  ;;  %v1907_v24 = vadd.f32 %v1303_v22, %v1157_v21  ;;  %1478 = vadd.xlane.f32.xlu1 %v1477_v17  ;;  %1462 = vst [vmem:[%s3072_s7 + $0x38] sm:$0xff] %v2799_v18  ;;  %v1480_v31 = vadd.f32 %v2799_v18, %v2791_v12 }
 0x16b   :  { %v1415_v26 = vmul.f32 %v2710_v11, %v1387_v19  ;;  %v1389_v27 = vadd.f32 %v1906_v20, %v2704_v6 }
 0x16c   :  { %v1416_v29 = vmul.f32 %v2713_v15, %v1388_v23  ;;  %v1390_v30 = vadd.f32 %v1907_v24, %v2707_v9 }
 0x16d   :  { %v1417_v34 = vmul.f32 %v2710_v11, %v1389_v27  ;;  %v2827_v35 = vadd.f32 %v1431_v25, %v1415_v26  ;;  %v1161_v40 = vpop.f32.mrb[12].mxu1 }
 0x16e   :  { %v1418_v38 = vmul.f32 %v2713_v15, %v1390_v30  ;;  %v1307_v39 = vpop.f32.mrb[12].mxu0  ;;  %1481 = vadd.xlane.f32.xlu1 %v1480_v31  ;;  %v2833_v42 = vadd.f32 %v1432_v28, %v1416_v29  ;;  %v1163_v44 = vpop.f32.mrb[13].mxu1 }
 0x16f   :  { %v1908_v43 = vadd.f32 %v1307_v39, %v1161_v40  ;;  %v1309_v45 = vpop.f32.mrb[13].mxu0  ;;  %1463 = vst [vmem:[%s3072_s7 + $0x40] sm:$0xff] %v2827_v35  ;;  %v2839_v47 = vadd.f32 %v1433_v33, %v1417_v34  ;;  %v1165_v49 = vpop.f32.mrb[14].mxu1 }
 0x170   :  { %v1909_v48 = vadd.f32 %v1309_v45, %v1163_v44  ;;  %v1311_v50 = vpop.f32.mrb[14].mxu0  ;;  %v1483_v51 = vadd.f32 %v2833_v42, %v2827_v35  ;;  %1464 = vst [vmem:[%s3072_s7 + $0x48] sm:$0xff] %v2833_v42  ;;  %v2847_v52 = vadd.f32 %v1434_v36, %v1418_v38  ;;  %v1167_v55 = vpop.f32.mrb[15].mxu1 }
 0x171   :  { %v1391_v53 = vadd.f32 %v1908_v43, %v2704_v6  ;;  %v1910_v54 = vadd.f32 %v1311_v50, %v1165_v49  ;;  %v1313_v56 = vpop.f32.mrb[15].mxu0  ;;  %1465 = vst [vmem:[%s3072_s7 + $0x50] sm:$0xff] %v2839_v47 }
 0x172   :  { %v1392_v57 = vadd.f32 %v1909_v48, %v2707_v9  ;;  %v1911_v58 = vadd.f32 %v1313_v56, %v1167_v55  ;;  %1484 = vadd.xlane.f32.xlu0 %v1483_v51  ;;  %v1486_v59 = vadd.f32 %v2847_v52, %v2839_v47  ;;  %1466 = vst [vmem:[%s3072_s7 + $0x58] sm:$0xff] %v2847_v52 }
 0x173   :  { %v1419_v61 = vmul.f32 %v2710_v11, %v1391_v53  ;;  %v1393_v63 = vadd.f32 %v1910_v54, %v2704_v6  ;;  %v1438_v6 = vld [vmem:[%s3071_s4 + $0x78] sm:$0xff] }
 0x174   :  { %v1420_v1 = vmul.f32 %v2713_v15, %v1392_v57  ;;  %v1394_v3 = vadd.f32 %v1911_v58, %v2707_v9  ;;  %1487 = vadd.xlane.f32.xlu1 %v1486_v59 }
 0x175   :  { %v1421_v8 = vmul.f32 %v2710_v11, %v1393_v63  ;;  %v2875_v10 = vadd.f32 %v1435_v60, %v1419_v61 }
 0x176   :  { %v1422_v13 = vmul.f32 %v2713_v15, %v1394_v3  ;;  %v1452_v14 = vadd.f32 %v1436_v0, %v1420_v1 }
 0x177   :  { %1467 = vst [vmem:[%s3072_s7 + $0x60] sm:$0xff] %v2875_v10  ;;  %v2885_v9 = vadd.f32 %v1437_v7, %v1421_v8 }
 0x178   :  { %v1489_v16 = vadd.f32 %v1452_v14, %v2875_v10  ;;  %1468 = vst [vmem:[%s3072_s7 + $0x68] sm:$0xff] %v1452_v14  ;;  %v1454_v11 = vadd.f32 %v1438_v6, %v1422_v13 }
 0x179   :  { %1469 = vst [vmem:[%s3072_s7 + $0x70] sm:$0xff] %v2885_v9 }
 0x17a   :  { %1490 = vadd.xlane.f32.xlu0 %v1489_v16  ;;  %v1492_v15 = vadd.f32 %v1454_v11, %v2885_v9  ;;  %1470 = vst [vmem:[%s3072_s7 + $0x78] sm:$0xff] %v1454_v11 }
 0x17c   :  { %1493 = vadd.xlane.f32.xlu1 %v1492_v15 }
 0x1ef   :  { %v1473_v17 = vpop.xlane.xlu0 %1472 }
 0x1f0   :  { %v1496_v19 = vmul.f32 0.00390625, %v1473_v17 }
 0x1f2   :  { %v2900_v20 = vsub.f32 %v2731_v32, %v1496_v19  ;;  %v2903_v21 = vsub.f32 %v2737_v37, %v1496_v19 }
 0x1f3   :  { %v1476_v22 = vpop.xlane.xlu0 %1475 }
 0x1f4   :  { %v1497_v23 = vmul.f32 0.00390625, %v1476_v22  ;;  %v1520_v24 = vmul.f32 %v2900_v20, %v2900_v20  ;;  %v1521_v25 = vmul.f32 %v2903_v21, %v2903_v21  ;;  %v1600_v22 = vld [vmem:[%s3073_s5] sm:$0x3] }
 0x1f6   :  { %v2910_v26 = vsub.f32 %v2743_v41, %v1497_v23  ;;  %v2913_v27 = vsub.f32 %v2751_v46, %v1497_v23  ;;  %v1536_v28 = vadd.f32 %v1521_v25, %v1520_v24  ;;  %v1628_v25 = vld [vmem:[%s3074_s6] sm:$0x3] }
 0x1f7   :  { %v1479_v32 = vpop.xlane.xlu1 %1478 }
 0x1f8   :  { %v1498_v29 = vmul.f32 0.00390625, %v1479_v32  ;;  %1537 = vadd.xlane.f32.xlu0 %v1536_v28  ;;  %v1522_v37 = vmul.f32 %v2910_v26, %v2910_v26  ;;  %v1523_v30 = vmul.f32 %v2913_v27, %v2913_v27  ;;  %v2984_v32 = vrot.slane %v1600_v22, %v2693_v2 }
 0x1fa   :  { %v2920_v31 = vsub.f32 %v2779_v62, %v1498_v29  ;;  %v2923_v33 = vsub.f32 %v2785_v5, %v1498_v29  ;;  %v1539_v41 = vadd.f32 %v1523_v30, %v1522_v37  ;;  %v2987_v29 = vrot.slane %v1600_v22, %v2698_v4 }
 0x1fb   :  { %v1482_v34 = vpop.xlane.xlu1 %1481 }
 0x1fc   :  { %v1499_v46 = vmul.f32 0.00390625, %v1482_v34  ;;  %1540 = vadd.xlane.f32.xlu1 %v1539_v41  ;;  %v1524_v36 = vmul.f32 %v2920_v31, %v2920_v31  ;;  %v1525_v38 = vmul.f32 %v2923_v33, %v2923_v33  ;;  %v2990_v41 = vrot.slane %v1628_v25, %v2693_v2 }
 0x1fd   :  { %v2993_v34 = vrot.slane %v1628_v25, %v2698_v4 }
 0x1fe   :  { %v2930_v39 = vsub.f32 %v2791_v12, %v1499_v46  ;;  %v2933_v40 = vsub.f32 %v2799_v18, %v1499_v46  ;;  %v1542_v62 = vadd.f32 %v1525_v38, %v1524_v36 }
 0x1ff   :  { %v1485_v43 = vpop.xlane.xlu0 %1484 }
 0x200   :  { %v1500_v5 = vmul.f32 0.00390625, %v1485_v43  ;;  %1543 = vadd.xlane.f32.xlu0 %v1542_v62  ;;  %v1526_v44 = vmul.f32 %v2930_v39, %v2930_v39  ;;  %v1527_v45 = vmul.f32 %v2933_v40, %v2933_v40 }
 0x201   :  { %v1488_v48 = vpop.xlane.xlu1 %1487 }
 0x202   :  { %v2940_v49 = vsub.f32 %v2827_v35, %v1500_v5  ;;  %v2943_v12 = vsub.f32 %v2833_v42, %v1500_v5  ;;  %v1501_v50 = vmul.f32 0.00390625, %v1488_v48  ;;  %v1545_v18 = vadd.f32 %v1527_v45, %v1526_v44 }
 0x204   :  { %v2946_v51 = vsub.f32 %v2839_v47, %v1501_v50  ;;  %v2949_v53 = vsub.f32 %v2847_v52, %v1501_v50  ;;  %1546 = vadd.xlane.f32.xlu1 %v1545_v18  ;;  %v1528_v54 = vmul.f32 %v2940_v49, %v2940_v49  ;;  %v1529_v55 = vmul.f32 %v2943_v12, %v2943_v12 }
 0x206   :  { %v1548_v35 = vadd.f32 %v1529_v55, %v1528_v54  ;;  %v1530_v42 = vmul.f32 %v2946_v51, %v2946_v51  ;;  %v1531_v56 = vmul.f32 %v2949_v53, %v2949_v53 }
 0x207   :  { %v1491_v57 = vpop.xlane.xlu0 %1490 }
 0x208   :  { %v1502_v47 = vmul.f32 0.00390625, %v1491_v57  ;;  %1549 = vadd.xlane.f32.xlu0 %v1548_v35  ;;  %v1551_v58 = vadd.f32 %v1531_v56, %v1530_v42 }
 0x209   :  { %v1494_v52 = vpop.xlane.xlu1 %1493 }
 0x20a   :  { %v2960_v59 = vsub.f32 %v2875_v10, %v1502_v47  ;;  %v2962_v60 = vsub.f32 %v1452_v14, %v1502_v47  ;;  %v1503_v61 = vmul.f32 0.00390625, %v1494_v52  ;;  %1552 = vadd.xlane.f32.xlu1 %v1551_v58 }
 0x20c   :  { %v2965_v63 = vsub.f32 %v2885_v9, %v1503_v61  ;;  %v2967_v0 = vsub.f32 %v1454_v11, %v1503_v61  ;;  %v1532_v1 = vmul.f32 %v2960_v59, %v2960_v59  ;;  %v1533_v3 = vmul.f32 %v2962_v60, %v2962_v60 }
 0x20e   :  { %v1554_v7 = vadd.f32 %v1533_v3, %v1532_v1  ;;  %v1534_v8 = vmul.f32 %v2965_v63, %v2965_v63  ;;  %v1535_v10 = vmul.f32 %v2967_v0, %v2967_v0 }
 0x210   :  { %1555 = vadd.xlane.f32.xlu0 %v1554_v7  ;;  %v1557_v6 = vadd.f32 %v1535_v10, %v1534_v8 }
 0x212   :  { %1558 = vadd.xlane.f32.xlu1 %v1557_v6 }
 0x285   :  { %v1538_v13 = vpop.xlane.xlu0 %1537 }
 0x286   :  { %v1560_v14 = vmul.f32 0.00390625, %v1538_v13 }
 0x288   :  { %v1568_v9 = vadd.f32 1e-06, %v1560_v14 }
 0x289   :  { %v1541_v16 = vpop.xlane.xlu1 %1540 }
 0x28a   :  { %2136 = vrsqrt.f32 %v1568_v9  ;;  %v1561_v11 = vmul.f32 0.00390625, %v1541_v16 }
 0x28c   :  { %v1569_v15 = vadd.f32 1e-06, %v1561_v11 }
 0x28d   :  { %v1544_v17 = vpop.xlane.xlu0 %1543 }
 0x28e   :  { %2138 = vrsqrt.f32 %v1569_v15  ;;  %v1562_v19 = vmul.f32 0.00390625, %v1544_v17 }
 0x290   :  { %v1570_v23 = vadd.f32 1e-06, %v1562_v19 }
 0x291   :  { %v1547_v24 = vpop.xlane.xlu1 %1546 }
 0x292   :  { %2140 = vrsqrt.f32 %v1570_v23  ;;  %v1563_v28 = vmul.f32 0.00390625, %v1547_v24 }
 0x294   :  { %v2137_v37 = vpop.eup %2136  ;;  %v1571_v30 = vadd.f32 1e-06, %v1563_v28 }
 0x295   :  { %v1584_v46 = vmul.f32 %v2137_v37, %v2900_v20  ;;  %v1585_v36 = vmul.f32 %v2137_v37, %v2903_v21  ;;  %v1550_v38 = vpop.xlane.xlu0 %1549 }
 0x296   :  { %2142 = vrsqrt.f32 %v1571_v30  ;;  %v1564_v62 = vmul.f32 0.00390625, %v1550_v38 }
 0x297   :  { %v1612_v43 = vmul.f32 %v2984_v32, %v1584_v46  ;;  %v1613_v5 = vmul.f32 %v2987_v29, %v1585_v36  ;;  %v1553_v44 = vpop.xlane.xlu1 %1552 }
 0x298   :  { %v2139_v45 = vpop.eup %2138  ;;  %v1572_v48 = vadd.f32 1e-06, %v1564_v62  ;;  %v1565_v50 = vmul.f32 0.00390625, %v1553_v44 }
 0x299   :  { %v1640_v2 = vadd.f32 %v2990_v41, %v1612_v43  ;;  %v1641_v4 = vadd.f32 %v2993_v34, %v1613_v5  ;;  %v1586_v18 = vmul.f32 %v2139_v45, %v2910_v26  ;;  %v1587_v20 = vmul.f32 %v2139_v45, %v2913_v27 }
 0x29a   :  { %2144 = vrsqrt.f32 %v1572_v48  ;;  %v1573_v21 = vadd.f32 1e-06, %v1565_v50 }
 0x29b   :  { %v1888_v54 = vpack.c.bf16 %v1641_v4, %v1640_v2  ;;  %v1614_v55 = vmul.f32 %v2984_v32, %v1586_v18  ;;  %v1615_v35 = vmul.f32 %v2987_v29, %v1587_v20 }
 0x29c   :  { %v2141_v42 = vpop.eup %2140  ;;  %2146 = vrsqrt.f32 %v1573_v21 }
 0x29d   :  { %1704 = vst [vmem:[%s3075_s8] sm:$0xff] %v1888_v54  ;;  %v1642_v56 = vadd.f32 %v2990_v41, %v1614_v55  ;;  %v1643_v57 = vadd.f32 %v2993_v34, %v1615_v35  ;;  %v1588_v26 = vmul.f32 %v2141_v42, %v2920_v31  ;;  %v1589_v27 = vmul.f32 %v2141_v42, %v2923_v33  ;;  %v1556_v47 = vpop.xlane.xlu0 %1555 }
 0x29e   :  { %v1566_v58 = vmul.f32 0.00390625, %v1556_v47 }
 0x29f   :  { %v1889_v52 = vpack.c.bf16 %v1643_v57, %v1642_v56  ;;  %v1616_v61 = vmul.f32 %v2984_v32, %v1588_v26  ;;  %v1617_v1 = vmul.f32 %v2987_v29, %v1589_v27  ;;  %v1559_v3 = vpop.xlane.xlu1 %1558 }
 0x2a0   :  { %v2143_v7 = vpop.eup %2142  ;;  %v1574_v8 = vadd.f32 1e-06, %v1566_v58  ;;  %v1567_v10 = vmul.f32 0.00390625, %v1559_v3 }
 0x2a1   :  { %1705 = vst [vmem:[%s3075_s8 + $0x8] sm:$0xff] %v1889_v52  ;;  %v1644_v6 = vadd.f32 %v2990_v41, %v1616_v61  ;;  %v1645_v31 = vadd.f32 %v2993_v34, %v1617_v1  ;;  %v1590_v33 = vmul.f32 %v2143_v7, %v2930_v39  ;;  %v1591_v13 = vmul.f32 %v2143_v7, %v2933_v40 }
 0x2a2   :  { %2148 = vrsqrt.f32 %v1574_v8  ;;  %v1575_v14 = vadd.f32 1e-06, %v1567_v10 }
 0x2a3   :  { %v1890_v9 = vpack.c.bf16 %v1645_v31, %v1644_v6  ;;  %v1618_v16 = vmul.f32 %v2984_v32, %v1590_v33  ;;  %v1619_v11 = vmul.f32 %v2987_v29, %v1591_v13 }
 0x2a4   :  { %v2145_v15 = vpop.eup %2144  ;;  %2150 = vrsqrt.f32 %v1575_v14 }
 0x2a5   :  { %1706 = vst [vmem:[%s3075_s8 + $0x10] sm:$0xff] %v1890_v9  ;;  %v1646_v17 = vadd.f32 %v2990_v41, %v1618_v16  ;;  %v1647_v19 = vadd.f32 %v2993_v34, %v1619_v11  ;;  %v1592_v39 = vmul.f32 %v2145_v15, %v2940_v49  ;;  %v1593_v40 = vmul.f32 %v2145_v15, %v2943_v12 }
 0x2a6   :  { %v2147_v22 = vpop.eup %2146 }
 0x2a7   :  { %v1891_v23 = vpack.c.bf16 %v1647_v19, %v1646_v17  ;;  %v1620_v24 = vmul.f32 %v2984_v32, %v1592_v39  ;;  %v1621_v25 = vmul.f32 %v2987_v29, %v1593_v40  ;;  %v1594_v28 = vmul.f32 %v2147_v22, %v2946_v51 }
 0x2a8   :  { %v1595_v37 = vmul.f32 %v2147_v22, %v2949_v53 }
 0x2a9   :  { %1707 = vst [vmem:[%s3075_s8 + $0x18] sm:$0xff] %v1891_v23  ;;  %v1648_v30 = vadd.f32 %v2990_v41, %v1620_v24  ;;  %v1649_v49 = vadd.f32 %v2993_v34, %v1621_v25  ;;  %v1622_v12 = vmul.f32 %v2984_v32, %v1594_v28 }
 0x2aa   :  { %v1623_v46 = vmul.f32 %v2987_v29, %v1595_v37 }
 0x2ab   :  { %v1892_v36 = vpack.c.bf16 %v1649_v49, %v1648_v30  ;;  %v1650_v38 = vadd.f32 %v2990_v41, %v1622_v12 }
 0x2ac   :  { %v2149_v62 = vpop.eup %2148  ;;  %v1651_v51 = vadd.f32 %v2993_v34, %v1623_v46 }
 0x2ad   :  { %1708 = vst [vmem:[%s3075_s8 + $0x20] sm:$0xff] %v1892_v36  ;;  %v1596_v53 = vmul.f32 %v2149_v62, %v2960_v59  ;;  %v1597_v43 = vmul.f32 %v2149_v62, %v2962_v60 }
 0x2ae   :  { %v2151_v5 = vpop.eup %2150  ;;  %v1893_v44 = vpack.c.bf16 %v1651_v51, %v1650_v38 }
 0x2af   :  { %v1624_v45 = vmul.f32 %v2984_v32, %v1596_v53  ;;  %v1625_v48 = vmul.f32 %v2987_v29, %v1597_v43  ;;  %v1598_v50 = vmul.f32 %v2151_v5, %v2965_v63  ;;  %v1599_v2 = vmul.f32 %v2151_v5, %v2967_v0 }
 0x2b0   :  { %1709 = vst [vmem:[%s3075_s8 + $0x28] sm:$0xff] %v1893_v44 }
 0x2b1   :  { %v1652_v4 = vadd.f32 %v2990_v41, %v1624_v45  ;;  %v1653_v59 = vadd.f32 %v2993_v34, %v1625_v48  ;;  %v1626_v60 = vmul.f32 %v2984_v32, %v1598_v50  ;;  %v1627_v18 = vmul.f32 %v2987_v29, %v1599_v2 }
 0x2b3   :  { %v1894_v20 = vpack.c.bf16 %v1653_v59, %v1652_v4  ;;  %v1654_v21 = vadd.f32 %v2990_v41, %v1626_v60  ;;  %v1655_v54 = vadd.f32 %v2993_v34, %v1627_v18 }
 0x2b5   :  { %1710 = vst [vmem:[%s3075_s8 + $0x30] sm:$0xff] %v1894_v20  ;;  %v1895_v63 = vpack.c.bf16 %v1655_v54, %v1654_v21 }
 0x2b7   :  { %1711 = vst [vmem:[%s3075_s8 + $0x38] sm:$0xff] %v1895_v63 }

// kernel: dinov2_forward.44
= control target key start
LH: loop header
LB: loop body
LE: loop exit
PB: predicated region body
PF: predicated region fallthrough
CT: control target
= control target key end

     0   :  { %s3074_s0 = inlined_call_operand.vmem [shape: bf16[64,1024], index: 0, kind: input, shape index: {}]   ;;  %s3075_s1 = inlined_call_operand.vmem [shape: bf16[1024,256], index: 1, kind: input, shape index: {}]   ;;  %s3076_s2 = inlined_call_operand.vmem [shape: f32[1,256], index: 2, kind: input, shape index: {}]   ;;  %s3077_s3 = inlined_call_operand.vmem [shape: f32[1,256], index: 3, kind: input, shape index: {}]   ;;  %s3078_s4 = inlined_call_operand.vmem [shape: f32[64,256], index: 4, kind: input, shape index: {}]   ;;  %s3079_s5 = inlined_call_operand.vmem [shape: f32[1,256], index: 5, kind: input, shape index: {}]   ;;  %s3080_s6 = inlined_call_operand.vmem [shape: f32[1,256], index: 6, kind: input, shape index: {}]   ;;  %s3081_s7 = inlined_call_operand.hbm [shape: f32[64,256], index: 7, kind: output, shape index: {0}]   ;;  %s3082_s8 = inlined_call_operand.vmem [shape: bf16[64,256], index: 8, kind: output, shape index: {1}]  }
   0x1   :  { %v1960_v0 = vld [vmem:[%s3075_s1 + $0x4] ss:$8 sps:$4 sm:$0xff]   ;;  %v1964_v2 = vld [vmem:[%s3075_s1] ss:$8 sps:$4 sm:$0xff]   ;;  %v1966_v4 = vld [vmem:[%s3075_s1 + $0x14] ss:$8 sps:$4 sm:$0xff]  }
   0x2   :  { %v1962_v1 = vld [vmem:[%s3075_s1 + $0x204] ss:$8 sps:$4 sm:$0xff]   ;;  %1025 = vmatprep.subr.bf16.mxu1 %v1960_v0  ;;  %v1965_v3 = vld [vmem:[%s3075_s1 + $0x200] ss:$8 sps:$4 sm:$0xff]   ;;  %v1968_v5 = vld [vmem:[%s3075_s1 + $0x214] ss:$8 sps:$4 sm:$0xff]  }
   0x3   :  { %1171 = vmatprep.subr.bf16.mxu0 %v1962_v1  ;;  %1026 = vmatpush1.bf16.msra.mxu1 %v1964_v2  ;;  %v1970_v6 = vld [vmem:[%s3075_s1 + $0x10] ss:$8 sps:$4 sm:$0xff]   ;;  %v1972_v8 = vld [vmem:[%s3075_s1 + $0x24] ss:$8 sps:$4 sm:$0xff]   ;;  %v1976_v10 = vld [vmem:[%s3075_s1 + $0x20] ss:$8 sps:$4 sm:$0xff]  }
   0x4   :  { %1172 = vmatpush1.bf16.msra.mxu0 %v1965_v3  ;;  %1027 = vmatprep.subr.bf16.mxu1 %v1966_v4  ;;  %v1971_v7 = vld [vmem:[%s3075_s1 + $0x210] ss:$8 sps:$4 sm:$0xff]   ;;  %v1974_v9 = vld [vmem:[%s3075_s1 + $0x224] ss:$8 sps:$4 sm:$0xff]   ;;  %v1977_v11 = vld [vmem:[%s3075_s1 + $0x220] ss:$8 sps:$4 sm:$0xff]  }
   0x5   :  { %1173 = vmatprep.subr.bf16.mxu0 %v1968_v5  ;;  %v1978_v12 = vld [vmem:[%s3075_s1 + $0x34] ss:$8 sps:$4 sm:$0xff]   ;;  %v1982_v14 = vld [vmem:[%s3075_s1 + $0x30] ss:$8 sps:$4 sm:$0xff]   ;;  %v1984_v16 = vld [vmem:[%s3075_s1 + $0x44] ss:$8 sps:$4 sm:$0xff]  }
   0x6   :  { %v1980_v13 = vld [vmem:[%s3075_s1 + $0x234] ss:$8 sps:$4 sm:$0xff]   ;;  %v1983_v15 = vld [vmem:[%s3075_s1 + $0x230] ss:$8 sps:$4 sm:$0xff]   ;;  %v1986_v17 = vld [vmem:[%s3075_s1 + $0x244] ss:$8 sps:$4 sm:$0xff]  }
   0x7   :  { %1028 = vmatpush1.bf16.msra.mxu1 %v1970_v6  ;;  %v1988_v18 = vld [vmem:[%s3075_s1 + $0x40] ss:$8 sps:$4 sm:$0xff]   ;;  %v1990_v20 = vld [vmem:[%s3075_s1 + $0x54] ss:$8 sps:$4 sm:$0xff]   ;;  %v1994_v22 = vld [vmem:[%s3075_s1 + $0x50] ss:$8 sps:$4 sm:$0xff]  }
   0x8   :  { %1174 = vmatpush1.bf16.msra.mxu0 %v1971_v7  ;;  %1029 = vmatprep.subr.bf16.mxu1 %v1972_v8  ;;  %v1989_v19 = vld [vmem:[%s3075_s1 + $0x240] ss:$8 sps:$4 sm:$0xff]   ;;  %v1992_v21 = vld [vmem:[%s3075_s1 + $0x254] ss:$8 sps:$4 sm:$0xff]   ;;  %v1995_v23 = vld [vmem:[%s3075_s1 + $0x250] ss:$8 sps:$4 sm:$0xff]  }
   0x9   :  { %1175 = vmatprep.subr.bf16.mxu0 %v1974_v9  ;;  %v1996_v24 = vld [vmem:[%s3075_s1 + $0x64] ss:$8 sps:$4 sm:$0xff]   ;;  %v2000_v26 = vld [vmem:[%s3075_s1 + $0x60] ss:$8 sps:$4 sm:$0xff]   ;;  %v2002_v28 = vld [vmem:[%s3075_s1 + $0x74] ss:$8 sps:$4 sm:$0xff]  }
   0xa   :  { %v1998_v25 = vld [vmem:[%s3075_s1 + $0x264] ss:$8 sps:$4 sm:$0xff]   ;;  %v2001_v27 = vld [vmem:[%s3075_s1 + $0x260] ss:$8 sps:$4 sm:$0xff]   ;;  %v2004_v29 = vld [vmem:[%s3075_s1 + $0x274] ss:$8 sps:$4 sm:$0xff]  }
   0xb   :  { %1030 = vmatpush1.bf16.msra.mxu1 %v1976_v10  ;;  %v2006_v30 = vld [vmem:[%s3075_s1 + $0x70] ss:$8 sps:$4 sm:$0xff]   ;;  %v2008_v32 = vld [vmem:[%s3075_s1 + $0x84] ss:$8 sps:$4 sm:$0xff]   ;;  %v2012_v34 = vld [vmem:[%s3075_s1 + $0x80] ss:$8 sps:$4 sm:$0xff]  }
   0xc   :  { %1176 = vmatpush1.bf16.msra.mxu0 %v1977_v11  ;;  %1031 = vmatprep.subr.bf16.mxu1 %v1978_v12  ;;  %v2007_v31 = vld [vmem:[%s3075_s1 + $0x270] ss:$8 sps:$4 sm:$0xff]   ;;  %v2010_v33 = vld [vmem:[%s3075_s1 + $0x284] ss:$8 sps:$4 sm:$0xff]   ;;  %v2013_v35 = vld [vmem:[%s3075_s1 + $0x280] ss:$8 sps:$4 sm:$0xff]  }
   0xd   :  { %1177 = vmatprep.subr.bf16.mxu0 %v1980_v13  ;;  %v2014_v36 = vld [vmem:[%s3075_s1 + $0x94] ss:$8 sps:$4 sm:$0xff]   ;;  %v2018_v38 = vld [vmem:[%s3075_s1 + $0x90] ss:$8 sps:$4 sm:$0xff]   ;;  %v2020_v40 = vld [vmem:[%s3075_s1 + $0xa4] ss:$8 sps:$4 sm:$0xff]  }
   0xe   :  { %v2016_v37 = vld [vmem:[%s3075_s1 + $0x294] ss:$8 sps:$4 sm:$0xff]   ;;  %v2019_v39 = vld [vmem:[%s3075_s1 + $0x290] ss:$8 sps:$4 sm:$0xff]   ;;  %v2022_v41 = vld [vmem:[%s3075_s1 + $0x2a4] ss:$8 sps:$4 sm:$0xff]  }
   0xf   :  { %1032 = vmatpush1.bf16.msra.mxu1 %v1982_v14  ;;  %v2024_v42 = vld [vmem:[%s3075_s1 + $0xa0] ss:$8 sps:$4 sm:$0xff]   ;;  %v2026_v44 = vld [vmem:[%s3075_s1 + $0xb4] ss:$8 sps:$4 sm:$0xff]   ;;  %v2030_v46 = vld [vmem:[%s3075_s1 + $0xb0] ss:$8 sps:$4 sm:$0xff]  }
  0x10   :  { %1178 = vmatpush1.bf16.msra.mxu0 %v1983_v15  ;;  %1033 = vmatprep.subr.bf16.mxu1 %v1984_v16  ;;  %v2025_v43 = vld [vmem:[%s3075_s1 + $0x2a0] ss:$8 sps:$4 sm:$0xff]   ;;  %v2028_v45 = vld [vmem:[%s3075_s1 + $0x2b4] ss:$8 sps:$4 sm:$0xff]   ;;  %v2031_v47 = vld [vmem:[%s3075_s1 + $0x2b0] ss:$8 sps:$4 sm:$0xff]  }
  0x11   :  { %1179 = vmatprep.subr.bf16.mxu0 %v1986_v17  ;;  %v49_v48 = vld [vmem:[%s3074_s0] sm:$0xff]  ;;  %v51_v53 = vld [vmem:[%s3074_s0 + $0x10] sm:$0xff] }
  0x12   :  { %v53_v49 = vld [vmem:[%s3074_s0 + $0x20] sm:$0xff]  ;;  %v55_v54 = vld [vmem:[%s3074_s0 + $0x30] sm:$0xff] }
  0x13   :  { %1034 = vmatpush1.bf16.msra.mxu1 %v1988_v18  ;;  %v2032_v50 = vld [vmem:[%s3075_s1 + $0xc4] ss:$8 sps:$4 sm:$0xff]   ;;  %v1734_v52 = vcombine.high %v49_v48, %v53_v49  ;;  %v1738_v55 = vcombine.high %v51_v53, %v55_v54  ;;  %v2036_v56 = vld [vmem:[%s3075_s1 + $0xc0] ss:$8 sps:$4 sm:$0xff]   ;;  %v2038_v58 = vld [vmem:[%s3075_s1 + $0xd4] ss:$8 sps:$4 sm:$0xff]   ;;  %v1733_v8 = vcombine.low %v49_v48, %v53_v49  ;;  %v1737_v10 = vcombine.low %v51_v53, %v55_v54 }
  0x14   :  { %1180 = vmatpush1.bf16.msra.mxu0 %v1989_v19  ;;  %1035 = vmatprep.subr.bf16.mxu1 %v1990_v20  ;;  %v2034_v51 = vld [vmem:[%s3075_s1 + $0x2c4] ss:$8 sps:$4 sm:$0xff]   ;;  %v2037_v57 = vld [vmem:[%s3075_s1 + $0x2c0] ss:$8 sps:$4 sm:$0xff]   ;;  %v2040_v59 = vld [vmem:[%s3075_s1 + $0x2d4] ss:$8 sps:$4 sm:$0xff]  }
  0x15   :  { %1181 = vmatprep.subr.bf16.mxu0 %v1992_v21  ;;  %1057 = vmatprep.mubr.bf16.mxu1 %v1734_v52  ;;  %v2042_v60 = vld [vmem:[%s3075_s1 + $0xd0] ss:$8 sps:$4 sm:$0xff]   ;;  %v2044_v62 = vld [vmem:[%s3075_s1 + $0xe4] ss:$8 sps:$4 sm:$0xff]   ;;  %v2048_v0 = vld [vmem:[%s3075_s1 + $0xe0] ss:$8 sps:$4 sm:$0xff]  }
  0x16   :  { %1203 = vmatprep.mubr.bf16.mxu0 %v1738_v55  ;;  %v2043_v61 = vld [vmem:[%s3075_s1 + $0x2d0] ss:$8 sps:$4 sm:$0xff]   ;;  %v2046_v63 = vld [vmem:[%s3075_s1 + $0x2e4] ss:$8 sps:$4 sm:$0xff]   ;;  %v2049_v1 = vld [vmem:[%s3075_s1 + $0x2e0] ss:$8 sps:$4 sm:$0xff]  }
  0x17   :  { %1036 = vmatpush1.bf16.msra.mxu1 %v1994_v22  ;;  %v2050_v2 = vld [vmem:[%s3075_s1 + $0xf4] ss:$8 sps:$4 sm:$0xff]   ;;  %v2054_v4 = vld [vmem:[%s3075_s1 + $0xf0] ss:$8 sps:$4 sm:$0xff]   ;;  %v2058_v6 = vld [vmem:[%s3075_s1 + $0x104] ss:$8 sps:$4 sm:$0xff]  }
  0x18   :  { %1182 = vmatpush1.bf16.msra.mxu0 %v1995_v23  ;;  %1037 = vmatprep.subr.bf16.mxu1 %v1996_v24  ;;  %v2052_v3 = vld [vmem:[%s3075_s1 + $0x2f4] ss:$8 sps:$4 sm:$0xff]   ;;  %v2055_v5 = vld [vmem:[%s3075_s1 + $0x2f0] ss:$8 sps:$4 sm:$0xff]   ;;  %v2061_v7 = vld [vmem:[%s3075_s1 + $0x304] ss:$8 sps:$4 sm:$0xff]  }
  0x19   :  { %1183 = vmatprep.subr.bf16.mxu0 %v1998_v25  ;;  %v2056_v9 = vld [vmem:[%s3075_s1 + $0x100] ss:$8 sps:$4 sm:$0xff]   ;;  %v2064_v12 = vld [vmem:[%s3075_s1 + $0x114] ss:$8 sps:$4 sm:$0xff]   ;;  %v2062_v14 = vld [vmem:[%s3075_s1 + $0x110] ss:$8 sps:$4 sm:$0xff]  }
  0x1a   :  { %v2059_v11 = vld [vmem:[%s3075_s1 + $0x300] ss:$8 sps:$4 sm:$0xff]   ;;  %v2067_v13 = vld [vmem:[%s3075_s1 + $0x314] ss:$8 sps:$4 sm:$0xff]   ;;  %v2065_v15 = vld [vmem:[%s3075_s1 + $0x310] ss:$8 sps:$4 sm:$0xff]  }
  0x1b   :  { %1038 = vmatpush1.bf16.msra.mxu1 %v2000_v26  ;;  %v2070_v16 = vld [vmem:[%s3075_s1 + $0x124] ss:$8 sps:$4 sm:$0xff]   ;;  %v2068_v18 = vld [vmem:[%s3075_s1 + $0x120] ss:$8 sps:$4 sm:$0xff]   ;;  %v59_v22 = vld [vmem:[%s3074_s0 + $0x50] sm:$0xff] }
  0x1c   :  { %1184 = vmatpush1.bf16.msra.mxu0 %v2001_v27  ;;  %1039 = vmatprep.subr.bf16.mxu1 %v2002_v28  ;;  %v2073_v17 = vld [vmem:[%s3075_s1 + $0x324] ss:$8 sps:$4 sm:$0xff]   ;;  %v2071_v19 = vld [vmem:[%s3075_s1 + $0x320] ss:$8 sps:$4 sm:$0xff]   ;;  %v63_v23 = vld [vmem:[%s3074_s0 + $0x70] sm:$0xff] }
  0x1d   :  { %1185 = vmatprep.subr.bf16.mxu0 %v2004_v29  ;;  %v57_v20 = vld [vmem:[%s3074_s0 + $0x40] sm:$0xff]  ;;  %v2076_v24 = vld [vmem:[%s3075_s1 + $0x134] ss:$8 sps:$4 sm:$0xff]   ;;  %v1746_v26 = vcombine.high %v59_v22, %v63_v23  ;;  %v1745_v29 = vcombine.low %v59_v22, %v63_v23 }
  0x1e   :  { %v61_v21 = vld [vmem:[%s3074_s0 + $0x60] sm:$0xff]  ;;  %v2079_v28 = vld [vmem:[%s3075_s1 + $0x334] ss:$8 sps:$4 sm:$0xff]  }
  0x1f   :  { %1040 = vmatpush1.bf16.msra.mxu1 %v2006_v30  ;;  %v1742_v25 = vcombine.high %v57_v20, %v61_v21  ;;  %v1741_v27 = vcombine.low %v57_v20, %v61_v21  ;;  %v2074_v30 = vld [vmem:[%s3075_s1 + $0x130] ss:$8 sps:$4 sm:$0xff]   ;;  %v2094_v48 = vld [vmem:[%s3075_s1 + $0x164] ss:$8 sps:$4 sm:$0xff]  }
  0x20   :  { %1186 = vmatpush1.bf16.msra.mxu0 %v2007_v31  ;;  %1041 = vmatprep.subr.bf16.mxu1 %v2008_v32  ;;  %v2077_v31 = vld [vmem:[%s3075_s1 + $0x330] ss:$8 sps:$4 sm:$0xff]   ;;  %v2082_v32 = vld [vmem:[%s3075_s1 + $0x144] ss:$8 sps:$4 sm:$0xff]  }
  0x21   :  { %1187 = vmatprep.subr.bf16.mxu0 %v2010_v33  ;;  %v2085_v33 = vld [vmem:[%s3075_s1 + $0x344] ss:$8 sps:$4 sm:$0xff]   ;;  %v75_v52 = vld [vmem:[%s3074_s0 + $0xd0] sm:$0xff] }
  0x22   :  { %v2097_v49 = vld [vmem:[%s3075_s1 + $0x364] ss:$8 sps:$4 sm:$0xff]   ;;  %v79_v54 = vld [vmem:[%s3074_s0 + $0xf0] sm:$0xff] }
  0x23   :  { %1042 = vmatpush1.bf16.msra.mxu1 %v2012_v34  ;;  %v65_v34 = vld [vmem:[%s3074_s0 + $0x80] sm:$0xff]  ;;  %v1762_v55 = vcombine.high %v75_v52, %v79_v54 }
  0x24   :  { %1188 = vmatpush1.bf16.msra.mxu0 %v2013_v35  ;;  %1043 = vmatprep.subr.bf16.mxu1 %v2014_v36  ;;  %v69_v35 = vld [vmem:[%s3074_s0 + $0xa0] sm:$0xff] }
  0x25   :  { %1189 = vmatprep.subr.bf16.mxu0 %v2016_v37  ;;  %v1750_v36 = vcombine.high %v65_v34, %v69_v35  ;;  %v67_v37 = vld [vmem:[%s3074_s0 + $0x90] sm:$0xff] }
  0x27   :  { %1044 = vmatpush1.bf16.msra.mxu1 %v2018_v38  ;;  %v71_v38 = vld [vmem:[%s3074_s0 + $0xb0] sm:$0xff] }
  0x28   :  { %1190 = vmatpush1.bf16.msra.mxu0 %v2019_v39  ;;  %1045 = vmatprep.subr.bf16.mxu1 %v2020_v40  ;;  %v2080_v39 = vld [vmem:[%s3075_s1 + $0x140] ss:$8 sps:$4 sm:$0xff]  }
  0x29   :  { %1191 = vmatprep.subr.bf16.mxu0 %v2022_v41  ;;  %v2083_v40 = vld [vmem:[%s3075_s1 + $0x340] ss:$8 sps:$4 sm:$0xff]   ;;  %v1754_v41 = vcombine.high %v67_v37, %v71_v38 }
  0x2b   :  { %1046 = vmatpush1.bf16.msra.mxu1 %v2024_v42  ;;  %v1749_v42 = vcombine.low %v65_v34, %v69_v35 }
  0x2c   :  { %1192 = vmatpush1.bf16.msra.mxu0 %v2025_v43  ;;  %1047 = vmatprep.subr.bf16.mxu1 %v2026_v44  ;;  %v1753_v43 = vcombine.low %v67_v37, %v71_v38  ;;  %v2088_v44 = vld [vmem:[%s3075_s1 + $0x154] ss:$8 sps:$4 sm:$0xff]  }
  0x2d   :  { %1193 = vmatprep.subr.bf16.mxu0 %v2028_v45  ;;  %v2091_v45 = vld [vmem:[%s3075_s1 + $0x354] ss:$8 sps:$4 sm:$0xff]  }
  0x2f   :  { %1048 = vmatpush1.bf16.msra.mxu1 %v2030_v46  ;;  %v2086_v46 = vld [vmem:[%s3075_s1 + $0x150] ss:$8 sps:$4 sm:$0xff]  }
  0x30   :  { %1194 = vmatpush1.bf16.msra.mxu0 %v2031_v47  ;;  %1049 = vmatprep.subr.bf16.mxu1 %v2032_v50  ;;  %v2089_v47 = vld [vmem:[%s3075_s1 + $0x350] ss:$8 sps:$4 sm:$0xff]   ;;  %v73_v50 = vld [vmem:[%s3074_s0 + $0xc0] sm:$0xff] }
  0x31   :  { %1195 = vmatprep.subr.bf16.mxu0 %v2034_v51  ;;  %v77_v51 = vld [vmem:[%s3074_s0 + $0xe0] sm:$0xff] }
  0x32   :  { %v1758_v53 = vcombine.high %v73_v50, %v77_v51 }
  0x33   :  { %1050 = vmatpush1.bf16.msra.mxu1 %v2036_v56  ;;  %v2092_v56 = vld [vmem:[%s3075_s1 + $0x160] ss:$8 sps:$4 sm:$0xff]  }
  0x34   :  { %1196 = vmatpush1.bf16.msra.mxu0 %v2037_v57  ;;  %1051 = vmatprep.subr.bf16.mxu1 %v2038_v58  ;;  %v2095_v57 = vld [vmem:[%s3075_s1 + $0x360] ss:$8 sps:$4 sm:$0xff]   ;;  %v1757_v58 = vcombine.low %v73_v50, %v77_v51 }
  0x35   :  { %1197 = vmatprep.subr.bf16.mxu0 %v2040_v59  ;;  %v1761_v59 = vcombine.low %v75_v52, %v79_v54 }
  0x37   :  { %1052 = vmatpush1.bf16.msra.mxu1 %v2042_v60  ;;  %v2100_v60 = vld [vmem:[%s3075_s1 + $0x174] ss:$8 sps:$4 sm:$0xff]  }
  0x38   :  { %1198 = vmatpush1.bf16.msra.mxu0 %v2043_v61  ;;  %1053 = vmatprep.subr.bf16.mxu1 %v2044_v62  ;;  %v2103_v61 = vld [vmem:[%s3075_s1 + $0x374] ss:$8 sps:$4 sm:$0xff]   ;;  %v2573_v62 = vld [vmem:[%s3074_s0 + $0x8] sm:$0xff] }
  0x39   :  { %1199 = vmatprep.subr.bf16.mxu0 %v2046_v63  ;;  %v2578_v63 = vld [vmem:[%s3074_s0 + $0x28] sm:$0xff] }
  0x3b   :  { %1054 = vmatpush1.bf16.msra.mxu1 %v2048_v0  ;;  %v2583_v0 = vld [vmem:[%s3074_s0 + $0x18] sm:$0xff] }
  0x3c   :  { %1200 = vmatpush1.bf16.msra.mxu0 %v2049_v1  ;;  %1055 = vmatprep.subr.bf16.mxu1 %v2050_v2  ;;  %v2588_v1 = vld [vmem:[%s3074_s0 + $0x38] sm:$0xff] }
  0x3d   :  { %1201 = vmatprep.subr.bf16.mxu0 %v2052_v3  ;;  %v2098_v2 = vld [vmem:[%s3075_s1 + $0x170] ss:$8 sps:$4 sm:$0xff]  }
  0x3e   :  { %v2101_v3 = vld [vmem:[%s3075_s1 + $0x370] ss:$8 sps:$4 sm:$0xff]  }
  0x3f   :  { %1056 = vmatpush1.bf16.msra.mxu1 %v2054_v4  ;;  %v1736_v4 = vcombine.high %v2573_v62, %v2578_v63 }
  0x40   :  { %1202 = vmatpush1.bf16.msra.mxu0 %v2055_v5  ;;  %1098 = vmatprep.subr.bf16.mxu1 %v2058_v6  ;;  %v2106_v5 = vld [vmem:[%s3075_s1 + $0x184] ss:$8 sps:$4 sm:$0xff]  }
  0x41   :  { %1244 = vmatprep.subr.bf16.mxu0 %v2061_v7  ;;  %v2109_v6 = vld [vmem:[%s3075_s1 + $0x384] ss:$8 sps:$4 sm:$0xff]   ;;  %v1740_v7 = vcombine.high %v2583_v0, %v2588_v1 }
  0x42   :  { %1058 = vmatmul.mubr.bf16.vlgmr.msra.gmra.mrb[0].mxu1 %v1733_v8  ;;  %v2104_v8 = vld [vmem:[%s3075_s1 + $0x180] ss:$8 sps:$4 sm:$0xff]  }
  0x43   :  { %1204 = vmatmul.mubr.bf16.vlgmr.msra.gmra.mrb[0].mxu0 %v1737_v10  ;;  %1099 = vmatpush1.bf16.msra.mxu1 %v2056_v9  ;;  %v2107_v9 = vld [vmem:[%s3075_s1 + $0x380] ss:$8 sps:$4 sm:$0xff]  }
  0x44   :  { %1245 = vmatpush1.bf16.msra.mxu0 %v2059_v11  ;;  %1100 = vmatprep.subr.bf16.mxu1 %v2064_v12 }
  0x45   :  { %1246 = vmatprep.subr.bf16.mxu0 %v2067_v13  ;;  %1067 = vmatprep.mubr.bf16.mxu1 %v1742_v25 }
  0x46   :  { %1213 = vmatprep.mubr.bf16.mxu0 %v1746_v26 }
  0x47   :  { %1101 = vmatpush1.bf16.msra.mxu1 %v2062_v14 }
  0x48   :  { %1247 = vmatpush1.bf16.msra.mxu0 %v2065_v15  ;;  %1102 = vmatprep.subr.bf16.mxu1 %v2070_v16 }
  0x49   :  { %1248 = vmatprep.subr.bf16.mxu0 %v2073_v17 }
  0x4a   :  { %1068 = vmatmul.mubr.bf16.gmra.mrb[4].mxu1 %v1741_v27 }
  0x4b   :  { %1214 = vmatmul.mubr.bf16.gmra.mrb[4].mxu0 %v1745_v29  ;;  %1103 = vmatpush1.bf16.msra.mxu1 %v2068_v18 }
  0x4c   :  { %1249 = vmatpush1.bf16.msra.mxu0 %v2071_v19  ;;  %1104 = vmatprep.subr.bf16.mxu1 %v2076_v24 }
  0x4d   :  { %1250 = vmatprep.subr.bf16.mxu0 %v2079_v28  ;;  %1077 = vmatprep.mubr.bf16.mxu1 %v1750_v36 }
  0x4e   :  { %1223 = vmatprep.mubr.bf16.mxu0 %v1754_v41 }
  0x4f   :  { %1105 = vmatpush1.bf16.msra.mxu1 %v2074_v30 }
  0x50   :  { %1251 = vmatpush1.bf16.msra.mxu0 %v2077_v31  ;;  %1106 = vmatprep.subr.bf16.mxu1 %v2082_v32 }
  0x51   :  { %1252 = vmatprep.subr.bf16.mxu0 %v2085_v33 }
  0x52   :  { %1078 = vmatmul.mubr.bf16.gmra.mrb[8].mxu1 %v1749_v42 }
  0x53   :  { %1224 = vmatmul.mubr.bf16.gmra.mrb[8].mxu0 %v1753_v43  ;;  %1107 = vmatpush1.bf16.msra.mxu1 %v2080_v39 }
  0x54   :  { %1253 = vmatpush1.bf16.msra.mxu0 %v2083_v40  ;;  %1108 = vmatprep.subr.bf16.mxu1 %v2088_v44 }
  0x55   :  { %1254 = vmatprep.subr.bf16.mxu0 %v2091_v45  ;;  %1087 = vmatprep.mubr.bf16.mxu1 %v1758_v53 }
  0x56   :  { %1233 = vmatprep.mubr.bf16.mxu0 %v1762_v55 }
  0x57   :  { %1109 = vmatpush1.bf16.msra.mxu1 %v2086_v46 }
  0x58   :  { %1255 = vmatpush1.bf16.msra.mxu0 %v2089_v47  ;;  %1110 = vmatprep.subr.bf16.mxu1 %v2094_v48 }
  0x59   :  { %1256 = vmatprep.subr.bf16.mxu0 %v2097_v49 }
  0x5a   :  { %1088 = vmatmul.mubr.bf16.gmra.mrb[12].mxu1 %v1757_v58 }
  0x5b   :  { %1234 = vmatmul.mubr.bf16.gmra.mrb[12].mxu0 %v1761_v59  ;;  %1111 = vmatpush1.bf16.msra.mxu1 %v2092_v56 }
  0x5c   :  { %1257 = vmatpush1.bf16.msra.mxu0 %v2095_v57  ;;  %1112 = vmatprep.subr.bf16.mxu1 %v2100_v60 }
  0x5d   :  { %1258 = vmatprep.subr.bf16.mxu0 %v2103_v61  ;;  %1130 = vmatprep.mubr.bf16.mxu1 %v1736_v4 }
  0x5e   :  { %1276 = vmatprep.mubr.bf16.mxu0 %v1740_v7 }
  0x5f   :  { %1113 = vmatpush1.bf16.msra.mxu1 %v2098_v2 }
  0x60   :  { %1259 = vmatpush1.bf16.msra.mxu0 %v2101_v3 }
  0x61   :  { %14 = vsyncpa [#allocation4], 0  ;;  %1114 = vmatprep.subr.bf16.mxu1 %v2106_v5  ;;  %1260 = vmatprep.subr.bf16.mxu0 %v2109_v6  ;;  %v2112_v10 = vld [vmem:[%s3075_s1 + $0x194] ss:$8 sps:$4 sm:$0xff]   ;;  %v2110_v12 = vld [vmem:[%s3075_s1 + $0x190] ss:$8 sps:$4 sm:$0xff]   ;;  %v1735_v42 = vcombine.low %v2573_v62, %v2578_v63  ;;  %v1739_v43 = vcombine.low %v2583_v0, %v2588_v1  ;;  %v1370_v0 = vlaneseq }
  0x62   :  { %v2115_v11 = vld [vmem:[%s3075_s1 + $0x394] ss:$8 sps:$4 sm:$0xff]   ;;  %v2113_v13 = vld [vmem:[%s3075_s1 + $0x390] ss:$8 sps:$4 sm:$0xff]   ;;  %v2118_v14 = vld [vmem:[%s3075_s1 + $0x1a4] ss:$8 sps:$4 sm:$0xff]  }
  0x63   :  { %1115 = vmatpush1.bf16.msra.mxu1 %v2104_v8  ;;  %v2121_v15 = vld [vmem:[%s3075_s1 + $0x3a4] ss:$8 sps:$4 sm:$0xff]   ;;  %v2116_v16 = vld [vmem:[%s3075_s1 + $0x1a0] ss:$8 sps:$4 sm:$0xff]   ;;  %v2124_v18 = vld [vmem:[%s3075_s1 + $0x1b4] ss:$8 sps:$4 sm:$0xff]  }
  0x64   :  { %1261 = vmatpush1.bf16.msra.mxu0 %v2107_v9  ;;  %1116 = vmatprep.subr.bf16.mxu1 %v2112_v10  ;;  %v2119_v17 = vld [vmem:[%s3075_s1 + $0x3a0] ss:$8 sps:$4 sm:$0xff]   ;;  %v2127_v19 = vld [vmem:[%s3075_s1 + $0x3b4] ss:$8 sps:$4 sm:$0xff]   ;;  %v2122_v20 = vld [vmem:[%s3075_s1 + $0x1b0] ss:$8 sps:$4 sm:$0xff]  }
  0x65   :  { %1262 = vmatprep.subr.bf16.mxu0 %v2115_v11  ;;  %v2125_v21 = vld [vmem:[%s3075_s1 + $0x3b0] ss:$8 sps:$4 sm:$0xff]   ;;  %v2130_v22 = vld [vmem:[%s3075_s1 + $0x1c4] ss:$8 sps:$4 sm:$0xff]   ;;  %v2128_v24 = vld [vmem:[%s3075_s1 + $0x1c0] ss:$8 sps:$4 sm:$0xff]  }
  0x66   :  { %v2133_v23 = vld [vmem:[%s3075_s1 + $0x3c4] ss:$8 sps:$4 sm:$0xff]   ;;  %v2131_v25 = vld [vmem:[%s3075_s1 + $0x3c0] ss:$8 sps:$4 sm:$0xff]   ;;  %v2136_v26 = vld [vmem:[%s3075_s1 + $0x1d4] ss:$8 sps:$4 sm:$0xff]  }
  0x67   :  { %1117 = vmatpush1.bf16.msra.mxu1 %v2110_v12  ;;  %v2139_v27 = vld [vmem:[%s3075_s1 + $0x3d4] ss:$8 sps:$4 sm:$0xff]   ;;  %v2134_v28 = vld [vmem:[%s3075_s1 + $0x1d0] ss:$8 sps:$4 sm:$0xff]   ;;  %v2142_v30 = vld [vmem:[%s3075_s1 + $0x1e4] ss:$8 sps:$4 sm:$0xff]  }
  0x68   :  { %1263 = vmatpush1.bf16.msra.mxu0 %v2113_v13  ;;  %1118 = vmatprep.subr.bf16.mxu1 %v2118_v14  ;;  %v2137_v29 = vld [vmem:[%s3075_s1 + $0x3d0] ss:$8 sps:$4 sm:$0xff]   ;;  %v2145_v31 = vld [vmem:[%s3075_s1 + $0x3e4] ss:$8 sps:$4 sm:$0xff]   ;;  %v2140_v32 = vld [vmem:[%s3075_s1 + $0x1e0] ss:$8 sps:$4 sm:$0xff]  }
  0x69   :  { %1264 = vmatprep.subr.bf16.mxu0 %v2121_v15  ;;  %v2143_v33 = vld [vmem:[%s3075_s1 + $0x3e0] ss:$8 sps:$4 sm:$0xff]   ;;  %v2148_v34 = vld [vmem:[%s3075_s1 + $0x1f4] ss:$8 sps:$4 sm:$0xff]   ;;  %v2146_v36 = vld [vmem:[%s3075_s1 + $0x1f0] ss:$8 sps:$4 sm:$0xff]  }
  0x6a   :  { %v2151_v35 = vld [vmem:[%s3075_s1 + $0x3f4] ss:$8 sps:$4 sm:$0xff]   ;;  %v2149_v37 = vld [vmem:[%s3075_s1 + $0x3f0] ss:$8 sps:$4 sm:$0xff]   ;;  %v58_v38 = vld [vmem:[%s3074_s0 + $0x48] sm:$0xff]  ;;  %v1371_v1 = vshrl.u32 %v1370_v0, 7 }
  0x6b   :  { %1119 = vmatpush1.bf16.msra.mxu1 %v2116_v16  ;;  %v62_v39 = vld [vmem:[%s3074_s0 + $0x68] sm:$0xff]  ;;  %v60_v40 = vld [vmem:[%s3074_s0 + $0x58] sm:$0xff]  ;;  %v1368_v3 = vld [vmem:[%s3076_s2] sm:$0x3] }
  0x6c   :  { %1265 = vmatpush1.bf16.msra.mxu0 %v2119_v17  ;;  %1120 = vmatprep.subr.bf16.mxu1 %v2124_v18  ;;  %v64_v41 = vld [vmem:[%s3074_s0 + $0x78] sm:$0xff]  ;;  %v1744_v44 = vcombine.high %v58_v38, %v62_v39  ;;  %v66_v46 = vld [vmem:[%s3074_s0 + $0x88] sm:$0xff]  ;;  %v1743_v50 = vcombine.low %v58_v38, %v62_v39  ;;  %v2736_v2 = vsub.s32 0, %v1371_v1  ;;  %v2741_v4 = vsub.s32 1, %v1371_v1  ;;  %v1396_v5 = vld [vmem:[%s3077_s3] sm:$0x3] }
  0x6d   :  { %1266 = vmatprep.subr.bf16.mxu0 %v2127_v19  ;;  %v1748_v45 = vcombine.high %v60_v40, %v64_v41  ;;  %v70_v47 = vld [vmem:[%s3074_s0 + $0xa8] sm:$0xff]  ;;  %v68_v48 = vld [vmem:[%s3074_s0 + $0x98] sm:$0xff]  ;;  %v1747_v51 = vcombine.low %v60_v40, %v64_v41 }
  0x6e   :  { %v72_v49 = vld [vmem:[%s3074_s0 + $0xb8] sm:$0xff]  ;;  %v1752_v52 = vcombine.high %v66_v46, %v70_v47  ;;  %v74_v54 = vld [vmem:[%s3074_s0 + $0xc8] sm:$0xff]  ;;  %v1751_v58 = vcombine.low %v66_v46, %v70_v47  ;;  %v2747_v6 = vrot.slane %v1368_v3, %v2736_v2  ;;  %v2750_v9 = vrot.slane %v1368_v3, %v2741_v4 }
  0x6f   :  { %1121 = vmatpush1.bf16.msra.mxu1 %v2122_v20  ;;  %v1756_v53 = vcombine.high %v68_v48, %v72_v49  ;;  %v78_v55 = vld [vmem:[%s3074_s0 + $0xe8] sm:$0xff]  ;;  %v76_v56 = vld [vmem:[%s3074_s0 + $0xd8] sm:$0xff]  ;;  %v1755_v59 = vcombine.low %v68_v48, %v72_v49  ;;  %v2753_v11 = vrot.slane %v1396_v5, %v2736_v2  ;;  %v2756_v15 = vrot.slane %v1396_v5, %v2741_v4 }
  0x70   :  { %1267 = vmatpush1.bf16.msra.mxu0 %v2125_v21  ;;  %1122 = vmatprep.subr.bf16.mxu1 %v2130_v22  ;;  %v80_v57 = vld [vmem:[%s3074_s0 + $0xf8] sm:$0xff]  ;;  %v1760_v60 = vcombine.high %v74_v54, %v78_v55  ;;  %v1759_v62 = vcombine.low %v74_v54, %v78_v55 }
  0x71   :  { %1268 = vmatprep.subr.bf16.mxu0 %v2133_v23  ;;  %v1764_v61 = vcombine.high %v76_v56, %v80_v57  ;;  %v1763_v63 = vcombine.low %v76_v56, %v80_v57  ;;  %v1429_v56 = vld [vmem:[%s3078_s4 + $0x28] sm:$0xff] }
  0x73   :  { %1123 = vmatpush1.bf16.msra.mxu1 %v2128_v24  ;;  %v1424_v24 = vld [vmem:[%s3078_s4] sm:$0xff] }
  0x74   :  { %1269 = vmatpush1.bf16.msra.mxu0 %v2131_v25  ;;  %1124 = vmatprep.subr.bf16.mxu1 %v2136_v26 }
  0x75   :  { %1270 = vmatprep.subr.bf16.mxu0 %v2139_v27  ;;  %v1425_v27 = vld [vmem:[%s3078_s4 + $0x8] sm:$0xff] }
  0x77   :  { %1125 = vmatpush1.bf16.msra.mxu1 %v2134_v28 }
  0x78   :  { %1271 = vmatpush1.bf16.msra.mxu0 %v2137_v29  ;;  %1126 = vmatprep.subr.bf16.mxu1 %v2142_v30  ;;  %v1426_v30 = vld [vmem:[%s3078_s4 + $0x10] sm:$0xff] }
  0x79   :  { %1272 = vmatprep.subr.bf16.mxu0 %v2145_v31 }
  0x7b   :  { %1127 = vmatpush1.bf16.msra.mxu1 %v2140_v32 }
  0x7c   :  { %1273 = vmatpush1.bf16.msra.mxu0 %v2143_v33  ;;  %1128 = vmatprep.subr.bf16.mxu1 %v2148_v34  ;;  %v1427_v33 = vld [vmem:[%s3078_s4 + $0x18] sm:$0xff] }
  0x7d   :  { %1274 = vmatprep.subr.bf16.mxu0 %v2151_v35 }
  0x7f   :  { %1129 = vmatpush1.bf16.msra.mxu1 %v2146_v36 }
  0x80   :  { %1275 = vmatpush1.bf16.msra.mxu0 %v2149_v37 }
  0x82   :  { %1131 = vmatmul.mubr.bf16.vlgmr.msra.gmra.mrb[0].mxu1 %v1735_v42 }
  0x83   :  { %1277 = vmatmul.mubr.bf16.vlgmr.msra.gmra.mrb[0].mxu0 %v1739_v43  ;;  %1140 = vmatprep.mubr.bf16.mxu1 %v1744_v44 }
  0x84   :  { %1286 = vmatprep.mubr.bf16.mxu0 %v1748_v45 }
  0x8a   :  { %1141 = vmatmul.mubr.bf16.gmra.mrb[4].mxu1 %v1743_v50 }
  0x8b   :  { %1287 = vmatmul.mubr.bf16.gmra.mrb[4].mxu0 %v1747_v51  ;;  %1150 = vmatprep.mubr.bf16.mxu1 %v1752_v52 }
  0x8c   :  { %1296 = vmatprep.mubr.bf16.mxu0 %v1756_v53  ;;  %v1428_v53 = vld [vmem:[%s3078_s4 + $0x20] sm:$0xff] }
  0x92   :  { %1151 = vmatmul.mubr.bf16.gmra.mrb[8].mxu1 %v1751_v58 }
  0x93   :  { %1297 = vmatmul.mubr.bf16.gmra.mrb[8].mxu0 %v1755_v59  ;;  %1160 = vmatprep.mubr.bf16.mxu1 %v1760_v60  ;;  %v1430_v60 = vld [vmem:[%s3078_s4 + $0x30] sm:$0xff] }
  0x94   :  { %1306 = vmatprep.mubr.bf16.mxu0 %v1764_v61 }
  0x9a   :  { %1161 = vmatmul.mubr.bf16.gmra.mrb[12].mxu1 %v1759_v62 }
  0x9b   :  { %1307 = vmatmul.mubr.bf16.gmra.mrb[12].mxu0 %v1763_v63  ;;  %v1431_v63 = vld [vmem:[%s3078_s4 + $0x38] sm:$0xff] }
 0x155   :  { %v1132_v7 = vpop.f32.mrb[0].mxu1 }
 0x156   :  { %v1278_v8 = vpop.f32.mrb[0].mxu0  ;;  %v1134_v12 = vpop.f32.mrb[1].mxu1 }
 0x157   :  { %v1909_v10 = vadd.f32 %v1278_v8, %v1132_v7  ;;  %v1280_v13 = vpop.f32.mrb[1].mxu0  ;;  %v1136_v16 = vpop.f32.mrb[2].mxu1 }
 0x158   :  { %v1910_v14 = vadd.f32 %v1280_v13, %v1134_v12  ;;  %v1282_v17 = vpop.f32.mrb[2].mxu0  ;;  %v1138_v20 = vpop.f32.mrb[3].mxu1 }
 0x159   :  { %v1380_v18 = vadd.f32 %v1909_v10, %v2747_v6  ;;  %v1911_v19 = vadd.f32 %v1282_v17, %v1136_v16  ;;  %v1284_v21 = vpop.f32.mrb[3].mxu0 }
 0x15a   :  { %v1381_v22 = vadd.f32 %v1910_v14, %v2750_v9  ;;  %v1912_v23 = vadd.f32 %v1284_v21, %v1138_v20 }
 0x15b   :  { %v1408_v25 = vmul.f32 %v2753_v11, %v1380_v18  ;;  %v1382_v26 = vadd.f32 %v1911_v19, %v2747_v6 }
 0x15c   :  { %v1409_v28 = vmul.f32 %v2756_v15, %v1381_v22  ;;  %v1383_v29 = vadd.f32 %v1912_v23, %v2750_v9 }
 0x15d   :  { %v1410_v31 = vmul.f32 %v2753_v11, %v1382_v26  ;;  %v2774_v32 = vadd.f32 %v1424_v24, %v1408_v25  ;;  %v1142_v35 = vpop.f32.mrb[4].mxu1  ;;  %v1432_v25 = vld [vmem:[%s3078_s4 + $0x40] sm:$0xff] }
 0x15e   :  { %v1411_v34 = vmul.f32 %v2756_v15, %v1383_v29  ;;  %v1288_v36 = vpop.f32.mrb[4].mxu0  ;;  %v2780_v37 = vadd.f32 %v1425_v27, %v1409_v28  ;;  %v1144_v39 = vpop.f32.mrb[5].mxu1  ;;  %v1433_v28 = vld [vmem:[%s3078_s4 + $0x48] sm:$0xff] }
 0x15f   :  { %v1913_v38 = vadd.f32 %v1288_v36, %v1142_v35  ;;  %v1290_v40 = vpop.f32.mrb[5].mxu0  ;;  %1456 = vst [vmem:[#allocation3] sm:$0xff] %v2774_v32  ;;  %v2783_v41 = vadd.f32 %v1426_v30, %v1410_v31  ;;  %v1146_v43 = vpop.f32.mrb[6].mxu1  ;;  %v1435_v36 = vld [vmem:[%s3078_s4 + $0x58] sm:$0xff] }
 0x160   :  { %v1914_v42 = vadd.f32 %v1290_v40, %v1144_v39  ;;  %v1292_v44 = vpop.f32.mrb[6].mxu0  ;;  %v1472_v45 = vadd.f32 %v2780_v37, %v2774_v32  ;;  %1457 = vst [vmem:[#allocation3 + $0x8] sm:$0xff] %v2780_v37  ;;  %v2788_v46 = vadd.f32 %v1427_v33, %v1411_v34  ;;  %v1148_v49 = vpop.f32.mrb[7].mxu1  ;;  %v1434_v33 = vld [vmem:[%s3078_s4 + $0x50] sm:$0xff] }
 0x161   :  { %v1384_v47 = vadd.f32 %v1913_v38, %v2747_v6  ;;  %v1915_v48 = vadd.f32 %v1292_v44, %v1146_v43  ;;  %v1294_v50 = vpop.f32.mrb[7].mxu0  ;;  %1458 = vst [vmem:[#allocation3 + $0x10] sm:$0xff] %v2783_v41 }
 0x162   :  { %v1385_v51 = vadd.f32 %v1914_v42, %v2750_v9  ;;  %v1916_v52 = vadd.f32 %v1294_v50, %v1148_v49  ;;  %1473 = vadd.xlane.f32.xlu0 %v1472_v45  ;;  %1459 = vst [vmem:[#allocation3 + $0x18] sm:$0xff] %v2788_v46  ;;  %v1475_v59 = vadd.f32 %v2788_v46, %v2783_v41 }
 0x163   :  { %v1412_v54 = vmul.f32 %v2753_v11, %v1384_v47  ;;  %v1386_v55 = vadd.f32 %v1915_v48, %v2747_v6 }
 0x164   :  { %v1413_v57 = vmul.f32 %v2756_v15, %v1385_v51  ;;  %v1387_v58 = vadd.f32 %v1916_v52, %v2750_v9 }
 0x165   :  { %v1414_v61 = vmul.f32 %v2753_v11, %v1386_v55  ;;  %v2810_v62 = vadd.f32 %v1428_v53, %v1412_v54  ;;  %v1152_v3 = vpop.f32.mrb[8].mxu1 }
 0x166   :  { %v1415_v0 = vmul.f32 %v2756_v15, %v1387_v58  ;;  %v1298_v1 = vpop.f32.mrb[8].mxu0  ;;  %1476 = vadd.xlane.f32.xlu0 %v1475_v59  ;;  %v2816_v5 = vadd.f32 %v1429_v56, %v1413_v57  ;;  %v1154_v8 = vpop.f32.mrb[9].mxu1 }
 0x167   :  { %v1917_v7 = vadd.f32 %v1298_v1, %v1152_v3  ;;  %v1300_v10 = vpop.f32.mrb[9].mxu0  ;;  %1460 = vst [vmem:[#allocation3 + $0x20] sm:$0xff] %v2810_v62  ;;  %v2819_v12 = vadd.f32 %v1430_v60, %v1414_v61  ;;  %v1156_v14 = vpop.f32.mrb[10].mxu1  ;;  %v1436_v60 = vld [vmem:[%s3078_s4 + $0x60] sm:$0xff] }
 0x168   :  { %v1918_v13 = vadd.f32 %v1300_v10, %v1154_v8  ;;  %v1302_v16 = vpop.f32.mrb[10].mxu0  ;;  %v1478_v17 = vadd.f32 %v2816_v5, %v2810_v62  ;;  %1461 = vst [vmem:[#allocation3 + $0x28] sm:$0xff] %v2816_v5  ;;  %v2824_v18 = vadd.f32 %v1431_v63, %v1415_v0  ;;  %v1158_v21 = vpop.f32.mrb[11].mxu1  ;;  %v1437_v0 = vld [vmem:[%s3078_s4 + $0x68] sm:$0xff] }
 0x169   :  { %v1388_v19 = vadd.f32 %v1917_v7, %v2747_v6  ;;  %v1919_v20 = vadd.f32 %v1302_v16, %v1156_v14  ;;  %v1304_v22 = vpop.f32.mrb[11].mxu0  ;;  %1462 = vst [vmem:[#allocation3 + $0x30] sm:$0xff] %v2819_v12  ;;  %v1438_v7 = vld [vmem:[%s3078_s4 + $0x70] sm:$0xff] }
 0x16a   :  { %v1389_v23 = vadd.f32 %v1918_v13, %v2750_v9  ;;  %v1920_v24 = vadd.f32 %v1304_v22, %v1158_v21  ;;  %1479 = vadd.xlane.f32.xlu1 %v1478_v17  ;;  %1463 = vst [vmem:[#allocation3 + $0x38] sm:$0xff] %v2824_v18  ;;  %v1481_v31 = vadd.f32 %v2824_v18, %v2819_v12 }
 0x16b   :  { %v1416_v26 = vmul.f32 %v2753_v11, %v1388_v19  ;;  %v1390_v27 = vadd.f32 %v1919_v20, %v2747_v6 }
 0x16c   :  { %v1417_v29 = vmul.f32 %v2756_v15, %v1389_v23  ;;  %v1391_v30 = vadd.f32 %v1920_v24, %v2750_v9 }
 0x16d   :  { %v1418_v34 = vmul.f32 %v2753_v11, %v1390_v27  ;;  %v2846_v35 = vadd.f32 %v1432_v25, %v1416_v26  ;;  %v1162_v40 = vpop.f32.mrb[12].mxu1 }
 0x16e   :  { %v1419_v38 = vmul.f32 %v2756_v15, %v1391_v30  ;;  %v1308_v39 = vpop.f32.mrb[12].mxu0  ;;  %1482 = vadd.xlane.f32.xlu1 %v1481_v31  ;;  %v2852_v42 = vadd.f32 %v1433_v28, %v1417_v29  ;;  %v1164_v44 = vpop.f32.mrb[13].mxu1 }
 0x16f   :  { %v1921_v43 = vadd.f32 %v1308_v39, %v1162_v40  ;;  %v1310_v45 = vpop.f32.mrb[13].mxu0  ;;  %1464 = vst [vmem:[#allocation3 + $0x40] sm:$0xff] %v2846_v35  ;;  %v2855_v47 = vadd.f32 %v1434_v33, %v1418_v34  ;;  %v1166_v49 = vpop.f32.mrb[14].mxu1 }
 0x170   :  { %v1922_v48 = vadd.f32 %v1310_v45, %v1164_v44  ;;  %v1312_v50 = vpop.f32.mrb[14].mxu0  ;;  %v1484_v51 = vadd.f32 %v2852_v42, %v2846_v35  ;;  %1465 = vst [vmem:[#allocation3 + $0x48] sm:$0xff] %v2852_v42  ;;  %v2860_v52 = vadd.f32 %v1435_v36, %v1419_v38  ;;  %v1168_v55 = vpop.f32.mrb[15].mxu1 }
 0x171   :  { %v1392_v53 = vadd.f32 %v1921_v43, %v2747_v6  ;;  %v1923_v54 = vadd.f32 %v1312_v50, %v1166_v49  ;;  %v1314_v56 = vpop.f32.mrb[15].mxu0  ;;  %1466 = vst [vmem:[#allocation3 + $0x50] sm:$0xff] %v2855_v47 }
 0x172   :  { %v1393_v57 = vadd.f32 %v1922_v48, %v2750_v9  ;;  %v1924_v58 = vadd.f32 %v1314_v56, %v1168_v55  ;;  %1485 = vadd.xlane.f32.xlu0 %v1484_v51  ;;  %v1487_v59 = vadd.f32 %v2860_v52, %v2855_v47  ;;  %1467 = vst [vmem:[#allocation3 + $0x58] sm:$0xff] %v2860_v52 }
 0x173   :  { %v1420_v61 = vmul.f32 %v2753_v11, %v1392_v53  ;;  %v1394_v63 = vadd.f32 %v1923_v54, %v2747_v6  ;;  %v1439_v6 = vld [vmem:[%s3078_s4 + $0x78] sm:$0xff]  ;;  %s2192_s4 = smov [#allocation3]  }
 0x174   :  { %v1421_v1 = vmul.f32 %v2756_v15, %v1393_v57  ;;  %v1395_v3 = vadd.f32 %v1924_v58, %v2750_v9  ;;  %1488 = vadd.xlane.f32.xlu1 %v1487_v59  ;;  %s1718_s1 = sshll.u32 %s2192_s4, 4  ;;  %s1719_s1 = int_to_ptr.vmem [resolvable:$true] %s1718_s1 }
 0x175   :  { %v1422_v8 = vmul.f32 %v2753_v11, %v1394_v63  ;;  %v2882_v10 = vadd.f32 %v1436_v60, %v1420_v61  ;;  %s2168_s23 = scalar_lea.vmem %s1719_s1, 2048  ;;  %p2173_p1 = scmp.lt.s32.totalorder %s1719_s1, %s1719_s1 }
 0x176   :  { %v1423_v13 = vmul.f32 %v2756_v15, %v1395_v3  ;;  %v1453_v14 = vadd.f32 %v1437_v0, %v1421_v1  ;;  %p2169_p0 = scmp.ne.s32.totalorder %s1719_s1, %s2168_s23  ;;  %p2174_p2 = scmp.lt.s32.totalorder %s2168_s23, %s2168_s23 }
 0x177   :  { %1468 = vst [vmem:[#allocation3 + $0x60] sm:$0xff] %v2882_v10  ;;  %v2889_v16 = vadd.f32 %v1438_v7, %v1422_v8 }
 0x178   :  { %v1490_v9 = vadd.f32 %v1453_v14, %v2882_v10  ;;  %1469 = vst [vmem:[#allocation3 + $0x68] sm:$0xff] %v1453_v14  ;;  %v1455_v17 = vadd.f32 %v1439_v6, %v1423_v13  ;;  %p2175_p3 = por %p2174_p2, %p2173_p1 }
 0x179   :  { %1470 = vst [vmem:[#allocation3 + $0x70] sm:$0xff] %v2889_v16 }
 0x17a   :  { %1491 = vadd.xlane.f32.xlu0 %v1490_v9  ;;  %v1493_v11 = vadd.f32 %v1455_v17, %v2889_v16  ;;  %1471 = vst [vmem:[#allocation3 + $0x78] sm:$0xff] %v1455_v17  ;;  %p2176_p4 = pnand %p2175_p3, %p2169_p0 }
 0x17c   :  { %1494 = vadd.xlane.f32.xlu1 %v1493_v11 }
 0x1ef   :  { %v1474_v19 = vpop.xlane.xlu0 %1473 }
 0x1f0   :  { %v1497_v20 = vmul.f32 0.00390625, %v1474_v19 }
 0x1f2   :  { %v2895_v15 = vsub.f32 %v2774_v32, %v1497_v20  ;;  %v2898_v21 = vsub.f32 %v2780_v37, %v1497_v20 }
 0x1f3   :  { %v1477_v22 = vpop.xlane.xlu0 %1476 }
 0x1f4   :  { %v1498_v23 = vmul.f32 0.00390625, %v1477_v22  ;;  %v1521_v24 = vmul.f32 %v2895_v15, %v2895_v15  ;;  %v1522_v25 = vmul.f32 %v2898_v21, %v2898_v21 }
 0x1f6   :  { %v2905_v26 = vsub.f32 %v2783_v41, %v1498_v23  ;;  %v2908_v27 = vsub.f32 %v2788_v46, %v1498_v23  ;;  %v1537_v28 = vadd.f32 %v1522_v25, %v1521_v24 }
 0x1f7   :  { %v1480_v32 = vpop.xlane.xlu1 %1479 }
 0x1f8   :  { %v1499_v29 = vmul.f32 0.00390625, %v1480_v32  ;;  %1538 = vadd.xlane.f32.xlu0 %v1537_v28  ;;  %v1523_v37 = vmul.f32 %v2905_v26, %v2905_v26  ;;  %v1524_v30 = vmul.f32 %v2908_v27, %v2908_v27 }
 0x1fa   :  { %v2915_v31 = vsub.f32 %v2810_v62, %v1499_v29  ;;  %v2918_v33 = vsub.f32 %v2816_v5, %v1499_v29  ;;  %v1540_v41 = vadd.f32 %v1524_v30, %v1523_v37 }
 0x1fb   :  { %v1483_v34 = vpop.xlane.xlu1 %1482 }
 0x1fc   :  { %v1500_v46 = vmul.f32 0.00390625, %v1483_v34  ;;  %1541 = vadd.xlane.f32.xlu1 %v1540_v41  ;;  %v1525_v36 = vmul.f32 %v2915_v31, %v2915_v31  ;;  %v1526_v38 = vmul.f32 %v2918_v33, %v2918_v33 }
 0x1fe   :  { %v2925_v39 = vsub.f32 %v2819_v12, %v1500_v46  ;;  %v2928_v40 = vsub.f32 %v2824_v18, %v1500_v46  ;;  %v1543_v62 = vadd.f32 %v1526_v38, %v1525_v36 }
 0x1ff   :  { %v1486_v43 = vpop.xlane.xlu0 %1485 }
 0x200   :  { %v1501_v5 = vmul.f32 0.00390625, %v1486_v43  ;;  %1544 = vadd.xlane.f32.xlu0 %v1543_v62  ;;  %v1527_v44 = vmul.f32 %v2925_v39, %v2925_v39  ;;  %v1528_v45 = vmul.f32 %v2928_v40, %v2928_v40 }
 0x201   :  { %v1489_v48 = vpop.xlane.xlu1 %1488 }
 0x202   :  { %v2935_v49 = vsub.f32 %v2846_v35, %v1501_v5  ;;  %v2938_v12 = vsub.f32 %v2852_v42, %v1501_v5  ;;  %v1502_v50 = vmul.f32 0.00390625, %v1489_v48  ;;  %v1546_v18 = vadd.f32 %v1528_v45, %v1527_v44 }
 0x204   :  { %v2941_v51 = vsub.f32 %v2855_v47, %v1502_v50  ;;  %v2944_v53 = vsub.f32 %v2860_v52, %v1502_v50  ;;  %1547 = vadd.xlane.f32.xlu1 %v1546_v18  ;;  %v1529_v54 = vmul.f32 %v2935_v49, %v2935_v49  ;;  %v1530_v55 = vmul.f32 %v2938_v12, %v2938_v12 }
 0x206   :  { %v1549_v35 = vadd.f32 %v1530_v55, %v1529_v54  ;;  %v1531_v42 = vmul.f32 %v2941_v51, %v2941_v51  ;;  %v1532_v56 = vmul.f32 %v2944_v53, %v2944_v53 }
 0x207   :  { %v1492_v57 = vpop.xlane.xlu0 %1491 }
 0x208   :  { %v1503_v47 = vmul.f32 0.00390625, %v1492_v57  ;;  %1550 = vadd.xlane.f32.xlu0 %v1549_v35  ;;  %v1552_v58 = vadd.f32 %v1532_v56, %v1531_v42 }
 0x209   :  { %v1495_v52 = vpop.xlane.xlu1 %1494 }
 0x20a   :  { %v2955_v59 = vsub.f32 %v2882_v10, %v1503_v47  ;;  %v2957_v60 = vsub.f32 %v1453_v14, %v1503_v47  ;;  %v1504_v61 = vmul.f32 0.00390625, %v1495_v52  ;;  %1553 = vadd.xlane.f32.xlu1 %v1552_v58 }
 0x20c   :  { %v2960_v63 = vsub.f32 %v2889_v16, %v1504_v61  ;;  %v2962_v0 = vsub.f32 %v1455_v17, %v1504_v61  ;;  %v1533_v1 = vmul.f32 %v2955_v59, %v2955_v59  ;;  %v1534_v3 = vmul.f32 %v2957_v60, %v2957_v60 }
 0x20e   :  { %v1555_v7 = vadd.f32 %v1534_v3, %v1533_v1  ;;  %v1535_v8 = vmul.f32 %v2960_v63, %v2960_v63  ;;  %v1536_v10 = vmul.f32 %v2962_v0, %v2962_v0 }
 0x210   :  { %1556 = vadd.xlane.f32.xlu0 %v1555_v7  ;;  %v1558_v6 = vadd.f32 %v1536_v10, %v1535_v8 }
 0x212   :  { %1559 = vadd.xlane.f32.xlu1 %v1558_v6 }
 0x213   :  { %2179 = shalt.err (!%p2176_p4)
}
 0x214   :  { %s2180_s26 = scalar_lea.hbm %s3081_s7, 2048 }
 0x215   :  { %p2181_p5 = scmp.ne.s32.totalorder %s3081_s7, %s2180_s26  ;;  %p2184_p6 = scmp.lt.u32.totalorder %s2180_s26, %s3081_s7 }
 0x217   :  { %p2186_p7 = pnand %p2184_p6, %p2181_p5 }
 0x219   :  { %2189 = shalt.err (!%p2186_p7)
}
 0x21a   :  { %s2193_s9 = smov 256   ;;  %s2194_s10 = smov 16   ;;  %v1601_v22 = vld [vmem:[%s3079_s5] sm:$0x3] }
 0x21b   :  { %1724 = dma.vmem_to_hbm [thread:$0]  %s1719_s1, 2048, %s3081_s7, [#allocation4], %s2193_s9, %s2193_s9, %s2194_s10   ;;  %v2991_v32 = vrot.slane %v1601_v22, %v2736_v2  ;;  %v2994_v29 = vrot.slane %v1601_v22, %v2741_v4 }
 0x21c   :  { %v1629_v25 = vld [vmem:[%s3080_s6] sm:$0x3] }
 0x21d   :  { %v2997_v41 = vrot.slane %v1629_v25, %v2736_v2  ;;  %v3000_v34 = vrot.slane %v1629_v25, %v2741_v4 }
 0x285   :  { %v1539_v13 = vpop.xlane.xlu0 %1538 }
 0x286   :  { %v1561_v14 = vmul.f32 0.00390625, %v1539_v13 }
 0x288   :  { %v1569_v16 = vadd.f32 1e-06, %v1561_v14 }
 0x289   :  { %v1542_v9 = vpop.xlane.xlu1 %1541 }
 0x28a   :  { %2152 = vrsqrt.f32 %v1569_v16  ;;  %v1562_v17 = vmul.f32 0.00390625, %v1542_v9 }
 0x28c   :  { %v1570_v11 = vadd.f32 1e-06, %v1562_v17 }
 0x28d   :  { %v1545_v19 = vpop.xlane.xlu0 %1544 }
 0x28e   :  { %2154 = vrsqrt.f32 %v1570_v11  ;;  %v1563_v20 = vmul.f32 0.00390625, %v1545_v19 }
 0x290   :  { %v1571_v23 = vadd.f32 1e-06, %v1563_v20 }
 0x291   :  { %v1548_v24 = vpop.xlane.xlu1 %1547 }
 0x292   :  { %2156 = vrsqrt.f32 %v1571_v23  ;;  %v1564_v28 = vmul.f32 0.00390625, %v1548_v24 }
 0x294   :  { %v2153_v37 = vpop.eup %2152  ;;  %v1572_v30 = vadd.f32 1e-06, %v1564_v28 }
 0x295   :  { %v1585_v46 = vmul.f32 %v2153_v37, %v2895_v15  ;;  %v1586_v36 = vmul.f32 %v2153_v37, %v2898_v21  ;;  %v1551_v38 = vpop.xlane.xlu0 %1550 }
 0x296   :  { %2158 = vrsqrt.f32 %v1572_v30  ;;  %v1565_v62 = vmul.f32 0.00390625, %v1551_v38 }
 0x297   :  { %v1613_v43 = vmul.f32 %v2991_v32, %v1585_v46  ;;  %v1614_v5 = vmul.f32 %v2994_v29, %v1586_v36  ;;  %v1554_v44 = vpop.xlane.xlu1 %1553 }
 0x298   :  { %v2155_v45 = vpop.eup %2154  ;;  %v1573_v48 = vadd.f32 1e-06, %v1565_v62  ;;  %v1566_v50 = vmul.f32 0.00390625, %v1554_v44 }
 0x299   :  { %v1641_v2 = vadd.f32 %v2997_v41, %v1613_v43  ;;  %v1642_v4 = vadd.f32 %v3000_v34, %v1614_v5  ;;  %v1587_v18 = vmul.f32 %v2155_v45, %v2905_v26  ;;  %v1588_v15 = vmul.f32 %v2155_v45, %v2908_v27 }
 0x29a   :  { %2160 = vrsqrt.f32 %v1573_v48  ;;  %v1574_v21 = vadd.f32 1e-06, %v1566_v50 }
 0x29b   :  { %v1901_v54 = vpack.c.bf16 %v1642_v4, %v1641_v2  ;;  %v1615_v55 = vmul.f32 %v2991_v32, %v1587_v18  ;;  %v1616_v35 = vmul.f32 %v2994_v29, %v1588_v15 }
 0x29c   :  { %v2157_v42 = vpop.eup %2156  ;;  %2162 = vrsqrt.f32 %v1574_v21 }
 0x29d   :  { %1705 = vst [vmem:[%s3082_s8] sm:$0xff] %v1901_v54  ;;  %v1643_v56 = vadd.f32 %v2997_v41, %v1615_v55  ;;  %v1644_v57 = vadd.f32 %v3000_v34, %v1616_v35  ;;  %v1589_v26 = vmul.f32 %v2157_v42, %v2915_v31  ;;  %v1590_v27 = vmul.f32 %v2157_v42, %v2918_v33  ;;  %v1557_v47 = vpop.xlane.xlu0 %1556 }
 0x29e   :  { %v1567_v58 = vmul.f32 0.00390625, %v1557_v47 }
 0x29f   :  { %v1902_v52 = vpack.c.bf16 %v1644_v57, %v1643_v56  ;;  %v1617_v61 = vmul.f32 %v2991_v32, %v1589_v26  ;;  %v1618_v1 = vmul.f32 %v2994_v29, %v1590_v27  ;;  %v1560_v3 = vpop.xlane.xlu1 %1559 }
 0x2a0   :  { %v2159_v7 = vpop.eup %2158  ;;  %v1575_v8 = vadd.f32 1e-06, %v1567_v58  ;;  %v1568_v10 = vmul.f32 0.00390625, %v1560_v3 }
 0x2a1   :  { %1706 = vst [vmem:[%s3082_s8 + $0x8] sm:$0xff] %v1902_v52  ;;  %v1645_v6 = vadd.f32 %v2997_v41, %v1617_v61  ;;  %v1646_v31 = vadd.f32 %v3000_v34, %v1618_v1  ;;  %v1591_v33 = vmul.f32 %v2159_v7, %v2925_v39  ;;  %v1592_v13 = vmul.f32 %v2159_v7, %v2928_v40 }
 0x2a2   :  { %2164 = vrsqrt.f32 %v1575_v8  ;;  %v1576_v14 = vadd.f32 1e-06, %v1568_v10 }
 0x2a3   :  { %v1903_v16 = vpack.c.bf16 %v1646_v31, %v1645_v6  ;;  %v1619_v9 = vmul.f32 %v2991_v32, %v1591_v33  ;;  %v1620_v17 = vmul.f32 %v2994_v29, %v1592_v13 }
 0x2a4   :  { %v2161_v11 = vpop.eup %2160  ;;  %2166 = vrsqrt.f32 %v1576_v14 }
 0x2a5   :  { %1707 = vst [vmem:[%s3082_s8 + $0x10] sm:$0xff] %v1903_v16  ;;  %v1647_v19 = vadd.f32 %v2997_v41, %v1619_v9  ;;  %v1648_v20 = vadd.f32 %v3000_v34, %v1620_v17  ;;  %v1593_v39 = vmul.f32 %v2161_v11, %v2935_v49  ;;  %v1594_v40 = vmul.f32 %v2161_v11, %v2938_v12 }
 0x2a6   :  { %v2163_v22 = vpop.eup %2162 }
 0x2a7   :  { %v1904_v23 = vpack.c.bf16 %v1648_v20, %v1647_v19  ;;  %v1621_v24 = vmul.f32 %v2991_v32, %v1593_v39  ;;  %v1622_v25 = vmul.f32 %v2994_v29, %v1594_v40  ;;  %v1595_v28 = vmul.f32 %v2163_v22, %v2941_v51 }
 0x2a8   :  { %v1596_v37 = vmul.f32 %v2163_v22, %v2944_v53 }
 0x2a9   :  { %1708 = vst [vmem:[%s3082_s8 + $0x18] sm:$0xff] %v1904_v23  ;;  %v1649_v30 = vadd.f32 %v2997_v41, %v1621_v24  ;;  %v1650_v49 = vadd.f32 %v3000_v34, %v1622_v25  ;;  %v1623_v12 = vmul.f32 %v2991_v32, %v1595_v28 }
 0x2aa   :  { %v1624_v46 = vmul.f32 %v2994_v29, %v1596_v37 }
 0x2ab   :  { %v1905_v36 = vpack.c.bf16 %v1650_v49, %v1649_v30  ;;  %v1651_v38 = vadd.f32 %v2997_v41, %v1623_v12 }
 0x2ac   :  { %v2165_v62 = vpop.eup %2164  ;;  %v1652_v51 = vadd.f32 %v3000_v34, %v1624_v46 }
 0x2ad   :  { %1709 = vst [vmem:[%s3082_s8 + $0x20] sm:$0xff] %v1905_v36  ;;  %v1597_v53 = vmul.f32 %v2165_v62, %v2955_v59  ;;  %v1598_v43 = vmul.f32 %v2165_v62, %v2957_v60 }
 0x2ae   :  { %v2167_v5 = vpop.eup %2166  ;;  %v1906_v44 = vpack.c.bf16 %v1652_v51, %v1651_v38 }
 0x2af   :  { %v1625_v45 = vmul.f32 %v2991_v32, %v1597_v53  ;;  %v1626_v48 = vmul.f32 %v2994_v29, %v1598_v43  ;;  %v1599_v50 = vmul.f32 %v2167_v5, %v2960_v63  ;;  %v1600_v2 = vmul.f32 %v2167_v5, %v2962_v0 }
 0x2b0   :  { %1710 = vst [vmem:[%s3082_s8 + $0x28] sm:$0xff] %v1906_v44 }
 0x2b1   :  { %v1653_v4 = vadd.f32 %v2997_v41, %v1625_v45  ;;  %v1654_v59 = vadd.f32 %v3000_v34, %v1626_v48  ;;  %v1627_v60 = vmul.f32 %v2991_v32, %v1599_v50  ;;  %v1628_v18 = vmul.f32 %v2994_v29, %v1600_v2 }
 0x2b3   :  { %v1907_v15 = vpack.c.bf16 %v1654_v59, %v1653_v4  ;;  %v1655_v21 = vadd.f32 %v2997_v41, %v1627_v60  ;;  %v1656_v54 = vadd.f32 %v3000_v34, %v1628_v18 }
 0x2b5   :  { %1711 = vst [vmem:[%s3082_s8 + $0x30] sm:$0xff] %v1907_v15  ;;  %v1908_v63 = vpack.c.bf16 %v1656_v54, %v1655_v21 }
 0x2b7   :  { %1712 = vst [vmem:[%s3082_s8 + $0x38] sm:$0xff] %v1908_v63 }
 0x2b8   :  { %2190 = dma.done.wait [#allocation4], 2048  }
 0x2b9   :  { %2191 = vsyncadd [#allocation4], 4294965248 }
 0x2ba   :  { %1732 = vsyncpa [#allocation4], 1 }

// kernel: dinov2_forward.45
= control target key start
LH: loop header
LB: loop body
LE: loop exit
PB: predicated region body
PF: predicated region fallthrough
CT: control target
= control target key end

     0   :  { %s995_s1 = inlined_call_operand.vmem [shape: bf16[256,512], index: 1, kind: input, shape index: {}]   ;;  %s996_s0 = inlined_call_operand.vmem [shape: bf16[16,256], index: 0, kind: input, shape index: {}]   ;;  %s997_s2 = inlined_call_operand.vmem [shape: f32[1,512], index: 2, kind: input, shape index: {}]   ;;  %s998_s3 = inlined_call_operand.vmem [shape: f32[16,512], index: 3, kind: output, shape index: {}]  }
   0x1   :  { %v651_v0 = vld [vmem:[%s995_s1 + $0x4] ss:$16 sps:$4 sm:$0xff]   ;;  %v653_v1 = vld [vmem:[%s995_s1 + $0xc] ss:$16 sps:$4 sm:$0xff]   ;;  %v655_v2 = vld [vmem:[%s995_s1] ss:$16 sps:$4 sm:$0xff]  }
   0x2   :  { %430 = vmatprep.subr.bf16.mxu0 %v651_v0  ;;  %v656_v3 = vld [vmem:[%s995_s1 + $0x8] ss:$16 sps:$4 sm:$0xff]   ;;  %473 = vmatprep.subr.bf16.mxu1 %v653_v1  ;;  %v657_v4 = vld [vmem:[%s995_s1 + $0x24] ss:$16 sps:$4 sm:$0xff]   ;;  %v659_v5 = vld [vmem:[%s995_s1 + $0x2c] ss:$16 sps:$4 sm:$0xff]  }
   0x3   :  { %431 = vmatpush1.bf16.msra.mxu0 %v655_v2  ;;  %474 = vmatpush1.bf16.msra.mxu1 %v656_v3  ;;  %v661_v6 = vld [vmem:[%s995_s1 + $0x20] ss:$16 sps:$4 sm:$0xff]   ;;  %v662_v7 = vld [vmem:[%s995_s1 + $0x28] ss:$16 sps:$4 sm:$0xff]   ;;  %v663_v8 = vld [vmem:[%s995_s1 + $0x44] ss:$16 sps:$4 sm:$0xff]   ;;  %v545_v2 = vlaneseq }
   0x4   :  { %432 = vmatprep.subr.bf16.mxu0 %v657_v4  ;;  %475 = vmatprep.subr.bf16.mxu1 %v659_v5  ;;  %v665_v9 = vld [vmem:[%s995_s1 + $0x4c] ss:$16 sps:$4 sm:$0xff]   ;;  %v667_v10 = vld [vmem:[%s995_s1 + $0x40] ss:$16 sps:$4 sm:$0xff]   ;;  %v668_v11 = vld [vmem:[%s995_s1 + $0x48] ss:$16 sps:$4 sm:$0xff]  }
   0x5   :  { %v669_v12 = vld [vmem:[%s995_s1 + $0x64] ss:$16 sps:$4 sm:$0xff]   ;;  %v671_v13 = vld [vmem:[%s995_s1 + $0x6c] ss:$16 sps:$4 sm:$0xff]   ;;  %v673_v14 = vld [vmem:[%s995_s1 + $0x60] ss:$16 sps:$4 sm:$0xff]  }
   0x6   :  { %v674_v15 = vld [vmem:[%s995_s1 + $0x68] ss:$16 sps:$4 sm:$0xff]   ;;  %v675_v16 = vld [vmem:[%s995_s1 + $0x84] ss:$16 sps:$4 sm:$0xff]   ;;  %v677_v17 = vld [vmem:[%s995_s1 + $0x8c] ss:$16 sps:$4 sm:$0xff]  }
   0x7   :  { %433 = vmatpush1.bf16.msra.mxu0 %v661_v6  ;;  %476 = vmatpush1.bf16.msra.mxu1 %v662_v7  ;;  %v679_v18 = vld [vmem:[%s995_s1 + $0x80] ss:$16 sps:$4 sm:$0xff]   ;;  %v680_v19 = vld [vmem:[%s995_s1 + $0x88] ss:$16 sps:$4 sm:$0xff]   ;;  %v681_v20 = vld [vmem:[%s995_s1 + $0xa4] ss:$16 sps:$4 sm:$0xff]  }
   0x8   :  { %434 = vmatprep.subr.bf16.mxu0 %v663_v8  ;;  %477 = vmatprep.subr.bf16.mxu1 %v665_v9  ;;  %v683_v21 = vld [vmem:[%s995_s1 + $0xac] ss:$16 sps:$4 sm:$0xff]   ;;  %v685_v22 = vld [vmem:[%s995_s1 + $0xa0] ss:$16 sps:$4 sm:$0xff]   ;;  %v686_v23 = vld [vmem:[%s995_s1 + $0xa8] ss:$16 sps:$4 sm:$0xff]  }
   0x9   :  { %v687_v24 = vld [vmem:[%s995_s1 + $0xc4] ss:$16 sps:$4 sm:$0xff]   ;;  %v689_v25 = vld [vmem:[%s995_s1 + $0xcc] ss:$16 sps:$4 sm:$0xff]   ;;  %v691_v26 = vld [vmem:[%s995_s1 + $0xc0] ss:$16 sps:$4 sm:$0xff]  }
   0xa   :  { %v692_v27 = vld [vmem:[%s995_s1 + $0xc8] ss:$16 sps:$4 sm:$0xff]   ;;  %v693_v28 = vld [vmem:[%s995_s1 + $0xe4] ss:$16 sps:$4 sm:$0xff]   ;;  %v695_v29 = vld [vmem:[%s995_s1 + $0xec] ss:$16 sps:$4 sm:$0xff]  }
   0xb   :  { %435 = vmatpush1.bf16.msra.mxu0 %v667_v10  ;;  %478 = vmatpush1.bf16.msra.mxu1 %v668_v11  ;;  %v697_v30 = vld [vmem:[%s995_s1 + $0xe0] ss:$16 sps:$4 sm:$0xff]   ;;  %v698_v31 = vld [vmem:[%s995_s1 + $0xe8] ss:$16 sps:$4 sm:$0xff]   ;;  %v699_v32 = vld [vmem:[%s995_s1 + $0x104] ss:$16 sps:$4 sm:$0xff]  }
   0xc   :  { %436 = vmatprep.subr.bf16.mxu0 %v669_v12  ;;  %479 = vmatprep.subr.bf16.mxu1 %v671_v13  ;;  %v701_v33 = vld [vmem:[%s995_s1 + $0x10c] ss:$16 sps:$4 sm:$0xff]   ;;  %v703_v34 = vld [vmem:[%s995_s1 + $0x100] ss:$16 sps:$4 sm:$0xff]   ;;  %v704_v35 = vld [vmem:[%s995_s1 + $0x108] ss:$16 sps:$4 sm:$0xff]  }
   0xd   :  { %v705_v36 = vld [vmem:[%s995_s1 + $0x124] ss:$16 sps:$4 sm:$0xff]   ;;  %v707_v37 = vld [vmem:[%s995_s1 + $0x12c] ss:$16 sps:$4 sm:$0xff]   ;;  %v709_v38 = vld [vmem:[%s995_s1 + $0x120] ss:$16 sps:$4 sm:$0xff]  }
   0xe   :  { %v710_v39 = vld [vmem:[%s995_s1 + $0x128] ss:$16 sps:$4 sm:$0xff]   ;;  %v711_v40 = vld [vmem:[%s995_s1 + $0x144] ss:$16 sps:$4 sm:$0xff]   ;;  %v713_v41 = vld [vmem:[%s995_s1 + $0x14c] ss:$16 sps:$4 sm:$0xff]  }
   0xf   :  { %437 = vmatpush1.bf16.msra.mxu0 %v673_v14  ;;  %480 = vmatpush1.bf16.msra.mxu1 %v674_v15  ;;  %v715_v42 = vld [vmem:[%s995_s1 + $0x140] ss:$16 sps:$4 sm:$0xff]   ;;  %v716_v43 = vld [vmem:[%s995_s1 + $0x148] ss:$16 sps:$4 sm:$0xff]   ;;  %v717_v44 = vld [vmem:[%s995_s1 + $0x164] ss:$16 sps:$4 sm:$0xff]  }
  0x10   :  { %438 = vmatprep.subr.bf16.mxu0 %v675_v16  ;;  %481 = vmatprep.subr.bf16.mxu1 %v677_v17  ;;  %v719_v45 = vld [vmem:[%s995_s1 + $0x16c] ss:$16 sps:$4 sm:$0xff]   ;;  %v721_v47 = vld [vmem:[%s995_s1 + $0x160] ss:$16 sps:$4 sm:$0xff]   ;;  %v722_v48 = vld [vmem:[%s995_s1 + $0x168] ss:$16 sps:$4 sm:$0xff]  }
  0x11   :  { %v749_v46 = vld [vmem:[%s996_s0 + $0x4] ss:$8 sps:$4 sm:$0xff]   ;;  %v727_v51 = vld [vmem:[%s995_s1 + $0x180] ss:$16 sps:$4 sm:$0xff]   ;;  %v728_v52 = vld [vmem:[%s995_s1 + $0x188] ss:$16 sps:$4 sm:$0xff]  }
  0x12   :  { %v723_v49 = vld [vmem:[%s995_s1 + $0x184] ss:$16 sps:$4 sm:$0xff]   ;;  %v725_v50 = vld [vmem:[%s995_s1 + $0x18c] ss:$16 sps:$4 sm:$0xff]   ;;  %462 = vmatprep.mubr.bf16.mxu0 %v749_v46  ;;  %505 = vmatprep.mubr.bf16.mxu1 %v749_v46  ;;  %v733_v55 = vld [vmem:[%s995_s1 + $0x1a0] ss:$16 sps:$4 sm:$0xff]  }
  0x13   :  { %439 = vmatpush1.bf16.msra.mxu0 %v679_v18  ;;  %482 = vmatpush1.bf16.msra.mxu1 %v680_v19  ;;  %v729_v53 = vld [vmem:[%s995_s1 + $0x1a4] ss:$16 sps:$4 sm:$0xff]   ;;  %v731_v54 = vld [vmem:[%s995_s1 + $0x1ac] ss:$16 sps:$4 sm:$0xff]   ;;  %v734_v56 = vld [vmem:[%s995_s1 + $0x1a8] ss:$16 sps:$4 sm:$0xff]  }
  0x14   :  { %440 = vmatprep.subr.bf16.mxu0 %v681_v20  ;;  %483 = vmatprep.subr.bf16.mxu1 %v683_v21  ;;  %v735_v57 = vld [vmem:[%s995_s1 + $0x1c4] ss:$16 sps:$4 sm:$0xff]   ;;  %v737_v58 = vld [vmem:[%s995_s1 + $0x1cc] ss:$16 sps:$4 sm:$0xff]   ;;  %v739_v59 = vld [vmem:[%s995_s1 + $0x1c0] ss:$16 sps:$4 sm:$0xff]  }
  0x15   :  { %v740_v60 = vld [vmem:[%s995_s1 + $0x1c8] ss:$16 sps:$4 sm:$0xff]   ;;  %v741_v61 = vld [vmem:[%s995_s1 + $0x1e4] ss:$16 sps:$4 sm:$0xff]   ;;  %v743_v62 = vld [vmem:[%s995_s1 + $0x1ec] ss:$16 sps:$4 sm:$0xff]  }
  0x16   :  { %v745_v63 = vld [vmem:[%s995_s1 + $0x1e0] ss:$16 sps:$4 sm:$0xff]   ;;  %v746_v0 = vld [vmem:[%s995_s1 + $0x1e8] ss:$16 sps:$4 sm:$0xff]   ;;  %v546_v3 = vshrl.u32 %v545_v2, 7 }
  0x17   :  { %441 = vmatpush1.bf16.msra.mxu0 %v685_v22  ;;  %484 = vmatpush1.bf16.msra.mxu1 %v686_v23  ;;  %v747_v1 = vld [vmem:[%s996_s0] ss:$8 sps:$4 sm:$0xff]  }
  0x18   :  { %442 = vmatprep.subr.bf16.mxu0 %v687_v24  ;;  %485 = vmatprep.subr.bf16.mxu1 %v689_v25  ;;  %v547_v4 = vsub.s32 0, %v546_v3  ;;  %v555_v5 = vsub.s32 2, %v546_v3  ;;  %v543_v6 = vld [vmem:[%s997_s2] sm:$0xf]  ;;  %v551_v7 = vsub.s32 1, %v546_v3  ;;  %v559_v8 = vsub.s32 3, %v546_v3 }
  0x1a   :  { %v548_v9 = vrot.slane %v543_v6, %v547_v4  ;;  %v556_v10 = vrot.slane %v543_v6, %v555_v5  ;;  %v552_v11 = vrot.slane %v543_v6, %v551_v7  ;;  %v560_v12 = vrot.slane %v543_v6, %v559_v8 }
  0x1b   :  { %443 = vmatpush1.bf16.msra.mxu0 %v691_v26  ;;  %486 = vmatpush1.bf16.msra.mxu1 %v692_v27 }
  0x1c   :  { %444 = vmatprep.subr.bf16.mxu0 %v693_v28  ;;  %487 = vmatprep.subr.bf16.mxu1 %v695_v29 }
  0x1f   :  { %445 = vmatpush1.bf16.msra.mxu0 %v697_v30  ;;  %488 = vmatpush1.bf16.msra.mxu1 %v698_v31 }
  0x20   :  { %446 = vmatprep.subr.bf16.mxu0 %v699_v32  ;;  %489 = vmatprep.subr.bf16.mxu1 %v701_v33 }
  0x23   :  { %447 = vmatpush1.bf16.msra.mxu0 %v703_v34  ;;  %490 = vmatpush1.bf16.msra.mxu1 %v704_v35 }
  0x24   :  { %448 = vmatprep.subr.bf16.mxu0 %v705_v36  ;;  %491 = vmatprep.subr.bf16.mxu1 %v707_v37 }
  0x27   :  { %449 = vmatpush1.bf16.msra.mxu0 %v709_v38  ;;  %492 = vmatpush1.bf16.msra.mxu1 %v710_v39 }
  0x28   :  { %450 = vmatprep.subr.bf16.mxu0 %v711_v40  ;;  %493 = vmatprep.subr.bf16.mxu1 %v713_v41 }
  0x2b   :  { %451 = vmatpush1.bf16.msra.mxu0 %v715_v42  ;;  %494 = vmatpush1.bf16.msra.mxu1 %v716_v43 }
  0x2c   :  { %452 = vmatprep.subr.bf16.mxu0 %v717_v44  ;;  %495 = vmatprep.subr.bf16.mxu1 %v719_v45 }
  0x2f   :  { %453 = vmatpush1.bf16.msra.mxu0 %v721_v47  ;;  %496 = vmatpush1.bf16.msra.mxu1 %v722_v48 }
  0x30   :  { %454 = vmatprep.subr.bf16.mxu0 %v723_v49  ;;  %497 = vmatprep.subr.bf16.mxu1 %v725_v50 }
  0x33   :  { %455 = vmatpush1.bf16.msra.mxu0 %v727_v51  ;;  %498 = vmatpush1.bf16.msra.mxu1 %v728_v52 }
  0x34   :  { %456 = vmatprep.subr.bf16.mxu0 %v729_v53  ;;  %499 = vmatprep.subr.bf16.mxu1 %v731_v54 }
  0x37   :  { %457 = vmatpush1.bf16.msra.mxu0 %v733_v55  ;;  %500 = vmatpush1.bf16.msra.mxu1 %v734_v56 }
  0x38   :  { %458 = vmatprep.subr.bf16.mxu0 %v735_v57  ;;  %501 = vmatprep.subr.bf16.mxu1 %v737_v58 }
  0x3b   :  { %459 = vmatpush1.bf16.msra.mxu0 %v739_v59  ;;  %502 = vmatpush1.bf16.msra.mxu1 %v740_v60 }
  0x3c   :  { %460 = vmatprep.subr.bf16.mxu0 %v741_v61  ;;  %503 = vmatprep.subr.bf16.mxu1 %v743_v62 }
  0x3f   :  { %461 = vmatpush1.bf16.msra.mxu0 %v745_v63  ;;  %504 = vmatpush1.bf16.msra.mxu1 %v746_v0 }
  0x42   :  { %463 = vmatmul.mubr.bf16.vlgmr.msra.gmra.mrb[0].mxu0 %v747_v1  ;;  %506 = vmatmul.mubr.bf16.vlgmr.msra.gmra.mrb[0].mxu1 %v747_v1 }
 0x115   :  { %v464_v13 = vpop.f32.mrb[0].mxu0  ;;  %v507_v14 = vpop.f32.mrb[0].mxu1 }
 0x116   :  { %v565_v15 = vadd.f32 %v548_v9, %v464_v13  ;;  %v567_v16 = vadd.f32 %v556_v10, %v507_v14  ;;  %v466_v17 = vpop.f32.mrb[1].mxu0  ;;  %v509_v18 = vpop.f32.mrb[1].mxu1 }
 0x117   :  { %v566_v19 = vadd.f32 %v552_v11, %v466_v17  ;;  %v568_v20 = vadd.f32 %v560_v12, %v509_v18  ;;  %v468_v21 = vpop.f32.mrb[2].mxu0  ;;  %v511_v22 = vpop.f32.mrb[2].mxu1 }
 0x118   :  { %573 = vst [vmem:[%s998_s3] sm:$0xff] %v565_v15  ;;  %575 = vst [vmem:[%s998_s3 + $0x10] sm:$0xff] %v567_v16  ;;  %v569_v23 = vadd.f32 %v548_v9, %v468_v21  ;;  %v571_v24 = vadd.f32 %v556_v10, %v511_v22  ;;  %v470_v25 = vpop.f32.mrb[3].mxu0  ;;  %v513_v26 = vpop.f32.mrb[3].mxu1 }
 0x119   :  { %574 = vst [vmem:[%s998_s3 + $0x8] sm:$0xff] %v566_v19  ;;  %576 = vst [vmem:[%s998_s3 + $0x18] sm:$0xff] %v568_v20  ;;  %v570_v27 = vadd.f32 %v552_v11, %v470_v25  ;;  %v572_v28 = vadd.f32 %v560_v12, %v513_v26 }
 0x11a   :  { %577 = vst [vmem:[%s998_s3 + $0x20] sm:$0xff] %v569_v23  ;;  %579 = vst [vmem:[%s998_s3 + $0x30] sm:$0xff] %v571_v24 }
 0x11b   :  { %578 = vst [vmem:[%s998_s3 + $0x28] sm:$0xff] %v570_v27  ;;  %580 = vst [vmem:[%s998_s3 + $0x38] sm:$0xff] %v572_v28 }

</bundles_post_ra>
